<compile_context>
chip_gen: v6e
topology: v6e:2x2x1
jax: 0.10.0
libtpu: 0.0.40
codegen_flags: <defaults>
</compile_context>

<pallas_src>
import numpy as np

import jax
import jax.numpy as jnp
from jax.experimental import pallas as pl
from jax.experimental.pallas import tpu as pltpu


# ----------------------------------------------------------------------------
# Host-side weight packing (runs once, outside the jitted forward pass)
# ----------------------------------------------------------------------------
def _pack_conv(w, b, w_in):
    """Pack PyTorch conv weight (OC, IC, KH, KW) into per-kh lane matrices.

    In-kernel activation layout is (H, W*IC) with lane index w*IC + ic.
    M[kh] maps lane (w*IC + ic) -> lane (ow*OC + oc) so that
        out[oh, ow*OC + oc] = sum_kh  act[oh + kh, :] @ M[kh]
    reproduces the valid, stride-1 convolution exactly.
    """
    w = np.asarray(w, dtype=np.float32)
    b = np.asarray(b, dtype=np.float32)
    oc, ic, kh_sz, kw_sz = w.shape
    ow = w_in - kw_sz + 1
    m = np.zeros((kh_sz, w_in * ic, ow * oc), dtype=np.float32)
    for kh in range(kh_sz):
        for kw in range(kw_sz):
            blk = w[:, :, kh, kw].T                       # (IC, OC)
            for o in range(ow):
                wi = o + kw
                m[kh, wi * ic:(wi + 1) * ic, o * oc:(o + 1) * oc] = blk
    bias_row = np.tile(b, ow)[None, :]                    # (1, OW*OC)
    return m, bias_row


def _pack_pool(oh, ow, c):
    """ReLU output (OH, OW*C) -> pooled (OH/2, (OW/2)*C) via Prow @ x @ Pcol."""
    prow = np.zeros((oh // 2, oh), dtype=np.float32)
    for i in range(oh // 2):
        prow[i, 2 * i] = 0.25
        prow[i, 2 * i + 1] = 0.25
    pcol = np.zeros((ow * c, (ow // 2) * c), dtype=np.float32)
    for j in range(ow // 2):
        for d in (0, 1):
            for ch in range(c):
                pcol[(2 * j + d) * c + ch, j * c + ch] = 1.0
    return prow, pcol


def pack_params(params):
    """Pre-pack all weights once: structured conv matrices, pool matrices,
    transposed FC weights. MXU operands in bf16, biases in f32."""
    bf16, f32 = jnp.bfloat16, jnp.float32
    m1, b1 = _pack_conv(params["conv1_w"], params["conv1_b"], 32)   # (5,96,168)
    m2, b2 = _pack_conv(params["conv2_w"], params["conv2_b"], 14)   # (5,84,160)
    m3, b3 = _pack_conv(params["conv3_w"], params["conv3_b"], 5)    # (5,80,120)
    pr1, pc1 = _pack_pool(28, 28, 6)                                # (14,28),(168,84)
    pr2, pc2 = _pack_pool(10, 10, 16)                               # (5,10),(160,80)
    wl1 = np.asarray(params["lin1_w"], np.float32).T                # (120,84)
    wl2 = np.asarray(params["lin2_w"], np.float32).T                # (84,10)
    bl1 = np.asarray(params["lin1_b"], np.float32)[None, :]
    bl2 = np.asarray(params["lin2_b"], np.float32)[None, :]
    return (
        jnp.asarray(m1, bf16), jnp.asarray(b1, f32),
        jnp.asarray(pr1, bf16), jnp.asarray(pc1, bf16),
        jnp.asarray(m2, bf16), jnp.asarray(b2, f32),
        jnp.asarray(pr2, bf16), jnp.asarray(pc2, bf16),
        jnp.asarray(m3, bf16), jnp.asarray(b3, f32),
        jnp.asarray(wl1, bf16), jnp.asarray(bl1, f32),
        jnp.asarray(wl2, bf16), jnp.asarray(bl2, f32),
    )


# ----------------------------------------------------------------------------
# Fused Pallas kernel: conv1+pool -> conv2+pool -> conv3 -> fc1 -> fc2
# ----------------------------------------------------------------------------
def _lenet_kernel(x_ref,
                  m1_ref, b1_ref, pr1_ref, pc1_ref,
                  m2_ref, b2_ref, pr2_ref, pc2_ref,
                  m3_ref, b3_ref, wl1_ref, bl1_ref, wl2_ref, bl2_ref,
                  o_ref,
                  act1_ref, act2_ref, fc_ref):
    f32, bf16 = jnp.float32, jnp.bfloat16
    tb = x_ref.shape[0]

    def conv_relu_pool(src_ref, b, oh, m_ref, bias_ref, pr_ref, pc_ref, dst_ref):
        n_out = m_ref.shape[2]
        acc = jnp.zeros((oh, n_out), f32)
        for kh in range(m_ref.shape[0]):           # 5 shifted-row MXU matmuls
            lhs = src_ref[b, kh:kh + oh, :].astype(bf16)
            acc = acc + jnp.dot(lhs, m_ref[kh], preferred_element_type=f32)
        r = jnp.maximum(acc + bias_ref[...], 0.0).astype(bf16)      # bias + ReLU
        rowp = jnp.dot(pr_ref[...], r, preferred_element_type=f32)  # 2x1 row avg
        dst_ref[b, :, :] = jnp.dot(rowp.astype(bf16), pc_ref[...],  # 1x2 col sum
                                   preferred_element_type=f32)

    for b in range(tb):
        # conv1 (3->6, 5x5) + ReLU + AvgPool2 : (32, 32*3) -> (14, 14*6)
        conv_relu_pool(x_ref, b, 28, m1_ref, b1_ref, pr1_ref, pc1_ref, act1_ref)
        # conv2 (6->16, 5x5) + ReLU + AvgPool2 : (14, 14*6) -> (5, 5*16)
        conv_relu_pool(act1_ref, b, 10, m2_ref, b2_ref, pr2_ref, pc2_ref, act2_ref)
        # conv3 (16->120, 5x5, 1x1 spatial output) + ReLU : (5, 5*16) -> (1, 120)
        acc = jnp.zeros((1, 120), f32)
        for kh in range(5):
            lhs = act2_ref[b, kh:kh + 1, :].astype(bf16)
            acc = acc + jnp.dot(lhs, m3_ref[kh], preferred_element_type=f32)
        fc_ref[b:b + 1, :] = jnp.maximum(acc + b3_ref[...], 0.0)

    # Fully-connected head, batched over the whole tile.
    h = fc_ref[...].astype(bf16)                                      # (TB, 120)
    h = jnp.dot(h, wl1_ref[...], preferred_element_type=f32) + bl1_ref[...]
    h = jnp.maximum(h, 0.0).astype(bf16)                              # ReLU
    o_ref[...] = jnp.dot(h, wl2_ref[...], preferred_element_type=f32) + bl2_ref[...]


# ----------------------------------------------------------------------------
# Wrapper
# ----------------------------------------------------------------------------
def _full_block_spec(arr):
    zeros = (0,) * arr.ndim
    return pl.BlockSpec(arr.shape, lambda i, _z=zeros: _z)


@jax.jit
def lenet_forward(x_nchw, packed):
    n = x_nchw.shape[0]
    # NCHW -> (N, H, W*C) lane layout the kernel expects (single cheap XLA op).
    x = jnp.transpose(x_nchw, (0, 2, 3, 1)).astype(jnp.float32).reshape(n, 32, 96)

    tb = n if n <= 8 else 8                       # batch tile per grid step
    n_pad = ((n + tb - 1) // tb) * tb
    if n_pad != n:
        x = jnp.pad(x, ((0, n_pad - n), (0, 0), (0, 0)))

    in_specs = [pl.BlockSpec((tb, 32, 96), lambda i: (i, 0, 0))]
    in_specs += [_full_block_spec(a) for a in packed]

    out = pl.pallas_call(
        _lenet_kernel,
        out_shape=jax.ShapeDtypeStruct((n_pad, 10), jnp.float32),
        grid_spec=pltpu.PrefetchScalarGridSpec(
            num_scalar_prefetch=0,
            grid=(n_pad // tb,),
            in_specs=in_specs,
            out_specs=pl.BlockSpec((tb, 10), lambda i: (i, 0)),
            scratch_shapes=[
                pltpu.VMEM((tb, 14, 84), jnp.float32),   # pooled conv1 activation
                pltpu.VMEM((tb, 5, 80), jnp.float32),    # pooled conv2 activation
                pltpu.VMEM((tb, 120), jnp.float32),      # flattened conv3 activation
            ]),
        compiler_params=pltpu.CompilerParams(
            dimension_semantics=("parallel",)),
    )(x, *packed)
    return out[:n]


# ----------------------------------------------------------------------------
# LeNet params (PyTorch-default-style init, deterministic)
# ----------------------------------------------------------------------------
def init_params(key):
    ks = jax.random.split(key, 10)

    def u(k, shape, fan_in):
        bound = 1.0 / float(fan_in) ** 0.5
        return jax.random.uniform(k, shape, jnp.float32, -bound, bound)

    return {
        "conv1_w": u(ks[0], (6, 3, 5, 5), 3 * 25),
        "conv1_b": u(ks[1], (6,), 3 * 25),
        "conv2_w": u(ks[2], (16, 6, 5, 5), 6 * 25),
        "conv2_b": u(ks[3], (16,), 6 * 25),
        "conv3_w": u(ks[4], (120, 16, 5, 5), 16 * 25),
        "conv3_b": u(ks[5], (120,), 16 * 25),
        "lin1_w": u(ks[6], (84, 120), 120),
        "lin1_b": u(ks[7], (84,), 120),
        "lin2_w": u(ks[8], (10, 84), 84),
        "lin2_b": u(ks[9], (10,), 84),
    }


if __name__ == "__main__":
    key = jax.random.PRNGKey(0)
    pkey, xkey = jax.random.split(key)
    params = init_params(pkey)
    packed = pack_params(params)           # one-time host-side weight packing
    # LeNet requires 32x32 spatial input (conv3 consumes the final 5x5); batch 4.
    x = jax.random.normal(xkey, (4, 3, 32, 32), dtype=jnp.float32)
    out = lenet_forward(x, packed)
    jax.block_until_ready(out)
    assert out.shape == (4, 10) and out.dtype == jnp.float32
    assert bool(jnp.all(jnp.isfinite(out)))
    print("KERNEL_OK")
</pallas_src>

<mosaic_0001>
module attributes {stable_mosaic.version = 11 : i64} {
  func.func @_lenet_kernel(%arg0: i32, %arg1: memref<4x32x96xf32, #tpu.memory_space<vmem>>, %arg2: memref<5x96x168xbf16, #tpu.memory_space<vmem>>, %arg3: memref<1x168xf32, #tpu.memory_space<vmem>>, %arg4: memref<14x28xbf16, #tpu.memory_space<vmem>>, %arg5: memref<168x84xbf16, #tpu.memory_space<vmem>>, %arg6: memref<5x84x160xbf16, #tpu.memory_space<vmem>>, %arg7: memref<1x160xf32, #tpu.memory_space<vmem>>, %arg8: memref<5x10xbf16, #tpu.memory_space<vmem>>, %arg9: memref<160x80xbf16, #tpu.memory_space<vmem>>, %arg10: memref<5x80x120xbf16, #tpu.memory_space<vmem>>, %arg11: memref<1x120xf32, #tpu.memory_space<vmem>>, %arg12: memref<120x84xbf16, #tpu.memory_space<vmem>>, %arg13: memref<1x84xf32, #tpu.memory_space<vmem>>, %arg14: memref<84x10xbf16, #tpu.memory_space<vmem>>, %arg15: memref<1x10xf32, #tpu.memory_space<vmem>>, %arg16: memref<4x10xf32, #tpu.memory_space<vmem>>, %arg17: memref<4x14x84xf32, #tpu.memory_space<vmem>>, %arg18: memref<4x5x80xf32, #tpu.memory_space<vmem>>, %arg19: memref<4x120xf32, #tpu.memory_space<vmem>>) attributes {dimension_semantics = [#tpu.dimension_semantics<parallel>], iteration_bounds = array<i64: 1>, scalar_prefetch = 0 : i64, scratch_operands = 3 : i64, tpu.core_type = #tpu.core_type<tc>, window_params = [{transform_indices = @transform_0, window_bounds = array<i64: 4, 32, 96>}, {pipeline_mode = #tpu.pipeline_mode<synchronous>, transform_indices = @transform_1, window_bounds = array<i64: 5, 96, 168>}, {pipeline_mode = #tpu.pipeline_mode<synchronous>, transform_indices = @transform_2, window_bounds = array<i64: 1, 168>}, {pipeline_mode = #tpu.pipeline_mode<synchronous>, transform_indices = @transform_3, window_bounds = array<i64: 14, 28>}, {pipeline_mode = #tpu.pipeline_mode<synchronous>, transform_indices = @transform_4, window_bounds = array<i64: 168, 84>}, {pipeline_mode = #tpu.pipeline_mode<synchronous>, transform_indices = @transform_5, window_bounds = array<i64: 5, 84, 160>}, {pipeline_mode = #tpu.pipeline_mode<synchronous>, transform_indices = @transform_6, window_bounds = array<i64: 1, 160>}, {pipeline_mode = #tpu.pipeline_mode<synchronous>, transform_indices = @transform_7, window_bounds = array<i64: 5, 10>}, {pipeline_mode = #tpu.pipeline_mode<synchronous>, transform_indices = @transform_8, window_bounds = array<i64: 160, 80>}, {pipeline_mode = #tpu.pipeline_mode<synchronous>, transform_indices = @transform_9, window_bounds = array<i64: 5, 80, 120>}, {pipeline_mode = #tpu.pipeline_mode<synchronous>, transform_indices = @transform_10, window_bounds = array<i64: 1, 120>}, {pipeline_mode = #tpu.pipeline_mode<synchronous>, transform_indices = @transform_11, window_bounds = array<i64: 120, 84>}, {pipeline_mode = #tpu.pipeline_mode<synchronous>, transform_indices = @transform_12, window_bounds = array<i64: 1, 84>}, {pipeline_mode = #tpu.pipeline_mode<synchronous>, transform_indices = @transform_13, window_bounds = array<i64: 84, 10>}, {pipeline_mode = #tpu.pipeline_mode<synchronous>, transform_indices = @transform_14, window_bounds = array<i64: 1, 10>}, {transform_indices = @transform_15, window_bounds = array<i64: 4, 10>}]} {
    %cst = arith.constant 0.000000e+00 : f32
    %0 = vector.broadcast %cst : f32 to vector<28x168xf32>
    %c0 = arith.constant 0 : index
    %c0_0 = arith.constant 0 : index
    %c0_1 = arith.constant 0 : index
    %1 = vector.load %arg1[%c0, %c0_0, %c0_1] : memref<4x32x96xf32, #tpu.memory_space<vmem>>, vector<1x28x96xf32>
    %2 = vector.shape_cast %1 : vector<1x28x96xf32> to vector<28x96xf32>
    %3 = arith.truncf %2 : vector<28x96xf32> to vector<28x96xbf16>
    %c0_2 = arith.constant 0 : index
    %c0_3 = arith.constant 0 : index
    %c0_4 = arith.constant 0 : index
    %4 = vector.load %arg2[%c0_2, %c0_3, %c0_4] : memref<5x96x168xbf16, #tpu.memory_space<vmem>>, vector<1x96x168xbf16>
    %5 = vector.shape_cast %4 : vector<1x96x168xbf16> to vector<96x168xbf16>
    %cst_5 = arith.constant dense<0.000000e+00> : vector<28x168xf32>
    %6 = tpu.matmul %3, %5, %cst_5 {dimension_numbers = #tpu.dot_dimension_numbers<[1], [0], [0], [1], [0, 0, 1, 1], [], []>} : vector<28x96xbf16>, vector<96x168xbf16>, vector<28x168xf32> -> vector<28x168xf32>
    %7 = arith.addf %0, %6 : vector<28x168xf32>
    %c0_6 = arith.constant 0 : index
    %c1 = arith.constant 1 : index
    %c0_7 = arith.constant 0 : index
    %8 = vector.load %arg1[%c0_6, %c1, %c0_7] : memref<4x32x96xf32, #tpu.memory_space<vmem>>, vector<1x28x96xf32>
    %9 = vector.shape_cast %8 : vector<1x28x96xf32> to vector<28x96xf32>
    %10 = arith.truncf %9 : vector<28x96xf32> to vector<28x96xbf16>
    %c1_8 = arith.constant 1 : index
    %c0_9 = arith.constant 0 : index
    %c0_10 = arith.constant 0 : index
    %11 = vector.load %arg2[%c1_8, %c0_9, %c0_10] : memref<5x96x168xbf16, #tpu.memory_space<vmem>>, vector<1x96x168xbf16>
    %12 = vector.shape_cast %11 : vector<1x96x168xbf16> to vector<96x168xbf16>
    %cst_11 = arith.constant dense<0.000000e+00> : vector<28x168xf32>
    %13 = tpu.matmul %10, %12, %cst_11 {dimension_numbers = #tpu.dot_dimension_numbers<[1], [0], [0], [1], [0, 0, 1, 1], [], []>} : vector<28x96xbf16>, vector<96x168xbf16>, vector<28x168xf32> -> vector<28x168xf32>
    %14 = arith.addf %7, %13 : vector<28x168xf32>
    %c0_12 = arith.constant 0 : index
    %c2 = arith.constant 2 : index
    %c0_13 = arith.constant 0 : index
    %15 = vector.load %arg1[%c0_12, %c2, %c0_13] : memref<4x32x96xf32, #tpu.memory_space<vmem>>, vector<1x28x96xf32>
    %16 = vector.shape_cast %15 : vector<1x28x96xf32> to vector<28x96xf32>
    %17 = arith.truncf %16 : vector<28x96xf32> to vector<28x96xbf16>
    %c2_14 = arith.constant 2 : index
    %c0_15 = arith.constant 0 : index
    %c0_16 = arith.constant 0 : index
    %18 = vector.load %arg2[%c2_14, %c0_15, %c0_16] : memref<5x96x168xbf16, #tpu.memory_space<vmem>>, vector<1x96x168xbf16>
    %19 = vector.shape_cast %18 : vector<1x96x168xbf16> to vector<96x168xbf16>
    %cst_17 = arith.constant dense<0.000000e+00> : vector<28x168xf32>
    %20 = tpu.matmul %17, %19, %cst_17 {dimension_numbers = #tpu.dot_dimension_numbers<[1], [0], [0], [1], [0, 0, 1, 1], [], []>} : vector<28x96xbf16>, vector<96x168xbf16>, vector<28x168xf32> -> vector<28x168xf32>
    %21 = arith.addf %14, %20 : vector<28x168xf32>
    %c0_18 = arith.constant 0 : index
    %c3 = arith.constant 3 : index
    %c0_19 = arith.constant 0 : index
    %22 = vector.load %arg1[%c0_18, %c3, %c0_19] : memref<4x32x96xf32, #tpu.memory_space<vmem>>, vector<1x28x96xf32>
    %23 = vector.shape_cast %22 : vector<1x28x96xf32> to vector<28x96xf32>
    %24 = arith.truncf %23 : vector<28x96xf32> to vector<28x96xbf16>
    %c3_20 = arith.constant 3 : index
    %c0_21 = arith.constant 0 : index
    %c0_22 = arith.constant 0 : index
    %25 = vector.load %arg2[%c3_20, %c0_21, %c0_22] : memref<5x96x168xbf16, #tpu.memory_space<vmem>>, vector<1x96x168xbf16>
    %26 = vector.shape_cast %25 : vector<1x96x168xbf16> to vector<96x168xbf16>
    %cst_23 = arith.constant dense<0.000000e+00> : vector<28x168xf32>
    %27 = tpu.matmul %24, %26, %cst_23 {dimension_numbers = #tpu.dot_dimension_numbers<[1], [0], [0], [1], [0, 0, 1, 1], [], []>} : vector<28x96xbf16>, vector<96x168xbf16>, vector<28x168xf32> -> vector<28x168xf32>
    %28 = arith.addf %21, %27 : vector<28x168xf32>
    %c0_24 = arith.constant 0 : index
    %c4 = arith.constant 4 : index
    %c0_25 = arith.constant 0 : index
    %29 = vector.load %arg1[%c0_24, %c4, %c0_25] : memref<4x32x96xf32, #tpu.memory_space<vmem>>, vector<1x28x96xf32>
    %30 = vector.shape_cast %29 : vector<1x28x96xf32> to vector<28x96xf32>
    %31 = arith.truncf %30 : vector<28x96xf32> to vector<28x96xbf16>
    %c4_26 = arith.constant 4 : index
    %c0_27 = arith.constant 0 : index
    %c0_28 = arith.constant 0 : index
    %32 = vector.load %arg2[%c4_26, %c0_27, %c0_28] : memref<5x96x168xbf16, #tpu.memory_space<vmem>>, vector<1x96x168xbf16>
    %33 = vector.shape_cast %32 : vector<1x96x168xbf16> to vector<96x168xbf16>
    %cst_29 = arith.constant dense<0.000000e+00> : vector<28x168xf32>
    %34 = tpu.matmul %31, %33, %cst_29 {dimension_numbers = #tpu.dot_dimension_numbers<[1], [0], [0], [1], [0, 0, 1, 1], [], []>} : vector<28x96xbf16>, vector<96x168xbf16>, vector<28x168xf32> -> vector<28x168xf32>
    %35 = arith.addf %28, %34 : vector<28x168xf32>
    %c0_30 = arith.constant 0 : index
    %c0_31 = arith.constant 0 : index
    %36 = vector.load %arg3[%c0_30, %c0_31] : memref<1x168xf32, #tpu.memory_space<vmem>>, vector<1x168xf32>
    %37 = vector.broadcast %36 : vector<1x168xf32> to vector<28x168xf32>
    %38 = arith.addf %35, %37 : vector<28x168xf32>
    %cst_32 = arith.constant 0.000000e+00 : f32
    %39 = vector.broadcast %cst_32 : f32 to vector<28x168xf32>
    %40 = arith.maximumf %38, %39 : vector<28x168xf32>
    %41 = arith.truncf %40 : vector<28x168xf32> to vector<28x168xbf16>
    %c0_33 = arith.constant 0 : index
    %c0_34 = arith.constant 0 : index
    %42 = vector.load %arg4[%c0_33, %c0_34] : memref<14x28xbf16, #tpu.memory_space<vmem>>, vector<14x28xbf16>
    %cst_35 = arith.constant dense<0.000000e+00> : vector<14x168xf32>
    %43 = tpu.matmul %42, %41, %cst_35 {dimension_numbers = #tpu.dot_dimension_numbers<[1], [0], [0], [1], [0, 0, 1, 1], [], []>} : vector<14x28xbf16>, vector<28x168xbf16>, vector<14x168xf32> -> vector<14x168xf32>
    %44 = arith.truncf %43 : vector<14x168xf32> to vector<14x168xbf16>
    %c0_36 = arith.constant 0 : index
    %c0_37 = arith.constant 0 : index
    %45 = vector.load %arg5[%c0_36, %c0_37] : memref<168x84xbf16, #tpu.memory_space<vmem>>, vector<168x84xbf16>
    %cst_38 = arith.constant dense<0.000000e+00> : vector<14x84xf32>
    %46 = tpu.matmul %44, %45, %cst_38 {dimension_numbers = #tpu.dot_dimension_numbers<[1], [0], [0], [1], [0, 0, 1, 1], [], []>} : vector<14x168xbf16>, vector<168x84xbf16>, vector<14x84xf32> -> vector<14x84xf32>
    %c0_39 = arith.constant 0 : index
    %c0_40 = arith.constant 0 : index
    %c0_41 = arith.constant 0 : index
    %47 = vector.load %arg17[%c0_39, %c0_40, %c0_41] : memref<4x14x84xf32, #tpu.memory_space<vmem>>, vector<1x14x84xf32>
    %48 = vector.shape_cast %47 : vector<1x14x84xf32> to vector<14x84xf32>
    %49 = vector.shape_cast %46 : vector<14x84xf32> to vector<1x14x84xf32>
    tpu.vector_store %arg17[%c0_39, %c0_40, %c0_41], %49 {strides = array<i32>} : memref<4x14x84xf32, #tpu.memory_space<vmem>>, vector<1x14x84xf32>,
    %cst_42 = arith.constant 0.000000e+00 : f32
    %50 = vector.broadcast %cst_42 : f32 to vector<10x160xf32>
    %c0_43 = arith.constant 0 : index
    %c0_44 = arith.constant 0 : index
    %c0_45 = arith.constant 0 : index
    %51 = vector.load %arg17[%c0_43, %c0_44, %c0_45] : memref<4x14x84xf32, #tpu.memory_space<vmem>>, vector<1x10x84xf32>
    %52 = vector.shape_cast %51 : vector<1x10x84xf32> to vector<10x84xf32>
    %53 = arith.truncf %52 : vector<10x84xf32> to vector<10x84xbf16>
    %c0_46 = arith.constant 0 : index
    %c0_47 = arith.constant 0 : index
    %c0_48 = arith.constant 0 : index
    %54 = vector.load %arg6[%c0_46, %c0_47, %c0_48] : memref<5x84x160xbf16, #tpu.memory_space<vmem>>, vector<1x84x160xbf16>
    %55 = vector.shape_cast %54 : vector<1x84x160xbf16> to vector<84x160xbf16>
    %cst_49 = arith.constant dense<0.000000e+00> : vector<10x160xf32>
    %56 = tpu.matmul %53, %55, %cst_49 {dimension_numbers = #tpu.dot_dimension_numbers<[1], [0], [0], [1], [0, 0, 1, 1], [], []>} : vector<10x84xbf16>, vector<84x160xbf16>, vector<10x160xf32> -> vector<10x160xf32>
    %57 = arith.addf %50, %56 : vector<10x160xf32>
    %c0_50 = arith.constant 0 : index
    %c1_51 = arith.constant 1 : index
    %c0_52 = arith.constant 0 : index
    %58 = vector.load %arg17[%c0_50, %c1_51, %c0_52] : memref<4x14x84xf32, #tpu.memory_space<vmem>>, vector<1x10x84xf32>
    %59 = vector.shape_cast %58 : vector<1x10x84xf32> to vector<10x84xf32>
    %60 = arith.truncf %59 : vector<10x84xf32> to vector<10x84xbf16>
    %c1_53 = arith.constant 1 : index
    %c0_54 = arith.constant 0 : index
    %c0_55 = arith.constant 0 : index
    %61 = vector.load %arg6[%c1_53, %c0_54, %c0_55] : memref<5x84x160xbf16, #tpu.memory_space<vmem>>, vector<1x84x160xbf16>
    %62 = vector.shape_cast %61 : vector<1x84x160xbf16> to vector<84x160xbf16>
    %cst_56 = arith.constant dense<0.000000e+00> : vector<10x160xf32>
    %63 = tpu.matmul %60, %62, %cst_56 {dimension_numbers = #tpu.dot_dimension_numbers<[1], [0], [0], [1], [0, 0, 1, 1], [], []>} : vector<10x84xbf16>, vector<84x160xbf16>, vector<10x160xf32> -> vector<10x160xf32>
    %64 = arith.addf %57, %63 : vector<10x160xf32>
    %c0_57 = arith.constant 0 : index
    %c2_58 = arith.constant 2 : index
    %c0_59 = arith.constant 0 : index
    %65 = vector.load %arg17[%c0_57, %c2_58, %c0_59] : memref<4x14x84xf32, #tpu.memory_space<vmem>>, vector<1x10x84xf32>
    %66 = vector.shape_cast %65 : vector<1x10x84xf32> to vector<10x84xf32>
    %67 = arith.truncf %66 : vector<10x84xf32> to vector<10x84xbf16>
    %c2_60 = arith.constant 2 : index
    %c0_61 = arith.constant 0 : index
    %c0_62 = arith.constant 0 : index
    %68 = vector.load %arg6[%c2_60, %c0_61, %c0_62] : memref<5x84x160xbf16, #tpu.memory_space<vmem>>, vector<1x84x160xbf16>
    %69 = vector.shape_cast %68 : vector<1x84x160xbf16> to vector<84x160xbf16>
    %cst_63 = arith.constant dense<0.000000e+00> : vector<10x160xf32>
    %70 = tpu.matmul %67, %69, %cst_63 {dimension_numbers = #tpu.dot_dimension_numbers<[1], [0], [0], [1], [0, 0, 1, 1], [], []>} : vector<10x84xbf16>, vector<84x160xbf16>, vector<10x160xf32> -> vector<10x160xf32>
    %71 = arith.addf %64, %70 : vector<10x160xf32>
    %c0_64 = arith.constant 0 : index
    %c3_65 = arith.constant 3 : index
    %c0_66 = arith.constant 0 : index
    %72 = vector.load %arg17[%c0_64, %c3_65, %c0_66] : memref<4x14x84xf32, #tpu.memory_space<vmem>>, vector<1x10x84xf32>
    %73 = vector.shape_cast %72 : vector<1x10x84xf32> to vector<10x84xf32>
    %74 = arith.truncf %73 : vector<10x84xf32> to vector<10x84xbf16>
    %c3_67 = arith.constant 3 : index
    %c0_68 = arith.constant 0 : index
    %c0_69 = arith.constant 0 : index
    %75 = vector.load %arg6[%c3_67, %c0_68, %c0_69] : memref<5x84x160xbf16, #tpu.memory_space<vmem>>, vector<1x84x160xbf16>
    %76 = vector.shape_cast %75 : vector<1x84x160xbf16> to vector<84x160xbf16>
    %cst_70 = arith.constant dense<0.000000e+00> : vector<10x160xf32>
    %77 = tpu.matmul %74, %76, %cst_70 {dimension_numbers = #tpu.dot_dimension_numbers<[1], [0], [0], [1], [0, 0, 1, 1], [], []>} : vector<10x84xbf16>, vector<84x160xbf16>, vector<10x160xf32> -> vector<10x160xf32>
    %78 = arith.addf %71, %77 : vector<10x160xf32>
    %c0_71 = arith.constant 0 : index
    %c4_72 = arith.constant 4 : index
    %c0_73 = arith.constant 0 : index
    %79 = vector.load %arg17[%c0_71, %c4_72, %c0_73] : memref<4x14x84xf32, #tpu.memory_space<vmem>>, vector<1x10x84xf32>
    %80 = vector.shape_cast %79 : vector<1x10x84xf32> to vector<10x84xf32>
    %81 = arith.truncf %80 : vector<10x84xf32> to vector<10x84xbf16>
    %c4_74 = arith.constant 4 : index
    %c0_75 = arith.constant 0 : index
    %c0_76 = arith.constant 0 : index
    %82 = vector.load %arg6[%c4_74, %c0_75, %c0_76] : memref<5x84x160xbf16, #tpu.memory_space<vmem>>, vector<1x84x160xbf16>
    %83 = vector.shape_cast %82 : vector<1x84x160xbf16> to vector<84x160xbf16>
    %cst_77 = arith.constant dense<0.000000e+00> : vector<10x160xf32>
    %84 = tpu.matmul %81, %83, %cst_77 {dimension_numbers = #tpu.dot_dimension_numbers<[1], [0], [0], [1], [0, 0, 1, 1], [], []>} : vector<10x84xbf16>, vector<84x160xbf16>, vector<10x160xf32> -> vector<10x160xf32>
    %85 = arith.addf %78, %84 : vector<10x160xf32>
    %c0_78 = arith.constant 0 : index
    %c0_79 = arith.constant 0 : index
    %86 = vector.load %arg7[%c0_78, %c0_79] : memref<1x160xf32, #tpu.memory_space<vmem>>, vector<1x160xf32>
    %87 = vector.broadcast %86 : vector<1x160xf32> to vector<10x160xf32>
    %88 = arith.addf %85, %87 : vector<10x160xf32>
    %cst_80 = arith.constant 0.000000e+00 : f32
    %89 = vector.broadcast %cst_80 : f32 to vector<10x160xf32>
    %90 = arith.maximumf %88, %89 : vector<10x160xf32>
    %91 = arith.truncf %90 : vector<10x160xf32> to vector<10x160xbf16>
    %c0_81 = arith.constant 0 : index
    %c0_82 = arith.constant 0 : index
    %92 = vector.load %arg8[%c0_81, %c0_82] : memref<5x10xbf16, #tpu.memory_space<vmem>>, vector<5x10xbf16>
    %cst_83 = arith.constant dense<0.000000e+00> : vector<5x160xf32>
    %93 = tpu.matmul %92, %91, %cst_83 {dimension_numbers = #tpu.dot_dimension_numbers<[1], [0], [0], [1], [0, 0, 1, 1], [], []>} : vector<5x10xbf16>, vector<10x160xbf16>, vector<5x160xf32> -> vector<5x160xf32>
    %94 = arith.truncf %93 : vector<5x160xf32> to vector<5x160xbf16>
    %c0_84 = arith.constant 0 : index
    %c0_85 = arith.constant 0 : index
    %95 = vector.load %arg9[%c0_84, %c0_85] : memref<160x80xbf16, #tpu.memory_space<vmem>>, vector<160x80xbf16>
    %cst_86 = arith.constant dense<0.000000e+00> : vector<5x80xf32>
    %96 = tpu.matmul %94, %95, %cst_86 {dimension_numbers = #tpu.dot_dimension_numbers<[1], [0], [0], [1], [0, 0, 1, 1], [], []>} : vector<5x160xbf16>, vector<160x80xbf16>, vector<5x80xf32> -> vector<5x80xf32>
    %c0_87 = arith.constant 0 : index
    %c0_88 = arith.constant 0 : index
    %c0_89 = arith.constant 0 : index
    %97 = vector.load %arg18[%c0_87, %c0_88, %c0_89] : memref<4x5x80xf32, #tpu.memory_space<vmem>>, vector<1x5x80xf32>
    %98 = vector.shape_cast %97 : vector<1x5x80xf32> to vector<5x80xf32>
    %99 = vector.shape_cast %96 : vector<5x80xf32> to vector<1x5x80xf32>
    tpu.vector_store %arg18[%c0_87, %c0_88, %c0_89], %99 {strides = array<i32>} : memref<4x5x80xf32, #tpu.memory_space<vmem>>, vector<1x5x80xf32>,
    %cst_90 = arith.constant 0.000000e+00 : f32
    %100 = vector.broadcast %cst_90 : f32 to vector<1x120xf32>
    %c0_91 = arith.constant 0 : index
    %c0_92 = arith.constant 0 : index
    %c0_93 = arith.constant 0 : index
    %101 = vector.load %arg18[%c0_91, %c0_92, %c0_93] : memref<4x5x80xf32, #tpu.memory_space<vmem>>, vector<1x1x80xf32>
    %102 = vector.shape_cast %101 : vector<1x1x80xf32> to vector<1x80xf32>
    %103 = arith.truncf %102 : vector<1x80xf32> to vector<1x80xbf16>
    %c0_94 = arith.constant 0 : index
    %c0_95 = arith.constant 0 : index
    %c0_96 = arith.constant 0 : index
    %104 = vector.load %arg10[%c0_94, %c0_95, %c0_96] : memref<5x80x120xbf16, #tpu.memory_space<vmem>>, vector<1x80x120xbf16>
    %105 = vector.shape_cast %104 : vector<1x80x120xbf16> to vector<80x120xbf16>
    %cst_97 = arith.constant dense<0.000000e+00> : vector<1x120xf32>
    %106 = tpu.matmul %103, %105, %cst_97 {dimension_numbers = #tpu.dot_dimension_numbers<[1], [0], [0], [1], [0, 0, 1, 1], [], []>} : vector<1x80xbf16>, vector<80x120xbf16>, vector<1x120xf32> -> vector<1x120xf32>
    %107 = arith.addf %100, %106 : vector<1x120xf32>
    %c0_98 = arith.constant 0 : index
    %c1_99 = arith.constant 1 : index
    %c0_100 = arith.constant 0 : index
    %108 = vector.load %arg18[%c0_98, %c1_99, %c0_100] : memref<4x5x80xf32, #tpu.memory_space<vmem>>, vector<1x1x80xf32>
    %109 = vector.shape_cast %108 : vector<1x1x80xf32> to vector<1x80xf32>
    %110 = arith.truncf %109 : vector<1x80xf32> to vector<1x80xbf16>
    %c1_101 = arith.constant 1 : index
    %c0_102 = arith.constant 0 : index
    %c0_103 = arith.constant 0 : index
    %111 = vector.load %arg10[%c1_101, %c0_102, %c0_103] : memref<5x80x120xbf16, #tpu.memory_space<vmem>>, vector<1x80x120xbf16>
    %112 = vector.shape_cast %111 : vector<1x80x120xbf16> to vector<80x120xbf16>
    %cst_104 = arith.constant dense<0.000000e+00> : vector<1x120xf32>
    %113 = tpu.matmul %110, %112, %cst_104 {dimension_numbers = #tpu.dot_dimension_numbers<[1], [0], [0], [1], [0, 0, 1, 1], [], []>} : vector<1x80xbf16>, vector<80x120xbf16>, vector<1x120xf32> -> vector<1x120xf32>
    %114 = arith.addf %107, %113 : vector<1x120xf32>
    %c0_105 = arith.constant 0 : index
    %c2_106 = arith.constant 2 : index
    %c0_107 = arith.constant 0 : index
    %115 = vector.load %arg18[%c0_105, %c2_106, %c0_107] : memref<4x5x80xf32, #tpu.memory_space<vmem>>, vector<1x1x80xf32>
    %116 = vector.shape_cast %115 : vector<1x1x80xf32> to vector<1x80xf32>
    %117 = arith.truncf %116 : vector<1x80xf32> to vector<1x80xbf16>
    %c2_108 = arith.constant 2 : index
    %c0_109 = arith.constant 0 : index
    %c0_110 = arith.constant 0 : index
    %118 = vector.load %arg10[%c2_108, %c0_109, %c0_110] : memref<5x80x120xbf16, #tpu.memory_space<vmem>>, vector<1x80x120xbf16>
    %119 = vector.shape_cast %118 : vector<1x80x120xbf16> to vector<80x120xbf16>
    %cst_111 = arith.constant dense<0.000000e+00> : vector<1x120xf32>
    %120 = tpu.matmul %117, %119, %cst_111 {dimension_numbers = #tpu.dot_dimension_numbers<[1], [0], [0], [1], [0, 0, 1, 1], [], []>} : vector<1x80xbf16>, vector<80x120xbf16>, vector<1x120xf32> -> vector<1x120xf32>
    %121 = arith.addf %114, %120 : vector<1x120xf32>
    %c0_112 = arith.constant 0 : index
    %c3_113 = arith.constant 3 : index
    %c0_114 = arith.constant 0 : index
    %122 = vector.load %arg18[%c0_112, %c3_113, %c0_114] : memref<4x5x80xf32, #tpu.memory_space<vmem>>, vector<1x1x80xf32>
    %123 = vector.shape_cast %122 : vector<1x1x80xf32> to vector<1x80xf32>
    %124 = arith.truncf %123 : vector<1x80xf32> to vector<1x80xbf16>
    %c3_115 = arith.constant 3 : index
    %c0_116 = arith.constant 0 : index
    %c0_117 = arith.constant 0 : index
    %125 = vector.load %arg10[%c3_115, %c0_116, %c0_117] : memref<5x80x120xbf16, #tpu.memory_space<vmem>>, vector<1x80x120xbf16>
    %126 = vector.shape_cast %125 : vector<1x80x120xbf16> to vector<80x120xbf16>
    %cst_118 = arith.constant dense<0.000000e+00> : vector<1x120xf32>
    %127 = tpu.matmul %124, %126, %cst_118 {dimension_numbers = #tpu.dot_dimension_numbers<[1], [0], [0], [1], [0, 0, 1, 1], [], []>} : vector<1x80xbf16>, vector<80x120xbf16>, vector<1x120xf32> -> vector<1x120xf32>
    %128 = arith.addf %121, %127 : vector<1x120xf32>
    %c0_119 = arith.constant 0 : index
    %c4_120 = arith.constant 4 : index
    %c0_121 = arith.constant 0 : index
    %129 = vector.load %arg18[%c0_119, %c4_120, %c0_121] : memref<4x5x80xf32, #tpu.memory_space<vmem>>, vector<1x1x80xf32>
    %130 = vector.shape_cast %129 : vector<1x1x80xf32> to vector<1x80xf32>
    %131 = arith.truncf %130 : vector<1x80xf32> to vector<1x80xbf16>
    %c4_122 = arith.constant 4 : index
    %c0_123 = arith.constant 0 : index
    %c0_124 = arith.constant 0 : index
    %132 = vector.load %arg10[%c4_122, %c0_123, %c0_124] : memref<5x80x120xbf16, #tpu.memory_space<vmem>>, vector<1x80x120xbf16>
    %133 = vector.shape_cast %132 : vector<1x80x120xbf16> to vector<80x120xbf16>
    %cst_125 = arith.constant dense<0.000000e+00> : vector<1x120xf32>
    %134 = tpu.matmul %131, %133, %cst_125 {dimension_numbers = #tpu.dot_dimension_numbers<[1], [0], [0], [1], [0, 0, 1, 1], [], []>} : vector<1x80xbf16>, vector<80x120xbf16>, vector<1x120xf32> -> vector<1x120xf32>
    %135 = arith.addf %128, %134 : vector<1x120xf32>
    %c0_126 = arith.constant 0 : index
    %c0_127 = arith.constant 0 : index
    %136 = vector.load %arg11[%c0_126, %c0_127] : memref<1x120xf32, #tpu.memory_space<vmem>>, vector<1x120xf32>
    %137 = arith.addf %135, %136 : vector<1x120xf32>
    %cst_128 = arith.constant 0.000000e+00 : f32
    %138 = vector.broadcast %cst_128 : f32 to vector<1x120xf32>
    %139 = arith.maximumf %137, %138 : vector<1x120xf32>
    %c0_129 = arith.constant 0 : index
    %c0_130 = arith.constant 0 : index
    %140 = vector.load %arg19[%c0_129, %c0_130] : memref<4x120xf32, #tpu.memory_space<vmem>>, vector<1x120xf32>
    tpu.vector_store %arg19[%c0_129, %c0_130], %139 {strides = array<i32>} : memref<4x120xf32, #tpu.memory_space<vmem>>, vector<1x120xf32>,
    %cst_131 = arith.constant 0.000000e+00 : f32
    %141 = vector.broadcast %cst_131 : f32 to vector<28x168xf32>
    %c1_132 = arith.constant 1 : index
    %c0_133 = arith.constant 0 : index
    %c0_134 = arith.constant 0 : index
    %142 = vector.load %arg1[%c1_132, %c0_133, %c0_134] : memref<4x32x96xf32, #tpu.memory_space<vmem>>, vector<1x28x96xf32>
    %143 = vector.shape_cast %142 : vector<1x28x96xf32> to vector<28x96xf32>
    %144 = arith.truncf %143 : vector<28x96xf32> to vector<28x96xbf16>
    %c0_135 = arith.constant 0 : index
    %c0_136 = arith.constant 0 : index
    %c0_137 = arith.constant 0 : index
    %145 = vector.load %arg2[%c0_135, %c0_136, %c0_137] : memref<5x96x168xbf16, #tpu.memory_space<vmem>>, vector<1x96x168xbf16>
    %146 = vector.shape_cast %145 : vector<1x96x168xbf16> to vector<96x168xbf16>
    %cst_138 = arith.constant dense<0.000000e+00> : vector<28x168xf32>
    %147 = tpu.matmul %144, %146, %cst_138 {dimension_numbers = #tpu.dot_dimension_numbers<[1], [0], [0], [1], [0, 0, 1, 1], [], []>} : vector<28x96xbf16>, vector<96x168xbf16>, vector<28x168xf32> -> vector<28x168xf32>
    %148 = arith.addf %141, %147 : vector<28x168xf32>
    %c1_139 = arith.constant 1 : index
    %c1_140 = arith.constant 1 : index
    %c0_141 = arith.constant 0 : index
    %149 = vector.load %arg1[%c1_139, %c1_140, %c0_141] : memref<4x32x96xf32, #tpu.memory_space<vmem>>, vector<1x28x96xf32>
    %150 = vector.shape_cast %149 : vector<1x28x96xf32> to vector<28x96xf32>
    %151 = arith.truncf %150 : vector<28x96xf32> to vector<28x96xbf16>
    %c1_142 = arith.constant 1 : index
    %c0_143 = arith.constant 0 : index
    %c0_144 = arith.constant 0 : index
    %152 = vector.load %arg2[%c1_142, %c0_143, %c0_144] : memref<5x96x168xbf16, #tpu.memory_space<vmem>>, vector<1x96x168xbf16>
    %153 = vector.shape_cast %152 : vector<1x96x168xbf16> to vector<96x168xbf16>
    %cst_145 = arith.constant dense<0.000000e+00> : vector<28x168xf32>
    %154 = tpu.matmul %151, %153, %cst_145 {dimension_numbers = #tpu.dot_dimension_numbers<[1], [0], [0], [1], [0, 0, 1, 1], [], []>} : vector<28x96xbf16>, vector<96x168xbf16>, vector<28x168xf32> -> vector<28x168xf32>
    %155 = arith.addf %148, %154 : vector<28x168xf32>
    %c1_146 = arith.constant 1 : index
    %c2_147 = arith.constant 2 : index
    %c0_148 = arith.constant 0 : index
    %156 = vector.load %arg1[%c1_146, %c2_147, %c0_148] : memref<4x32x96xf32, #tpu.memory_space<vmem>>, vector<1x28x96xf32>
    %157 = vector.shape_cast %156 : vector<1x28x96xf32> to vector<28x96xf32>
    %158 = arith.truncf %157 : vector<28x96xf32> to vector<28x96xbf16>
    %c2_149 = arith.constant 2 : index
    %c0_150 = arith.constant 0 : index
    %c0_151 = arith.constant 0 : index
    %159 = vector.load %arg2[%c2_149, %c0_150, %c0_151] : memref<5x96x168xbf16, #tpu.memory_space<vmem>>, vector<1x96x168xbf16>
    %160 = vector.shape_cast %159 : vector<1x96x168xbf16> to vector<96x168xbf16>
    %cst_152 = arith.constant dense<0.000000e+00> : vector<28x168xf32>
    %161 = tpu.matmul %158, %160, %cst_152 {dimension_numbers = #tpu.dot_dimension_numbers<[1], [0], [0], [1], [0, 0, 1, 1], [], []>} : vector<28x96xbf16>, vector<96x168xbf16>, vector<28x168xf32> -> vector<28x168xf32>
    %162 = arith.addf %155, %161 : vector<28x168xf32>
    %c1_153 = arith.constant 1 : index
    %c3_154 = arith.constant 3 : index
    %c0_155 = arith.constant 0 : index
    %163 = vector.load %arg1[%c1_153, %c3_154, %c0_155] : memref<4x32x96xf32, #tpu.memory_space<vmem>>, vector<1x28x96xf32>
    %164 = vector.shape_cast %163 : vector<1x28x96xf32> to vector<28x96xf32>
    %165 = arith.truncf %164 : vector<28x96xf32> to vector<28x96xbf16>
    %c3_156 = arith.constant 3 : index
    %c0_157 = arith.constant 0 : index
    %c0_158 = arith.constant 0 : index
    %166 = vector.load %arg2[%c3_156, %c0_157, %c0_158] : memref<5x96x168xbf16, #tpu.memory_space<vmem>>, vector<1x96x168xbf16>
    %167 = vector.shape_cast %166 : vector<1x96x168xbf16> to vector<96x168xbf16>
    %cst_159 = arith.constant dense<0.000000e+00> : vector<28x168xf32>
    %168 = tpu.matmul %165, %167, %cst_159 {dimension_numbers = #tpu.dot_dimension_numbers<[1], [0], [0], [1], [0, 0, 1, 1], [], []>} : vector<28x96xbf16>, vector<96x168xbf16>, vector<28x168xf32> -> vector<28x168xf32>
    %169 = arith.addf %162, %168 : vector<28x168xf32>
    %c1_160 = arith.constant 1 : index
    %c4_161 = arith.constant 4 : index
    %c0_162 = arith.constant 0 : index
    %170 = vector.load %arg1[%c1_160, %c4_161, %c0_162] : memref<4x32x96xf32, #tpu.memory_space<vmem>>, vector<1x28x96xf32>
    %171 = vector.shape_cast %170 : vector<1x28x96xf32> to vector<28x96xf32>
    %172 = arith.truncf %171 : vector<28x96xf32> to vector<28x96xbf16>
    %c4_163 = arith.constant 4 : index
    %c0_164 = arith.constant 0 : index
    %c0_165 = arith.constant 0 : index
    %173 = vector.load %arg2[%c4_163, %c0_164, %c0_165] : memref<5x96x168xbf16, #tpu.memory_space<vmem>>, vector<1x96x168xbf16>
    %174 = vector.shape_cast %173 : vector<1x96x168xbf16> to vector<96x168xbf16>
    %cst_166 = arith.constant dense<0.000000e+00> : vector<28x168xf32>
    %175 = tpu.matmul %172, %174, %cst_166 {dimension_numbers = #tpu.dot_dimension_numbers<[1], [0], [0], [1], [0, 0, 1, 1], [], []>} : vector<28x96xbf16>, vector<96x168xbf16>, vector<28x168xf32> -> vector<28x168xf32>
    %176 = arith.addf %169, %175 : vector<28x168xf32>
    %c0_167 = arith.constant 0 : index
    %c0_168 = arith.constant 0 : index
    %177 = vector.load %arg3[%c0_167, %c0_168] : memref<1x168xf32, #tpu.memory_space<vmem>>, vector<1x168xf32>
    %178 = vector.broadcast %177 : vector<1x168xf32> to vector<28x168xf32>
    %179 = arith.addf %176, %178 : vector<28x168xf32>
    %cst_169 = arith.constant 0.000000e+00 : f32
    %180 = vector.broadcast %cst_169 : f32 to vector<28x168xf32>
    %181 = arith.maximumf %179, %180 : vector<28x168xf32>
    %182 = arith.truncf %181 : vector<28x168xf32> to vector<28x168xbf16>
    %c0_170 = arith.constant 0 : index
    %c0_171 = arith.constant 0 : index
    %183 = vector.load %arg4[%c0_170, %c0_171] : memref<14x28xbf16, #tpu.memory_space<vmem>>, vector<14x28xbf16>
    %cst_172 = arith.constant dense<0.000000e+00> : vector<14x168xf32>
    %184 = tpu.matmul %183, %182, %cst_172 {dimension_numbers = #tpu.dot_dimension_numbers<[1], [0], [0], [1], [0, 0, 1, 1], [], []>} : vector<14x28xbf16>, vector<28x168xbf16>, vector<14x168xf32> -> vector<14x168xf32>
    %185 = arith.truncf %184 : vector<14x168xf32> to vector<14x168xbf16>
    %c0_173 = arith.constant 0 : index
    %c0_174 = arith.constant 0 : index
    %186 = vector.load %arg5[%c0_173, %c0_174] : memref<168x84xbf16, #tpu.memory_space<vmem>>, vector<168x84xbf16>
    %cst_175 = arith.constant dense<0.000000e+00> : vector<14x84xf32>
    %187 = tpu.matmul %185, %186, %cst_175 {dimension_numbers = #tpu.dot_dimension_numbers<[1], [0], [0], [1], [0, 0, 1, 1], [], []>} : vector<14x168xbf16>, vector<168x84xbf16>, vector<14x84xf32> -> vector<14x84xf32>
    %c1_176 = arith.constant 1 : index
    %c0_177 = arith.constant 0 : index
    %c0_178 = arith.constant 0 : index
    %188 = vector.load %arg17[%c1_176, %c0_177, %c0_178] : memref<4x14x84xf32, #tpu.memory_space<vmem>>, vector<1x14x84xf32>
    %189 = vector.shape_cast %188 : vector<1x14x84xf32> to vector<14x84xf32>
    %190 = vector.shape_cast %187 : vector<14x84xf32> to vector<1x14x84xf32>
    tpu.vector_store %arg17[%c1_176, %c0_177, %c0_178], %190 {strides = array<i32>} : memref<4x14x84xf32, #tpu.memory_space<vmem>>, vector<1x14x84xf32>,
    %cst_179 = arith.constant 0.000000e+00 : f32
    %191 = vector.broadcast %cst_179 : f32 to vector<10x160xf32>
    %c1_180 = arith.constant 1 : index
    %c0_181 = arith.constant 0 : index
    %c0_182 = arith.constant 0 : index
    %192 = vector.load %arg17[%c1_180, %c0_181, %c0_182] : memref<4x14x84xf32, #tpu.memory_space<vmem>>, vector<1x10x84xf32>
    %193 = vector.shape_cast %192 : vector<1x10x84xf32> to vector<10x84xf32>
    %194 = arith.truncf %193 : vector<10x84xf32> to vector<10x84xbf16>
    %c0_183 = arith.constant 0 : index
    %c0_184 = arith.constant 0 : index
    %c0_185 = arith.constant 0 : index
    %195 = vector.load %arg6[%c0_183, %c0_184, %c0_185] : memref<5x84x160xbf16, #tpu.memory_space<vmem>>, vector<1x84x160xbf16>
    %196 = vector.shape_cast %195 : vector<1x84x160xbf16> to vector<84x160xbf16>
    %cst_186 = arith.constant dense<0.000000e+00> : vector<10x160xf32>
    %197 = tpu.matmul %194, %196, %cst_186 {dimension_numbers = #tpu.dot_dimension_numbers<[1], [0], [0], [1], [0, 0, 1, 1], [], []>} : vector<10x84xbf16>, vector<84x160xbf16>, vector<10x160xf32> -> vector<10x160xf32>
    %198 = arith.addf %191, %197 : vector<10x160xf32>
    %c1_187 = arith.constant 1 : index
    %c1_188 = arith.constant 1 : index
    %c0_189 = arith.constant 0 : index
    %199 = vector.load %arg17[%c1_187, %c1_188, %c0_189] : memref<4x14x84xf32, #tpu.memory_space<vmem>>, vector<1x10x84xf32>
    %200 = vector.shape_cast %199 : vector<1x10x84xf32> to vector<10x84xf32>
    %201 = arith.truncf %200 : vector<10x84xf32> to vector<10x84xbf16>
    %c1_190 = arith.constant 1 : index
    %c0_191 = arith.constant 0 : index
    %c0_192 = arith.constant 0 : index
    %202 = vector.load %arg6[%c1_190, %c0_191, %c0_192] : memref<5x84x160xbf16, #tpu.memory_space<vmem>>, vector<1x84x160xbf16>
    %203 = vector.shape_cast %202 : vector<1x84x160xbf16> to vector<84x160xbf16>
    %cst_193 = arith.constant dense<0.000000e+00> : vector<10x160xf32>
    %204 = tpu.matmul %201, %203, %cst_193 {dimension_numbers = #tpu.dot_dimension_numbers<[1], [0], [0], [1], [0, 0, 1, 1], [], []>} : vector<10x84xbf16>, vector<84x160xbf16>, vector<10x160xf32> -> vector<10x160xf32>
    %205 = arith.addf %198, %204 : vector<10x160xf32>
    %c1_194 = arith.constant 1 : index
    %c2_195 = arith.constant 2 : index
    %c0_196 = arith.constant 0 : index
    %206 = vector.load %arg17[%c1_194, %c2_195, %c0_196] : memref<4x14x84xf32, #tpu.memory_space<vmem>>, vector<1x10x84xf32>
    %207 = vector.shape_cast %206 : vector<1x10x84xf32> to vector<10x84xf32>
    %208 = arith.truncf %207 : vector<10x84xf32> to vector<10x84xbf16>
    %c2_197 = arith.constant 2 : index
    %c0_198 = arith.constant 0 : index
    %c0_199 = arith.constant 0 : index
    %209 = vector.load %arg6[%c2_197, %c0_198, %c0_199] : memref<5x84x160xbf16, #tpu.memory_space<vmem>>, vector<1x84x160xbf16>
    %210 = vector.shape_cast %209 : vector<1x84x160xbf16> to vector<84x160xbf16>
    %cst_200 = arith.constant dense<0.000000e+00> : vector<10x160xf32>
    %211 = tpu.matmul %208, %210, %cst_200 {dimension_numbers = #tpu.dot_dimension_numbers<[1], [0], [0], [1], [0, 0, 1, 1], [], []>} : vector<10x84xbf16>, vector<84x160xbf16>, vector<10x160xf32> -> vector<10x160xf32>
    %212 = arith.addf %205, %211 : vector<10x160xf32>
    %c1_201 = arith.constant 1 : index
    %c3_202 = arith.constant 3 : index
    %c0_203 = arith.constant 0 : index
    %213 = vector.load %arg17[%c1_201, %c3_202, %c0_203] : memref<4x14x84xf32, #tpu.memory_space<vmem>>, vector<1x10x84xf32>
    %214 = vector.shape_cast %213 : vector<1x10x84xf32> to vector<10x84xf32>
    %215 = arith.truncf %214 : vector<10x84xf32> to vector<10x84xbf16>
    %c3_204 = arith.constant 3 : index
    %c0_205 = arith.constant 0 : index
    %c0_206 = arith.constant 0 : index
    %216 = vector.load %arg6[%c3_204, %c0_205, %c0_206] : memref<5x84x160xbf16, #tpu.memory_space<vmem>>, vector<1x84x160xbf16>
    %217 = vector.shape_cast %216 : vector<1x84x160xbf16> to vector<84x160xbf16>
    %cst_207 = arith.constant dense<0.000000e+00> : vector<10x160xf32>
    %218 = tpu.matmul %215, %217, %cst_207 {dimension_numbers = #tpu.dot_dimension_numbers<[1], [0], [0], [1], [0, 0, 1, 1], [], []>} : vector<10x84xbf16>, vector<84x160xbf16>, vector<10x160xf32> -> vector<10x160xf32>
    %219 = arith.addf %212, %218 : vector<10x160xf32>
    %c1_208 = arith.constant 1 : index
    %c4_209 = arith.constant 4 : index
    %c0_210 = arith.constant 0 : index
    %220 = vector.load %arg17[%c1_208, %c4_209, %c0_210] : memref<4x14x84xf32, #tpu.memory_space<vmem>>, vector<1x10x84xf32>
    %221 = vector.shape_cast %220 : vector<1x10x84xf32> to vector<10x84xf32>
    %222 = arith.truncf %221 : vector<10x84xf32> to vector<10x84xbf16>
    %c4_211 = arith.constant 4 : index
    %c0_212 = arith.constant 0 : index
    %c0_213 = arith.constant 0 : index
    %223 = vector.load %arg6[%c4_211, %c0_212, %c0_213] : memref<5x84x160xbf16, #tpu.memory_space<vmem>>, vector<1x84x160xbf16>
    %224 = vector.shape_cast %223 : vector<1x84x160xbf16> to vector<84x160xbf16>
    %cst_214 = arith.constant dense<0.000000e+00> : vector<10x160xf32>
    %225 = tpu.matmul %222, %224, %cst_214 {dimension_numbers = #tpu.dot_dimension_numbers<[1], [0], [0], [1], [0, 0, 1, 1], [], []>} : vector<10x84xbf16>, vector<84x160xbf16>, vector<10x160xf32> -> vector<10x160xf32>
    %226 = arith.addf %219, %225 : vector<10x160xf32>
    %c0_215 = arith.constant 0 : index
    %c0_216 = arith.constant 0 : index
    %227 = vector.load %arg7[%c0_215, %c0_216] : memref<1x160xf32, #tpu.memory_space<vmem>>, vector<1x160xf32>
    %228 = vector.broadcast %227 : vector<1x160xf32> to vector<10x160xf32>
    %229 = arith.addf %226, %228 : vector<10x160xf32>
    %cst_217 = arith.constant 0.000000e+00 : f32
    %230 = vector.broadcast %cst_217 : f32 to vector<10x160xf32>
    %231 = arith.maximumf %229, %230 : vector<10x160xf32>
    %232 = arith.truncf %231 : vector<10x160xf32> to vector<10x160xbf16>
    %c0_218 = arith.constant 0 : index
    %c0_219 = arith.constant 0 : index
    %233 = vector.load %arg8[%c0_218, %c0_219] : memref<5x10xbf16, #tpu.memory_space<vmem>>, vector<5x10xbf16>
    %cst_220 = arith.constant dense<0.000000e+00> : vector<5x160xf32>
    %234 = tpu.matmul %233, %232, %cst_220 {dimension_numbers = #tpu.dot_dimension_numbers<[1], [0], [0], [1], [0, 0, 1, 1], [], []>} : vector<5x10xbf16>, vector<10x160xbf16>, vector<5x160xf32> -> vector<5x160xf32>
    %235 = arith.truncf %234 : vector<5x160xf32> to vector<5x160xbf16>
    %c0_221 = arith.constant 0 : index
    %c0_222 = arith.constant 0 : index
    %236 = vector.load %arg9[%c0_221, %c0_222] : memref<160x80xbf16, #tpu.memory_space<vmem>>, vector<160x80xbf16>
    %cst_223 = arith.constant dense<0.000000e+00> : vector<5x80xf32>
    %237 = tpu.matmul %235, %236, %cst_223 {dimension_numbers = #tpu.dot_dimension_numbers<[1], [0], [0], [1], [0, 0, 1, 1], [], []>} : vector<5x160xbf16>, vector<160x80xbf16>, vector<5x80xf32> -> vector<5x80xf32>
    %c1_224 = arith.constant 1 : index
    %c0_225 = arith.constant 0 : index
    %c0_226 = arith.constant 0 : index
    %238 = vector.load %arg18[%c1_224, %c0_225, %c0_226] : memref<4x5x80xf32, #tpu.memory_space<vmem>>, vector<1x5x80xf32>
    %239 = vector.shape_cast %238 : vector<1x5x80xf32> to vector<5x80xf32>
    %240 = vector.shape_cast %237 : vector<5x80xf32> to vector<1x5x80xf32>
    tpu.vector_store %arg18[%c1_224, %c0_225, %c0_226], %240 {strides = array<i32>} : memref<4x5x80xf32, #tpu.memory_space<vmem>>, vector<1x5x80xf32>,
    %cst_227 = arith.constant 0.000000e+00 : f32
    %241 = vector.broadcast %cst_227 : f32 to vector<1x120xf32>
    %c1_228 = arith.constant 1 : index
    %c0_229 = arith.constant 0 : index
    %c0_230 = arith.constant 0 : index
    %242 = vector.load %arg18[%c1_228, %c0_229, %c0_230] : memref<4x5x80xf32, #tpu.memory_space<vmem>>, vector<1x1x80xf32>
    %243 = vector.shape_cast %242 : vector<1x1x80xf32> to vector<1x80xf32>
    %244 = arith.truncf %243 : vector<1x80xf32> to vector<1x80xbf16>
    %c0_231 = arith.constant 0 : index
    %c0_232 = arith.constant 0 : index
    %c0_233 = arith.constant 0 : index
    %245 = vector.load %arg10[%c0_231, %c0_232, %c0_233] : memref<5x80x120xbf16, #tpu.memory_space<vmem>>, vector<1x80x120xbf16>
    %246 = vector.shape_cast %245 : vector<1x80x120xbf16> to vector<80x120xbf16>
    %cst_234 = arith.constant dense<0.000000e+00> : vector<1x120xf32>
    %247 = tpu.matmul %244, %246, %cst_234 {dimension_numbers = #tpu.dot_dimension_numbers<[1], [0], [0], [1], [0, 0, 1, 1], [], []>} : vector<1x80xbf16>, vector<80x120xbf16>, vector<1x120xf32> -> vector<1x120xf32>
    %248 = arith.addf %241, %247 : vector<1x120xf32>
    %c1_235 = arith.constant 1 : index
    %c1_236 = arith.constant 1 : index
    %c0_237 = arith.constant 0 : index
    %249 = vector.load %arg18[%c1_235, %c1_236, %c0_237] : memref<4x5x80xf32, #tpu.memory_space<vmem>>, vector<1x1x80xf32>
    %250 = vector.shape_cast %249 : vector<1x1x80xf32> to vector<1x80xf32>
    %251 = arith.truncf %250 : vector<1x80xf32> to vector<1x80xbf16>
    %c1_238 = arith.constant 1 : index
    %c0_239 = arith.constant 0 : index
    %c0_240 = arith.constant 0 : index
    %252 = vector.load %arg10[%c1_238, %c0_239, %c0_240] : memref<5x80x120xbf16, #tpu.memory_space<vmem>>, vector<1x80x120xbf16>
    %253 = vector.shape_cast %252 : vector<1x80x120xbf16> to vector<80x120xbf16>
    %cst_241 = arith.constant dense<0.000000e+00> : vector<1x120xf32>
    %254 = tpu.matmul %251, %253, %cst_241 {dimension_numbers = #tpu.dot_dimension_numbers<[1], [0], [0], [1], [0, 0, 1, 1], [], []>} : vector<1x80xbf16>, vector<80x120xbf16>, vector<1x120xf32> -> vector<1x120xf32>
    %255 = arith.addf %248, %254 : vector<1x120xf32>
    %c1_242 = arith.constant 1 : index
    %c2_243 = arith.constant 2 : index
    %c0_244 = arith.constant 0 : index
    %256 = vector.load %arg18[%c1_242, %c2_243, %c0_244] : memref<4x5x80xf32, #tpu.memory_space<vmem>>, vector<1x1x80xf32>
    %257 = vector.shape_cast %256 : vector<1x1x80xf32> to vector<1x80xf32>
    %258 = arith.truncf %257 : vector<1x80xf32> to vector<1x80xbf16>
    %c2_245 = arith.constant 2 : index
    %c0_246 = arith.constant 0 : index
    %c0_247 = arith.constant 0 : index
    %259 = vector.load %arg10[%c2_245, %c0_246, %c0_247] : memref<5x80x120xbf16, #tpu.memory_space<vmem>>, vector<1x80x120xbf16>
    %260 = vector.shape_cast %259 : vector<1x80x120xbf16> to vector<80x120xbf16>
    %cst_248 = arith.constant dense<0.000000e+00> : vector<1x120xf32>
    %261 = tpu.matmul %258, %260, %cst_248 {dimension_numbers = #tpu.dot_dimension_numbers<[1], [0], [0], [1], [0, 0, 1, 1], [], []>} : vector<1x80xbf16>, vector<80x120xbf16>, vector<1x120xf32> -> vector<1x120xf32>
    %262 = arith.addf %255, %261 : vector<1x120xf32>
    %c1_249 = arith.constant 1 : index
    %c3_250 = arith.constant 3 : index
    %c0_251 = arith.constant 0 : index
    %263 = vector.load %arg18[%c1_249, %c3_250, %c0_251] : memref<4x5x80xf32, #tpu.memory_space<vmem>>, vector<1x1x80xf32>
    %264 = vector.shape_cast %263 : vector<1x1x80xf32> to vector<1x80xf32>
    %265 = arith.truncf %264 : vector<1x80xf32> to vector<1x80xbf16>
    %c3_252 = arith.constant 3 : index
    %c0_253 = arith.constant 0 : index
    %c0_254 = arith.constant 0 : index
    %266 = vector.load %arg10[%c3_252, %c0_253, %c0_254] : memref<5x80x120xbf16, #tpu.memory_space<vmem>>, vector<1x80x120xbf16>
    %267 = vector.shape_cast %266 : vector<1x80x120xbf16> to vector<80x120xbf16>
    %cst_255 = arith.constant dense<0.000000e+00> : vector<1x120xf32>
    %268 = tpu.matmul %265, %267, %cst_255 {dimension_numbers = #tpu.dot_dimension_numbers<[1], [0], [0], [1], [0, 0, 1, 1], [], []>} : vector<1x80xbf16>, vector<80x120xbf16>, vector<1x120xf32> -> vector<1x120xf32>
    %269 = arith.addf %262, %268 : vector<1x120xf32>
    %c1_256 = arith.constant 1 : index
    %c4_257 = arith.constant 4 : index
    %c0_258 = arith.constant 0 : index
    %270 = vector.load %arg18[%c1_256, %c4_257, %c0_258] : memref<4x5x80xf32, #tpu.memory_space<vmem>>, vector<1x1x80xf32>
    %271 = vector.shape_cast %270 : vector<1x1x80xf32> to vector<1x80xf32>
    %272 = arith.truncf %271 : vector<1x80xf32> to vector<1x80xbf16>
    %c4_259 = arith.constant 4 : index
    %c0_260 = arith.constant 0 : index
    %c0_261 = arith.constant 0 : index
    %273 = vector.load %arg10[%c4_259, %c0_260, %c0_261] : memref<5x80x120xbf16, #tpu.memory_space<vmem>>, vector<1x80x120xbf16>
    %274 = vector.shape_cast %273 : vector<1x80x120xbf16> to vector<80x120xbf16>
    %cst_262 = arith.constant dense<0.000000e+00> : vector<1x120xf32>
    %275 = tpu.matmul %272, %274, %cst_262 {dimension_numbers = #tpu.dot_dimension_numbers<[1], [0], [0], [1], [0, 0, 1, 1], [], []>} : vector<1x80xbf16>, vector<80x120xbf16>, vector<1x120xf32> -> vector<1x120xf32>
    %276 = arith.addf %269, %275 : vector<1x120xf32>
    %c0_263 = arith.constant 0 : index
    %c0_264 = arith.constant 0 : index
    %277 = vector.load %arg11[%c0_263, %c0_264] : memref<1x120xf32, #tpu.memory_space<vmem>>, vector<1x120xf32>
    %278 = arith.addf %276, %277 : vector<1x120xf32>
    %cst_265 = arith.constant 0.000000e+00 : f32
    %279 = vector.broadcast %cst_265 : f32 to vector<1x120xf32>
    %280 = arith.maximumf %278, %279 : vector<1x120xf32>
    %c1_266 = arith.constant 1 : index
    %c0_267 = arith.constant 0 : index
    %281 = vector.load %arg19[%c1_266, %c0_267] : memref<4x120xf32, #tpu.memory_space<vmem>>, vector<1x120xf32>
    tpu.vector_store %arg19[%c1_266, %c0_267], %280 {strides = array<i32>} : memref<4x120xf32, #tpu.memory_space<vmem>>, vector<1x120xf32>,
    %cst_268 = arith.constant 0.000000e+00 : f32
    %282 = vector.broadcast %cst_268 : f32 to vector<28x168xf32>
    %c2_269 = arith.constant 2 : index
    %c0_270 = arith.constant 0 : index
    %c0_271 = arith.constant 0 : index
    %283 = vector.load %arg1[%c2_269, %c0_270, %c0_271] : memref<4x32x96xf32, #tpu.memory_space<vmem>>, vector<1x28x96xf32>
    %284 = vector.shape_cast %283 : vector<1x28x96xf32> to vector<28x96xf32>
    %285 = arith.truncf %284 : vector<28x96xf32> to vector<28x96xbf16>
    %c0_272 = arith.constant 0 : index
    %c0_273 = arith.constant 0 : index
    %c0_274 = arith.constant 0 : index
    %286 = vector.load %arg2[%c0_272, %c0_273, %c0_274] : memref<5x96x168xbf16, #tpu.memory_space<vmem>>, vector<1x96x168xbf16>
    %287 = vector.shape_cast %286 : vector<1x96x168xbf16> to vector<96x168xbf16>
    %cst_275 = arith.constant dense<0.000000e+00> : vector<28x168xf32>
    %288 = tpu.matmul %285, %287, %cst_275 {dimension_numbers = #tpu.dot_dimension_numbers<[1], [0], [0], [1], [0, 0, 1, 1], [], []>} : vector<28x96xbf16>, vector<96x168xbf16>, vector<28x168xf32> -> vector<28x168xf32>
    %289 = arith.addf %282, %288 : vector<28x168xf32>
    %c2_276 = arith.constant 2 : index
    %c1_277 = arith.constant 1 : index
    %c0_278 = arith.constant 0 : index
    %290 = vector.load %arg1[%c2_276, %c1_277, %c0_278] : memref<4x32x96xf32, #tpu.memory_space<vmem>>, vector<1x28x96xf32>
    %291 = vector.shape_cast %290 : vector<1x28x96xf32> to vector<28x96xf32>
    %292 = arith.truncf %291 : vector<28x96xf32> to vector<28x96xbf16>
    %c1_279 = arith.constant 1 : index
    %c0_280 = arith.constant 0 : index
    %c0_281 = arith.constant 0 : index
    %293 = vector.load %arg2[%c1_279, %c0_280, %c0_281] : memref<5x96x168xbf16, #tpu.memory_space<vmem>>, vector<1x96x168xbf16>
    %294 = vector.shape_cast %293 : vector<1x96x168xbf16> to vector<96x168xbf16>
    %cst_282 = arith.constant dense<0.000000e+00> : vector<28x168xf32>
    %295 = tpu.matmul %292, %294, %cst_282 {dimension_numbers = #tpu.dot_dimension_numbers<[1], [0], [0], [1], [0, 0, 1, 1], [], []>} : vector<28x96xbf16>, vector<96x168xbf16>, vector<28x168xf32> -> vector<28x168xf32>
    %296 = arith.addf %289, %295 : vector<28x168xf32>
    %c2_283 = arith.constant 2 : index
    %c2_284 = arith.constant 2 : index
    %c0_285 = arith.constant 0 : index
    %297 = vector.load %arg1[%c2_283, %c2_284, %c0_285] : memref<4x32x96xf32, #tpu.memory_space<vmem>>, vector<1x28x96xf32>
    %298 = vector.shape_cast %297 : vector<1x28x96xf32> to vector<28x96xf32>
    %299 = arith.truncf %298 : vector<28x96xf32> to vector<28x96xbf16>
    %c2_286 = arith.constant 2 : index
    %c0_287 = arith.constant 0 : index
    %c0_288 = arith.constant 0 : index
    %300 = vector.load %arg2[%c2_286, %c0_287, %c0_288] : memref<5x96x168xbf16, #tpu.memory_space<vmem>>, vector<1x96x168xbf16>
    %301 = vector.shape_cast %300 : vector<1x96x168xbf16> to vector<96x168xbf16>
    %cst_289 = arith.constant dense<0.000000e+00> : vector<28x168xf32>
    %302 = tpu.matmul %299, %301, %cst_289 {dimension_numbers = #tpu.dot_dimension_numbers<[1], [0], [0], [1], [0, 0, 1, 1], [], []>} : vector<28x96xbf16>, vector<96x168xbf16>, vector<28x168xf32> -> vector<28x168xf32>
    %303 = arith.addf %296, %302 : vector<28x168xf32>
    %c2_290 = arith.constant 2 : index
    %c3_291 = arith.constant 3 : index
    %c0_292 = arith.constant 0 : index
    %304 = vector.load %arg1[%c2_290, %c3_291, %c0_292] : memref<4x32x96xf32, #tpu.memory_space<vmem>>, vector<1x28x96xf32>
    %305 = vector.shape_cast %304 : vector<1x28x96xf32> to vector<28x96xf32>
    %306 = arith.truncf %305 : vector<28x96xf32> to vector<28x96xbf16>
    %c3_293 = arith.constant 3 : index
    %c0_294 = arith.constant 0 : index
    %c0_295 = arith.constant 0 : index
    %307 = vector.load %arg2[%c3_293, %c0_294, %c0_295] : memref<5x96x168xbf16, #tpu.memory_space<vmem>>, vector<1x96x168xbf16>
    %308 = vector.shape_cast %307 : vector<1x96x168xbf16> to vector<96x168xbf16>
    %cst_296 = arith.constant dense<0.000000e+00> : vector<28x168xf32>
    %309 = tpu.matmul %306, %308, %cst_296 {dimension_numbers = #tpu.dot_dimension_numbers<[1], [0], [0], [1], [0, 0, 1, 1], [], []>} : vector<28x96xbf16>, vector<96x168xbf16>, vector<28x168xf32> -> vector<28x168xf32>
    %310 = arith.addf %303, %309 : vector<28x168xf32>
    %c2_297 = arith.constant 2 : index
    %c4_298 = arith.constant 4 : index
    %c0_299 = arith.constant 0 : index
    %311 = vector.load %arg1[%c2_297, %c4_298, %c0_299] : memref<4x32x96xf32, #tpu.memory_space<vmem>>, vector<1x28x96xf32>
    %312 = vector.shape_cast %311 : vector<1x28x96xf32> to vector<28x96xf32>
    %313 = arith.truncf %312 : vector<28x96xf32> to vector<28x96xbf16>
    %c4_300 = arith.constant 4 : index
    %c0_301 = arith.constant 0 : index
    %c0_302 = arith.constant 0 : index
    %314 = vector.load %arg2[%c4_300, %c0_301, %c0_302] : memref<5x96x168xbf16, #tpu.memory_space<vmem>>, vector<1x96x168xbf16>
    %315 = vector.shape_cast %314 : vector<1x96x168xbf16> to vector<96x168xbf16>
    %cst_303 = arith.constant dense<0.000000e+00> : vector<28x168xf32>
    %316 = tpu.matmul %313, %315, %cst_303 {dimension_numbers = #tpu.dot_dimension_numbers<[1], [0], [0], [1], [0, 0, 1, 1], [], []>} : vector<28x96xbf16>, vector<96x168xbf16>, vector<28x168xf32> -> vector<28x168xf32>
    %317 = arith.addf %310, %316 : vector<28x168xf32>
    %c0_304 = arith.constant 0 : index
    %c0_305 = arith.constant 0 : index
    %318 = vector.load %arg3[%c0_304, %c0_305] : memref<1x168xf32, #tpu.memory_space<vmem>>, vector<1x168xf32>
    %319 = vector.broadcast %318 : vector<1x168xf32> to vector<28x168xf32>
    %320 = arith.addf %317, %319 : vector<28x168xf32>
    %cst_306 = arith.constant 0.000000e+00 : f32
    %321 = vector.broadcast %cst_306 : f32 to vector<28x168xf32>
    %322 = arith.maximumf %320, %321 : vector<28x168xf32>
    %323 = arith.truncf %322 : vector<28x168xf32> to vector<28x168xbf16>
    %c0_307 = arith.constant 0 : index
    %c0_308 = arith.constant 0 : index
    %324 = vector.load %arg4[%c0_307, %c0_308] : memref<14x28xbf16, #tpu.memory_space<vmem>>, vector<14x28xbf16>
    %cst_309 = arith.constant dense<0.000000e+00> : vector<14x168xf32>
    %325 = tpu.matmul %324, %323, %cst_309 {dimension_numbers = #tpu.dot_dimension_numbers<[1], [0], [0], [1], [0, 0, 1, 1], [], []>} : vector<14x28xbf16>, vector<28x168xbf16>, vector<14x168xf32> -> vector<14x168xf32>
    %326 = arith.truncf %325 : vector<14x168xf32> to vector<14x168xbf16>
    %c0_310 = arith.constant 0 : index
    %c0_311 = arith.constant 0 : index
    %327 = vector.load %arg5[%c0_310, %c0_311] : memref<168x84xbf16, #tpu.memory_space<vmem>>, vector<168x84xbf16>
    %cst_312 = arith.constant dense<0.000000e+00> : vector<14x84xf32>
    %328 = tpu.matmul %326, %327, %cst_312 {dimension_numbers = #tpu.dot_dimension_numbers<[1], [0], [0], [1], [0, 0, 1, 1], [], []>} : vector<14x168xbf16>, vector<168x84xbf16>, vector<14x84xf32> -> vector<14x84xf32>
    %c2_313 = arith.constant 2 : index
    %c0_314 = arith.constant 0 : index
    %c0_315 = arith.constant 0 : index
    %329 = vector.load %arg17[%c2_313, %c0_314, %c0_315] : memref<4x14x84xf32, #tpu.memory_space<vmem>>, vector<1x14x84xf32>
    %330 = vector.shape_cast %329 : vector<1x14x84xf32> to vector<14x84xf32>
    %331 = vector.shape_cast %328 : vector<14x84xf32> to vector<1x14x84xf32>
    tpu.vector_store %arg17[%c2_313, %c0_314, %c0_315], %331 {strides = array<i32>} : memref<4x14x84xf32, #tpu.memory_space<vmem>>, vector<1x14x84xf32>,
    %cst_316 = arith.constant 0.000000e+00 : f32
    %332 = vector.broadcast %cst_316 : f32 to vector<10x160xf32>
    %c2_317 = arith.constant 2 : index
    %c0_318 = arith.constant 0 : index
    %c0_319 = arith.constant 0 : index
    %333 = vector.load %arg17[%c2_317, %c0_318, %c0_319] : memref<4x14x84xf32, #tpu.memory_space<vmem>>, vector<1x10x84xf32>
    %334 = vector.shape_cast %333 : vector<1x10x84xf32> to vector<10x84xf32>
    %335 = arith.truncf %334 : vector<10x84xf32> to vector<10x84xbf16>
    %c0_320 = arith.constant 0 : index
    %c0_321 = arith.constant 0 : index
    %c0_322 = arith.constant 0 : index
    %336 = vector.load %arg6[%c0_320, %c0_321, %c0_322] : memref<5x84x160xbf16, #tpu.memory_space<vmem>>, vector<1x84x160xbf16>
    %337 = vector.shape_cast %336 : vector<1x84x160xbf16> to vector<84x160xbf16>
    %cst_323 = arith.constant dense<0.000000e+00> : vector<10x160xf32>
    %338 = tpu.matmul %335, %337, %cst_323 {dimension_numbers = #tpu.dot_dimension_numbers<[1], [0], [0], [1], [0, 0, 1, 1], [], []>} : vector<10x84xbf16>, vector<84x160xbf16>, vector<10x160xf32> -> vector<10x160xf32>
    %339 = arith.addf %332, %338 : vector<10x160xf32>
    %c2_324 = arith.constant 2 : index
    %c1_325 = arith.constant 1 : index
    %c0_326 = arith.constant 0 : index
    %340 = vector.load %arg17[%c2_324, %c1_325, %c0_326] : memref<4x14x84xf32, #tpu.memory_space<vmem>>, vector<1x10x84xf32>
    %341 = vector.shape_cast %340 : vector<1x10x84xf32> to vector<10x84xf32>
    %342 = arith.truncf %341 : vector<10x84xf32> to vector<10x84xbf16>
    %c1_327 = arith.constant 1 : index
    %c0_328 = arith.constant 0 : index
    %c0_329 = arith.constant 0 : index
    %343 = vector.load %arg6[%c1_327, %c0_328, %c0_329] : memref<5x84x160xbf16, #tpu.memory_space<vmem>>, vector<1x84x160xbf16>
    %344 = vector.shape_cast %343 : vector<1x84x160xbf16> to vector<84x160xbf16>
    %cst_330 = arith.constant dense<0.000000e+00> : vector<10x160xf32>
    %345 = tpu.matmul %342, %344, %cst_330 {dimension_numbers = #tpu.dot_dimension_numbers<[1], [0], [0], [1], [0, 0, 1, 1], [], []>} : vector<10x84xbf16>, vector<84x160xbf16>, vector<10x160xf32> -> vector<10x160xf32>
    %346 = arith.addf %339, %345 : vector<10x160xf32>
    %c2_331 = arith.constant 2 : index
    %c2_332 = arith.constant 2 : index
    %c0_333 = arith.constant 0 : index
    %347 = vector.load %arg17[%c2_331, %c2_332, %c0_333] : memref<4x14x84xf32, #tpu.memory_space<vmem>>, vector<1x10x84xf32>
    %348 = vector.shape_cast %347 : vector<1x10x84xf32> to vector<10x84xf32>
    %349 = arith.truncf %348 : vector<10x84xf32> to vector<10x84xbf16>
    %c2_334 = arith.constant 2 : index
    %c0_335 = arith.constant 0 : index
    %c0_336 = arith.constant 0 : index
    %350 = vector.load %arg6[%c2_334, %c0_335, %c0_336] : memref<5x84x160xbf16, #tpu.memory_space<vmem>>, vector<1x84x160xbf16>
    %351 = vector.shape_cast %350 : vector<1x84x160xbf16> to vector<84x160xbf16>
    %cst_337 = arith.constant dense<0.000000e+00> : vector<10x160xf32>
    %352 = tpu.matmul %349, %351, %cst_337 {dimension_numbers = #tpu.dot_dimension_numbers<[1], [0], [0], [1], [0, 0, 1, 1], [], []>} : vector<10x84xbf16>, vector<84x160xbf16>, vector<10x160xf32> -> vector<10x160xf32>
    %353 = arith.addf %346, %352 : vector<10x160xf32>
    %c2_338 = arith.constant 2 : index
    %c3_339 = arith.constant 3 : index
    %c0_340 = arith.constant 0 : index
    %354 = vector.load %arg17[%c2_338, %c3_339, %c0_340] : memref<4x14x84xf32, #tpu.memory_space<vmem>>, vector<1x10x84xf32>
    %355 = vector.shape_cast %354 : vector<1x10x84xf32> to vector<10x84xf32>
    %356 = arith.truncf %355 : vector<10x84xf32> to vector<10x84xbf16>
    %c3_341 = arith.constant 3 : index
    %c0_342 = arith.constant 0 : index
    %c0_343 = arith.constant 0 : index
    %357 = vector.load %arg6[%c3_341, %c0_342, %c0_343] : memref<5x84x160xbf16, #tpu.memory_space<vmem>>, vector<1x84x160xbf16>
    %358 = vector.shape_cast %357 : vector<1x84x160xbf16> to vector<84x160xbf16>
    %cst_344 = arith.constant dense<0.000000e+00> : vector<10x160xf32>
    %359 = tpu.matmul %356, %358, %cst_344 {dimension_numbers = #tpu.dot_dimension_numbers<[1], [0], [0], [1], [0, 0, 1, 1], [], []>} : vector<10x84xbf16>, vector<84x160xbf16>, vector<10x160xf32> -> vector<10x160xf32>
    %360 = arith.addf %353, %359 : vector<10x160xf32>
    %c2_345 = arith.constant 2 : index
    %c4_346 = arith.constant 4 : index
    %c0_347 = arith.constant 0 : index
    %361 = vector.load %arg17[%c2_345, %c4_346, %c0_347] : memref<4x14x84xf32, #tpu.memory_space<vmem>>, vector<1x10x84xf32>
    %362 = vector.shape_cast %361 : vector<1x10x84xf32> to vector<10x84xf32>
    %363 = arith.truncf %362 : vector<10x84xf32> to vector<10x84xbf16>
    %c4_348 = arith.constant 4 : index
    %c0_349 = arith.constant 0 : index
    %c0_350 = arith.constant 0 : index
    %364 = vector.load %arg6[%c4_348, %c0_349, %c0_350] : memref<5x84x160xbf16, #tpu.memory_space<vmem>>, vector<1x84x160xbf16>
    %365 = vector.shape_cast %364 : vector<1x84x160xbf16> to vector<84x160xbf16>
    %cst_351 = arith.constant dense<0.000000e+00> : vector<10x160xf32>
    %366 = tpu.matmul %363, %365, %cst_351 {dimension_numbers = #tpu.dot_dimension_numbers<[1], [0], [0], [1], [0, 0, 1, 1], [], []>} : vector<10x84xbf16>, vector<84x160xbf16>, vector<10x160xf32> -> vector<10x160xf32>
    %367 = arith.addf %360, %366 : vector<10x160xf32>
    %c0_352 = arith.constant 0 : index
    %c0_353 = arith.constant 0 : index
    %368 = vector.load %arg7[%c0_352, %c0_353] : memref<1x160xf32, #tpu.memory_space<vmem>>, vector<1x160xf32>
    %369 = vector.broadcast %368 : vector<1x160xf32> to vector<10x160xf32>
    %370 = arith.addf %367, %369 : vector<10x160xf32>
    %cst_354 = arith.constant 0.000000e+00 : f32
    %371 = vector.broadcast %cst_354 : f32 to vector<10x160xf32>
    %372 = arith.maximumf %370, %371 : vector<10x160xf32>
    %373 = arith.truncf %372 : vector<10x160xf32> to vector<10x160xbf16>
    %c0_355 = arith.constant 0 : index
    %c0_356 = arith.constant 0 : index
    %374 = vector.load %arg8[%c0_355, %c0_356] : memref<5x10xbf16, #tpu.memory_space<vmem>>, vector<5x10xbf16>
    %cst_357 = arith.constant dense<0.000000e+00> : vector<5x160xf32>
    %375 = tpu.matmul %374, %373, %cst_357 {dimension_numbers = #tpu.dot_dimension_numbers<[1], [0], [0], [1], [0, 0, 1, 1], [], []>} : vector<5x10xbf16>, vector<10x160xbf16>, vector<5x160xf32> -> vector<5x160xf32>
    %376 = arith.truncf %375 : vector<5x160xf32> to vector<5x160xbf16>
    %c0_358 = arith.constant 0 : index
    %c0_359 = arith.constant 0 : index
    %377 = vector.load %arg9[%c0_358, %c0_359] : memref<160x80xbf16, #tpu.memory_space<vmem>>, vector<160x80xbf16>
    %cst_360 = arith.constant dense<0.000000e+00> : vector<5x80xf32>
    %378 = tpu.matmul %376, %377, %cst_360 {dimension_numbers = #tpu.dot_dimension_numbers<[1], [0], [0], [1], [0, 0, 1, 1], [], []>} : vector<5x160xbf16>, vector<160x80xbf16>, vector<5x80xf32> -> vector<5x80xf32>
    %c2_361 = arith.constant 2 : index
    %c0_362 = arith.constant 0 : index
    %c0_363 = arith.constant 0 : index
    %379 = vector.load %arg18[%c2_361, %c0_362, %c0_363] : memref<4x5x80xf32, #tpu.memory_space<vmem>>, vector<1x5x80xf32>
    %380 = vector.shape_cast %379 : vector<1x5x80xf32> to vector<5x80xf32>
    %381 = vector.shape_cast %378 : vector<5x80xf32> to vector<1x5x80xf32>
    tpu.vector_store %arg18[%c2_361, %c0_362, %c0_363], %381 {strides = array<i32>} : memref<4x5x80xf32, #tpu.memory_space<vmem>>, vector<1x5x80xf32>,
    %cst_364 = arith.constant 0.000000e+00 : f32
    %382 = vector.broadcast %cst_364 : f32 to vector<1x120xf32>
    %c2_365 = arith.constant 2 : index
    %c0_366 = arith.constant 0 : index
    %c0_367 = arith.constant 0 : index
    %383 = vector.load %arg18[%c2_365, %c0_366, %c0_367] : memref<4x5x80xf32, #tpu.memory_space<vmem>>, vector<1x1x80xf32>
    %384 = vector.shape_cast %383 : vector<1x1x80xf32> to vector<1x80xf32>
    %385 = arith.truncf %384 : vector<1x80xf32> to vector<1x80xbf16>
    %c0_368 = arith.constant 0 : index
    %c0_369 = arith.constant 0 : index
    %c0_370 = arith.constant 0 : index
    %386 = vector.load %arg10[%c0_368, %c0_369, %c0_370] : memref<5x80x120xbf16, #tpu.memory_space<vmem>>, vector<1x80x120xbf16>
    %387 = vector.shape_cast %386 : vector<1x80x120xbf16> to vector<80x120xbf16>
    %cst_371 = arith.constant dense<0.000000e+00> : vector<1x120xf32>
    %388 = tpu.matmul %385, %387, %cst_371 {dimension_numbers = #tpu.dot_dimension_numbers<[1], [0], [0], [1], [0, 0, 1, 1], [], []>} : vector<1x80xbf16>, vector<80x120xbf16>, vector<1x120xf32> -> vector<1x120xf32>
    %389 = arith.addf %382, %388 : vector<1x120xf32>
    %c2_372 = arith.constant 2 : index
    %c1_373 = arith.constant 1 : index
    %c0_374 = arith.constant 0 : index
    %390 = vector.load %arg18[%c2_372, %c1_373, %c0_374] : memref<4x5x80xf32, #tpu.memory_space<vmem>>, vector<1x1x80xf32>
    %391 = vector.shape_cast %390 : vector<1x1x80xf32> to vector<1x80xf32>
    %392 = arith.truncf %391 : vector<1x80xf32> to vector<1x80xbf16>
    %c1_375 = arith.constant 1 : index
    %c0_376 = arith.constant 0 : index
    %c0_377 = arith.constant 0 : index
    %393 = vector.load %arg10[%c1_375, %c0_376, %c0_377] : memref<5x80x120xbf16, #tpu.memory_space<vmem>>, vector<1x80x120xbf16>
    %394 = vector.shape_cast %393 : vector<1x80x120xbf16> to vector<80x120xbf16>
    %cst_378 = arith.constant dense<0.000000e+00> : vector<1x120xf32>
    %395 = tpu.matmul %392, %394, %cst_378 {dimension_numbers = #tpu.dot_dimension_numbers<[1], [0], [0], [1], [0, 0, 1, 1], [], []>} : vector<1x80xbf16>, vector<80x120xbf16>, vector<1x120xf32> -> vector<1x120xf32>
    %396 = arith.addf %389, %395 : vector<1x120xf32>
    %c2_379 = arith.constant 2 : index
    %c2_380 = arith.constant 2 : index
    %c0_381 = arith.constant 0 : index
    %397 = vector.load %arg18[%c2_379, %c2_380, %c0_381] : memref<4x5x80xf32, #tpu.memory_space<vmem>>, vector<1x1x80xf32>
    %398 = vector.shape_cast %397 : vector<1x1x80xf32> to vector<1x80xf32>
    %399 = arith.truncf %398 : vector<1x80xf32> to vector<1x80xbf16>
    %c2_382 = arith.constant 2 : index
    %c0_383 = arith.constant 0 : index
    %c0_384 = arith.constant 0 : index
    %400 = vector.load %arg10[%c2_382, %c0_383, %c0_384] : memref<5x80x120xbf16, #tpu.memory_space<vmem>>, vector<1x80x120xbf16>
    %401 = vector.shape_cast %400 : vector<1x80x120xbf16> to vector<80x120xbf16>
    %cst_385 = arith.constant dense<0.000000e+00> : vector<1x120xf32>
    %402 = tpu.matmul %399, %401, %cst_385 {dimension_numbers = #tpu.dot_dimension_numbers<[1], [0], [0], [1], [0, 0, 1, 1], [], []>} : vector<1x80xbf16>, vector<80x120xbf16>, vector<1x120xf32> -> vector<1x120xf32>
    %403 = arith.addf %396, %402 : vector<1x120xf32>
    %c2_386 = arith.constant 2 : index
    %c3_387 = arith.constant 3 : index
    %c0_388 = arith.constant 0 : index
    %404 = vector.load %arg18[%c2_386, %c3_387, %c0_388] : memref<4x5x80xf32, #tpu.memory_space<vmem>>, vector<1x1x80xf32>
    %405 = vector.shape_cast %404 : vector<1x1x80xf32> to vector<1x80xf32>
    %406 = arith.truncf %405 : vector<1x80xf32> to vector<1x80xbf16>
    %c3_389 = arith.constant 3 : index
    %c0_390 = arith.constant 0 : index
    %c0_391 = arith.constant 0 : index
    %407 = vector.load %arg10[%c3_389, %c0_390, %c0_391] : memref<5x80x120xbf16, #tpu.memory_space<vmem>>, vector<1x80x120xbf16>
    %408 = vector.shape_cast %407 : vector<1x80x120xbf16> to vector<80x120xbf16>
    %cst_392 = arith.constant dense<0.000000e+00> : vector<1x120xf32>
    %409 = tpu.matmul %406, %408, %cst_392 {dimension_numbers = #tpu.dot_dimension_numbers<[1], [0], [0], [1], [0, 0, 1, 1], [], []>} : vector<1x80xbf16>, vector<80x120xbf16>, vector<1x120xf32> -> vector<1x120xf32>
    %410 = arith.addf %403, %409 : vector<1x120xf32>
    %c2_393 = arith.constant 2 : index
    %c4_394 = arith.constant 4 : index
    %c0_395 = arith.constant 0 : index
    %411 = vector.load %arg18[%c2_393, %c4_394, %c0_395] : memref<4x5x80xf32, #tpu.memory_space<vmem>>, vector<1x1x80xf32>
    %412 = vector.shape_cast %411 : vector<1x1x80xf32> to vector<1x80xf32>
    %413 = arith.truncf %412 : vector<1x80xf32> to vector<1x80xbf16>
    %c4_396 = arith.constant 4 : index
    %c0_397 = arith.constant 0 : index
    %c0_398 = arith.constant 0 : index
    %414 = vector.load %arg10[%c4_396, %c0_397, %c0_398] : memref<5x80x120xbf16, #tpu.memory_space<vmem>>, vector<1x80x120xbf16>
    %415 = vector.shape_cast %414 : vector<1x80x120xbf16> to vector<80x120xbf16>
    %cst_399 = arith.constant dense<0.000000e+00> : vector<1x120xf32>
    %416 = tpu.matmul %413, %415, %cst_399 {dimension_numbers = #tpu.dot_dimension_numbers<[1], [0], [0], [1], [0, 0, 1, 1], [], []>} : vector<1x80xbf16>, vector<80x120xbf16>, vector<1x120xf32> -> vector<1x120xf32>
    %417 = arith.addf %410, %416 : vector<1x120xf32>
    %c0_400 = arith.constant 0 : index
    %c0_401 = arith.constant 0 : index
    %418 = vector.load %arg11[%c0_400, %c0_401] : memref<1x120xf32, #tpu.memory_space<vmem>>, vector<1x120xf32>
    %419 = arith.addf %417, %418 : vector<1x120xf32>
    %cst_402 = arith.constant 0.000000e+00 : f32
    %420 = vector.broadcast %cst_402 : f32 to vector<1x120xf32>
    %421 = arith.maximumf %419, %420 : vector<1x120xf32>
    %c2_403 = arith.constant 2 : index
    %c0_404 = arith.constant 0 : index
    %422 = vector.load %arg19[%c2_403, %c0_404] : memref<4x120xf32, #tpu.memory_space<vmem>>, vector<1x120xf32>
    tpu.vector_store %arg19[%c2_403, %c0_404], %421 {strides = array<i32>} : memref<4x120xf32, #tpu.memory_space<vmem>>, vector<1x120xf32>,
    %cst_405 = arith.constant 0.000000e+00 : f32
    %423 = vector.broadcast %cst_405 : f32 to vector<28x168xf32>
    %c3_406 = arith.constant 3 : index
    %c0_407 = arith.constant 0 : index
    %c0_408 = arith.constant 0 : index
    %424 = vector.load %arg1[%c3_406, %c0_407, %c0_408] : memref<4x32x96xf32, #tpu.memory_space<vmem>>, vector<1x28x96xf32>
    %425 = vector.shape_cast %424 : vector<1x28x96xf32> to vector<28x96xf32>
    %426 = arith.truncf %425 : vector<28x96xf32> to vector<28x96xbf16>
    %c0_409 = arith.constant 0 : index
    %c0_410 = arith.constant 0 : index
    %c0_411 = arith.constant 0 : index
    %427 = vector.load %arg2[%c0_409, %c0_410, %c0_411] : memref<5x96x168xbf16, #tpu.memory_space<vmem>>, vector<1x96x168xbf16>
    %428 = vector.shape_cast %427 : vector<1x96x168xbf16> to vector<96x168xbf16>
    %cst_412 = arith.constant dense<0.000000e+00> : vector<28x168xf32>
    %429 = tpu.matmul %426, %428, %cst_412 {dimension_numbers = #tpu.dot_dimension_numbers<[1], [0], [0], [1], [0, 0, 1, 1], [], []>} : vector<28x96xbf16>, vector<96x168xbf16>, vector<28x168xf32> -> vector<28x168xf32>
    %430 = arith.addf %423, %429 : vector<28x168xf32>
    %c3_413 = arith.constant 3 : index
    %c1_414 = arith.constant 1 : index
    %c0_415 = arith.constant 0 : index
    %431 = vector.load %arg1[%c3_413, %c1_414, %c0_415] : memref<4x32x96xf32, #tpu.memory_space<vmem>>, vector<1x28x96xf32>
    %432 = vector.shape_cast %431 : vector<1x28x96xf32> to vector<28x96xf32>
    %433 = arith.truncf %432 : vector<28x96xf32> to vector<28x96xbf16>
    %c1_416 = arith.constant 1 : index
    %c0_417 = arith.constant 0 : index
    %c0_418 = arith.constant 0 : index
    %434 = vector.load %arg2[%c1_416, %c0_417, %c0_418] : memref<5x96x168xbf16, #tpu.memory_space<vmem>>, vector<1x96x168xbf16>
    %435 = vector.shape_cast %434 : vector<1x96x168xbf16> to vector<96x168xbf16>
    %cst_419 = arith.constant dense<0.000000e+00> : vector<28x168xf32>
    %436 = tpu.matmul %433, %435, %cst_419 {dimension_numbers = #tpu.dot_dimension_numbers<[1], [0], [0], [1], [0, 0, 1, 1], [], []>} : vector<28x96xbf16>, vector<96x168xbf16>, vector<28x168xf32> -> vector<28x168xf32>
    %437 = arith.addf %430, %436 : vector<28x168xf32>
    %c3_420 = arith.constant 3 : index
    %c2_421 = arith.constant 2 : index
    %c0_422 = arith.constant 0 : index
    %438 = vector.load %arg1[%c3_420, %c2_421, %c0_422] : memref<4x32x96xf32, #tpu.memory_space<vmem>>, vector<1x28x96xf32>
    %439 = vector.shape_cast %438 : vector<1x28x96xf32> to vector<28x96xf32>
    %440 = arith.truncf %439 : vector<28x96xf32> to vector<28x96xbf16>
    %c2_423 = arith.constant 2 : index
    %c0_424 = arith.constant 0 : index
    %c0_425 = arith.constant 0 : index
    %441 = vector.load %arg2[%c2_423, %c0_424, %c0_425] : memref<5x96x168xbf16, #tpu.memory_space<vmem>>, vector<1x96x168xbf16>
    %442 = vector.shape_cast %441 : vector<1x96x168xbf16> to vector<96x168xbf16>
    %cst_426 = arith.constant dense<0.000000e+00> : vector<28x168xf32>
    %443 = tpu.matmul %440, %442, %cst_426 {dimension_numbers = #tpu.dot_dimension_numbers<[1], [0], [0], [1], [0, 0, 1, 1], [], []>} : vector<28x96xbf16>, vector<96x168xbf16>, vector<28x168xf32> -> vector<28x168xf32>
    %444 = arith.addf %437, %443 : vector<28x168xf32>
    %c3_427 = arith.constant 3 : index
    %c3_428 = arith.constant 3 : index
    %c0_429 = arith.constant 0 : index
    %445 = vector.load %arg1[%c3_427, %c3_428, %c0_429] : memref<4x32x96xf32, #tpu.memory_space<vmem>>, vector<1x28x96xf32>
    %446 = vector.shape_cast %445 : vector<1x28x96xf32> to vector<28x96xf32>
    %447 = arith.truncf %446 : vector<28x96xf32> to vector<28x96xbf16>
    %c3_430 = arith.constant 3 : index
    %c0_431 = arith.constant 0 : index
    %c0_432 = arith.constant 0 : index
    %448 = vector.load %arg2[%c3_430, %c0_431, %c0_432] : memref<5x96x168xbf16, #tpu.memory_space<vmem>>, vector<1x96x168xbf16>
    %449 = vector.shape_cast %448 : vector<1x96x168xbf16> to vector<96x168xbf16>
    %cst_433 = arith.constant dense<0.000000e+00> : vector<28x168xf32>
    %450 = tpu.matmul %447, %449, %cst_433 {dimension_numbers = #tpu.dot_dimension_numbers<[1], [0], [0], [1], [0, 0, 1, 1], [], []>} : vector<28x96xbf16>, vector<96x168xbf16>, vector<28x168xf32> -> vector<28x168xf32>
    %451 = arith.addf %444, %450 : vector<28x168xf32>
    %c3_434 = arith.constant 3 : index
    %c4_435 = arith.constant 4 : index
    %c0_436 = arith.constant 0 : index
    %452 = vector.load %arg1[%c3_434, %c4_435, %c0_436] : memref<4x32x96xf32, #tpu.memory_space<vmem>>, vector<1x28x96xf32>
    %453 = vector.shape_cast %452 : vector<1x28x96xf32> to vector<28x96xf32>
    %454 = arith.truncf %453 : vector<28x96xf32> to vector<28x96xbf16>
    %c4_437 = arith.constant 4 : index
    %c0_438 = arith.constant 0 : index
    %c0_439 = arith.constant 0 : index
    %455 = vector.load %arg2[%c4_437, %c0_438, %c0_439] : memref<5x96x168xbf16, #tpu.memory_space<vmem>>, vector<1x96x168xbf16>
    %456 = vector.shape_cast %455 : vector<1x96x168xbf16> to vector<96x168xbf16>
    %cst_440 = arith.constant dense<0.000000e+00> : vector<28x168xf32>
    %457 = tpu.matmul %454, %456, %cst_440 {dimension_numbers = #tpu.dot_dimension_numbers<[1], [0], [0], [1], [0, 0, 1, 1], [], []>} : vector<28x96xbf16>, vector<96x168xbf16>, vector<28x168xf32> -> vector<28x168xf32>
    %458 = arith.addf %451, %457 : vector<28x168xf32>
    %c0_441 = arith.constant 0 : index
    %c0_442 = arith.constant 0 : index
    %459 = vector.load %arg3[%c0_441, %c0_442] : memref<1x168xf32, #tpu.memory_space<vmem>>, vector<1x168xf32>
    %460 = vector.broadcast %459 : vector<1x168xf32> to vector<28x168xf32>
    %461 = arith.addf %458, %460 : vector<28x168xf32>
    %cst_443 = arith.constant 0.000000e+00 : f32
    %462 = vector.broadcast %cst_443 : f32 to vector<28x168xf32>
    %463 = arith.maximumf %461, %462 : vector<28x168xf32>
    %464 = arith.truncf %463 : vector<28x168xf32> to vector<28x168xbf16>
    %c0_444 = arith.constant 0 : index
    %c0_445 = arith.constant 0 : index
    %465 = vector.load %arg4[%c0_444, %c0_445] : memref<14x28xbf16, #tpu.memory_space<vmem>>, vector<14x28xbf16>
    %cst_446 = arith.constant dense<0.000000e+00> : vector<14x168xf32>
    %466 = tpu.matmul %465, %464, %cst_446 {dimension_numbers = #tpu.dot_dimension_numbers<[1], [0], [0], [1], [0, 0, 1, 1], [], []>} : vector<14x28xbf16>, vector<28x168xbf16>, vector<14x168xf32> -> vector<14x168xf32>
    %467 = arith.truncf %466 : vector<14x168xf32> to vector<14x168xbf16>
    %c0_447 = arith.constant 0 : index
    %c0_448 = arith.constant 0 : index
    %468 = vector.load %arg5[%c0_447, %c0_448] : memref<168x84xbf16, #tpu.memory_space<vmem>>, vector<168x84xbf16>
    %cst_449 = arith.constant dense<0.000000e+00> : vector<14x84xf32>
    %469 = tpu.matmul %467, %468, %cst_449 {dimension_numbers = #tpu.dot_dimension_numbers<[1], [0], [0], [1], [0, 0, 1, 1], [], []>} : vector<14x168xbf16>, vector<168x84xbf16>, vector<14x84xf32> -> vector<14x84xf32>
    %c3_450 = arith.constant 3 : index
    %c0_451 = arith.constant 0 : index
    %c0_452 = arith.constant 0 : index
    %470 = vector.load %arg17[%c3_450, %c0_451, %c0_452] : memref<4x14x84xf32, #tpu.memory_space<vmem>>, vector<1x14x84xf32>
    %471 = vector.shape_cast %470 : vector<1x14x84xf32> to vector<14x84xf32>
    %472 = vector.shape_cast %469 : vector<14x84xf32> to vector<1x14x84xf32>
    tpu.vector_store %arg17[%c3_450, %c0_451, %c0_452], %472 {strides = array<i32>} : memref<4x14x84xf32, #tpu.memory_space<vmem>>, vector<1x14x84xf32>,
    %cst_453 = arith.constant 0.000000e+00 : f32
    %473 = vector.broadcast %cst_453 : f32 to vector<10x160xf32>
    %c3_454 = arith.constant 3 : index
    %c0_455 = arith.constant 0 : index
    %c0_456 = arith.constant 0 : index
    %474 = vector.load %arg17[%c3_454, %c0_455, %c0_456] : memref<4x14x84xf32, #tpu.memory_space<vmem>>, vector<1x10x84xf32>
    %475 = vector.shape_cast %474 : vector<1x10x84xf32> to vector<10x84xf32>
    %476 = arith.truncf %475 : vector<10x84xf32> to vector<10x84xbf16>
    %c0_457 = arith.constant 0 : index
    %c0_458 = arith.constant 0 : index
    %c0_459 = arith.constant 0 : index
    %477 = vector.load %arg6[%c0_457, %c0_458, %c0_459] : memref<5x84x160xbf16, #tpu.memory_space<vmem>>, vector<1x84x160xbf16>
    %478 = vector.shape_cast %477 : vector<1x84x160xbf16> to vector<84x160xbf16>
    %cst_460 = arith.constant dense<0.000000e+00> : vector<10x160xf32>
    %479 = tpu.matmul %476, %478, %cst_460 {dimension_numbers = #tpu.dot_dimension_numbers<[1], [0], [0], [1], [0, 0, 1, 1], [], []>} : vector<10x84xbf16>, vector<84x160xbf16>, vector<10x160xf32> -> vector<10x160xf32>
    %480 = arith.addf %473, %479 : vector<10x160xf32>
    %c3_461 = arith.constant 3 : index
    %c1_462 = arith.constant 1 : index
    %c0_463 = arith.constant 0 : index
    %481 = vector.load %arg17[%c3_461, %c1_462, %c0_463] : memref<4x14x84xf32, #tpu.memory_space<vmem>>, vector<1x10x84xf32>
    %482 = vector.shape_cast %481 : vector<1x10x84xf32> to vector<10x84xf32>
    %483 = arith.truncf %482 : vector<10x84xf32> to vector<10x84xbf16>
    %c1_464 = arith.constant 1 : index
    %c0_465 = arith.constant 0 : index
    %c0_466 = arith.constant 0 : index
    %484 = vector.load %arg6[%c1_464, %c0_465, %c0_466] : memref<5x84x160xbf16, #tpu.memory_space<vmem>>, vector<1x84x160xbf16>
    %485 = vector.shape_cast %484 : vector<1x84x160xbf16> to vector<84x160xbf16>
    %cst_467 = arith.constant dense<0.000000e+00> : vector<10x160xf32>
    %486 = tpu.matmul %483, %485, %cst_467 {dimension_numbers = #tpu.dot_dimension_numbers<[1], [0], [0], [1], [0, 0, 1, 1], [], []>} : vector<10x84xbf16>, vector<84x160xbf16>, vector<10x160xf32> -> vector<10x160xf32>
    %487 = arith.addf %480, %486 : vector<10x160xf32>
    %c3_468 = arith.constant 3 : index
    %c2_469 = arith.constant 2 : index
    %c0_470 = arith.constant 0 : index
    %488 = vector.load %arg17[%c3_468, %c2_469, %c0_470] : memref<4x14x84xf32, #tpu.memory_space<vmem>>, vector<1x10x84xf32>
    %489 = vector.shape_cast %488 : vector<1x10x84xf32> to vector<10x84xf32>
    %490 = arith.truncf %489 : vector<10x84xf32> to vector<10x84xbf16>
    %c2_471 = arith.constant 2 : index
    %c0_472 = arith.constant 0 : index
    %c0_473 = arith.constant 0 : index
    %491 = vector.load %arg6[%c2_471, %c0_472, %c0_473] : memref<5x84x160xbf16, #tpu.memory_space<vmem>>, vector<1x84x160xbf16>
    %492 = vector.shape_cast %491 : vector<1x84x160xbf16> to vector<84x160xbf16>
    %cst_474 = arith.constant dense<0.000000e+00> : vector<10x160xf32>
    %493 = tpu.matmul %490, %492, %cst_474 {dimension_numbers = #tpu.dot_dimension_numbers<[1], [0], [0], [1], [0, 0, 1, 1], [], []>} : vector<10x84xbf16>, vector<84x160xbf16>, vector<10x160xf32> -> vector<10x160xf32>
    %494 = arith.addf %487, %493 : vector<10x160xf32>
    %c3_475 = arith.constant 3 : index
    %c3_476 = arith.constant 3 : index
    %c0_477 = arith.constant 0 : index
    %495 = vector.load %arg17[%c3_475, %c3_476, %c0_477] : memref<4x14x84xf32, #tpu.memory_space<vmem>>, vector<1x10x84xf32>
    %496 = vector.shape_cast %495 : vector<1x10x84xf32> to vector<10x84xf32>
    %497 = arith.truncf %496 : vector<10x84xf32> to vector<10x84xbf16>
    %c3_478 = arith.constant 3 : index
    %c0_479 = arith.constant 0 : index
    %c0_480 = arith.constant 0 : index
    %498 = vector.load %arg6[%c3_478, %c0_479, %c0_480] : memref<5x84x160xbf16, #tpu.memory_space<vmem>>, vector<1x84x160xbf16>
    %499 = vector.shape_cast %498 : vector<1x84x160xbf16> to vector<84x160xbf16>
    %cst_481 = arith.constant dense<0.000000e+00> : vector<10x160xf32>
    %500 = tpu.matmul %497, %499, %cst_481 {dimension_numbers = #tpu.dot_dimension_numbers<[1], [0], [0], [1], [0, 0, 1, 1], [], []>} : vector<10x84xbf16>, vector<84x160xbf16>, vector<10x160xf32> -> vector<10x160xf32>
    %501 = arith.addf %494, %500 : vector<10x160xf32>
    %c3_482 = arith.constant 3 : index
    %c4_483 = arith.constant 4 : index
    %c0_484 = arith.constant 0 : index
    %502 = vector.load %arg17[%c3_482, %c4_483, %c0_484] : memref<4x14x84xf32, #tpu.memory_space<vmem>>, vector<1x10x84xf32>
    %503 = vector.shape_cast %502 : vector<1x10x84xf32> to vector<10x84xf32>
    %504 = arith.truncf %503 : vector<10x84xf32> to vector<10x84xbf16>
    %c4_485 = arith.constant 4 : index
    %c0_486 = arith.constant 0 : index
    %c0_487 = arith.constant 0 : index
    %505 = vector.load %arg6[%c4_485, %c0_486, %c0_487] : memref<5x84x160xbf16, #tpu.memory_space<vmem>>, vector<1x84x160xbf16>
    %506 = vector.shape_cast %505 : vector<1x84x160xbf16> to vector<84x160xbf16>
    %cst_488 = arith.constant dense<0.000000e+00> : vector<10x160xf32>
    %507 = tpu.matmul %504, %506, %cst_488 {dimension_numbers = #tpu.dot_dimension_numbers<[1], [0], [0], [1], [0, 0, 1, 1], [], []>} : vector<10x84xbf16>, vector<84x160xbf16>, vector<10x160xf32> -> vector<10x160xf32>
    %508 = arith.addf %501, %507 : vector<10x160xf32>
    %c0_489 = arith.constant 0 : index
    %c0_490 = arith.constant 0 : index
    %509 = vector.load %arg7[%c0_489, %c0_490] : memref<1x160xf32, #tpu.memory_space<vmem>>, vector<1x160xf32>
    %510 = vector.broadcast %509 : vector<1x160xf32> to vector<10x160xf32>
    %511 = arith.addf %508, %510 : vector<10x160xf32>
    %cst_491 = arith.constant 0.000000e+00 : f32
    %512 = vector.broadcast %cst_491 : f32 to vector<10x160xf32>
    %513 = arith.maximumf %511, %512 : vector<10x160xf32>
    %514 = arith.truncf %513 : vector<10x160xf32> to vector<10x160xbf16>
    %c0_492 = arith.constant 0 : index
    %c0_493 = arith.constant 0 : index
    %515 = vector.load %arg8[%c0_492, %c0_493] : memref<5x10xbf16, #tpu.memory_space<vmem>>, vector<5x10xbf16>
    %cst_494 = arith.constant dense<0.000000e+00> : vector<5x160xf32>
    %516 = tpu.matmul %515, %514, %cst_494 {dimension_numbers = #tpu.dot_dimension_numbers<[1], [0], [0], [1], [0, 0, 1, 1], [], []>} : vector<5x10xbf16>, vector<10x160xbf16>, vector<5x160xf32> -> vector<5x160xf32>
    %517 = arith.truncf %516 : vector<5x160xf32> to vector<5x160xbf16>
    %c0_495 = arith.constant 0 : index
    %c0_496 = arith.constant 0 : index
    %518 = vector.load %arg9[%c0_495, %c0_496] : memref<160x80xbf16, #tpu.memory_space<vmem>>, vector<160x80xbf16>
    %cst_497 = arith.constant dense<0.000000e+00> : vector<5x80xf32>
    %519 = tpu.matmul %517, %518, %cst_497 {dimension_numbers = #tpu.dot_dimension_numbers<[1], [0], [0], [1], [0, 0, 1, 1], [], []>} : vector<5x160xbf16>, vector<160x80xbf16>, vector<5x80xf32> -> vector<5x80xf32>
    %c3_498 = arith.constant 3 : index
    %c0_499 = arith.constant 0 : index
    %c0_500 = arith.constant 0 : index
    %520 = vector.load %arg18[%c3_498, %c0_499, %c0_500] : memref<4x5x80xf32, #tpu.memory_space<vmem>>, vector<1x5x80xf32>
    %521 = vector.shape_cast %520 : vector<1x5x80xf32> to vector<5x80xf32>
    %522 = vector.shape_cast %519 : vector<5x80xf32> to vector<1x5x80xf32>
    tpu.vector_store %arg18[%c3_498, %c0_499, %c0_500], %522 {strides = array<i32>} : memref<4x5x80xf32, #tpu.memory_space<vmem>>, vector<1x5x80xf32>,
    %cst_501 = arith.constant 0.000000e+00 : f32
    %523 = vector.broadcast %cst_501 : f32 to vector<1x120xf32>
    %c3_502 = arith.constant 3 : index
    %c0_503 = arith.constant 0 : index
    %c0_504 = arith.constant 0 : index
    %524 = vector.load %arg18[%c3_502, %c0_503, %c0_504] : memref<4x5x80xf32, #tpu.memory_space<vmem>>, vector<1x1x80xf32>
    %525 = vector.shape_cast %524 : vector<1x1x80xf32> to vector<1x80xf32>
    %526 = arith.truncf %525 : vector<1x80xf32> to vector<1x80xbf16>
    %c0_505 = arith.constant 0 : index
    %c0_506 = arith.constant 0 : index
    %c0_507 = arith.constant 0 : index
    %527 = vector.load %arg10[%c0_505, %c0_506, %c0_507] : memref<5x80x120xbf16, #tpu.memory_space<vmem>>, vector<1x80x120xbf16>
    %528 = vector.shape_cast %527 : vector<1x80x120xbf16> to vector<80x120xbf16>
    %cst_508 = arith.constant dense<0.000000e+00> : vector<1x120xf32>
    %529 = tpu.matmul %526, %528, %cst_508 {dimension_numbers = #tpu.dot_dimension_numbers<[1], [0], [0], [1], [0, 0, 1, 1], [], []>} : vector<1x80xbf16>, vector<80x120xbf16>, vector<1x120xf32> -> vector<1x120xf32>
    %530 = arith.addf %523, %529 : vector<1x120xf32>
    %c3_509 = arith.constant 3 : index
    %c1_510 = arith.constant 1 : index
    %c0_511 = arith.constant 0 : index
    %531 = vector.load %arg18[%c3_509, %c1_510, %c0_511] : memref<4x5x80xf32, #tpu.memory_space<vmem>>, vector<1x1x80xf32>
    %532 = vector.shape_cast %531 : vector<1x1x80xf32> to vector<1x80xf32>
    %533 = arith.truncf %532 : vector<1x80xf32> to vector<1x80xbf16>
    %c1_512 = arith.constant 1 : index
    %c0_513 = arith.constant 0 : index
    %c0_514 = arith.constant 0 : index
    %534 = vector.load %arg10[%c1_512, %c0_513, %c0_514] : memref<5x80x120xbf16, #tpu.memory_space<vmem>>, vector<1x80x120xbf16>
    %535 = vector.shape_cast %534 : vector<1x80x120xbf16> to vector<80x120xbf16>
    %cst_515 = arith.constant dense<0.000000e+00> : vector<1x120xf32>
    %536 = tpu.matmul %533, %535, %cst_515 {dimension_numbers = #tpu.dot_dimension_numbers<[1], [0], [0], [1], [0, 0, 1, 1], [], []>} : vector<1x80xbf16>, vector<80x120xbf16>, vector<1x120xf32> -> vector<1x120xf32>
    %537 = arith.addf %530, %536 : vector<1x120xf32>
    %c3_516 = arith.constant 3 : index
    %c2_517 = arith.constant 2 : index
    %c0_518 = arith.constant 0 : index
    %538 = vector.load %arg18[%c3_516, %c2_517, %c0_518] : memref<4x5x80xf32, #tpu.memory_space<vmem>>, vector<1x1x80xf32>
    %539 = vector.shape_cast %538 : vector<1x1x80xf32> to vector<1x80xf32>
    %540 = arith.truncf %539 : vector<1x80xf32> to vector<1x80xbf16>
    %c2_519 = arith.constant 2 : index
    %c0_520 = arith.constant 0 : index
    %c0_521 = arith.constant 0 : index
    %541 = vector.load %arg10[%c2_519, %c0_520, %c0_521] : memref<5x80x120xbf16, #tpu.memory_space<vmem>>, vector<1x80x120xbf16>
    %542 = vector.shape_cast %541 : vector<1x80x120xbf16> to vector<80x120xbf16>
    %cst_522 = arith.constant dense<0.000000e+00> : vector<1x120xf32>
    %543 = tpu.matmul %540, %542, %cst_522 {dimension_numbers = #tpu.dot_dimension_numbers<[1], [0], [0], [1], [0, 0, 1, 1], [], []>} : vector<1x80xbf16>, vector<80x120xbf16>, vector<1x120xf32> -> vector<1x120xf32>
    %544 = arith.addf %537, %543 : vector<1x120xf32>
    %c3_523 = arith.constant 3 : index
    %c3_524 = arith.constant 3 : index
    %c0_525 = arith.constant 0 : index
    %545 = vector.load %arg18[%c3_523, %c3_524, %c0_525] : memref<4x5x80xf32, #tpu.memory_space<vmem>>, vector<1x1x80xf32>
    %546 = vector.shape_cast %545 : vector<1x1x80xf32> to vector<1x80xf32>
    %547 = arith.truncf %546 : vector<1x80xf32> to vector<1x80xbf16>
    %c3_526 = arith.constant 3 : index
    %c0_527 = arith.constant 0 : index
    %c0_528 = arith.constant 0 : index
    %548 = vector.load %arg10[%c3_526, %c0_527, %c0_528] : memref<5x80x120xbf16, #tpu.memory_space<vmem>>, vector<1x80x120xbf16>
    %549 = vector.shape_cast %548 : vector<1x80x120xbf16> to vector<80x120xbf16>
    %cst_529 = arith.constant dense<0.000000e+00> : vector<1x120xf32>
    %550 = tpu.matmul %547, %549, %cst_529 {dimension_numbers = #tpu.dot_dimension_numbers<[1], [0], [0], [1], [0, 0, 1, 1], [], []>} : vector<1x80xbf16>, vector<80x120xbf16>, vector<1x120xf32> -> vector<1x120xf32>
    %551 = arith.addf %544, %550 : vector<1x120xf32>
    %c3_530 = arith.constant 3 : index
    %c4_531 = arith.constant 4 : index
    %c0_532 = arith.constant 0 : index
    %552 = vector.load %arg18[%c3_530, %c4_531, %c0_532] : memref<4x5x80xf32, #tpu.memory_space<vmem>>, vector<1x1x80xf32>
    %553 = vector.shape_cast %552 : vector<1x1x80xf32> to vector<1x80xf32>
    %554 = arith.truncf %553 : vector<1x80xf32> to vector<1x80xbf16>
    %c4_533 = arith.constant 4 : index
    %c0_534 = arith.constant 0 : index
    %c0_535 = arith.constant 0 : index
    %555 = vector.load %arg10[%c4_533, %c0_534, %c0_535] : memref<5x80x120xbf16, #tpu.memory_space<vmem>>, vector<1x80x120xbf16>
    %556 = vector.shape_cast %555 : vector<1x80x120xbf16> to vector<80x120xbf16>
    %cst_536 = arith.constant dense<0.000000e+00> : vector<1x120xf32>
    %557 = tpu.matmul %554, %556, %cst_536 {dimension_numbers = #tpu.dot_dimension_numbers<[1], [0], [0], [1], [0, 0, 1, 1], [], []>} : vector<1x80xbf16>, vector<80x120xbf16>, vector<1x120xf32> -> vector<1x120xf32>
    %558 = arith.addf %551, %557 : vector<1x120xf32>
    %c0_537 = arith.constant 0 : index
    %c0_538 = arith.constant 0 : index
    %559 = vector.load %arg11[%c0_537, %c0_538] : memref<1x120xf32, #tpu.memory_space<vmem>>, vector<1x120xf32>
    %560 = arith.addf %558, %559 : vector<1x120xf32>
    %cst_539 = arith.constant 0.000000e+00 : f32
    %561 = vector.broadcast %cst_539 : f32 to vector<1x120xf32>
    %562 = arith.maximumf %560, %561 : vector<1x120xf32>
    %c3_540 = arith.constant 3 : index
    %c0_541 = arith.constant 0 : index
    %563 = vector.load %arg19[%c3_540, %c0_541] : memref<4x120xf32, #tpu.memory_space<vmem>>, vector<1x120xf32>
    tpu.vector_store %arg19[%c3_540, %c0_541], %562 {strides = array<i32>} : memref<4x120xf32, #tpu.memory_space<vmem>>, vector<1x120xf32>,
    %c0_542 = arith.constant 0 : index
    %c0_543 = arith.constant 0 : index
    %564 = vector.load %arg19[%c0_542, %c0_543] : memref<4x120xf32, #tpu.memory_space<vmem>>, vector<4x120xf32>
    %565 = arith.truncf %564 : vector<4x120xf32> to vector<4x120xbf16>
    %c0_544 = arith.constant 0 : index
    %c0_545 = arith.constant 0 : index
    %566 = vector.load %arg12[%c0_544, %c0_545] : memref<120x84xbf16, #tpu.memory_space<vmem>>, vector<120x84xbf16>
    %cst_546 = arith.constant dense<0.000000e+00> : vector<4x84xf32>
    %567 = tpu.matmul %565, %566, %cst_546 {dimension_numbers = #tpu.dot_dimension_numbers<[1], [0], [0], [1], [0, 0, 1, 1], [], []>} : vector<4x120xbf16>, vector<120x84xbf16>, vector<4x84xf32> -> vector<4x84xf32>
    %c0_547 = arith.constant 0 : index
    %c0_548 = arith.constant 0 : index
    %568 = vector.load %arg13[%c0_547, %c0_548] : memref<1x84xf32, #tpu.memory_space<vmem>>, vector<1x84xf32>
    %569 = vector.broadcast %568 : vector<1x84xf32> to vector<4x84xf32>
    %570 = arith.addf %567, %569 : vector<4x84xf32>
    %cst_549 = arith.constant 0.000000e+00 : f32
    %571 = vector.broadcast %cst_549 : f32 to vector<4x84xf32>
    %572 = arith.maximumf %570, %571 : vector<4x84xf32>
    %573 = arith.truncf %572 : vector<4x84xf32> to vector<4x84xbf16>
    %c0_550 = arith.constant 0 : index
    %c0_551 = arith.constant 0 : index
    %574 = vector.load %arg14[%c0_550, %c0_551] : memref<84x10xbf16, #tpu.memory_space<vmem>>, vector<84x10xbf16>
    %cst_552 = arith.constant dense<0.000000e+00> : vector<4x10xf32>
    %575 = tpu.matmul %573, %574, %cst_552 {dimension_numbers = #tpu.dot_dimension_numbers<[1], [0], [0], [1], [0, 0, 1, 1], [], []>} : vector<4x84xbf16>, vector<84x10xbf16>, vector<4x10xf32> -> vector<4x10xf32>
    %c0_553 = arith.constant 0 : index
    %c0_554 = arith.constant 0 : index
    %576 = vector.load %arg15[%c0_553, %c0_554] : memref<1x10xf32, #tpu.memory_space<vmem>>, vector<1x10xf32>
    %577 = vector.broadcast %576 : vector<1x10xf32> to vector<4x10xf32>
    %578 = arith.addf %575, %577 : vector<4x10xf32>
    %c0_555 = arith.constant 0 : index
    %c0_556 = arith.constant 0 : index
    %579 = vector.load %arg16[%c0_555, %c0_556] : memref<4x10xf32, #tpu.memory_space<vmem>>, vector<4x10xf32>
    tpu.vector_store %arg16[%c0_555, %c0_556], %578 {strides = array<i32>} : memref<4x10xf32, #tpu.memory_space<vmem>>, vector<4x10xf32>,
    return
  }
  func.func @transform_0(%arg0: i32) -> (i32, i32, i32) {
    %c0_i32 = arith.constant 0 : i32
    %c0_i32_0 = arith.constant 0 : i32
    %c0_i32_1 = arith.constant 0 : i32
    return %arg0, %c0_i32, %c0_i32_0 : i32, i32, i32
  }
  func.func @transform_1(%arg0: i32) -> (i32, i32, i32) {
    %c0_i32 = arith.constant 0 : i32
    %c0_i32_0 = arith.constant 0 : i32
    %c0_i32_1 = arith.constant 0 : i32
    %c0_i32_2 = arith.constant 0 : i32
    return %c0_i32, %c0_i32_0, %c0_i32_1 : i32, i32, i32
  }
  func.func @transform_2(%arg0: i32) -> (i32, i32) {
    %c0_i32 = arith.constant 0 : i32
    %c0_i32_0 = arith.constant 0 : i32
    %c0_i32_1 = arith.constant 0 : i32
    return %c0_i32, %c0_i32_0 : i32, i32
  }
  func.func @transform_3(%arg0: i32) -> (i32, i32) {
    %c0_i32 = arith.constant 0 : i32
    %c0_i32_0 = arith.constant 0 : i32
    %c0_i32_1 = arith.constant 0 : i32
    return %c0_i32, %c0_i32_0 : i32, i32
  }
  func.func @transform_4(%arg0: i32) -> (i32, i32) {
    %c0_i32 = arith.constant 0 : i32
    %c0_i32_0 = arith.constant 0 : i32
    %c0_i32_1 = arith.constant 0 : i32
    return %c0_i32, %c0_i32_0 : i32, i32
  }
  func.func @transform_5(%arg0: i32) -> (i32, i32, i32) {
    %c0_i32 = arith.constant 0 : i32
    %c0_i32_0 = arith.constant 0 : i32
    %c0_i32_1 = arith.constant 0 : i32
    %c0_i32_2 = arith.constant 0 : i32
    return %c0_i32, %c0_i32_0, %c0_i32_1 : i32, i32, i32
  }
  func.func @transform_6(%arg0: i32) -> (i32, i32) {
    %c0_i32 = arith.constant 0 : i32
    %c0_i32_0 = arith.constant 0 : i32
    %c0_i32_1 = arith.constant 0 : i32
    return %c0_i32, %c0_i32_0 : i32, i32
  }
  func.func @transform_7(%arg0: i32) -> (i32, i32) {
    %c0_i32 = arith.constant 0 : i32
    %c0_i32_0 = arith.constant 0 : i32
    %c0_i32_1 = arith.constant 0 : i32
    return %c0_i32, %c0_i32_0 : i32, i32
  }
  func.func @transform_8(%arg0: i32) -> (i32, i32) {
    %c0_i32 = arith.constant 0 : i32
    %c0_i32_0 = arith.constant 0 : i32
    %c0_i32_1 = arith.constant 0 : i32
    return %c0_i32, %c0_i32_0 : i32, i32
  }
  func.func @transform_9(%arg0: i32) -> (i32, i32, i32) {
    %c0_i32 = arith.constant 0 : i32
    %c0_i32_0 = arith.constant 0 : i32
    %c0_i32_1 = arith.constant 0 : i32
    %c0_i32_2 = arith.constant 0 : i32
    return %c0_i32, %c0_i32_0, %c0_i32_1 : i32, i32, i32
  }
  func.func @transform_10(%arg0: i32) -> (i32, i32) {
    %c0_i32 = arith.constant 0 : i32
    %c0_i32_0 = arith.constant 0 : i32
    %c0_i32_1 = arith.constant 0 : i32
    return %c0_i32, %c0_i32_0 : i32, i32
  }
  func.func @transform_11(%arg0: i32) -> (i32, i32) {
    %c0_i32 = arith.constant 0 : i32
    %c0_i32_0 = arith.constant 0 : i32
    %c0_i32_1 = arith.constant 0 : i32
    return %c0_i32, %c0_i32_0 : i32, i32
  }
  func.func @transform_12(%arg0: i32) -> (i32, i32) {
    %c0_i32 = arith.constant 0 : i32
    %c0_i32_0 = arith.constant 0 : i32
    %c0_i32_1 = arith.constant 0 : i32
    return %c0_i32, %c0_i32_0 : i32, i32
  }
  func.func @transform_13(%arg0: i32) -> (i32, i32) {
    %c0_i32 = arith.constant 0 : i32
    %c0_i32_0 = arith.constant 0 : i32
    %c0_i32_1 = arith.constant 0 : i32
    return %c0_i32, %c0_i32_0 : i32, i32
  }
  func.func @transform_14(%arg0: i32) -> (i32, i32) {
    %c0_i32 = arith.constant 0 : i32
    %c0_i32_0 = arith.constant 0 : i32
    %c0_i32_1 = arith.constant 0 : i32
    return %c0_i32, %c0_i32_0 : i32, i32
  }
  func.func @transform_15(%arg0: i32) -> (i32, i32) {
    %c0_i32 = arith.constant 0 : i32
    %c0_i32_0 = arith.constant 0 : i32
    return %arg0, %c0_i32 : i32, i32
  }
}

</mosaic_0001>

<bundles_post_ra>
// kernel: lenet_forward.1
= control target key start
LH: loop header
LB: loop body
LE: loop exit
PB: predicated region body
PF: predicated region fallthrough
CT: control target
= control target key end

     0   :  { %v11828_v2 = vmov 0   ;;  %vm149_vm0 = vcmask 785408   ;;  %vm809_vm1 = vcmask 1045504   ;;  %vm805_vm2 = vcmask 228352   ;;  %s14700_s0 = inlined_call_operand.vmem [shape: f32[4,32,96], index: 0, kind: input, shape index: {}]   ;;  %s14701_s1 = inlined_call_operand.vmem [shape: bf16[5,96,168], index: 1, kind: input, shape index: {}]   ;;  %s14702_s2 = inlined_call_operand.vmem [shape: f32[1,168], index: 2, kind: input, shape index: {}]   ;;  %s14703_s3 = inlined_call_operand.vmem [shape: bf16[14,28], index: 3, kind: input, shape index: {}]   ;;  %s14704_s4 = inlined_call_operand.vmem [shape: bf16[168,84], index: 4, kind: input, shape index: {}]   ;;  %s14705_s5 = inlined_call_operand.vmem [shape: bf16[5,84,160], index: 5, kind: input, shape index: {}]   ;;  %s14706_s6 = inlined_call_operand.vmem [shape: f32[1,160], index: 6, kind: input, shape index: {}]   ;;  %s14707_s7 = inlined_call_operand.vmem [shape: bf16[5,10], index: 7, kind: input, shape index: {}]   ;;  %s14708_s8 = inlined_call_operand.vmem [shape: bf16[160,80], index: 8, kind: input, shape index: {}]   ;;  %s14709_s9 = inlined_call_operand.vmem [shape: bf16[5,80,120], index: 9, kind: input, shape index: {}]   ;;  %s14710_s10 = inlined_call_operand.vmem [shape: f32[1,120], index: 10, kind: input, shape index: {}]   ;;  %s14711_s11 = inlined_call_operand.vmem [shape: bf16[120,84], index: 11, kind: input, shape index: {}]   ;;  %s14712_s12 = inlined_call_operand.vmem [shape: f32[1,84], index: 12, kind: input, shape index: {}]   ;;  %s14713_s13 = inlined_call_operand.vmem [shape: bf16[84,10], index: 13, kind: input, shape index: {}]   ;;  %s14714_s14 = inlined_call_operand.vmem [shape: f32[1,10], index: 14, kind: input, shape index: {}]   ;;  %s14715_s15 = inlined_call_operand.hbm [shape: f32[4,10], index: 15, kind: output, shape index: {}]  }
   0x1   :  { %v10904_v0 = vld [vmem:[%s14701_s1 + $0xb4] ss:$8 sps:$4 sm:$0xff]   ;;  %188 = vmatprep.mubr.bf16.mxu0 %v11828_v2  ;;  %307 = vmatprep.mubr.bf16.mxu1 %v11828_v2  ;;  %v10908_v3 = vld [vmem:[%s14701_s1 + $0xb0] ss:$8 sps:$4 sm:$0xff]   ;;  %v10910_v5 = vld [vmem:[%s14701_s1 + $0xa4] ss:$8 sps:$4 sm:$0xff]  }
   0x2   :  { %v10906_v1 = vld [vmem:[%s14701_s1 + $0x54] ss:$8 sps:$4 sm:$0xff]   ;;  %160 = vmatprep.subr.bf16.mxu0 %v10904_v0  ;;  %v10909_v4 = vld [vmem:[%s14701_s1 + $0x50] ss:$8 sps:$4 sm:$0xff]   ;;  %v10912_v6 = vld [vmem:[%s14701_s1 + $0x44] ss:$8 sps:$4 sm:$0xff]  }
   0x3   :  { %279 = vmatprep.subr.bf16.mxu1 %v10906_v1  ;;  %161 = vmatpush1.bf16.msra.mxu0 %v10908_v3  ;;  %v10914_v7 = vld [vmem:[%s14701_s1 + $0xa0] ss:$8 sps:$4 sm:$0xff]   ;;  %v10916_v9 = vld [vmem:[%s14701_s1 + $0x94] ss:$8 sps:$4 sm:$0xff]   ;;  %v10920_v11 = vld [vmem:[%s14701_s1 + $0x90] ss:$8 sps:$4 sm:$0xff]  }
   0x4   :  { %280 = vmatpush1.bf16.msra.mxu1 %v10909_v4  ;;  %162 = vmatprep.subr.bf16.mxu0 %v10910_v5  ;;  %v10915_v8 = vld [vmem:[%s14701_s1 + $0x40] ss:$8 sps:$4 sm:$0xff]   ;;  %v10918_v10 = vld [vmem:[%s14701_s1 + $0x34] ss:$8 sps:$4 sm:$0xff]   ;;  %v10921_v12 = vld [vmem:[%s14701_s1 + $0x30] ss:$8 sps:$4 sm:$0xff]  }
   0x5   :  { %281 = vmatprep.subr.bf16.mxu1 %v10912_v6  ;;  %v10922_v13 = vld [vmem:[%s14701_s1 + $0x84] ss:$8 sps:$4 sm:$0xff]   ;;  %v10926_v15 = vld [vmem:[%s14701_s1 + $0x80] ss:$8 sps:$4 sm:$0xff]   ;;  %v10928_v17 = vld [vmem:[%s14701_s1 + $0x74] ss:$8 sps:$4 sm:$0xff]  }
   0x6   :  { %v10924_v14 = vld [vmem:[%s14701_s1 + $0x24] ss:$8 sps:$4 sm:$0xff]   ;;  %v10927_v16 = vld [vmem:[%s14701_s1 + $0x20] ss:$8 sps:$4 sm:$0xff]   ;;  %v10930_v18 = vld [vmem:[%s14701_s1 + $0x14] ss:$8 sps:$4 sm:$0xff]  }
   0x7   :  { %163 = vmatpush1.bf16.msra.mxu0 %v10914_v7  ;;  %v10932_v19 = vld [vmem:[%s14701_s1 + $0x70] ss:$8 sps:$4 sm:$0xff]   ;;  %v10934_v21 = vld [vmem:[%s14701_s1 + $0x64] ss:$8 sps:$4 sm:$0xff]   ;;  %v10938_v23 = vld [vmem:[%s14701_s1 + $0x60] ss:$8 sps:$4 sm:$0xff]  }
   0x8   :  { %282 = vmatpush1.bf16.msra.mxu1 %v10915_v8  ;;  %164 = vmatprep.subr.bf16.mxu0 %v10916_v9  ;;  %v10933_v20 = vld [vmem:[%s14701_s1 + $0x10] ss:$8 sps:$4 sm:$0xff]   ;;  %v10936_v22 = vld [vmem:[%s14701_s1 + $0x4] ss:$8 sps:$4 sm:$0xff]   ;;  %v10939_v24 = vld [vmem:[%s14701_s1] ss:$8 sps:$4 sm:$0xff]  }
   0x9   :  { %283 = vmatprep.subr.bf16.mxu1 %v10918_v10  ;;  %v70_v25 = vld [vmem:[%s14700_s0 + $0x1] sm:$0xff]  ;;  %v71_v26 = vld [vmem:[%s14700_s0 + $0x9] sm:$0xff]  ;;  %v10942_v29 = vld [vmem:[%s14701_s1 + $0x114] ss:$8 sps:$4 sm:$0xff]  }
   0xa   :  { %v52_v27 = vld [vmem:[%s14700_s0] sm:$0xff]  ;;  %v53_v28 = vld [vmem:[%s14700_s0 + $0x8] sm:$0xff]  ;;  %v10945_v30 = vld [vmem:[%s14701_s1 + $0x174] ss:$8 sps:$4 sm:$0xff]   ;;  %v74_v31 = vpack.c.bf16 %v71_v26, %v70_v25 }
   0xb   :  { %165 = vmatpush1.bf16.msra.mxu0 %v10920_v11  ;;  %v56_v32 = vpack.c.bf16 %v53_v28, %v52_v27  ;;  %v10940_v33 = vld [vmem:[%s14701_s1 + $0x110] ss:$8 sps:$4 sm:$0xff]   ;;  %v10948_v35 = vld [vmem:[%s14701_s1 + $0x104] ss:$8 sps:$4 sm:$0xff]   ;;  %v10946_v37 = vld [vmem:[%s14701_s1 + $0x100] ss:$8 sps:$4 sm:$0xff]  }
   0xc   :  { %284 = vmatpush1.bf16.msra.mxu1 %v10921_v12  ;;  %166 = vmatprep.subr.bf16.mxu0 %v10922_v13  ;;  %v10943_v34 = vld [vmem:[%s14701_s1 + $0x170] ss:$8 sps:$4 sm:$0xff]   ;;  %v10951_v36 = vld [vmem:[%s14701_s1 + $0x164] ss:$8 sps:$4 sm:$0xff]   ;;  %v10949_v38 = vld [vmem:[%s14701_s1 + $0x160] ss:$8 sps:$4 sm:$0xff]  }
   0xd   :  { %285 = vmatprep.subr.bf16.mxu1 %v10924_v14  ;;  %v72_v39 = vld [vmem:[%s14700_s0 + $0x11] sm:$0xff]  ;;  %v73_v41 = vld [vmem:[%s14700_s0 + $0x19] sm:$0xf]  ;;  %v10960_v49 = vld [vmem:[%s14701_s1 + $0xe4] ss:$8 sps:$4 sm:$0xff]  }
   0xe   :  { %v10954_v40 = vld [vmem:[%s14701_s1 + $0xf4] ss:$8 sps:$4 sm:$0xff]   ;;  %v55_v43 = vld [vmem:[%s14700_s0 + $0x18] sm:$0xf]  ;;  %v75_v47 = vpack.c.bf16 %v73_v41, %v72_v39  ;;  %v10963_v50 = vld [vmem:[%s14701_s1 + $0x144] ss:$8 sps:$4 sm:$0xff]  }
   0xf   :  { %167 = vmatpush1.bf16.msra.mxu0 %v10926_v15  ;;  %v54_v42 = vld [vmem:[%s14700_s0 + $0x10] sm:$0xff]  ;;  %v10958_v51 = vld [vmem:[%s14701_s1 + $0xe0] ss:$8 sps:$4 sm:$0xff]   ;;  %v10972_v57 = vld [vmem:[%s14701_s1 + $0xc4] ss:$8 sps:$4 sm:$0xff]  }
  0x10   :  { %286 = vmatpush1.bf16.msra.mxu1 %v10927_v16  ;;  %168 = vmatprep.subr.bf16.mxu0 %v10928_v17  ;;  %v10957_v44 = vld [vmem:[%s14701_s1 + $0x154] ss:$8 sps:$4 sm:$0xff]   ;;  %v10952_v45 = vld [vmem:[%s14701_s1 + $0xf0] ss:$8 sps:$4 sm:$0xff]   ;;  %v57_v48 = vpack.c.bf16 %v55_v43, %v54_v42  ;;  %v10961_v52 = vld [vmem:[%s14701_s1 + $0x140] ss:$8 sps:$4 sm:$0xff]  }
  0x11   :  { %287 = vmatprep.subr.bf16.mxu1 %v10930_v18  ;;  %v10955_v46 = vld [vmem:[%s14701_s1 + $0x150] ss:$8 sps:$4 sm:$0xff]   ;;  %v10966_v53 = vld [vmem:[%s14701_s1 + $0xd4] ss:$8 sps:$4 sm:$0xff]   ;;  %v10975_v58 = vld [vmem:[%s14701_s1 + $0x124] ss:$8 sps:$4 sm:$0xff]  }
  0x12   :  { %v10969_v54 = vld [vmem:[%s14701_s1 + $0x134] ss:$8 sps:$4 sm:$0xff]   ;;  %v10964_v55 = vld [vmem:[%s14701_s1 + $0xd0] ss:$8 sps:$4 sm:$0xff]   ;;  %v10970_v59 = vld [vmem:[%s14701_s1 + $0xc0] ss:$8 sps:$4 sm:$0xff]  }
  0x13   :  { %169 = vmatpush1.bf16.msra.mxu0 %v10932_v19  ;;  %v10967_v56 = vld [vmem:[%s14701_s1 + $0x130] ss:$8 sps:$4 sm:$0xff]   ;;  %v10973_v60 = vld [vmem:[%s14701_s1 + $0x120] ss:$8 sps:$4 sm:$0xff]   ;;  %v10978_v1 = vld [vmem:[%s14701_s1 + $0x1d4] ss:$8 sps:$4 sm:$0xff]  }
  0x14   :  { %288 = vmatpush1.bf16.msra.mxu1 %v10933_v20  ;;  %170 = vmatprep.subr.bf16.mxu0 %v10934_v21  ;;  %v328_v61 = vld [vmem:[%s14700_s0 + $0x2] sm:$0xff]  ;;  %v329_v62 = vld [vmem:[%s14700_s0 + $0xa] sm:$0xff]  ;;  %v330_v8 = vld [vmem:[%s14700_s0 + $0x12] sm:$0xff] }
  0x15   :  { %289 = vmatprep.subr.bf16.mxu1 %v10936_v22  ;;  %v474_v63 = vld [vmem:[%s14700_s0 + $0x3] sm:$0xff]  ;;  %v475_v0 = vld [vmem:[%s14700_s0 + $0xb] sm:$0xff]  ;;  %v332_v4 = vpack.c.bf16 %v329_v62, %v328_v61  ;;  %v331_v9 = vld [vmem:[%s14700_s0 + $0x1a] sm:$0xf] }
  0x16   :  { %v10976_v3 = vld [vmem:[%s14701_s1 + $0x1d0] ss:$8 sps:$4 sm:$0xff]   ;;  %v478_v5 = vpack.c.bf16 %v475_v0, %v474_v63  ;;  %v10981_v6 = vld [vmem:[%s14701_s1 + $0x1c4] ss:$8 sps:$4 sm:$0xff]   ;;  %v10979_v7 = vld [vmem:[%s14701_s1 + $0x1c0] ss:$8 sps:$4 sm:$0xff]   ;;  %v333_v14 = vpack.c.bf16 %v331_v9, %v330_v8 }
  0x17   :  { %171 = vmatpush1.bf16.msra.mxu0 %v10938_v23  ;;  %v476_v10 = vld [vmem:[%s14700_s0 + $0x13] sm:$0xff]  ;;  %v477_v11 = vld [vmem:[%s14700_s0 + $0x1b] sm:$0xf]  ;;  %v10987_v16 = vld [vmem:[%s14701_s1 + $0x1a4] ss:$8 sps:$4 sm:$0xff]  }
  0x18   :  { %290 = vmatpush1.bf16.msra.mxu1 %v10939_v24  ;;  %417 = vmatprep.subr.bf16.mxu0 %v10942_v29  ;;  %v10984_v12 = vld [vmem:[%s14701_s1 + $0x1b4] ss:$8 sps:$4 sm:$0xff]   ;;  %v10982_v13 = vld [vmem:[%s14701_s1 + $0x1b0] ss:$8 sps:$4 sm:$0xff]   ;;  %v479_v15 = vpack.c.bf16 %v477_v11, %v476_v10  ;;  %v10985_v17 = vld [vmem:[%s14701_s1 + $0x1a0] ss:$8 sps:$4 sm:$0xff]  }
  0x19   :  { %563 = vmatprep.subr.bf16.mxu1 %v10945_v30  ;;  %v10990_v18 = vld [vmem:[%s14701_s1 + $0x194] ss:$8 sps:$4 sm:$0xff]   ;;  %v10988_v19 = vld [vmem:[%s14701_s1 + $0x190] ss:$8 sps:$4 sm:$0xff]   ;;  %v10993_v20 = vld [vmem:[%s14701_s1 + $0x184] ss:$8 sps:$4 sm:$0xff]  }
  0x1a   :  { %9074 = vmatmul.mubr.msk.bf16.vlgmr.msra.gmra.mxu0 %vm149_vm0, %v74_v31  ;;  %v10991_v21 = vld [vmem:[%s14701_s1 + $0x180] ss:$8 sps:$4 sm:$0xff]   ;;  %v621_v23 = vld [vmem:[%s14700_s0 + $0xc] sm:$0xff]  ;;  %v622_v25 = vld [vmem:[%s14700_s0 + $0x14] sm:$0xff] }
  0x1b   :  { %9088 = vmatmul.mubr.msk.bf16.vlgmr.msra.gmra.mxu1 %vm149_vm0, %v56_v32  ;;  %418 = vmatpush1.bf16.msra.mxu0 %v10940_v33  ;;  %v620_v22 = vld [vmem:[%s14700_s0 + $0x4] sm:$0xff]  ;;  %v623_v26 = vld [vmem:[%s14700_s0 + $0x1c] sm:$0xf]  ;;  %v766_v61 = vld [vmem:[%s14702_s2] sm:$0x3] }
  0x1c   :  { %564 = vmatpush1.bf16.msra.mxu1 %v10943_v34  ;;  %419 = vmatprep.subr.bf16.mxu0 %v10948_v35  ;;  %v624_v24 = vpack.c.bf16 %v621_v23, %v620_v22  ;;  %v625_v27 = vpack.c.bf16 %v623_v26, %v622_v25 }
  0x1d   :  { %565 = vmatprep.subr.bf16.mxu1 %v10951_v36  ;;  %198 = vmatprep.mubr.bf16.mxu0 %v11828_v2 }
  0x1e   :  { %317 = vmatprep.mubr.bf16.mxu1 %v11828_v2 }
  0x1f   :  { %420 = vmatpush1.bf16.msra.mxu0 %v10946_v37 }
  0x20   :  { %566 = vmatpush1.bf16.msra.mxu1 %v10949_v38  ;;  %421 = vmatprep.subr.bf16.mxu0 %v10954_v40 }
  0x21   :  { %567 = vmatprep.subr.bf16.mxu1 %v10957_v44 }
  0x22   :  { %9075 = vmatmul.mubr.msk.bf16.gmra.mxu0 %vm149_vm0, %v75_v47 }
  0x23   :  { %9089 = vmatmul.mubr.msk.bf16.gmra.mxu1 %vm149_vm0, %v57_v48  ;;  %422 = vmatpush1.bf16.msra.mxu0 %v10952_v45 }
  0x24   :  { %568 = vmatpush1.bf16.msra.mxu1 %v10955_v46  ;;  %423 = vmatprep.subr.bf16.mxu0 %v10960_v49 }
  0x25   :  { %569 = vmatprep.subr.bf16.mxu1 %v10963_v50  ;;  %445 = vmatprep.mubr.bf16.mxu0 %v11828_v2 }
  0x26   :  { %591 = vmatprep.mubr.bf16.mxu1 %v11828_v2 }
  0x27   :  { %424 = vmatpush1.bf16.msra.mxu0 %v10958_v51 }
  0x28   :  { %570 = vmatpush1.bf16.msra.mxu1 %v10961_v52  ;;  %425 = vmatprep.subr.bf16.mxu0 %v10966_v53  ;;  %v768_v53 = vlaneseq }
  0x29   :  { %571 = vmatprep.subr.bf16.mxu1 %v10969_v54 }
  0x2b   :  { %426 = vmatpush1.bf16.msra.mxu0 %v10964_v55 }
  0x2c   :  { %572 = vmatpush1.bf16.msra.mxu1 %v10967_v56  ;;  %427 = vmatprep.subr.bf16.mxu0 %v10972_v57  ;;  %v769_v56 = vshrl.u32 %v768_v53, 7 }
  0x2d   :  { %573 = vmatprep.subr.bf16.mxu1 %v10975_v58 }
  0x2e   :  { %v12177_v63 = vsub.s32 0, %v769_v56 }
  0x2f   :  { %428 = vmatpush1.bf16.msra.mxu0 %v10970_v59 }
  0x30   :  { %574 = vmatpush1.bf16.msra.mxu1 %v10973_v60  ;;  %709 = vmatprep.subr.bf16.mxu0 %v10978_v1  ;;  %v771_v9 = vrot.slane %v766_v61, %v12177_v63 }
  0x32   :  { %9114 = vmatmul.mubr.msk.bf16.vlgmr.msra.gmra.mxu0 %vm149_vm0, %v332_v4  ;;  %v12179_v4 = vsub.s32 1, %v769_v56 }
  0x33   :  { %9140 = vmatmul.mubr.msk.bf16.vlgmr.msra.gmra.mxu1 %vm149_vm0, %v478_v5  ;;  %710 = vmatpush1.bf16.msra.mxu0 %v10976_v3 }
  0x34   :  { %455 = vmatprep.mubr.bf16.mxu0 %v11828_v2  ;;  %711 = vmatprep.subr.bf16.mxu0 %v10981_v6 }
  0x35   :  { %601 = vmatprep.mubr.bf16.mxu1 %v11828_v2 }
  0x37   :  { %712 = vmatpush1.bf16.msra.mxu0 %v10979_v7 }
  0x38   :  { %713 = vmatprep.subr.bf16.mxu0 %v10984_v12 }
  0x3a   :  { %9115 = vmatmul.mubr.msk.bf16.gmra.mxu0 %vm149_vm0, %v333_v14 }
  0x3b   :  { %9141 = vmatmul.mubr.msk.bf16.gmra.mxu1 %vm149_vm0, %v479_v15  ;;  %714 = vmatpush1.bf16.msra.mxu0 %v10982_v13 }
  0x3c   :  { %737 = vmatprep.mubr.bf16.mxu0 %v11828_v2  ;;  %715 = vmatprep.subr.bf16.mxu0 %v10987_v16  ;;  %v775_v16 = vrot.slane %v766_v61, %v12179_v4 }
  0x3d   :  { %848 = vmatprep.mubr.bf16.mxu1 %v11828_v2 }
  0x3f   :  { %716 = vmatpush1.bf16.msra.mxu0 %v10985_v17 }
  0x40   :  { %717 = vmatprep.subr.bf16.mxu0 %v10990_v18 }
  0x43   :  { %718 = vmatpush1.bf16.msra.mxu0 %v10988_v19 }
  0x44   :  { %719 = vmatprep.subr.bf16.mxu0 %v10993_v20 }
  0x47   :  { %720 = vmatpush1.bf16.msra.mxu0 %v10991_v21 }
  0x4a   :  { %9166 = vmatmul.mubr.msk.bf16.vlgmr.msra.gmra.mxu0 %vm149_vm0, %v624_v24 }
  0x4b   :  { %747 = vmatprep.mubr.bf16.mxu0 %v11828_v2 }
  0x52   :  { %9167 = vmatmul.mubr.msk.bf16.gmra.mxu0 %vm149_vm0, %v625_v27 }
  0x53   :  { %1124 = vmatprep.mubr.bf16.mxu0 %v11828_v2 }
  0xda   :  { %v190_v28 = vpop.f32.mrf.mxu0 }
  0xdb   :  { %v309_v29 = vpop.f32.mrf.mxu1 }
  0xdc   :  { %v192_v30 = vpop.f32.mrf.mxu0  ;;  %v310_v57 = vadd.f32 %v309_v29, %v190_v28 }
  0xdd   :  { %v311_v32 = vpop.f32.mrf.mxu1 }
  0xde   :  { %v194_v31 = vpop.f32.mrf.mxu0  ;;  %v312_v58 = vadd.f32 %v311_v32, %v192_v30 }
  0xdf   :  { %v313_v34 = vpop.f32.mrf.mxu1 }
  0xe0   :  { %v196_v33 = vpop.f32.mrf.mxu0  ;;  %v314_v15 = vadd.f32 %v313_v34, %v194_v31 }
  0xe1   :  { %v315_v36 = vpop.f32.mrf.mxu1 }
  0xe2   :  { %v200_v35 = vpop.f32.mrf.mxu0  ;;  %v316_v0 = vadd.f32 %v315_v36, %v196_v33 }
  0xe3   :  { %v319_v38 = vpop.f32.mrf.mxu1 }
  0xe4   :  { %v202_v37 = vpop.f32.mrf.mxu0  ;;  %v320_v5 = vadd.f32 %v319_v38, %v200_v35 }
  0xe5   :  { %v321_v40 = vpop.f32.mrf.mxu1 }
  0xe6   :  { %v204_v39 = vpop.f32.mrf.mxu0  ;;  %v322_v11 = vadd.f32 %v321_v40, %v202_v37 }
  0xe7   :  { %v323_v42 = vpop.f32.mrf.mxu1 }
  0xe8   :  { %v206_v41 = vpop.f32.mrf.mxu0  ;;  %v324_v18 = vadd.f32 %v323_v42, %v204_v39 }
  0xe9   :  { %v325_v45 = vpop.f32.mrf.mxu1 }
  0xea   :  { %v326_v23 = vadd.f32 %v325_v45, %v206_v41 }
  0xf2   :  { %v447_v43 = vpop.f32.mrf.mxu0 }
  0xf3   :  { %v593_v47 = vpop.f32.mrf.mxu1  ;;  %v466_v59 = vadd.f32 %v447_v43, %v310_v57 }
  0xf4   :  { %v449_v44 = vpop.f32.mrf.mxu0 }
  0xf5   :  { %v595_v49 = vpop.f32.mrf.mxu1  ;;  %v467_v1 = vadd.f32 %v449_v44, %v312_v58  ;;  %v612_v6 = vadd.f32 %v593_v47, %v466_v59 }
  0xf6   :  { %v451_v46 = vpop.f32.mrf.mxu0 }
  0xf7   :  { %v597_v51 = vpop.f32.mrf.mxu1  ;;  %v613_v12 = vadd.f32 %v595_v49, %v467_v1  ;;  %v468_v24 = vadd.f32 %v451_v46, %v314_v15  ;;  %v10994_v1 = vld [vmem:[%s14703_s3] sm:$0x7f]  }
  0xf8   :  { %v453_v48 = vpop.f32.mrf.mxu0 }
  0xf9   :  { %v599_v54 = vpop.f32.mrf.mxu1  ;;  %v469_v7 = vadd.f32 %v453_v48, %v316_v0  ;;  %v614_v36 = vadd.f32 %v597_v51, %v468_v24 }
  0xfa   :  { %v457_v50 = vpop.f32.mrf.mxu0 }
  0xfb   :  { %v603_v60 = vpop.f32.mrf.mxu1  ;;  %v470_v13 = vadd.f32 %v457_v50, %v320_v5  ;;  %v615_v19 = vadd.f32 %v599_v54, %v469_v7  ;;  %v10995_v5 = vld [vmem:[%s14704_s4 + $0x38] sm:$0xff]   ;;  %v10997_v7 = vld [vmem:[%s14704_s4 + $0x28] sm:$0xff]  }
  0xfc   :  { %v459_v52 = vpop.f32.mrf.mxu0 }
  0xfd   :  { %v605_v8 = vpop.f32.mrf.mxu1  ;;  %v471_v20 = vadd.f32 %v459_v52, %v322_v11  ;;  %v616_v26 = vadd.f32 %v603_v60, %v470_v13 }
  0xfe   :  { %v461_v55 = vpop.f32.mrf.mxu0 }
  0xff   :  { %v607_v21 = vpop.f32.mrf.mxu1  ;;  %v472_v27 = vadd.f32 %v461_v55, %v324_v18  ;;  %v617_v33 = vadd.f32 %v605_v8, %v471_v20  ;;  %v10998_v8 = vld [vmem:[%s14704_s4 + $0x20] sm:$0xff]  }
 0x100   :  { %v463_v62 = vpop.f32.mrf.mxu0 }
 0x101   :  { %v473_v30 = vadd.f32 %v463_v62, %v326_v23  ;;  %v609_v35 = vpop.f32.mrf.mxu1  ;;  %v618_v38 = vadd.f32 %v607_v21, %v472_v27 }
 0x103   :  { %v619_v41 = vadd.f32 %v609_v35, %v473_v30 }
 0x10a   :  { %v739_v3 = vpop.f32.mrf.mxu0 }
 0x10b   :  { %v758_v14 = vadd.f32 %v739_v3, %v612_v6  ;;  %v10996_v6 = vld [vmem:[%s14704_s4 + $0x30] sm:$0xff]  }
 0x10c   :  { %v741_v10 = vpop.f32.mrf.mxu0 }
 0x10d   :  { %v759_v22 = vadd.f32 %v741_v10, %v613_v12  ;;  %v778_v28 = vadd.f32 %v771_v9, %v758_v14 }
 0x10e   :  { %v743_v17 = vpop.f32.mrf.mxu0 }
 0x10f   :  { %v779_v31 = vadd.f32 %v775_v16, %v759_v22  ;;  %v786_v39 = vmax.f32 %v778_v28, 0.0  ;;  %v760_v45 = vadd.f32 %v743_v17, %v614_v36 }
 0x110   :  { %v745_v25 = vpop.f32.mrf.mxu0 }
 0x111   :  { %v761_v29 = vadd.f32 %v745_v25, %v615_v19  ;;  %v787_v44 = vmax.f32 %v779_v31, 0.0  ;;  %v780_v54 = vadd.f32 %v771_v9, %v760_v45 }
 0x112   :  { %v749_v32 = vpop.f32.mrf.mxu0 }
 0x113   :  { %v762_v34 = vadd.f32 %v749_v32, %v616_v26  ;;  %v781_v40 = vadd.f32 %v775_v16, %v761_v29  ;;  %v788_v60 = vmax.f32 %v780_v54, 0.0 }
 0x114   :  { %v751_v37 = vpop.f32.mrf.mxu0 }
 0x115   :  { %v763_v42 = vadd.f32 %v751_v37, %v617_v33  ;;  %v782_v46 = vadd.f32 %v771_v9, %v762_v34  ;;  %v789_v49 = vmax.f32 %v781_v40, 0.0  ;;  %v794_v3 = vpack.c.bf16 %v788_v60, %v786_v39 }
 0x116   :  { %v753_v43 = vpop.f32.mrf.mxu0 }
 0x117   :  { %v764_v47 = vadd.f32 %v753_v43, %v618_v38  ;;  %v783_v50 = vadd.f32 %v775_v16, %v763_v42  ;;  %v790_v55 = vmax.f32 %v782_v46, 0.0  ;;  %v795_v0 = vpack.c.bf16 %v789_v49, %v787_v44 }
 0x118   :  { %v755_v48 = vpop.f32.mrf.mxu0 }
 0x119   :  { %v784_v52 = vadd.f32 %v771_v9, %v764_v47  ;;  %v765_v53 = vadd.f32 %v755_v48, %v619_v41  ;;  %v791_v57 = vmax.f32 %v783_v50, 0.0  ;;  %v10999_v9 = vld [vmem:[%s14704_s4 + $0x18] sm:$0xff]  }
 0x11b   :  { %v792_v51 = vmax.f32 %v784_v52, 0.0  ;;  %v785_v56 = vadd.f32 %v775_v16, %v765_v53 }
 0x11d   :  { %v796_v58 = vpack.c.bf16 %v792_v51, %v790_v55  ;;  %v793_v59 = vmax.f32 %v785_v56, 0.0 }
 0x11f   :  { %v797_v61 = vpack.c.bf16 %v793_v59, %v791_v57  ;;  %v811_v62 = vsel %vm809_vm1, %v796_v58, 0 }
 0x121   :  { %9169 = vmatprep.subr.msk.bf16.mxu1 %vm809_vm1, %v797_v61 }
 0x122   :  { %829 = vmatpush1.bf16.msra.mxu1 %v811_v62 }
 0x123   :  { %830 = vmatprep.subr.bf16.mxu1 %v795_v0 }
 0x126   :  { %831 = vmatpush1.bf16.msra.mxu1 %v794_v3 }
 0x127   :  { %953 = vmatprep.subr.bf16.mxu1 %v11828_v2 }
 0x129   :  { %9170 = vmatmul.mubr.msk.bf16.vlgmr.msra.gmra.mxu1 %vm805_vm2, %v10994_v1 }
 0x12a   :  { %954 = vmatpush1.bf16.msra.mxu1 %v10995_v5 }
 0x12b   :  { %955 = vmatprep.subr.bf16.mxu1 %v11828_v2 }
 0x12e   :  { %956 = vmatpush1.bf16.msra.mxu1 %v10996_v6 }
 0x12f   :  { %957 = vmatprep.subr.bf16.mxu1 %v11828_v2 }
 0x132   :  { %958 = vmatpush1.bf16.msra.mxu1 %v10997_v7 }
 0x133   :  { %959 = vmatprep.subr.bf16.mxu1 %v11828_v2 }
 0x136   :  { %960 = vmatpush1.bf16.msra.mxu1 %v10998_v8 }
 0x137   :  { %20 = vsyncpa [#allocation6], 0  ;;  %961 = vmatprep.subr.bf16.mxu1 %v11828_v2  ;;  %v11000_v10 = vld [vmem:[%s14704_s4 + $0x10] sm:$0xff]   ;;  %v11001_v11 = vld [vmem:[%s14704_s4 + $0x8] sm:$0xff]   ;;  %vm949_vm3 = vcmask 1043456   ;;  %vm1085_vm4 = vcmask 1041408  }
 0x138   :  { %v11002_v12 = vld [vmem:[%s14704_s4] sm:$0xff]   ;;  %v11003_v13 = vld [vmem:[%s14704_s4 + $0x50] ss:$0 sps:$4 sm:$0xff]   ;;  %v11004_v15 = vld [vmem:[%s14704_s4 + $0x48] sm:$0xff]   ;;  %vm945_vm5 = vcmask 326656   ;;  %vm994_vm6 = vcmask 687104  }
 0x139   :  { %v951_v14 = vsel %vm949_vm3, %v11003_v13, 0  ;;  %v11005_v16 = vld [vmem:[%s14704_s4 + $0x40] sm:$0xff]   ;;  %v9193_v17 = vld [vmem:[%s14705_s5 + $0xa8] sm:$0x33]  ;;  %v11015_v34 = vld [vmem:[%s14705_s5 + $0xf4] ss:$8 sps:$4 sm:$0xff]  }
 0x13a   :  { %962 = vmatpush1.bf16.msra.mxu1 %v10999_v9  ;;  %v9232_v18 = vld [vmem:[%s14705_s5 + $0x100] sm:$0x33]  ;;  %v9205_v19 = vcombine.high %v9193_v17, %v9193_v17  ;;  %v9204_v21 = vcombine.low %v9193_v17, %v9193_v17  ;;  %v11018_v25 = vld [vmem:[%s14705_s5 + $0x8c] ss:$8 sps:$4 sm:$0xff]   ;;  %v11016_v26 = vld [vmem:[%s14705_s5 + $0x88] ss:$8 sps:$4 sm:$0xff]  }
 0x13b   :  { %963 = vmatprep.subr.bf16.mxu1 %v11828_v2  ;;  %v9244_v20 = vcombine.high %v9232_v18, %v9232_v18  ;;  %v11012_v22 = vld [vmem:[%s14705_s5 + $0x9c] ss:$8 sps:$4 sm:$0xff]   ;;  %v11010_v24 = vld [vmem:[%s14705_s5 + $0x98] ss:$8 sps:$4 sm:$0xff]   ;;  %v9243_v30 = vcombine.low %v9232_v18, %v9232_v18  ;;  %v11030_v43 = vld [vmem:[%s14705_s5 + $0x6c] ss:$8 sps:$4 sm:$0xff]  }
 0x13c   :  { %9206 = vmatprep.subr.msk.bf16.mxu0 %vm1085_vm4, %v9205_v19  ;;  %v1087_v23 = vsel %vm1085_vm4, %v9204_v21, 0  ;;  %v11013_v36 = vld [vmem:[%s14705_s5 + $0xf0] ss:$8 sps:$4 sm:$0xff]   ;;  %v11021_v37 = vld [vmem:[%s14705_s5 + $0xe4] ss:$8 sps:$4 sm:$0xff]   ;;  %vm996_vm7 = vcmask 685056  }
 0x13d   :  { %1097 = vmatpush1.bf16.msra.mxu0 %v1087_v23  ;;  %v1316_v31 = vsel %vm1085_vm4, %v9243_v30, 0  ;;  %v11019_v38 = vld [vmem:[%s14705_s5 + $0xe0] ss:$8 sps:$4 sm:$0xff]   ;;  %v11024_v39 = vld [vmem:[%s14705_s5 + $0x7c] ss:$8 sps:$4 sm:$0xff]   ;;  %vm1647_vm8 = vcmask 1044480  }
 0x13e   :  { %964 = vmatpush1.bf16.msra.mxu1 %v11000_v10  ;;  %1098 = vmatprep.subr.bf16.mxu0 %v11012_v22  ;;  %v11027_v40 = vld [vmem:[%s14705_s5 + $0xd4] ss:$8 sps:$4 sm:$0xff]   ;;  %v11022_v42 = vld [vmem:[%s14705_s5 + $0x78] ss:$8 sps:$4 sm:$0xff]   ;;  %v11033_v44 = vld [vmem:[%s14705_s5 + $0xc4] ss:$8 sps:$4 sm:$0xff]  }
 0x13f   :  { %965 = vmatprep.subr.bf16.mxu1 %v11828_v2  ;;  %v11025_v41 = vld [vmem:[%s14705_s5 + $0xd0] ss:$8 sps:$4 sm:$0xff]   ;;  %v11031_v46 = vld [vmem:[%s14705_s5 + $0xc0] ss:$8 sps:$4 sm:$0xff]   ;;  %v11036_v48 = vld [vmem:[%s14705_s5 + $0x5c] ss:$8 sps:$4 sm:$0xff]  }
 0x140   :  { %v11028_v45 = vld [vmem:[%s14705_s5 + $0x68] ss:$8 sps:$4 sm:$0xff]   ;;  %v11034_v47 = vld [vmem:[%s14705_s5 + $0x58] ss:$8 sps:$4 sm:$0xff]   ;;  %v11039_v50 = vld [vmem:[%s14705_s5 + $0xb4] ss:$8 sps:$4 sm:$0xff]  }
 0x141   :  { %1099 = vmatpush1.bf16.msra.mxu0 %v11010_v24  ;;  %v11037_v49 = vld [vmem:[%s14705_s5 + $0xb0] ss:$8 sps:$4 sm:$0xff]   ;;  %v11046_v6 = vld [vmem:[%s14705_s5 + $0x44] ss:$8 sps:$4 sm:$0xff]   ;;  %v11044_v10 = vld [vmem:[%s14705_s5 + $0x40] ss:$8 sps:$4 sm:$0xff]  }
 0x142   :  { %966 = vmatpush1.bf16.msra.mxu1 %v11001_v11  ;;  %1100 = vmatprep.subr.bf16.mxu0 %v11018_v25  ;;  %v1011_v52 = vld [vmem:[%s14705_s5 + $0x50] sm:$0x33]  ;;  %v11049_v9 = vld [vmem:[%s14705_s5 + $0x1a4] ss:$8 sps:$4 sm:$0xff]   ;;  %v11047_v11 = vld [vmem:[%s14705_s5 + $0x1a0] ss:$8 sps:$4 sm:$0xff]  }
 0x143   :  { %967 = vmatprep.subr.bf16.mxu1 %v11828_v2  ;;  %v9282_v53 = vld [vmem:[%s14705_s5 + $0x1b0] sm:$0x33]  ;;  %v9219_v54 = vcombine.high %v1011_v52, %v1011_v52  ;;  %v9218_v59 = vcombine.low %v1011_v52, %v1011_v52  ;;  %v11061_v17 = vld [vmem:[%s14705_s5 + $0x184] ss:$8 sps:$4 sm:$0xff]   ;;  %v11056_v18 = vld [vmem:[%s14705_s5 + $0x20] ss:$8 sps:$4 sm:$0xff]  }
 0x144   :  { %v9294_v55 = vcombine.high %v9282_v53, %v9282_v53  ;;  %v9293_v60 = vcombine.low %v9282_v53, %v9282_v53  ;;  %v11055_v13 = vld [vmem:[%s14705_s5 + $0x194] ss:$8 sps:$4 sm:$0xff]   ;;  %v11059_v19 = vld [vmem:[%s14705_s5 + $0x180] ss:$8 sps:$4 sm:$0xff]   ;;  %v11062_v22 = vld [vmem:[%s14705_s5 + $0x10] ss:$8 sps:$4 sm:$0xff]  }
 0x145   :  { %1101 = vmatpush1.bf16.msra.mxu0 %v11016_v26  ;;  %v1194_v3 = vsel %vm1085_vm4, %v9218_v59, 0  ;;  %v11067_v21 = vld [vmem:[%s14705_s5 + $0x174] ss:$8 sps:$4 sm:$0xff]   ;;  %v11065_v23 = vld [vmem:[%s14705_s5 + $0x170] ss:$8 sps:$4 sm:$0xff]   ;;  %vm1643_vm9 = vcmask 80896  }
 0x146   :  { %968 = vmatpush1.bf16.msra.mxu1 %v11002_v12  ;;  %1102 = vmatprep.subr.bf16.mxu0 %v11024_v39  ;;  %v1568_v8 = vsel %vm1085_vm4, %v9293_v60, 0  ;;  %v11052_v12 = vld [vmem:[%s14705_s5 + $0x34] ss:$8 sps:$4 sm:$0xff]   ;;  %v11070_v24 = vld [vmem:[%s14705_s5 + $0x4] ss:$8 sps:$4 sm:$0xff]   ;;  %vm1777_vm10 = vcmask 261120  }
 0x147   :  { %979 = vmatprep.subr.bf16.mxu1 %v11828_v2  ;;  %v11073_v25 = vld [vmem:[%s14705_s5 + $0x164] ss:$8 sps:$4 sm:$0xff]   ;;  %v9257_v26 = vld [vmem:[%s14705_s5 + $0x158] sm:$0x33]  ;;  %v11076_v39 = vld [vmem:[%s14705_s5 + $0x148] ss:$8 sps:$4 sm:$0xff]  }
 0x148   :  { %v9268_v30 = vcombine.low %v9257_v26, %v9257_v26  ;;  %vm11830_vm11 = vmmov 0   ;;  %vm1821_vm12 = vcmask 651264   ;;  %vm1878_vm13 = vcmask 654336   ;;  %s11831_s21 = smov [#allocation5]  }
 0x149   :  { %1103 = vmatpush1.bf16.msra.mxu0 %v11022_v42  ;;  %v11079_v42 = vld [vmem:[%s14705_s5 + $0x138] ss:$8 sps:$4 sm:$0xff]   ;;  %vm2259_vm14 = vcmask 974848   ;;  %vm8888_vm15 = vcmask 982016  }
 0x14a   :  { %980 = vmatpush2.bf16.msra.mxu1 %v951_v14  ;;  %1104 = vmatprep.subr.bf16.mxu0 %v11030_v43  ;;  %v11050_v14 = vld [vmem:[%s14705_s5 + $0x30] ss:$8 sps:$4 sm:$0xff]  }
 0x14b   :  { %981 = vmatprep.subr.bf16.mxu1 %v11828_v2  ;;  %v11082_v43 = vld [vmem:[%s14705_s5 + $0x128] ss:$8 sps:$4 sm:$0xff]  }
 0x14d   :  { %1105 = vmatpush1.bf16.msra.mxu0 %v11028_v45  ;;  %v11085_v45 = vld [vmem:[%s14705_s5 + $0x118] ss:$8 sps:$4 sm:$0xff]  }
 0x14e   :  { %982 = vmatpush2.bf16.msra.mxu1 %v11004_v15  ;;  %1106 = vmatprep.subr.bf16.mxu0 %v11036_v48  ;;  %v11053_v15 = vld [vmem:[%s14705_s5 + $0x190] ss:$8 sps:$4 sm:$0xff]  }
 0x14f   :  { %983 = vmatprep.subr.bf16.mxu1 %v11828_v2 }
 0x151   :  { %1107 = vmatpush1.bf16.msra.mxu0 %v11034_v47  ;;  %v11088_v47 = vld [vmem:[%s14705_s5 + $0x108] ss:$8 sps:$4 sm:$0xff]  }
 0x152   :  { %984 = vmatpush2.bf16.msra.mxu1 %v11005_v16  ;;  %9220 = vmatprep.subr.msk.bf16.mxu0 %vm1085_vm4, %v9219_v54  ;;  %v11058_v16 = vld [vmem:[%s14705_s5 + $0x24] ss:$8 sps:$4 sm:$0xff]  }
 0x153   :  { %9245 = vmatprep.subr.msk.bf16.mxu1 %vm1085_vm4, %v9244_v20  ;;  %v11064_v20 = vld [vmem:[%s14705_s5 + $0x14] ss:$8 sps:$4 sm:$0xff]  }
 0x1e9   :  { %v850_v27 = vpop.f32.mrf.mxu1 }
 0x1eb   :  { %v852_v28 = vpop.f32.mrf.mxu1 }
 0x1ed   :  { %v854_v29 = vpop.f32.mrf.mxu1 }
 0x1ee   :  { %v859_v35 = vpack.c.bf16 %v854_v29, %v850_v27  ;;  %v11068_v27 = vld [vmem:[%s14705_s5] ss:$8 sps:$4 sm:$0xff]   ;;  %v9269_v29 = vcombine.high %v9257_v26, %v9257_v26 }
 0x1ef   :  { %v856_v32 = vpop.f32.mrf.mxu1 }
 0x1f0   :  { %v860_v33 = vpack.c.bf16 %v856_v32, %v852_v28  ;;  %v11071_v28 = vld [vmem:[%s14705_s5 + $0x160] ss:$8 sps:$4 sm:$0xff]  }
 0x1f2   :  { %9182 = vmatprep.mubr.msk.bf16.mxu1 %vm945_vm5, %v860_v33 }
 0x1f3   :  { %986 = vmatmul.mubr.bf16.vlgmr.msra.gmra.mxu1 %v859_v35 }
 0x1f4   :  { %1326 = vmatpush1.bf16.msra.mxu1 %v1316_v31  ;;  %1353 = vmatprep.mubr.bf16.mxu1 %v11828_v2 }
 0x1f5   :  { %1327 = vmatprep.subr.bf16.mxu1 %v11015_v34 }
 0x1f8   :  { %1328 = vmatpush1.bf16.msra.mxu1 %v11013_v36  ;;  %v1442_v36 = vsel %vm1085_vm4, %v9268_v30, 0 }
 0x1f9   :  { %1329 = vmatprep.subr.bf16.mxu1 %v11021_v37  ;;  %v11078_v37 = vld [vmem:[%s14705_s5 + $0x14c] ss:$8 sps:$4 sm:$0xff]  }
 0x1fc   :  { %1330 = vmatpush1.bf16.msra.mxu1 %v11019_v38 }
 0x1fd   :  { %1331 = vmatprep.subr.bf16.mxu1 %v11027_v40  ;;  %v11081_v40 = vld [vmem:[%s14705_s5 + $0x13c] ss:$8 sps:$4 sm:$0xff]  }
 0x200   :  { %1332 = vmatpush1.bf16.msra.mxu1 %v11025_v41  ;;  %v11084_v41 = vld [vmem:[%s14705_s5 + $0x12c] ss:$8 sps:$4 sm:$0xff]  }
 0x201   :  { %1333 = vmatprep.subr.bf16.mxu1 %v11033_v44  ;;  %v11087_v44 = vld [vmem:[%s14705_s5 + $0x11c] ss:$8 sps:$4 sm:$0xff]  }
 0x204   :  { %1334 = vmatpush1.bf16.msra.mxu1 %v11031_v46  ;;  %v11090_v46 = vld [vmem:[%s14705_s5 + $0x10c] ss:$8 sps:$4 sm:$0xff]  }
 0x205   :  { %1335 = vmatprep.subr.bf16.mxu1 %v11039_v50 }
 0x208   :  { %1336 = vmatpush1.bf16.msra.mxu1 %v11037_v49 }
 0x209   :  { %9295 = vmatprep.subr.msk.bf16.mxu1 %vm1085_vm4, %v9294_v55 }
 0x2b3   :  { %v987_v51 = vpop.f32.mrf.mxu1 }
 0x2b4   :  { %995 = vst.msk [vmem:[#allocation2] sm:$0xff] %vm994_vm6, %v987_v51 }
 0x2b5   :  { %v989_v56 = vpop.f32.mrf.mxu1 }
 0x2b7   :  { %v990_v57 = vpop.f32.mrf.mxu1 }
 0x2b8   :  { %997 = vst.msk [vmem:[#allocation2 + $0x8] sm:$0x3f] %vm996_vm7, %v990_v57 }
 0x2b9   :  { %v992_v58 = vpop.f32.mrf.mxu1 }
 0x2bb   :  { %v998_v31 = vld [vmem:[#allocation2] sm:$0xff] }
 0x2bf   :  { %v1012_v61 = vld [vmem:[#allocation2 + $0x1] sm:$0xff]  ;;  %v1013_v62 = vld [vmem:[#allocation2 + $0x9] sm:$0x3]  ;;  %v1495_v35 = vld [vmem:[#allocation2 + $0xc] sm:$0x3] }
 0x2c0   :  { %v1242_v0 = vld [vmem:[#allocation2 + $0x2] sm:$0xff]  ;;  %v1014_v1 = vpack.c.bf16 %v1013_v62, %v1012_v61  ;;  %v1243_v5 = vld [vmem:[#allocation2 + $0xa] sm:$0x3] }
 0x2c1   :  { %v1244_v7 = vpack.c.bf16 %v1243_v5, %v1242_v0  ;;  %v999_v32 = vld [vmem:[#allocation2 + $0x8] sm:$0x3]  ;;  %v1369_v49 = vld [vmem:[#allocation2 + $0xb] sm:$0x3] }
 0x2c2   :  { %9207 = vmatmul.mubr.msk.bf16.vlgmr.msra.gmra.mxu0 %vm994_vm6, %v1014_v1  ;;  %v1494_v33 = vld [vmem:[#allocation2 + $0x4] sm:$0xff]  ;;  %v1000_v34 = vpack.c.bf16 %v999_v32, %v998_v31 }
 0x2c3   :  { %1204 = vmatpush1.bf16.msra.mxu0 %v1194_v3  ;;  %9246 = vmatmul.mubr.msk.bf16.vlgmr.msra.gmra.mxu1 %vm994_vm6, %v1244_v7  ;;  %v1496_v38 = vpack.c.bf16 %v1495_v35, %v1494_v33  ;;  %v1368_v48 = vld [vmem:[#allocation2 + $0x3] sm:$0xff] }
 0x2c4   :  { %1578 = vmatpush1.bf16.msra.mxu1 %v1568_v8  ;;  %1205 = vmatprep.subr.bf16.mxu0 %v11046_v6  ;;  %v1370_v50 = vpack.c.bf16 %v1369_v49, %v1368_v48  ;;  %v11098_v48 = vld [vmem:[%s14708_s8] sm:$0xff]   ;;  %v11099_v49 = vld [vmem:[%s14708_s8 + $0x48] sm:$0xff]  }
 0x2c5   :  { %1579 = vmatprep.subr.bf16.mxu1 %v11049_v9  ;;  %1231 = vmatprep.mubr.bf16.mxu0 %v11828_v2  ;;  %v1620_v9 = vld [vmem:[%s14706_s6] sm:$0x3] }
 0x2c6   :  { %1605 = vmatprep.mubr.bf16.mxu1 %v11828_v2 }
 0x2c7   :  { %1206 = vmatpush1.bf16.msra.mxu0 %v11044_v10 }
 0x2c8   :  { %1580 = vmatpush1.bf16.msra.mxu1 %v11047_v11  ;;  %1207 = vmatprep.subr.bf16.mxu0 %v11052_v12 }
 0x2c9   :  { %1581 = vmatprep.subr.bf16.mxu1 %v11055_v13 }
 0x2cb   :  { %1208 = vmatpush1.bf16.msra.mxu0 %v11050_v14 }
 0x2cc   :  { %1582 = vmatpush1.bf16.msra.mxu1 %v11053_v15  ;;  %1209 = vmatprep.subr.bf16.mxu0 %v11058_v16  ;;  %v1625_v15 = vrot.slane %v1620_v9, %v12177_v63 }
 0x2cd   :  { %1583 = vmatprep.subr.bf16.mxu1 %v11061_v17 }
 0x2cf   :  { %1210 = vmatpush1.bf16.msra.mxu0 %v11056_v18 }
 0x2d0   :  { %1584 = vmatpush1.bf16.msra.mxu1 %v11059_v19  ;;  %1211 = vmatprep.subr.bf16.mxu0 %v11064_v20 }
 0x2d1   :  { %1585 = vmatprep.subr.bf16.mxu1 %v11067_v21  ;;  %v1629_v21 = vrot.slane %v1620_v9, %v12179_v4 }
 0x2d3   :  { %1212 = vmatpush1.bf16.msra.mxu0 %v11062_v22 }
 0x2d4   :  { %1586 = vmatpush1.bf16.msra.mxu1 %v11065_v23  ;;  %1213 = vmatprep.subr.bf16.mxu0 %v11070_v24 }
 0x2d5   :  { %1587 = vmatprep.subr.bf16.mxu1 %v11073_v25 }
 0x2d7   :  { %1214 = vmatpush1.bf16.msra.mxu0 %v11068_v27 }
 0x2d8   :  { %1588 = vmatpush1.bf16.msra.mxu1 %v11071_v28  ;;  %9270 = vmatprep.subr.msk.bf16.mxu0 %vm1085_vm4, %v9269_v29 }
 0x2da   :  { %9221 = vmatmul.mubr.msk.bf16.vlgmr.msra.gmra.mxu0 %vm994_vm6, %v1000_v34 }
 0x2db   :  { %9296 = vmatmul.mubr.msk.bf16.vlgmr.msra.gmra.mxu1 %vm994_vm6, %v1496_v38  ;;  %1452 = vmatpush1.bf16.msra.mxu0 %v1442_v36 }
 0x2dc   :  { %1453 = vmatprep.subr.bf16.mxu0 %v11078_v37  ;;  %1479 = vmatprep.mubr.bf16.mxu0 %v11828_v2 }
 0x2df   :  { %1454 = vmatpush1.bf16.msra.mxu0 %v11076_v39 }
 0x2e0   :  { %1455 = vmatprep.subr.bf16.mxu0 %v11081_v40  ;;  %v1642_v40 = vld [vmem:[%s14707_s7] sm:$0x7] }
 0x2e3   :  { %1456 = vmatpush1.bf16.msra.mxu0 %v11079_v42  ;;  %v11091_v42 = vld [vmem:[%s14708_s8 + $0x38] sm:$0xff]  }
 0x2e4   :  { %1457 = vmatprep.subr.bf16.mxu0 %v11084_v41  ;;  %v11092_v41 = vld [vmem:[%s14708_s8 + $0x30] sm:$0xff]  }
 0x2e7   :  { %1458 = vmatpush1.bf16.msra.mxu0 %v11082_v43  ;;  %v11093_v43 = vld [vmem:[%s14708_s8 + $0x28] sm:$0xff]  }
 0x2e8   :  { %1459 = vmatprep.subr.bf16.mxu0 %v11087_v44  ;;  %v11094_v44 = vld [vmem:[%s14708_s8 + $0x20] sm:$0xff]  }
 0x2eb   :  { %1460 = vmatpush1.bf16.msra.mxu0 %v11085_v45  ;;  %v11095_v45 = vld [vmem:[%s14708_s8 + $0x18] sm:$0xff]  }
 0x2ec   :  { %1461 = vmatprep.subr.bf16.mxu0 %v11090_v46  ;;  %v11096_v46 = vld [vmem:[%s14708_s8 + $0x10] sm:$0xff]  }
 0x2ef   :  { %1462 = vmatpush1.bf16.msra.mxu0 %v11088_v47  ;;  %v11097_v47 = vld [vmem:[%s14708_s8 + $0x8] sm:$0xff]  }
 0x2f2   :  { %9271 = vmatmul.mubr.msk.bf16.vlgmr.msra.gmra.mxu0 %vm994_vm6, %v1370_v50  ;;  %v11100_v50 = vld [vmem:[%s14708_s8 + $0x40] sm:$0xff]  }
 0x2f3   :  { %1686 = vmatprep.mubr.bf16.mxu0 %v11828_v2 }
 0x382   :  { %v1126_v52 = vpop.f32.mrf.mxu0 }
 0x383   :  { %v1355_v55 = vpop.f32.mrf.mxu1 }
 0x384   :  { %v1128_v53 = vpop.f32.mrf.mxu0 }
 0x385   :  { %v1357_v56 = vpop.f32.mrf.mxu1 }
 0x386   :  { %v1130_v54 = vpop.f32.mrf.mxu0 }
 0x387   :  { %v1359_v58 = vpop.f32.mrf.mxu1 }
 0x388   :  { %v1132_v51 = vpop.f32.mrf.mxu0 }
 0x389   :  { %v1361_v60 = vpop.f32.mrf.mxu1 }
 0x39a   :  { %v1233_v57 = vpop.f32.mrf.mxu0 }
 0x39b   :  { %v1234_v62 = vadd.f32 %v1233_v57, %v1126_v52  ;;  %v1607_v0 = vpop.f32.mrf.mxu1  ;;  %v11101_v52 = vld [vmem:[%s14709_s9 + $0x48] sm:$0xff]  }
 0x39c   :  { %v1235_v59 = vpop.f32.mrf.mxu0 }
 0x39d   :  { %v1236_v1 = vadd.f32 %v1235_v59, %v1128_v53  ;;  %v1364_v6 = vadd.f32 %v1355_v55, %v1234_v62  ;;  %v1609_v7 = vpop.f32.mrf.mxu1  ;;  %v11829_v53 = vmov 0.0   ;;  %v11105_v55 = vld [vmem:[%s14709_s9 + $0x38] sm:$0xff]   ;;  %v11104_v62 = vld [vmem:[%s14709_s9 + $0x68] sm:$0xff]  }
 0x39e   :  { %v1237_v61 = vpop.f32.mrf.mxu0  ;;  %10584 = vmatprep.subr.bf16.mxu1 %v11829_v53  ;;  %10594 = vmatprep.mubr.msk.bf16.mxu1 %vm11830_vm11, %v11829_v53 }
 0x39f   :  { %v1238_v5 = vadd.f32 %v1237_v61, %v1130_v54  ;;  %v1365_v12 = vadd.f32 %v1357_v56, %v1236_v1  ;;  %v1611_v18 = vpop.f32.mrf.mxu1  ;;  %10585 = vmatpush3.bf16.msra.mxu1 %v11101_v52  ;;  %v11103_v54 = vld [vmem:[%s14709_s9 + $0x40] sm:$0xff]   ;;  %v11107_v1 = vld [vmem:[%s14709_s9 + $0x30] sm:$0xff]  }
 0x3a0   :  { %v1239_v3 = vpop.f32.mrf.mxu0  ;;  %10586 = vmatprep.subr.bf16.mxu1 %v11829_v53  ;;  %v9380_v52 = vld [vmem:[%s14700_s0 + $0x20] sm:$0xff] }
 0x3a1   :  { %v1240_v10 = vadd.f32 %v1239_v3, %v1132_v51  ;;  %v1366_v17 = vadd.f32 %v1359_v58, %v1238_v5  ;;  %v1613_v28 = vpop.f32.mrf.mxu1  ;;  %v11102_v58 = vld [vmem:[%s14709_s9 + $0x70] sm:$0xff]   ;;  %v11108_v3 = vld [vmem:[%s14709_s9 + $0x58] sm:$0xff]   ;;  %v11109_v5 = vld [vmem:[%s14709_s9 + $0x28] sm:$0xff]  }
 0x3a3   :  { %v1367_v23 = vadd.f32 %v1361_v60, %v1240_v10  ;;  %10587 = vmatpush3.bf16.msra.mxu1 %v11103_v54  ;;  %v9381_v54 = vld [vmem:[%s14700_s0 + $0x28] sm:$0xff] }
 0x3a4   :  { %10588 = vmatprep.subr.bf16.mxu1 %v11829_v53 }
 0x3a7   :  { %10589 = vmatpush3.bf16.msra.mxu1 %v11105_v55  ;;  %v11167_v55 = vld [vmem:[%s14701_s1 + $0x174] ss:$8 sps:$4 sm:$0xff]  }
 0x3a8   :  { %10590 = vmatprep.subr.bf16.mxu1 %v11829_v53 }
 0x3ab   :  { %10591 = vmatpush3.bf16.msra.mxu1 %v11107_v1  ;;  %v9383_v1 = vld [vmem:[%s14700_s0 + $0x38] sm:$0xf] }
 0x3ac   :  { %10592 = vmatprep.subr.bf16.mxu1 %v11829_v53 }
 0x3af   :  { %10593 = vmatpush3.bf16.msra.mxu1 %v11109_v5  ;;  %v11144_v5 = vld [vmem:[%s14701_s1 + $0x80] ss:$8 sps:$4 sm:$0xff]  }
 0x3b0   :  { %10598 = vmatprep.subr.bf16.mxu1 %v11829_v53 }
 0x3b2   :  { %v1481_v8 = vpop.f32.mrf.mxu0 }
 0x3b3   :  { %v1490_v11 = vadd.f32 %v1481_v8, %v1364_v6  ;;  %v11110_v6 = vld [vmem:[%s14709_s9 + $0x50] sm:$0xff]  }
 0x3b4   :  { %v1483_v13 = vpop.f32.mrf.mxu0 }
 0x3b5   :  { %v1616_v14 = vadd.f32 %v1607_v0, %v1490_v11  ;;  %v1491_v16 = vadd.f32 %v1483_v13, %v1365_v12  ;;  %v11106_v0 = vld [vmem:[%s14709_s9 + $0x60] sm:$0xff]  }
 0x3b6   :  { %v1485_v19 = vpop.f32.mrf.mxu0  ;;  %v11111_v11 = vld [vmem:[%s14709_s9 + $0x20] sm:$0xff]  }
 0x3b7   :  { %v1617_v20 = vadd.f32 %v1609_v7, %v1491_v16  ;;  %v1492_v22 = vadd.f32 %v1485_v19, %v1366_v17  ;;  %v1632_v25 = vadd.f32 %v1625_v15, %v1616_v14  ;;  %v11112_v14 = vld [vmem:[%s14709_s9 + $0xc0] sm:$0xff]   ;;  %v11113_v17 = vld [vmem:[%s14709_s9 + $0x18] sm:$0xff]   ;;  %v11115_v19 = vld [vmem:[%s14709_s9 + $0x10] sm:$0xff]  }
 0x3b8   :  { %v1487_v24 = vpop.f32.mrf.mxu0 }
 0x3b9   :  { %v1618_v26 = vadd.f32 %v1611_v18, %v1492_v22  ;;  %v1493_v27 = vadd.f32 %v1487_v24, %v1367_v23  ;;  %v1633_v29 = vadd.f32 %v1629_v21, %v1617_v20  ;;  %v1636_v33 = vmax.f32 %v1632_v25, 0.0  ;;  %v11114_v18 = vld [vmem:[%s14709_s9 + $0xb8] sm:$0xff]   ;;  %v11116_v20 = vld [vmem:[%s14709_s9 + $0xb0] sm:$0xff]   ;;  %v11118_v22 = vld [vmem:[%s14709_s9 + $0xa8] sm:$0xff]  }
 0x3ba   :  { %v11119_v23 = vld [vmem:[%s14709_s9] sm:$0xff]   ;;  %v11131_v25 = vld [vmem:[%s14701_s1 + $0x54] ss:$8 sps:$4 sm:$0xff]  }
 0x3bb   :  { %v1634_v30 = vadd.f32 %v1625_v15, %v1618_v26  ;;  %v1619_v32 = vadd.f32 %v1613_v28, %v1493_v27  ;;  %v1637_v34 = vmax.f32 %v1633_v29, 0.0  ;;  %v11120_v24 = vld [vmem:[%s14709_s9 + $0xa0] sm:$0xff]   ;;  %v11121_v28 = vld [vmem:[%s14709_s9 + $0x98] sm:$0xff]  }
 0x3bd   :  { %v1638_v35 = vmax.f32 %v1634_v30, 0.0  ;;  %v1635_v31 = vadd.f32 %v1629_v21, %v1619_v32  ;;  %v11117_v21 = vld [vmem:[%s14709_s9 + $0x8] sm:$0xff]   ;;  %v11129_v32 = vld [vmem:[%s14701_s1 + $0x50] ss:$8 sps:$4 sm:$0xff]  }
 0x3bf   :  { %v1639_v36 = vmax.f32 %v1635_v31, 0.0  ;;  %v1640_v37 = vpack.c.bf16 %v1638_v35, %v1636_v33  ;;  %v11137_v33 = vld [vmem:[%s14701_s1 + $0x44] ss:$8 sps:$4 sm:$0xff]   ;;  %v11122_v35 = vld [vmem:[%s14709_s9 + $0x90] sm:$0xff]   ;;  %v11135_v31 = vld [vmem:[%s14701_s1 + $0x40] ss:$8 sps:$4 sm:$0xff]  }
 0x3c1   :  { %v1641_v38 = vpack.c.bf16 %v1639_v36, %v1637_v34  ;;  %v1649_v39 = vsel %vm1647_vm8, %v1640_v37, 0  ;;  %v11143_v34 = vld [vmem:[%s14701_s1 + $0x34] ss:$8 sps:$4 sm:$0xff]   ;;  %v11123_v36 = vld [vmem:[%s14709_s9 + $0x88] sm:$0xff]   ;;  %v11141_v37 = vld [vmem:[%s14701_s1 + $0x30] ss:$8 sps:$4 sm:$0xff]  }
 0x3c3   :  { %9297 = vmatprep.subr.msk.bf16.mxu0 %vm1647_vm8, %v1641_v38  ;;  %v11149_v38 = vld [vmem:[%s14701_s1 + $0x24] ss:$8 sps:$4 sm:$0xff]  }
 0x3c4   :  { %1669 = vmatpush1.bf16.msra.mxu0 %v1649_v39  ;;  %v11124_v39 = vld [vmem:[%s14709_s9 + $0x80] sm:$0xff]  }
 0x3c5   :  { %1781 = vmatprep.subr.bf16.mxu0 %v11828_v2 }
 0x3c7   :  { %9298 = vmatmul.mubr.msk.bf16.vlgmr.msra.gmra.mxu0 %vm1643_vm9, %v1642_v40  ;;  %v11147_v40 = vld [vmem:[%s14701_s1 + $0x20] ss:$8 sps:$4 sm:$0xff]  }
 0x3c8   :  { %1782 = vmatpush1.bf16.msra.mxu0 %v11091_v42  ;;  %v11155_v42 = vld [vmem:[%s14701_s1 + $0x14] ss:$8 sps:$4 sm:$0xff]  }
 0x3c9   :  { %1783 = vmatprep.subr.bf16.mxu0 %v11828_v2 }
 0x3cc   :  { %1784 = vmatpush1.bf16.msra.mxu0 %v11092_v41  ;;  %v11125_v41 = vld [vmem:[%s14709_s9 + $0x78] sm:$0xff]  }
 0x3cd   :  { %1785 = vmatprep.subr.bf16.mxu0 %v11828_v2 }
 0x3d0   :  { %1786 = vmatpush1.bf16.msra.mxu0 %v11093_v43  ;;  %v11128_v43 = vld [vmem:[%s14701_s1 + $0xb4] ss:$8 sps:$4 sm:$0xff]  }
 0x3d1   :  { %1787 = vmatprep.subr.bf16.mxu0 %v11828_v2 }
 0x3d4   :  { %1788 = vmatpush1.bf16.msra.mxu0 %v11094_v44  ;;  %v11153_v44 = vld [vmem:[%s14701_s1 + $0x10] ss:$8 sps:$4 sm:$0xff]  }
 0x3d5   :  { %1789 = vmatprep.subr.bf16.mxu0 %v11828_v2 }
 0x3d8   :  { %1790 = vmatpush1.bf16.msra.mxu0 %v11095_v45 }
 0x3d9   :  { %1791 = vmatprep.subr.bf16.mxu0 %v11828_v2 }
 0x3dc   :  { %1792 = vmatpush1.bf16.msra.mxu0 %v11096_v46  ;;  %v11161_v46 = vld [vmem:[%s14701_s1 + $0x4] ss:$8 sps:$4 sm:$0xff]  }
 0x3dd   :  { %1793 = vmatprep.subr.bf16.mxu0 %v11828_v2 }
 0x3e0   :  { %1794 = vmatpush1.bf16.msra.mxu0 %v11097_v47  ;;  %v11126_v47 = vld [vmem:[%s14701_s1 + $0xb0] ss:$8 sps:$4 sm:$0xff]  }
 0x3e1   :  { %1795 = vmatprep.subr.bf16.mxu0 %v11828_v2 }
 0x3e4   :  { %1796 = vmatpush1.bf16.msra.mxu0 %v11098_v48  ;;  %v11134_v48 = vld [vmem:[%s14701_s1 + $0xa4] ss:$8 sps:$4 sm:$0xff]  }
 0x3e5   :  { %1809 = vmatprep.subr.bf16.mxu0 %v11828_v2 }
 0x3e8   :  { %1810 = vmatpush2.bf16.msra.mxu0 %v11099_v49 }
 0x3e9   :  { %1811 = vmatprep.subr.bf16.mxu0 %v11828_v2 }
 0x3ec   :  { %1812 = vmatpush2.bf16.msra.mxu0 %v11100_v50  ;;  %v11159_v50 = vld [vmem:[%s14701_s1] ss:$8 sps:$4 sm:$0xff]  }
 0x3ed   :  { %10612 = vmatprep.subr.bf16.mxu0 %v11829_v53 }
 0x487   :  { %v1688_v51 = vpop.f32.mrf.mxu0 }
 0x488   :  { %v1695_v59 = vpack.c.bf16 %v1688_v51, %v1688_v51  ;;  %v11132_v51 = vld [vmem:[%s14701_s1 + $0xa0] ss:$8 sps:$4 sm:$0xff]  }
 0x489   :  { %v1690_v56 = vpop.f32.mrf.mxu0 }
 0x48a   :  { %v1696_v57 = vpack.c.bf16 %v1690_v56, %v1690_v56  ;;  %v2266_v56 = vpack.c.bf16 %v9381_v54, %v9380_v52  ;;  %v11206_v52 = vld [vmem:[%s14701_s1 + $0x1b4] ss:$8 sps:$4 sm:$0xff]  }
 0x48b   :  { %v1692_v60 = vpop.f32.mrf.mxu0 }
 0x48c   :  { %9309 = vmatprep.mubr.msk.bf16.mxu0 %vm1777_vm10, %v1696_v57  ;;  %v11140_v57 = vld [vmem:[%s14701_s1 + $0x94] ss:$8 sps:$4 sm:$0xff]   ;;  %v11138_v60 = vld [vmem:[%s14701_s1 + $0x90] ss:$8 sps:$4 sm:$0xff]  }
 0x48d   :  { %v1693_v61 = vpop.f32.mrf.mxu0  ;;  %1814 = vmatmul.mubr.bf16.vlgmr.msra.gmra.mxu0 %v1695_v59  ;;  %v11173_v59 = vld [vmem:[%s14701_s1 + $0x164] ss:$8 sps:$4 sm:$0xff]  }
 0x48e   :  { %10613 = vmatpush3.bf16.msra.mxu0 %v11102_v58  ;;  %10622 = vmatprep.mubr.msk.bf16.mxu0 %vm11830_vm11, %v11829_v53  ;;  %v11165_v58 = vld [vmem:[%s14701_s1 + $0x170] ss:$8 sps:$4 sm:$0xff]   ;;  %v11146_v61 = vld [vmem:[%s14701_s1 + $0x84] ss:$8 sps:$4 sm:$0xff]  }
 0x48f   :  { %10614 = vmatprep.subr.bf16.mxu0 %v11829_v53 }
 0x492   :  { %10615 = vmatpush3.bf16.msra.mxu0 %v11104_v62  ;;  %v11171_v62 = vld [vmem:[%s14701_s1 + $0x160] ss:$8 sps:$4 sm:$0xff]  }
 0x493   :  { %10616 = vmatprep.subr.bf16.mxu0 %v11829_v53 }
 0x496   :  { %10617 = vmatpush3.bf16.msra.mxu0 %v11106_v0  ;;  %v9382_v0 = vld [vmem:[%s14700_s0 + $0x30] sm:$0xff] }
 0x497   :  { %10618 = vmatprep.subr.bf16.mxu0 %v11829_v53 }
 0x49a   :  { %10619 = vmatpush3.bf16.msra.mxu0 %v11108_v3  ;;  %v11179_v3 = vld [vmem:[%s14701_s1 + $0x154] ss:$8 sps:$4 sm:$0xff]  }
 0x49b   :  { %10620 = vmatprep.subr.bf16.mxu0 %v11829_v53 }
 0x49e   :  { %10621 = vmatpush3.bf16.msra.mxu0 %v11110_v6  ;;  %v2267_v6 = vpack.c.bf16 %v9383_v1, %v9382_v0  ;;  %v9490_v1 = vld [vmem:[%s14700_s0 + $0x34] sm:$0xff] }
 0x49f   :  { %10640 = vmatprep.subr.bf16.mxu0 %v11829_v53 }
 0x54d   :  { %v1815_v7 = vpop.f32.mrf.mxu0 }
 0x54e   :  { %1822 = vst.msk [vmem:[#allocation3] sm:$0x1f] %vm1821_vm12, %v1815_v7  ;;  %v11152_v7 = vld [vmem:[%s14701_s1 + $0x74] ss:$8 sps:$4 sm:$0xff]  }
 0x54f   :  { %v1817_v8 = vpop.f32.mrf.mxu0 }
 0x550   :  { %v11177_v8 = vld [vmem:[%s14701_s1 + $0x150] ss:$8 sps:$4 sm:$0xff]  }
 0x551   :  { %v1818_v9 = vpop.f32.mrf.mxu0 }
 0x552   :  { %v11185_v9 = vld [vmem:[%s14701_s1 + $0x144] ss:$8 sps:$4 sm:$0xff]  }
 0x553   :  { %v1819_v10 = vpop.f32.mrf.mxu0 }
 0x554   :  { %v11150_v10 = vld [vmem:[%s14701_s1 + $0x70] ss:$8 sps:$4 sm:$0xff]  }
 0x555   :  { %v1835_v12 = vld [vmem:[#allocation3 + $0x1] sm:$0x1]  ;;  %v1995_v13 = vld [vmem:[#allocation3 + $0x2] sm:$0x1]  ;;  %v1823_v26 = vld [vmem:[#allocation3] sm:$0x1] }
 0x556   :  { %v1836_v15 = vpack.c.bf16 %v1835_v12, %v1835_v12  ;;  %v1996_v16 = vpack.c.bf16 %v1995_v13, %v1995_v13  ;;  %v2169_v27 = vld [vmem:[#allocation3 + $0x4] sm:$0x1]  ;;  %v1824_v29 = vpack.c.bf16 %v1823_v26, %v1823_v26  ;;  %v2082_v45 = vld [vmem:[#allocation3 + $0x3] sm:$0x1]  ;;  %v11191_v13 = vld [vmem:[%s14701_s1 + $0x134] ss:$8 sps:$4 sm:$0xff]  }
 0x557   :  { %v2170_v30 = vpack.c.bf16 %v2169_v27, %v2169_v27  ;;  %v2083_v49 = vpack.c.bf16 %v2082_v45, %v2082_v45  ;;  %v11183_v12 = vld [vmem:[%s14701_s1 + $0x140] ss:$8 sps:$4 sm:$0xff]   ;;  %v9386_v27 = vld [vmem:[%s14700_s0 + $0x31] sm:$0xff] }
 0x558   :  { %10595 = vmatmul.mubr.msk.bf16.vlgmr.msra.gmra.mxu1 %vm1878_vm13, %v1836_v15  ;;  %10623 = vmatmul.mubr.msk.bf16.vlgmr.msra.gmra.mxu0 %vm1878_vm13, %v1996_v16  ;;  %v9384_v15 = vld [vmem:[%s14700_s0 + $0x21] sm:$0xff]  ;;  %v9385_v16 = vld [vmem:[%s14700_s0 + $0x29] sm:$0xff] }
 0x559   :  { %10599 = vmatpush3.bf16.msra.mxu1 %v11111_v11  ;;  %10641 = vmatpush3.bf16.msra.mxu0 %v11112_v14  ;;  %v11158_v11 = vld [vmem:[%s14701_s1 + $0x64] ss:$8 sps:$4 sm:$0xff]   ;;  %v11156_v14 = vld [vmem:[%s14701_s1 + $0x60] ss:$8 sps:$4 sm:$0xff]  }
 0x55a   :  { %10600 = vmatprep.subr.bf16.mxu1 %v11829_v53  ;;  %10642 = vmatprep.subr.bf16.mxu0 %v11829_v53  ;;  %v11168_v26 = vld [vmem:[%s14701_s1 + $0x100] ss:$8 sps:$4 sm:$0xff]  }
 0x55b   :  { %10608 = vmatprep.mubr.msk.bf16.mxu1 %vm11830_vm11, %v11829_v53  ;;  %10650 = vmatprep.mubr.msk.bf16.mxu0 %vm11830_vm11, %v11829_v53 }
 0x55d   :  { %10601 = vmatpush3.bf16.msra.mxu1 %v11113_v17  ;;  %10643 = vmatpush3.bf16.msra.mxu0 %v11114_v18  ;;  %v11164_v17 = vld [vmem:[%s14701_s1 + $0x114] ss:$8 sps:$4 sm:$0xff]   ;;  %v11189_v18 = vld [vmem:[%s14701_s1 + $0x130] ss:$8 sps:$4 sm:$0xff]  }
 0x55e   :  { %10602 = vmatprep.subr.bf16.mxu1 %v11829_v53  ;;  %10644 = vmatprep.subr.bf16.mxu0 %v11829_v53 }
 0x561   :  { %10603 = vmatpush3.bf16.msra.mxu1 %v11115_v19  ;;  %10645 = vmatpush3.bf16.msra.mxu0 %v11116_v20  ;;  %v11197_v19 = vld [vmem:[%s14701_s1 + $0x124] ss:$8 sps:$4 sm:$0xff]   ;;  %v2284_v20 = vpack.c.bf16 %v9385_v16, %v9384_v15  ;;  %v11218_v15 = vld [vmem:[%s14704_s4 + $0x30] sm:$0xff]  }
 0x562   :  { %10604 = vmatprep.subr.bf16.mxu1 %v11829_v53  ;;  %10646 = vmatprep.subr.bf16.mxu0 %v11829_v53 }
 0x565   :  { %10605 = vmatpush3.bf16.msra.mxu1 %v11117_v21  ;;  %10647 = vmatpush3.bf16.msra.mxu0 %v11118_v22  ;;  %v11162_v21 = vld [vmem:[%s14701_s1 + $0x110] ss:$8 sps:$4 sm:$0xff]   ;;  %v11170_v22 = vld [vmem:[%s14701_s1 + $0x104] ss:$8 sps:$4 sm:$0xff]  }
 0x566   :  { %10606 = vmatprep.subr.bf16.mxu1 %v11829_v53  ;;  %10648 = vmatprep.subr.bf16.mxu0 %v11829_v53 }
 0x569   :  { %10607 = vmatpush3.bf16.msra.mxu1 %v11119_v23  ;;  %10649 = vmatpush3.bf16.msra.mxu0 %v11120_v24  ;;  %v11195_v23 = vld [vmem:[%s14701_s1 + $0x120] ss:$8 sps:$4 sm:$0xff]  }
 0x56a   :  { %10626 = vmatprep.subr.bf16.mxu1 %v11829_v53  ;;  %2487 = vmatprep.subr.bf16.mxu0 %v11131_v25  ;;  %v9458_v24 = vld [vmem:[%s14700_s0 + $0x23] sm:$0xff]  ;;  %v9459_v25 = vld [vmem:[%s14700_s0 + $0x2b] sm:$0xff] }
 0x56c   :  { %10609 = vmatmul.mubr.msk.bf16.vlgmr.msra.gmra.mxu1 %vm1878_vm13, %v1824_v29  ;;  %10651 = vmatmul.mubr.msk.bf16.vlgmr.msra.gmra.mxu0 %vm1878_vm13, %v2170_v30  ;;  %v2685_v29 = vpack.c.bf16 %v9459_v25, %v9458_v24  ;;  %v11176_v30 = vld [vmem:[%s14701_s1 + $0xf4] ss:$8 sps:$4 sm:$0xff]  }
 0x56d   :  { %10627 = vmatpush3.bf16.msra.mxu1 %v11121_v28  ;;  %10636 = vmatprep.mubr.msk.bf16.mxu1 %vm11830_vm11, %v11829_v53  ;;  %v9387_v28 = vld [vmem:[%s14700_s0 + $0x39] sm:$0xf] }
 0x56e   :  { %10628 = vmatprep.subr.bf16.mxu1 %v11829_v53  ;;  %2488 = vmatpush1.bf16.msra.mxu0 %v11129_v32  ;;  %v2285_v32 = vpack.c.bf16 %v9387_v28, %v9386_v27  ;;  %v11222_v27 = vld [vmem:[%s14704_s4 + $0x10] sm:$0xff]  }
 0x56f   :  { %2489 = vmatprep.subr.bf16.mxu0 %v11137_v33  ;;  %2515 = vmatprep.mubr.bf16.mxu0 %v11828_v2  ;;  %v11174_v33 = vld [vmem:[%s14701_s1 + $0xf0] ss:$8 sps:$4 sm:$0xff]  }
 0x571   :  { %10629 = vmatpush3.bf16.msra.mxu1 %v11122_v35  ;;  %v11182_v35 = vld [vmem:[%s14701_s1 + $0xe4] ss:$8 sps:$4 sm:$0xff]  }
 0x572   :  { %10630 = vmatprep.subr.bf16.mxu1 %v11829_v53  ;;  %2490 = vmatpush1.bf16.msra.mxu0 %v11135_v31  ;;  %v9460_v31 = vld [vmem:[%s14700_s0 + $0x33] sm:$0xff] }
 0x573   :  { %2491 = vmatprep.subr.bf16.mxu0 %v11143_v34  ;;  %v9461_v34 = vld [vmem:[%s14700_s0 + $0x3b] sm:$0xf] }
 0x575   :  { %10631 = vmatpush3.bf16.msra.mxu1 %v11123_v36  ;;  %v11180_v36 = vld [vmem:[%s14701_s1 + $0xe0] ss:$8 sps:$4 sm:$0xff]  }
 0x576   :  { %10632 = vmatprep.subr.bf16.mxu1 %v11829_v53  ;;  %2492 = vmatpush1.bf16.msra.mxu0 %v11141_v37  ;;  %v2686_v37 = vpack.c.bf16 %v9461_v34, %v9460_v31  ;;  %v2256_v31 = vld [vmem:[%s14710_s10] sm:$0x1] }
 0x577   :  { %2493 = vmatprep.subr.bf16.mxu0 %v11149_v38  ;;  %v11188_v38 = vld [vmem:[%s14701_s1 + $0xd4] ss:$8 sps:$4 sm:$0xff]  }
 0x579   :  { %10633 = vmatpush3.bf16.msra.mxu1 %v11124_v39  ;;  %v11186_v39 = vld [vmem:[%s14701_s1 + $0xd0] ss:$8 sps:$4 sm:$0xff]  }
 0x57a   :  { %10634 = vmatprep.subr.bf16.mxu1 %v11829_v53  ;;  %2494 = vmatpush1.bf16.msra.mxu0 %v11147_v40  ;;  %v11194_v40 = vld [vmem:[%s14701_s1 + $0xc4] ss:$8 sps:$4 sm:$0xff]  }
 0x57b   :  { %2495 = vmatprep.subr.bf16.mxu0 %v11155_v42  ;;  %v11192_v42 = vld [vmem:[%s14701_s1 + $0xc0] ss:$8 sps:$4 sm:$0xff]  }
 0x57d   :  { %10635 = vmatpush3.bf16.msra.mxu1 %v11125_v41  ;;  %v9428_v41 = vld [vmem:[%s14700_s0 + $0x22] sm:$0xff] }
 0x57e   :  { %2368 = vmatprep.subr.bf16.mxu1 %v11128_v43  ;;  %2496 = vmatpush1.bf16.msra.mxu0 %v11153_v44  ;;  %v9429_v43 = vld [vmem:[%s14700_s0 + $0x2a] sm:$0xff]  ;;  %v11200_v44 = vld [vmem:[%s14701_s1 + $0x1d4] ss:$8 sps:$4 sm:$0xff]  }
 0x57f   :  { %2497 = vmatprep.subr.bf16.mxu0 %v11161_v46  ;;  %v2540_v45 = vpack.c.bf16 %v9429_v43, %v9428_v41  ;;  %v11198_v46 = vld [vmem:[%s14701_s1 + $0x1d0] ss:$8 sps:$4 sm:$0xff]  }
 0x580   :  { %10637 = vmatmul.mubr.msk.bf16.vlgmr.msra.gmra.mxu1 %vm1878_vm13, %v2083_v49  ;;  %v9430_v49 = vld [vmem:[%s14700_s0 + $0x32] sm:$0xff] }
 0x581   :  { %2369 = vmatpush1.bf16.msra.mxu1 %v11126_v47  ;;  %2396 = vmatprep.mubr.bf16.mxu1 %v11828_v2  ;;  %v11203_v47 = vld [vmem:[%s14701_s1 + $0x1c4] ss:$8 sps:$4 sm:$0xff]  }
 0x582   :  { %2370 = vmatprep.subr.bf16.mxu1 %v11134_v48  ;;  %2498 = vmatpush1.bf16.msra.mxu0 %v11159_v50  ;;  %v11201_v48 = vld [vmem:[%s14701_s1 + $0x1c0] ss:$8 sps:$4 sm:$0xff]   ;;  %v9431_v50 = vld [vmem:[%s14700_s0 + $0x3a] sm:$0xf] }
 0x583   :  { %2769 = vmatprep.subr.bf16.mxu0 %v11167_v55  ;;  %v2541_v54 = vpack.c.bf16 %v9431_v50, %v9430_v49  ;;  %v11204_v55 = vld [vmem:[%s14701_s1 + $0x1b0] ss:$8 sps:$4 sm:$0xff]  }
 0x585   :  { %2371 = vmatpush1.bf16.msra.mxu1 %v11132_v51  ;;  %9426 = vmatmul.mubr.msk.bf16.vlgmr.msra.gmra.mxu0 %vm149_vm0, %v2266_v56  ;;  %v11209_v51 = vld [vmem:[%s14701_s1 + $0x1a4] ss:$8 sps:$4 sm:$0xff]   ;;  %v11207_v56 = vld [vmem:[%s14701_s1 + $0x1a0] ss:$8 sps:$4 sm:$0xff]  }
 0x586   :  { %2372 = vmatprep.subr.bf16.mxu1 %v11140_v57  ;;  %2770 = vmatpush1.bf16.msra.mxu0 %v11165_v58  ;;  %v11212_v57 = vld [vmem:[%s14701_s1 + $0x194] ss:$8 sps:$4 sm:$0xff]   ;;  %v11210_v58 = vld [vmem:[%s14701_s1 + $0x190] ss:$8 sps:$4 sm:$0xff]  }
 0x587   :  { %2771 = vmatprep.subr.bf16.mxu0 %v11173_v59  ;;  %2525 = vmatprep.mubr.bf16.mxu0 %v11828_v2  ;;  %v11215_v59 = vld [vmem:[%s14701_s1 + $0x184] ss:$8 sps:$4 sm:$0xff]  }
 0x589   :  { %2373 = vmatpush1.bf16.msra.mxu1 %v11138_v60  ;;  %v11213_v60 = vld [vmem:[%s14701_s1 + $0x180] ss:$8 sps:$4 sm:$0xff]  }
 0x58a   :  { %2374 = vmatprep.subr.bf16.mxu1 %v11146_v61  ;;  %2772 = vmatpush1.bf16.msra.mxu0 %v11171_v62  ;;  %v9488_v61 = vld [vmem:[%s14700_s0 + $0x24] sm:$0xff]  ;;  %v9489_v62 = vld [vmem:[%s14700_s0 + $0x2c] sm:$0xff] }
 0x58b   :  { %2773 = vmatprep.subr.bf16.mxu0 %v11179_v3  ;;  %v2830_v0 = vpack.c.bf16 %v9489_v62, %v9488_v61  ;;  %v9491_v3 = vld [vmem:[%s14700_s0 + $0x3c] sm:$0xf] }
 0x58d   :  { %2375 = vmatpush1.bf16.msra.mxu1 %v11144_v5  ;;  %9427 = vmatmul.mubr.msk.bf16.gmra.mxu0 %vm149_vm0, %v2267_v6  ;;  %v2831_v5 = vpack.c.bf16 %v9491_v3, %v9490_v1 }
 0x58e   :  { %2376 = vmatprep.subr.bf16.mxu1 %v11152_v7  ;;  %2774 = vmatpush1.bf16.msra.mxu0 %v11177_v8 }
 0x58f   :  { %2775 = vmatprep.subr.bf16.mxu0 %v11185_v9  ;;  %2797 = vmatprep.mubr.bf16.mxu0 %v11828_v2 }
 0x591   :  { %2377 = vmatpush1.bf16.msra.mxu1 %v11150_v10 }
 0x592   :  { %2378 = vmatprep.subr.bf16.mxu1 %v11158_v11  ;;  %2776 = vmatpush1.bf16.msra.mxu0 %v11183_v12 }
 0x593   :  { %2777 = vmatprep.subr.bf16.mxu0 %v11191_v13 }
 0x595   :  { %2379 = vmatpush1.bf16.msra.mxu1 %v11156_v14  ;;  %v11217_v14 = vld [vmem:[%s14704_s4 + $0x38] sm:$0xff]  }
 0x596   :  { %2624 = vmatprep.subr.bf16.mxu1 %v11164_v17  ;;  %2778 = vmatpush1.bf16.msra.mxu0 %v11189_v18  ;;  %v11219_v18 = vld [vmem:[%s14704_s4 + $0x28] sm:$0xff]  }
 0x597   :  { %2779 = vmatprep.subr.bf16.mxu0 %v11197_v19 }
 0x598   :  { %9412 = vmatmul.mubr.msk.bf16.vlgmr.msra.gmra.mxu1 %vm149_vm0, %v2284_v20 }
 0x599   :  { %2625 = vmatpush1.bf16.msra.mxu1 %v11162_v21  ;;  %2406 = vmatprep.mubr.bf16.mxu1 %v11828_v2 }
 0x59a   :  { %2626 = vmatprep.subr.bf16.mxu1 %v11170_v22  ;;  %2780 = vmatpush1.bf16.msra.mxu0 %v11195_v23  ;;  %v11220_v23 = vld [vmem:[%s14704_s4 + $0x20] sm:$0xff]  }
 0x59d   :  { %2627 = vmatpush1.bf16.msra.mxu1 %v11168_v26  ;;  %9486 = vmatmul.mubr.msk.bf16.vlgmr.msra.gmra.mxu0 %vm149_vm0, %v2685_v29  ;;  %v11221_v26 = vld [vmem:[%s14704_s4 + $0x18] sm:$0xff]   ;;  %v11223_v29 = vld [vmem:[%s14704_s4 + $0x8] sm:$0xff]  }
 0x59e   :  { %2628 = vmatprep.subr.bf16.mxu1 %v11176_v30  ;;  %2807 = vmatprep.mubr.bf16.mxu0 %v11828_v2 }
 0x5a0   :  { %9413 = vmatmul.mubr.msk.bf16.gmra.mxu1 %vm149_vm0, %v2285_v32 }
 0x5a1   :  { %2629 = vmatpush1.bf16.msra.mxu1 %v11174_v33  ;;  %2652 = vmatprep.mubr.bf16.mxu1 %v11828_v2 }
 0x5a2   :  { %2630 = vmatprep.subr.bf16.mxu1 %v11182_v35  ;;  %v11224_v35 = vld [vmem:[%s14704_s4] sm:$0xff]  }
 0x5a5   :  { %2631 = vmatpush1.bf16.msra.mxu1 %v11180_v36  ;;  %9487 = vmatmul.mubr.msk.bf16.gmra.mxu0 %vm149_vm0, %v2686_v37  ;;  %v11225_v36 = vld [vmem:[%s14704_s4 + $0x50] ss:$0 sps:$4 sm:$0xff]  }
 0x5a6   :  { %2632 = vmatprep.subr.bf16.mxu1 %v11188_v38  ;;  %3051 = vmatprep.mubr.bf16.mxu0 %v11828_v2 }
 0x5a9   :  { %2633 = vmatpush1.bf16.msra.mxu1 %v11186_v39 }
 0x5aa   :  { %2634 = vmatprep.subr.bf16.mxu1 %v11194_v40 }
 0x5ad   :  { %2635 = vmatpush1.bf16.msra.mxu1 %v11192_v42  ;;  %v3152_v42 = vsel %vm949_vm3, %v11225_v36, 0 }
 0x5ae   :  { %2914 = vmatprep.subr.bf16.mxu1 %v11200_v44 }
 0x5b0   :  { %9456 = vmatmul.mubr.msk.bf16.vlgmr.msra.gmra.mxu1 %vm149_vm0, %v2540_v45 }
 0x5b1   :  { %2915 = vmatpush1.bf16.msra.mxu1 %v11198_v46  ;;  %2662 = vmatprep.mubr.bf16.mxu1 %v11828_v2 }
 0x5b2   :  { %2916 = vmatprep.subr.bf16.mxu1 %v11203_v47 }
 0x5b5   :  { %2917 = vmatpush1.bf16.msra.mxu1 %v11201_v48 }
 0x5b6   :  { %2918 = vmatprep.subr.bf16.mxu1 %v11206_v52 }
 0x5b8   :  { %9457 = vmatmul.mubr.msk.bf16.gmra.mxu1 %vm149_vm0, %v2541_v54 }
 0x5b9   :  { %2919 = vmatpush1.bf16.msra.mxu1 %v11204_v55  ;;  %2942 = vmatprep.mubr.bf16.mxu1 %v11828_v2 }
 0x5ba   :  { %2920 = vmatprep.subr.bf16.mxu1 %v11209_v51 }
 0x5bd   :  { %2921 = vmatpush1.bf16.msra.mxu1 %v11207_v56 }
 0x5be   :  { %2922 = vmatprep.subr.bf16.mxu1 %v11212_v57 }
 0x5c1   :  { %2923 = vmatpush1.bf16.msra.mxu1 %v11210_v58 }
 0x5c2   :  { %2924 = vmatprep.subr.bf16.mxu1 %v11215_v59 }
 0x5c5   :  { %2925 = vmatpush1.bf16.msra.mxu1 %v11213_v60 }
 0x5c6   :  { %3154 = vmatprep.subr.bf16.mxu1 %v11828_v2 }
 0x5c8   :  { %9516 = vmatmul.mubr.msk.bf16.vlgmr.msra.gmra.mxu1 %vm149_vm0, %v2830_v0 }
 0x5c9   :  { %2952 = vmatprep.mubr.bf16.mxu1 %v11828_v2  ;;  %3155 = vmatpush1.bf16.msra.mxu1 %v11217_v14 }
 0x5ca   :  { %3156 = vmatprep.subr.bf16.mxu1 %v11828_v2 }
 0x5cd   :  { %3157 = vmatpush1.bf16.msra.mxu1 %v11218_v15 }
 0x5ce   :  { %3158 = vmatprep.subr.bf16.mxu1 %v11828_v2 }
 0x5d0   :  { %9517 = vmatmul.mubr.msk.bf16.gmra.mxu1 %vm149_vm0, %v2831_v5 }
 0x5d1   :  { %3159 = vmatpush1.bf16.msra.mxu1 %v11219_v18 }
 0x5d2   :  { %3160 = vmatprep.subr.bf16.mxu1 %v11828_v2 }
 0x5d5   :  { %3161 = vmatpush1.bf16.msra.mxu1 %v11220_v23 }
 0x5d6   :  { %3162 = vmatprep.subr.bf16.mxu1 %v11828_v2 }
 0x5d9   :  { %3163 = vmatpush1.bf16.msra.mxu1 %v11221_v26 }
 0x5da   :  { %3164 = vmatprep.subr.bf16.mxu1 %v11828_v2 }
 0x5dd   :  { %3165 = vmatpush1.bf16.msra.mxu1 %v11222_v27 }
 0x5de   :  { %3166 = vmatprep.subr.bf16.mxu1 %v11828_v2 }
 0x5e1   :  { %3167 = vmatpush1.bf16.msra.mxu1 %v11223_v29 }
 0x5e2   :  { %3168 = vmatprep.subr.bf16.mxu1 %v11828_v2 }
 0x5e5   :  { %3169 = vmatpush1.bf16.msra.mxu1 %v11224_v35 }
 0x5e6   :  { %3180 = vmatprep.subr.bf16.mxu1 %v11828_v2 }
 0x5e9   :  { %3181 = vmatpush2.bf16.msra.mxu1 %v3152_v42 }
 0x5ea   :  { %3182 = vmatprep.subr.bf16.mxu1 %v11828_v2 }
 0x618   :  { %v1916_v6 = vpop.f32.mrf.mxu1  ;;  %v2075_v7 = vpop.f32.mrf.mxu0 }
 0x61a   :  { %v10596_v8 = vpop.f32.mrf.mxu1  ;;  %v10624_v9 = vpop.f32.mrf.mxu0 }
 0x61c   :  { %v1919_v10 = vpop.f32.mrf.mxu1  ;;  %v2078_v11 = vpop.f32.mrf.mxu0 }
 0x61e   :  { %v10597_v12 = vpop.f32.mrf.mxu1  ;;  %v10625_v13 = vpop.f32.mrf.mxu0 }
 0x62c   :  { %v1989_v16 = vpop.f32.mrf.mxu1  ;;  %v2249_v17 = vpop.f32.mrf.mxu0 }
 0x62d   :  { %v1990_v28 = vadd.f32 %v1989_v16, %v1916_v6 }
 0x62e   :  { %v10610_v19 = vpop.f32.mrf.mxu1  ;;  %v10652_v20 = vpop.f32.mrf.mxu0 }
 0x62f   :  { %v2081_v30 = vadd.f32 %v2075_v7, %v1990_v28 }
 0x630   :  { %v1992_v21 = vpop.f32.mrf.mxu1  ;;  %v2252_v22 = vpop.f32.mrf.mxu0 }
 0x632   :  { %v10611_v24 = vpop.f32.mrf.mxu1  ;;  %v10653_v25 = vpop.f32.mrf.mxu0 }
 0x640   :  { %v2162_v32 = vpop.f32.mrf.mxu1 }
 0x641   :  { %v2168_v33 = vadd.f32 %v2162_v32, %v2081_v30  ;;  %v2971_v32 = vld [vmem:[%s14702_s2] sm:$0x3] }
 0x642   :  { %v10638_v34 = vpop.f32.mrf.mxu1  ;;  %v2976_v42 = vrot.slane %v2971_v32, %v12177_v63 }
 0x643   :  { %v2255_v37 = vadd.f32 %v2249_v17, %v2168_v33 }
 0x644   :  { %v2165_v38 = vpop.f32.mrf.mxu1 }
 0x645   :  { %v2257_v39 = vadd.f32 %v2256_v31, %v2255_v37  ;;  %v2517_v44 = vpop.f32.mrf.mxu0 }
 0x646   :  { %v10639_v40 = vpop.f32.mrf.mxu1 }
 0x647   :  { %v2258_v41 = vmax.f32 %v2257_v39, 0.0  ;;  %v2519_v47 = vpop.f32.mrf.mxu0 }
 0x649   :  { %2260 = vst.msk [vmem:[#allocation4] sm:$0x1] %vm2259_vm14, %v2258_v41  ;;  %v2521_v49 = vpop.f32.mrf.mxu0 }
 0x64b   :  { %v2523_v52 = vpop.f32.mrf.mxu0 }
 0x64d   :  { %v2527_v55 = vpop.f32.mrf.mxu0 }
 0x64f   :  { %v2529_v56 = vpop.f32.mrf.mxu0 }
 0x651   :  { %v2531_v58 = vpop.f32.mrf.mxu0 }
 0x653   :  { %v2533_v61 = vpop.f32.mrf.mxu0 }
 0x658   :  { %v2398_v43 = vpop.f32.mrf.mxu1 }
 0x659   :  { %v2518_v33 = vadd.f32 %v2517_v44, %v2398_v43 }
 0x65a   :  { %v2400_v45 = vpop.f32.mrf.mxu1 }
 0x65b   :  { %v2520_v20 = vadd.f32 %v2519_v47, %v2400_v45 }
 0x65c   :  { %v2402_v46 = vpop.f32.mrf.mxu1 }
 0x65d   :  { %v2799_v0 = vpop.f32.mrf.mxu0  ;;  %v2522_v24 = vadd.f32 %v2521_v49, %v2402_v46 }
 0x65e   :  { %v2404_v48 = vpop.f32.mrf.mxu1 }
 0x65f   :  { %v2801_v3 = vpop.f32.mrf.mxu0  ;;  %v2524_v16 = vadd.f32 %v2523_v52, %v2404_v48 }
 0x660   :  { %v2408_v50 = vpop.f32.mrf.mxu1 }
 0x661   :  { %v2803_v6 = vpop.f32.mrf.mxu0  ;;  %v2528_v13 = vadd.f32 %v2527_v55, %v2408_v50  ;;  %v2980_v50 = vrot.slane %v2971_v32, %v12179_v4  ;;  %v11238_v32 = vld [vmem:[%s14705_s5 + $0x88] ss:$8 sps:$4 sm:$0xff]  }
 0x662   :  { %v2410_v54 = vpop.f32.mrf.mxu1 }
 0x663   :  { %v2805_v8 = vpop.f32.mrf.mxu0  ;;  %v2530_v17 = vadd.f32 %v2529_v56, %v2410_v54 }
 0x664   :  { %v2412_v51 = vpop.f32.mrf.mxu1 }
 0x665   :  { %v2809_v10 = vpop.f32.mrf.mxu0  ;;  %v2532_v21 = vadd.f32 %v2531_v58, %v2412_v51 }
 0x666   :  { %v2414_v57 = vpop.f32.mrf.mxu1 }
 0x667   :  { %v2811_v14 = vpop.f32.mrf.mxu0  ;;  %v2534_v27 = vadd.f32 %v2533_v61, %v2414_v57 }
 0x669   :  { %v2813_v25 = vpop.f32.mrf.mxu0 }
 0x66b   :  { %v2815_v40 = vpop.f32.mrf.mxu0 }
 0x670   :  { %v2654_v59 = vpop.f32.mrf.mxu1 }
 0x671   :  { %v2673_v39 = vadd.f32 %v2654_v59, %v2518_v33 }
 0x672   :  { %v2656_v60 = vpop.f32.mrf.mxu1 }
 0x673   :  { %v2674_v28 = vadd.f32 %v2656_v60, %v2520_v20  ;;  %v2818_v51 = vadd.f32 %v2799_v0, %v2673_v39  ;;  %v11226_v20 = vld [vmem:[%s14704_s4 + $0x48] sm:$0xff]  }
 0x674   :  { %v2658_v62 = vpop.f32.mrf.mxu1  ;;  %3183 = vmatpush2.bf16.msra.mxu1 %v11226_v20  ;;  %v11272_v20 = vld [vmem:[%s14705_s5 + $0x30] ss:$8 sps:$4 sm:$0xff]  }
 0x675   :  { %v2675_v35 = vadd.f32 %v2658_v62, %v2522_v24  ;;  %v2819_v45 = vadd.f32 %v2801_v3, %v2674_v28  ;;  %3184 = vmatprep.subr.bf16.mxu1 %v11828_v2 }
 0x676   :  { %v2660_v1 = vpop.f32.mrf.mxu1 }
 0x677   :  { %v2676_v22 = vadd.f32 %v2660_v1, %v2524_v16  ;;  %v2820_v49 = vadd.f32 %v2803_v6, %v2675_v35 }
 0x678   :  { %v2664_v5 = vpop.f32.mrf.mxu1 }
 0x679   :  { %v2677_v18 = vadd.f32 %v2664_v5, %v2528_v13  ;;  %v2821_v34 = vadd.f32 %v2805_v8, %v2676_v22  ;;  %v9543_v22 = vld [vmem:[%s14705_s5 + $0xa8] sm:$0x33] }
 0x67a   :  { %v2666_v7 = vpop.f32.mrf.mxu1  ;;  %v9555_v24 = vcombine.high %v9543_v22, %v9543_v22 }
 0x67b   :  { %v2678_v23 = vadd.f32 %v2666_v7, %v2530_v17  ;;  %v2822_v29 = vadd.f32 %v2809_v10, %v2677_v18 }
 0x67c   :  { %v2668_v9 = vpop.f32.mrf.mxu1 }
 0x67d   :  { %v2679_v30 = vadd.f32 %v2668_v9, %v2532_v21  ;;  %v2823_v36 = vadd.f32 %v2811_v14, %v2678_v23  ;;  %v11227_v21 = vld [vmem:[%s14704_s4 + $0x40] sm:$0xff]  }
 0x67e   :  { %v2670_v11 = vpop.f32.mrf.mxu1  ;;  %3185 = vmatpush2.bf16.msra.mxu1 %v11227_v21  ;;  %v9582_v23 = vld [vmem:[%s14705_s5 + $0x100] sm:$0x33]  ;;  %v11275_v21 = vld [vmem:[%s14705_s5 + $0x190] ss:$8 sps:$4 sm:$0xff]  }
 0x67f   :  { %v2680_v37 = vadd.f32 %v2670_v11, %v2534_v27  ;;  %v2824_v46 = vadd.f32 %v2813_v25, %v2679_v30  ;;  %v9594_v25 = vcombine.high %v9582_v23, %v9582_v23  ;;  %v11234_v27 = vld [vmem:[%s14705_s5 + $0x9c] ss:$8 sps:$4 sm:$0xff]   ;;  %v11240_v30 = vld [vmem:[%s14705_s5 + $0x8c] ss:$8 sps:$4 sm:$0xff]  }
 0x681   :  { %v2825_v43 = vadd.f32 %v2815_v40, %v2680_v37  ;;  %9595 = vmatprep.subr.msk.bf16.mxu1 %vm1085_vm4, %v9594_v25  ;;  %v11237_v40 = vld [vmem:[%s14705_s5 + $0xf4] ss:$8 sps:$4 sm:$0xff]   ;;  %v11281_v25 = vld [vmem:[%s14705_s5 + $0x180] ss:$8 sps:$4 sm:$0xff]  }
 0x688   :  { %v2944_v12 = vpop.f32.mrf.mxu1 }
 0x689   :  { %v2963_v62 = vadd.f32 %v2944_v12, %v2818_v51  ;;  %v11259_v51 = vld [vmem:[%s14705_s5 + $0xb0] ss:$8 sps:$4 sm:$0xff]  }
 0x68a   :  { %v2946_v15 = vpop.f32.mrf.mxu1 }
 0x68b   :  { %v2964_v44 = vadd.f32 %v2946_v15, %v2819_v45  ;;  %v2983_v13 = vadd.f32 %v2976_v42, %v2963_v62  ;;  %v11241_v45 = vld [vmem:[%s14705_s5 + $0xe0] ss:$8 sps:$4 sm:$0xff]  }
 0x68c   :  { %v2948_v19 = vpop.f32.mrf.mxu1 }
 0x68d   :  { %v2965_v56 = vadd.f32 %v2948_v19, %v2820_v49  ;;  %v2984_v1 = vadd.f32 %v2980_v50, %v2964_v44  ;;  %v2991_v18 = vmax.f32 %v2983_v13, 0.0  ;;  %v11216_v19 = vld [vmem:[%s14703_s3] sm:$0x7f]   ;;  %v11247_v49 = vld [vmem:[%s14705_s5 + $0xd0] ss:$8 sps:$4 sm:$0xff]  }
 0x68e   :  { %v2950_v26 = vpop.f32.mrf.mxu1  ;;  %v11253_v44 = vld [vmem:[%s14705_s5 + $0xc0] ss:$8 sps:$4 sm:$0xff]  }
 0x68f   :  { %v2966_v47 = vadd.f32 %v2950_v26, %v2821_v34  ;;  %v2985_v6 = vadd.f32 %v2976_v42, %v2965_v56  ;;  %v2992_v14 = vmax.f32 %v2984_v1, 0.0  ;;  %v9554_v26 = vcombine.low %v9543_v22, %v9543_v22  ;;  %v11261_v56 = vld [vmem:[%s14705_s5 + $0xb4] ss:$8 sps:$4 sm:$0xff]   ;;  %v11280_v22 = vld [vmem:[%s14705_s5 + $0x24] ss:$8 sps:$4 sm:$0xff]  }
 0x690   :  { %v2954_v31 = vpop.f32.mrf.mxu1  ;;  %v9593_v34 = vcombine.low %v9582_v23, %v9582_v23  ;;  %v11283_v23 = vld [vmem:[%s14705_s5 + $0x184] ss:$8 sps:$4 sm:$0xff]  }
 0x691   :  { %v2967_v38 = vadd.f32 %v2954_v31, %v2822_v29  ;;  %v2986_v58 = vadd.f32 %v2980_v50, %v2966_v47  ;;  %v2993_v0 = vmax.f32 %v2985_v6, 0.0  ;;  %v3285_v28 = vsel %vm1085_vm4, %v9554_v26, 0  ;;  %v11232_v29 = vld [vmem:[%s14705_s5 + $0x98] ss:$8 sps:$4 sm:$0xff]   ;;  %v11249_v47 = vld [vmem:[%s14705_s5 + $0xd4] ss:$8 sps:$4 sm:$0xff]  }
 0x692   :  { %v2956_v41 = vpop.f32.mrf.mxu1  ;;  %v3513_v39 = vsel %vm1085_vm4, %v9593_v34, 0  ;;  %v11286_v26 = vld [vmem:[%s14705_s5 + $0x14] ss:$8 sps:$4 sm:$0xff]  }
 0x693   :  { %v2968_v48 = vadd.f32 %v2956_v41, %v2823_v36  ;;  %v2987_v54 = vadd.f32 %v2976_v42, %v2967_v38  ;;  %v2994_v8 = vmax.f32 %v2986_v58, 0.0  ;;  %v2999_v12 = vpack.c.bf16 %v2993_v0, %v2991_v18  ;;  %v11243_v41 = vld [vmem:[%s14705_s5 + $0xe4] ss:$8 sps:$4 sm:$0xff]   ;;  %v9632_v58 = vld [vmem:[%s14705_s5 + $0x1b0] sm:$0x33] }
 0x694   :  { %v2958_v52 = vpop.f32.mrf.mxu1  ;;  %v11269_v18 = vld [vmem:[%s14705_s5 + $0x1a0] ss:$8 sps:$4 sm:$0xff]  }
 0x695   :  { %v2969_v55 = vadd.f32 %v2958_v52, %v2824_v46  ;;  %v2988_v59 = vadd.f32 %v2980_v50, %v2968_v48  ;;  %v2995_v3 = vmax.f32 %v2987_v54, 0.0  ;;  %v3000_v17 = vpack.c.bf16 %v2994_v8, %v2992_v14  ;;  %v11246_v46 = vld [vmem:[%s14705_s5 + $0x7c] ss:$8 sps:$4 sm:$0xff]   ;;  %v11244_v48 = vld [vmem:[%s14705_s5 + $0x78] ss:$8 sps:$4 sm:$0xff]  }
 0x696   :  { %v2960_v57 = vpop.f32.mrf.mxu1  ;;  %v11255_v52 = vld [vmem:[%s14705_s5 + $0xc4] ss:$8 sps:$4 sm:$0xff]   ;;  %v11256_v54 = vld [vmem:[%s14705_s5 + $0x58] ss:$8 sps:$4 sm:$0xff]  }
 0x697   :  { %v2989_v60 = vadd.f32 %v2976_v42, %v2969_v55  ;;  %v2970_v61 = vadd.f32 %v2960_v57, %v2825_v43  ;;  %v2996_v9 = vmax.f32 %v2988_v59, 0.0  ;;  %v11235_v42 = vld [vmem:[%s14705_s5 + $0xf0] ss:$8 sps:$4 sm:$0xff]   ;;  %v11258_v55 = vld [vmem:[%s14705_s5 + $0x5c] ss:$8 sps:$4 sm:$0xff]  }
 0x698   :  { %v11250_v43 = vld [vmem:[%s14705_s5 + $0x68] ss:$8 sps:$4 sm:$0xff]   ;;  %v11268_v14 = vld [vmem:[%s14705_s5 + $0x44] ss:$8 sps:$4 sm:$0xff]  }
 0x699   :  { %v2997_v5 = vmax.f32 %v2989_v60, 0.0  ;;  %v2990_v7 = vadd.f32 %v2980_v50, %v2970_v61  ;;  %v11252_v50 = vld [vmem:[%s14705_s5 + $0x6c] ss:$8 sps:$4 sm:$0xff]   ;;  %v9644_v60 = vcombine.high %v9632_v58, %v9632_v58 }
 0x69a   :  { %v3211_v57 = vld [vmem:[%s14705_s5 + $0x50] sm:$0x33] }
 0x69b   :  { %v3001_v10 = vpack.c.bf16 %v2997_v5, %v2995_v3  ;;  %v2998_v11 = vmax.f32 %v2990_v7, 0.0  ;;  %v9569_v59 = vcombine.high %v3211_v57, %v3211_v57  ;;  %v9568_v5 = vcombine.low %v3211_v57, %v3211_v57 }
 0x69c   :  { %v9643_v7 = vcombine.low %v9632_v58, %v9632_v58 }
 0x69d   :  { %v3002_v15 = vpack.c.bf16 %v2998_v11, %v2996_v9  ;;  %v3014_v16 = vsel %vm809_vm1, %v3001_v10, 0  ;;  %v3392_v11 = vsel %vm1085_vm4, %v9568_v5, 0 }
 0x69e   :  { %v3763_v0 = vsel %vm1085_vm4, %v9643_v7, 0 }
 0x69f   :  { %9519 = vmatprep.subr.msk.bf16.mxu0 %vm809_vm1, %v3002_v15 }
 0x6a0   :  { %3032 = vmatpush1.bf16.msra.mxu0 %v3014_v16  ;;  %v11271_v16 = vld [vmem:[%s14705_s5 + $0x1a4] ss:$8 sps:$4 sm:$0xff]  }
 0x6a1   :  { %3033 = vmatprep.subr.bf16.mxu0 %v3000_v17  ;;  %v11266_v17 = vld [vmem:[%s14705_s5 + $0x40] ss:$8 sps:$4 sm:$0xff]  }
 0x6a4   :  { %3034 = vmatpush1.bf16.msra.mxu0 %v2999_v12  ;;  %v11274_v12 = vld [vmem:[%s14705_s5 + $0x34] ss:$8 sps:$4 sm:$0xff]  }
 0x6a5   :  { %9556 = vmatprep.subr.msk.bf16.mxu0 %vm1085_vm4, %v9555_v24  ;;  %v11278_v24 = vld [vmem:[%s14705_s5 + $0x20] ss:$8 sps:$4 sm:$0xff]  }
 0x6a7   :  { %9520 = vmatmul.mubr.msk.bf16.vlgmr.msra.gmra.mxu0 %vm805_vm2, %v11216_v19  ;;  %v11277_v19 = vld [vmem:[%s14705_s5 + $0x194] ss:$8 sps:$4 sm:$0xff]  }
 0x6a8   :  { %3322 = vmatprep.mubr.bf16.mxu0 %v11828_v2  ;;  %3295 = vmatpush1.bf16.msra.mxu0 %v3285_v28  ;;  %v11284_v28 = vld [vmem:[%s14705_s5 + $0x10] ss:$8 sps:$4 sm:$0xff]  }
 0x6a9   :  { %3296 = vmatprep.subr.bf16.mxu0 %v11234_v27  ;;  %v11289_v27 = vld [vmem:[%s14705_s5 + $0x174] ss:$8 sps:$4 sm:$0xff]  }
 0x6ac   :  { %3297 = vmatpush1.bf16.msra.mxu0 %v11232_v29  ;;  %v11287_v29 = vld [vmem:[%s14705_s5 + $0x170] ss:$8 sps:$4 sm:$0xff]  }
 0x6ad   :  { %3298 = vmatprep.subr.bf16.mxu0 %v11240_v30  ;;  %v11292_v30 = vld [vmem:[%s14705_s5 + $0x4] ss:$8 sps:$4 sm:$0xff]  }
 0x6b0   :  { %3299 = vmatpush1.bf16.msra.mxu0 %v11238_v32  ;;  %v11295_v32 = vld [vmem:[%s14705_s5 + $0x164] ss:$8 sps:$4 sm:$0xff]  }
 0x6b1   :  { %3300 = vmatprep.subr.bf16.mxu0 %v11246_v46 }
 0x6b4   :  { %3301 = vmatpush1.bf16.msra.mxu0 %v11244_v48  ;;  %v11303_v48 = vld [vmem:[%s14705_s5 + $0x13c] ss:$8 sps:$4 sm:$0xff]  }
 0x6b5   :  { %3302 = vmatprep.subr.bf16.mxu0 %v11252_v50  ;;  %v11306_v50 = vld [vmem:[%s14705_s5 + $0x12c] ss:$8 sps:$4 sm:$0xff]  }
 0x6b8   :  { %3303 = vmatpush1.bf16.msra.mxu0 %v11250_v43  ;;  %v11309_v43 = vld [vmem:[%s14705_s5 + $0x11c] ss:$8 sps:$4 sm:$0xff]  }
 0x6b9   :  { %3304 = vmatprep.subr.bf16.mxu0 %v11258_v55  ;;  %v11310_v55 = vld [vmem:[%s14705_s5 + $0x108] ss:$8 sps:$4 sm:$0xff]  }
 0x6bc   :  { %3305 = vmatpush1.bf16.msra.mxu0 %v11256_v54  ;;  %v11312_v54 = vld [vmem:[%s14705_s5 + $0x10c] ss:$8 sps:$4 sm:$0xff]  }
 0x6bd   :  { %9570 = vmatprep.subr.msk.bf16.mxu0 %vm1085_vm4, %v9569_v59 }
 0x767   :  { %v3053_v33 = vpop.f32.mrf.mxu0 }
 0x769   :  { %v3055_v35 = vpop.f32.mrf.mxu0 }
 0x76b   :  { %v3057_v31 = vpop.f32.mrf.mxu0 }
 0x76c   :  { %v3062_v38 = vpack.c.bf16 %v3057_v31, %v3053_v33  ;;  %v9607_v33 = vld [vmem:[%s14705_s5 + $0x158] sm:$0x33]  ;;  %v11293_v31 = vld [vmem:[%s14705_s5 + $0x160] ss:$8 sps:$4 sm:$0xff]  }
 0x76d   :  { %v3059_v36 = vpop.f32.mrf.mxu0  ;;  %v9619_v34 = vcombine.high %v9607_v33, %v9607_v33 }
 0x76e   :  { %v3063_v37 = vpack.c.bf16 %v3059_v36, %v3055_v35  ;;  %v11290_v35 = vld [vmem:[%s14705_s5] ss:$8 sps:$4 sm:$0xff]   ;;  %v9618_v36 = vcombine.low %v9607_v33, %v9607_v33 }
 0x770   :  { %9532 = vmatprep.mubr.msk.bf16.mxu1 %vm945_vm5, %v3063_v37 }
 0x771   :  { %3187 = vmatmul.mubr.bf16.vlgmr.msra.gmra.mxu1 %v3062_v38 }
 0x772   :  { %3523 = vmatpush1.bf16.msra.mxu1 %v3513_v39  ;;  %3550 = vmatprep.mubr.bf16.mxu1 %v11828_v2 }
 0x773   :  { %3524 = vmatprep.subr.bf16.mxu1 %v11237_v40 }
 0x776   :  { %3525 = vmatpush1.bf16.msra.mxu1 %v11235_v42 }
 0x777   :  { %3526 = vmatprep.subr.bf16.mxu1 %v11243_v41  ;;  %v3638_v41 = vsel %vm1085_vm4, %v9618_v36, 0 }
 0x77a   :  { %3527 = vmatpush1.bf16.msra.mxu1 %v11241_v45  ;;  %v11300_v45 = vld [vmem:[%s14705_s5 + $0x14c] ss:$8 sps:$4 sm:$0xff]  }
 0x77b   :  { %3528 = vmatprep.subr.bf16.mxu1 %v11249_v47  ;;  %v11298_v47 = vld [vmem:[%s14705_s5 + $0x148] ss:$8 sps:$4 sm:$0xff]  }
 0x77e   :  { %3529 = vmatpush1.bf16.msra.mxu1 %v11247_v49  ;;  %v11301_v49 = vld [vmem:[%s14705_s5 + $0x138] ss:$8 sps:$4 sm:$0xff]  }
 0x77f   :  { %3530 = vmatprep.subr.bf16.mxu1 %v11255_v52  ;;  %v11304_v52 = vld [vmem:[%s14705_s5 + $0x128] ss:$8 sps:$4 sm:$0xff]  }
 0x782   :  { %3531 = vmatpush1.bf16.msra.mxu1 %v11253_v44  ;;  %v11307_v44 = vld [vmem:[%s14705_s5 + $0x118] ss:$8 sps:$4 sm:$0xff]  }
 0x783   :  { %3532 = vmatprep.subr.bf16.mxu1 %v11261_v56 }
 0x786   :  { %3533 = vmatpush1.bf16.msra.mxu1 %v11259_v51 }
 0x787   :  { %9645 = vmatprep.subr.msk.bf16.mxu1 %vm1085_vm4, %v9644_v60 }
 0x831   :  { %v3188_v61 = vpop.f32.mrf.mxu1 }
 0x832   :  { %3196 = vst.msk [vmem:[#allocation2 + $0x10] sm:$0xff] %vm994_vm6, %v3188_v61 }
 0x833   :  { %v3190_v62 = vpop.f32.mrf.mxu1 }
 0x835   :  { %v3191_v1 = vpop.f32.mrf.mxu1 }
 0x836   :  { %3197 = vst.msk [vmem:[#allocation2 + $0x18] sm:$0x3f] %vm996_vm7, %v3191_v1 }
 0x837   :  { %v3193_v3 = vpop.f32.mrf.mxu1 }
 0x839   :  { %v3198_v40 = vld [vmem:[#allocation2 + $0x10] sm:$0xff] }
 0x83d   :  { %v3212_v6 = vld [vmem:[#allocation2 + $0x11] sm:$0xff]  ;;  %v3213_v8 = vld [vmem:[#allocation2 + $0x19] sm:$0x3]  ;;  %v3691_v39 = vld [vmem:[#allocation2 + $0x1c] sm:$0x3] }
 0x83e   :  { %v3440_v9 = vld [vmem:[#allocation2 + $0x12] sm:$0xff]  ;;  %v3214_v10 = vpack.c.bf16 %v3213_v8, %v3212_v6  ;;  %v3441_v13 = vld [vmem:[#allocation2 + $0x1a] sm:$0x3] }
 0x83f   :  { %v3442_v15 = vpack.c.bf16 %v3441_v13, %v3440_v9  ;;  %v3199_v37 = vld [vmem:[#allocation2 + $0x18] sm:$0x3]  ;;  %v3566_v56 = vld [vmem:[#allocation2 + $0x1b] sm:$0x3] }
 0x840   :  { %9557 = vmatmul.mubr.msk.bf16.vlgmr.msra.gmra.mxu0 %vm994_vm6, %v3214_v10  ;;  %v3690_v38 = vld [vmem:[#allocation2 + $0x14] sm:$0xff]  ;;  %v3200_v42 = vpack.c.bf16 %v3199_v37, %v3198_v40 }
 0x841   :  { %3402 = vmatpush1.bf16.msra.mxu0 %v3392_v11  ;;  %9596 = vmatmul.mubr.msk.bf16.vlgmr.msra.gmra.mxu1 %vm994_vm6, %v3442_v15  ;;  %v3692_v46 = vpack.c.bf16 %v3691_v39, %v3690_v38  ;;  %v3565_v51 = vld [vmem:[#allocation2 + $0x13] sm:$0xff] }
 0x842   :  { %3773 = vmatpush1.bf16.msra.mxu1 %v3763_v0  ;;  %3403 = vmatprep.subr.bf16.mxu0 %v11268_v14  ;;  %v3567_v57 = vpack.c.bf16 %v3566_v56, %v3565_v51  ;;  %v11319_v51 = vld [vmem:[%s14708_s8 + $0x8] sm:$0xff]   ;;  %v11320_v56 = vld [vmem:[%s14708_s8] sm:$0xff]  }
 0x843   :  { %3774 = vmatprep.subr.bf16.mxu1 %v11271_v16  ;;  %3429 = vmatprep.mubr.bf16.mxu0 %v11828_v2 }
 0x844   :  { %3800 = vmatprep.mubr.bf16.mxu1 %v11828_v2 }
 0x845   :  { %3404 = vmatpush1.bf16.msra.mxu0 %v11266_v17  ;;  %v3815_v17 = vld [vmem:[%s14706_s6] sm:$0x3] }
 0x846   :  { %3775 = vmatpush1.bf16.msra.mxu1 %v11269_v18  ;;  %3405 = vmatprep.subr.bf16.mxu0 %v11274_v12 }
 0x847   :  { %3776 = vmatprep.subr.bf16.mxu1 %v11277_v19 }
 0x849   :  { %3406 = vmatpush1.bf16.msra.mxu0 %v11272_v20 }
 0x84a   :  { %3777 = vmatpush1.bf16.msra.mxu1 %v11275_v21  ;;  %3407 = vmatprep.subr.bf16.mxu0 %v11280_v22  ;;  %v3820_v22 = vrot.slane %v3815_v17, %v12177_v63 }
 0x84b   :  { %3778 = vmatprep.subr.bf16.mxu1 %v11283_v23 }
 0x84d   :  { %3408 = vmatpush1.bf16.msra.mxu0 %v11278_v24 }
 0x84e   :  { %3779 = vmatpush1.bf16.msra.mxu1 %v11281_v25  ;;  %3409 = vmatprep.subr.bf16.mxu0 %v11286_v26 }
 0x84f   :  { %3780 = vmatprep.subr.bf16.mxu1 %v11289_v27 }
 0x851   :  { %3410 = vmatpush1.bf16.msra.mxu0 %v11284_v28  ;;  %v3824_v28 = vrot.slane %v3815_v17, %v12179_v4 }
 0x852   :  { %3781 = vmatpush1.bf16.msra.mxu1 %v11287_v29  ;;  %3411 = vmatprep.subr.bf16.mxu0 %v11292_v30 }
 0x853   :  { %3782 = vmatprep.subr.bf16.mxu1 %v11295_v32 }
 0x855   :  { %3412 = vmatpush1.bf16.msra.mxu0 %v11290_v35 }
 0x856   :  { %3783 = vmatpush1.bf16.msra.mxu1 %v11293_v31  ;;  %9620 = vmatprep.subr.msk.bf16.mxu0 %vm1085_vm4, %v9619_v34 }
 0x857   :  { %10654 = vmatprep.subr.bf16.mxu1 %v11829_v53 }
 0x858   :  { %9571 = vmatmul.mubr.msk.bf16.vlgmr.msra.gmra.mxu0 %vm994_vm6, %v3200_v42 }
 0x859   :  { %9646 = vmatmul.mubr.msk.bf16.vlgmr.msra.gmra.mxu1 %vm994_vm6, %v3692_v46  ;;  %3648 = vmatpush1.bf16.msra.mxu0 %v3638_v41 }
 0x85a   :  { %3649 = vmatprep.subr.bf16.mxu0 %v11300_v45  ;;  %3675 = vmatprep.mubr.bf16.mxu0 %v11828_v2 }
 0x85b   :  { %10664 = vmatprep.mubr.msk.bf16.mxu1 %vm11830_vm11, %v11829_v53 }
 0x85d   :  { %3650 = vmatpush1.bf16.msra.mxu0 %v11298_v47 }
 0x85e   :  { %3651 = vmatprep.subr.bf16.mxu0 %v11303_v48 }
 0x861   :  { %3652 = vmatpush1.bf16.msra.mxu0 %v11301_v49  ;;  %v3837_v49 = vld [vmem:[%s14707_s7] sm:$0x7] }
 0x862   :  { %3653 = vmatprep.subr.bf16.mxu0 %v11306_v50  ;;  %v11313_v50 = vld [vmem:[%s14708_s8 + $0x38] sm:$0xff]  }
 0x865   :  { %3654 = vmatpush1.bf16.msra.mxu0 %v11304_v52  ;;  %v11314_v52 = vld [vmem:[%s14708_s8 + $0x30] sm:$0xff]  }
 0x866   :  { %3655 = vmatprep.subr.bf16.mxu0 %v11309_v43  ;;  %v11315_v43 = vld [vmem:[%s14708_s8 + $0x28] sm:$0xff]  }
 0x869   :  { %3656 = vmatpush1.bf16.msra.mxu0 %v11307_v44  ;;  %v11316_v44 = vld [vmem:[%s14708_s8 + $0x20] sm:$0xff]  }
 0x86a   :  { %3657 = vmatprep.subr.bf16.mxu0 %v11312_v54  ;;  %v11317_v54 = vld [vmem:[%s14708_s8 + $0x18] sm:$0xff]  }
 0x86d   :  { %3658 = vmatpush1.bf16.msra.mxu0 %v11310_v55  ;;  %v11318_v55 = vld [vmem:[%s14708_s8 + $0x10] sm:$0xff]  }
 0x870   :  { %9621 = vmatmul.mubr.msk.bf16.vlgmr.msra.gmra.mxu0 %vm994_vm6, %v3567_v57  ;;  %v11321_v57 = vld [vmem:[%s14708_s8 + $0x48] sm:$0xff]  }
 0x871   :  { %3879 = vmatprep.mubr.bf16.mxu0 %v11828_v2 }
 0x900   :  { %v3324_v58 = vpop.f32.mrf.mxu0 }
 0x901   :  { %v3552_v61 = vpop.f32.mrf.mxu1 }
 0x902   :  { %v3326_v59 = vpop.f32.mrf.mxu0 }
 0x903   :  { %v3554_v1 = vpop.f32.mrf.mxu1 }
 0x904   :  { %v3328_v60 = vpop.f32.mrf.mxu0 }
 0x905   :  { %v3556_v5 = vpop.f32.mrf.mxu1 }
 0x906   :  { %v3330_v62 = vpop.f32.mrf.mxu0 }
 0x907   :  { %v3558_v6 = vpop.f32.mrf.mxu1 }
 0x918   :  { %v3431_v3 = vpop.f32.mrf.mxu0 }
 0x919   :  { %v3432_v9 = vadd.f32 %v3431_v3, %v3324_v58  ;;  %v3802_v10 = vpop.f32.mrf.mxu1  ;;  %v11322_v58 = vld [vmem:[%s14708_s8 + $0x40] sm:$0xff]  }
 0x91a   :  { %v3433_v7 = vpop.f32.mrf.mxu0 }
 0x91b   :  { %v3434_v11 = vadd.f32 %v3433_v7, %v3326_v59  ;;  %v3561_v15 = vadd.f32 %v3552_v61, %v3432_v9  ;;  %v3804_v0 = vpop.f32.mrf.mxu1  ;;  %v11323_v59 = vld [vmem:[%s14709_s9 + $0x48] sm:$0xff]   ;;  %v11327_v61 = vld [vmem:[%s14709_s9 + $0x38] sm:$0xff]  }
 0x91c   :  { %v3435_v8 = vpop.f32.mrf.mxu0  ;;  %10655 = vmatpush3.bf16.msra.mxu1 %v11323_v59  ;;  %v11326_v9 = vld [vmem:[%s14709_s9 + $0x68] sm:$0xff]   ;;  %v9730_v59 = vld [vmem:[%s14700_s0 + $0x40] sm:$0xff] }
 0x91d   :  { %v3436_v14 = vadd.f32 %v3435_v8, %v3328_v60  ;;  %v3562_v19 = vadd.f32 %v3554_v1, %v3434_v11  ;;  %v3806_v25 = vpop.f32.mrf.mxu1  ;;  %v11325_v60 = vld [vmem:[%s14709_s9 + $0x40] sm:$0xff]   ;;  %10656 = vmatprep.subr.bf16.mxu1 %v11829_v53  ;;  %v11329_v11 = vld [vmem:[%s14709_s9 + $0x30] sm:$0xff]  }
 0x91e   :  { %v3437_v13 = vpop.f32.mrf.mxu0 }
 0x91f   :  { %v3438_v18 = vadd.f32 %v3437_v13, %v3330_v62  ;;  %v3563_v24 = vadd.f32 %v3556_v5, %v3436_v14  ;;  %v3808_v34 = vpop.f32.mrf.mxu1  ;;  %v11324_v5 = vld [vmem:[%s14709_s9 + $0x70] sm:$0xff]   ;;  %v11330_v13 = vld [vmem:[%s14709_s9 + $0x58] sm:$0xff]   ;;  %v11331_v14 = vld [vmem:[%s14709_s9 + $0x28] sm:$0xff]  }
 0x920   :  { %10657 = vmatpush3.bf16.msra.mxu1 %v11325_v60  ;;  %v9731_v60 = vld [vmem:[%s14700_s0 + $0x48] sm:$0xff] }
 0x921   :  { %v3564_v30 = vadd.f32 %v3558_v6, %v3438_v18  ;;  %10658 = vmatprep.subr.bf16.mxu1 %v11829_v53 }
 0x924   :  { %10659 = vmatpush3.bf16.msra.mxu1 %v11327_v61  ;;  %v11389_v61 = vld [vmem:[%s14701_s1 + $0x174] ss:$8 sps:$4 sm:$0xff]  }
 0x925   :  { %10660 = vmatprep.subr.bf16.mxu1 %v11829_v53 }
 0x928   :  { %10661 = vmatpush3.bf16.msra.mxu1 %v11329_v11  ;;  %v9733_v11 = vld [vmem:[%s14700_s0 + $0x58] sm:$0xf] }
 0x929   :  { %10662 = vmatprep.subr.bf16.mxu1 %v11829_v53 }
 0x92c   :  { %10663 = vmatpush3.bf16.msra.mxu1 %v11331_v14  ;;  %v11366_v14 = vld [vmem:[%s14701_s1 + $0x80] ss:$8 sps:$4 sm:$0xff]  }
 0x92d   :  { %10668 = vmatprep.subr.bf16.mxu1 %v11829_v53 }
 0x930   :  { %v3677_v16 = vpop.f32.mrf.mxu0 }
 0x931   :  { %v3686_v12 = vadd.f32 %v3677_v16, %v3561_v15  ;;  %v11332_v15 = vld [vmem:[%s14709_s9 + $0x50] sm:$0xff]  }
 0x932   :  { %v3679_v20 = vpop.f32.mrf.mxu0 }
 0x933   :  { %v3811_v21 = vadd.f32 %v3802_v10, %v3686_v12  ;;  %v3687_v23 = vadd.f32 %v3679_v20, %v3562_v19  ;;  %v11328_v10 = vld [vmem:[%s14709_s9 + $0x60] sm:$0xff]  }
 0x934   :  { %v3681_v26 = vpop.f32.mrf.mxu0  ;;  %v11333_v12 = vld [vmem:[%s14709_s9 + $0x20] sm:$0xff]  }
 0x935   :  { %v3812_v27 = vadd.f32 %v3804_v0, %v3687_v23  ;;  %v3688_v29 = vadd.f32 %v3681_v26, %v3563_v24  ;;  %v3827_v33 = vadd.f32 %v3820_v22, %v3811_v21  ;;  %v11334_v21 = vld [vmem:[%s14709_s9 + $0xc0] sm:$0xff]   ;;  %v11335_v24 = vld [vmem:[%s14709_s9 + $0x18] sm:$0xff]   ;;  %v11337_v26 = vld [vmem:[%s14709_s9 + $0x10] sm:$0xff]  }
 0x936   :  { %v3683_v32 = vpop.f32.mrf.mxu0 }
 0x937   :  { %v3813_v35 = vadd.f32 %v3806_v25, %v3688_v29  ;;  %v3689_v31 = vadd.f32 %v3683_v32, %v3564_v30  ;;  %v3828_v36 = vadd.f32 %v3824_v28, %v3812_v27  ;;  %v3831_v39 = vmax.f32 %v3827_v33, 0.0  ;;  %v11336_v25 = vld [vmem:[%s14709_s9 + $0xb8] sm:$0xff]   ;;  %v11338_v27 = vld [vmem:[%s14709_s9 + $0xb0] sm:$0xff]   ;;  %v11340_v29 = vld [vmem:[%s14709_s9 + $0xa8] sm:$0xff]  }
 0x938   :  { %v11341_v30 = vld [vmem:[%s14709_s9] sm:$0xff]   ;;  %v11353_v33 = vld [vmem:[%s14701_s1 + $0x54] ss:$8 sps:$4 sm:$0xff]  }
 0x939   :  { %v3829_v37 = vadd.f32 %v3820_v22, %v3813_v35  ;;  %v3814_v38 = vadd.f32 %v3808_v34, %v3689_v31  ;;  %v3832_v41 = vmax.f32 %v3828_v36, 0.0  ;;  %v11342_v32 = vld [vmem:[%s14709_s9 + $0xa0] sm:$0xff]   ;;  %v11343_v34 = vld [vmem:[%s14709_s9 + $0x98] sm:$0xff]  }
 0x93b   :  { %v3833_v40 = vmax.f32 %v3829_v37, 0.0  ;;  %v3830_v42 = vadd.f32 %v3824_v28, %v3814_v38  ;;  %v11339_v28 = vld [vmem:[%s14709_s9 + $0x8] sm:$0xff]   ;;  %v11351_v38 = vld [vmem:[%s14701_s1 + $0x50] ss:$8 sps:$4 sm:$0xff]  }
 0x93d   :  { %v3834_v45 = vmax.f32 %v3830_v42, 0.0  ;;  %v3835_v46 = vpack.c.bf16 %v3833_v40, %v3831_v39  ;;  %v11359_v39 = vld [vmem:[%s14701_s1 + $0x44] ss:$8 sps:$4 sm:$0xff]   ;;  %v11344_v40 = vld [vmem:[%s14709_s9 + $0x90] sm:$0xff]   ;;  %v11357_v42 = vld [vmem:[%s14701_s1 + $0x40] ss:$8 sps:$4 sm:$0xff]  }
 0x93f   :  { %v3836_v47 = vpack.c.bf16 %v3834_v45, %v3832_v41  ;;  %v3842_v48 = vsel %vm1647_vm8, %v3835_v46, 0  ;;  %v11365_v41 = vld [vmem:[%s14701_s1 + $0x34] ss:$8 sps:$4 sm:$0xff]   ;;  %v11345_v45 = vld [vmem:[%s14709_s9 + $0x88] sm:$0xff]   ;;  %v11363_v46 = vld [vmem:[%s14701_s1 + $0x30] ss:$8 sps:$4 sm:$0xff]  }
 0x941   :  { %9647 = vmatprep.subr.msk.bf16.mxu0 %vm1647_vm8, %v3836_v47  ;;  %v11371_v47 = vld [vmem:[%s14701_s1 + $0x24] ss:$8 sps:$4 sm:$0xff]  }
 0x942   :  { %3862 = vmatpush1.bf16.msra.mxu0 %v3842_v48  ;;  %v11346_v48 = vld [vmem:[%s14709_s9 + $0x80] sm:$0xff]  }
 0x943   :  { %3973 = vmatprep.subr.bf16.mxu0 %v11828_v2 }
 0x945   :  { %9648 = vmatmul.mubr.msk.bf16.vlgmr.msra.gmra.mxu0 %vm1643_vm9, %v3837_v49  ;;  %v11369_v49 = vld [vmem:[%s14701_s1 + $0x20] ss:$8 sps:$4 sm:$0xff]  }
 0x946   :  { %3974 = vmatpush1.bf16.msra.mxu0 %v11313_v50  ;;  %v11377_v50 = vld [vmem:[%s14701_s1 + $0x14] ss:$8 sps:$4 sm:$0xff]  }
 0x947   :  { %3975 = vmatprep.subr.bf16.mxu0 %v11828_v2 }
 0x94a   :  { %3976 = vmatpush1.bf16.msra.mxu0 %v11314_v52  ;;  %v11347_v52 = vld [vmem:[%s14709_s9 + $0x78] sm:$0xff]  }
 0x94b   :  { %3977 = vmatprep.subr.bf16.mxu0 %v11828_v2 }
 0x94e   :  { %3978 = vmatpush1.bf16.msra.mxu0 %v11315_v43  ;;  %v11350_v43 = vld [vmem:[%s14701_s1 + $0xb4] ss:$8 sps:$4 sm:$0xff]  }
 0x94f   :  { %3979 = vmatprep.subr.bf16.mxu0 %v11828_v2 }
 0x952   :  { %3980 = vmatpush1.bf16.msra.mxu0 %v11316_v44  ;;  %v11375_v44 = vld [vmem:[%s14701_s1 + $0x10] ss:$8 sps:$4 sm:$0xff]  }
 0x953   :  { %3981 = vmatprep.subr.bf16.mxu0 %v11828_v2 }
 0x956   :  { %3982 = vmatpush1.bf16.msra.mxu0 %v11317_v54 }
 0x957   :  { %3983 = vmatprep.subr.bf16.mxu0 %v11828_v2 }
 0x95a   :  { %3984 = vmatpush1.bf16.msra.mxu0 %v11318_v55  ;;  %v11383_v55 = vld [vmem:[%s14701_s1 + $0x4] ss:$8 sps:$4 sm:$0xff]  }
 0x95b   :  { %3985 = vmatprep.subr.bf16.mxu0 %v11828_v2 }
 0x95e   :  { %3986 = vmatpush1.bf16.msra.mxu0 %v11319_v51  ;;  %v11348_v51 = vld [vmem:[%s14701_s1 + $0xb0] ss:$8 sps:$4 sm:$0xff]  }
 0x95f   :  { %3987 = vmatprep.subr.bf16.mxu0 %v11828_v2 }
 0x962   :  { %3988 = vmatpush1.bf16.msra.mxu0 %v11320_v56  ;;  %v11356_v56 = vld [vmem:[%s14701_s1 + $0xa4] ss:$8 sps:$4 sm:$0xff]  }
 0x963   :  { %4001 = vmatprep.subr.bf16.mxu0 %v11828_v2 }
 0x966   :  { %4002 = vmatpush2.bf16.msra.mxu0 %v11321_v57 }
 0x967   :  { %4003 = vmatprep.subr.bf16.mxu0 %v11828_v2 }
 0x96a   :  { %4004 = vmatpush2.bf16.msra.mxu0 %v11322_v58  ;;  %v11381_v58 = vld [vmem:[%s14701_s1] ss:$8 sps:$4 sm:$0xff]  }
 0x96b   :  { %10682 = vmatprep.subr.bf16.mxu0 %v11829_v53 }
 0xa05   :  { %v3881_v62 = vpop.f32.mrf.mxu0 }
 0xa06   :  { %v3888_v7 = vpack.c.bf16 %v3881_v62, %v3881_v62  ;;  %v11354_v62 = vld [vmem:[%s14701_s1 + $0xa0] ss:$8 sps:$4 sm:$0xff]  }
 0xa07   :  { %v3883_v1 = vpop.f32.mrf.mxu0 }
 0xa08   :  { %v3889_v3 = vpack.c.bf16 %v3883_v1, %v3883_v1  ;;  %v4452_v1 = vpack.c.bf16 %v9731_v60, %v9730_v59  ;;  %v11428_v59 = vld [vmem:[%s14701_s1 + $0x1b4] ss:$8 sps:$4 sm:$0xff]  }
 0xa09   :  { %v3885_v6 = vpop.f32.mrf.mxu0 }
 0xa0a   :  { %9659 = vmatprep.mubr.msk.bf16.mxu0 %vm1777_vm10, %v3889_v3  ;;  %v11362_v3 = vld [vmem:[%s14701_s1 + $0x94] ss:$8 sps:$4 sm:$0xff]   ;;  %v11360_v6 = vld [vmem:[%s14701_s1 + $0x90] ss:$8 sps:$4 sm:$0xff]  }
 0xa0b   :  { %v3886_v8 = vpop.f32.mrf.mxu0  ;;  %4006 = vmatmul.mubr.bf16.vlgmr.msra.gmra.mxu0 %v3888_v7  ;;  %v11395_v7 = vld [vmem:[%s14701_s1 + $0x164] ss:$8 sps:$4 sm:$0xff]  }
 0xa0c   :  { %10683 = vmatpush3.bf16.msra.mxu0 %v11324_v5  ;;  %10692 = vmatprep.mubr.msk.bf16.mxu0 %vm11830_vm11, %v11829_v53  ;;  %v11387_v5 = vld [vmem:[%s14701_s1 + $0x170] ss:$8 sps:$4 sm:$0xff]   ;;  %v11368_v8 = vld [vmem:[%s14701_s1 + $0x84] ss:$8 sps:$4 sm:$0xff]  }
 0xa0d   :  { %10684 = vmatprep.subr.bf16.mxu0 %v11829_v53 }
 0xa10   :  { %10685 = vmatpush3.bf16.msra.mxu0 %v11326_v9  ;;  %v11393_v9 = vld [vmem:[%s14701_s1 + $0x160] ss:$8 sps:$4 sm:$0xff]  }
 0xa11   :  { %10686 = vmatprep.subr.bf16.mxu0 %v11829_v53 }
 0xa14   :  { %10687 = vmatpush3.bf16.msra.mxu0 %v11328_v10  ;;  %v9732_v10 = vld [vmem:[%s14700_s0 + $0x50] sm:$0xff] }
 0xa15   :  { %10688 = vmatprep.subr.bf16.mxu0 %v11829_v53 }
 0xa18   :  { %10689 = vmatpush3.bf16.msra.mxu0 %v11330_v13  ;;  %v11401_v13 = vld [vmem:[%s14701_s1 + $0x154] ss:$8 sps:$4 sm:$0xff]  }
 0xa19   :  { %10690 = vmatprep.subr.bf16.mxu0 %v11829_v53 }
 0xa1c   :  { %10691 = vmatpush3.bf16.msra.mxu0 %v11332_v15  ;;  %v4453_v15 = vpack.c.bf16 %v9733_v11, %v9732_v10  ;;  %v9840_v11 = vld [vmem:[%s14700_s0 + $0x54] sm:$0xff] }
 0xa1d   :  { %10710 = vmatprep.subr.bf16.mxu0 %v11829_v53 }
 0xacb   :  { %v4007_v0 = vpop.f32.mrf.mxu0 }
 0xacc   :  { %4014 = vst.msk [vmem:[#allocation3 + $0x8] sm:$0x1f] %vm1821_vm12, %v4007_v0  ;;  %v11374_v0 = vld [vmem:[%s14701_s1 + $0x74] ss:$8 sps:$4 sm:$0xff]  }
 0xacd   :  { %v4009_v16 = vpop.f32.mrf.mxu0 }
 0xace   :  { %v11399_v16 = vld [vmem:[%s14701_s1 + $0x150] ss:$8 sps:$4 sm:$0xff]  }
 0xacf   :  { %v4010_v17 = vpop.f32.mrf.mxu0 }
 0xad0   :  { %v11407_v17 = vld [vmem:[%s14701_s1 + $0x144] ss:$8 sps:$4 sm:$0xff]  }
 0xad1   :  { %v4011_v18 = vpop.f32.mrf.mxu0 }
 0xad2   :  { %v11372_v18 = vld [vmem:[%s14701_s1 + $0x70] ss:$8 sps:$4 sm:$0xff]  }
 0xad3   :  { %v4027_v19 = vld [vmem:[#allocation3 + $0x9] sm:$0x1]  ;;  %v4185_v20 = vld [vmem:[#allocation3 + $0xa] sm:$0x1]  ;;  %v4015_v35 = vld [vmem:[#allocation3 + $0x8] sm:$0x1] }
 0xad4   :  { %v4028_v22 = vpack.c.bf16 %v4027_v19, %v4027_v19  ;;  %v4186_v23 = vpack.c.bf16 %v4185_v20, %v4185_v20  ;;  %v4357_v31 = vld [vmem:[#allocation3 + $0xc] sm:$0x1]  ;;  %v4016_v36 = vpack.c.bf16 %v4015_v35, %v4015_v35  ;;  %v4271_v54 = vld [vmem:[#allocation3 + $0xb] sm:$0x1]  ;;  %v11413_v20 = vld [vmem:[%s14701_s1 + $0x134] ss:$8 sps:$4 sm:$0xff]  }
 0xad5   :  { %v4358_v37 = vpack.c.bf16 %v4357_v31, %v4357_v31  ;;  %v4272_v57 = vpack.c.bf16 %v4271_v54, %v4271_v54  ;;  %v11405_v19 = vld [vmem:[%s14701_s1 + $0x140] ss:$8 sps:$4 sm:$0xff]   ;;  %v9736_v31 = vld [vmem:[%s14700_s0 + $0x51] sm:$0xff] }
 0xad6   :  { %10665 = vmatmul.mubr.msk.bf16.vlgmr.msra.gmra.mxu1 %vm1878_vm13, %v4028_v22  ;;  %10693 = vmatmul.mubr.msk.bf16.vlgmr.msra.gmra.mxu0 %vm1878_vm13, %v4186_v23  ;;  %v9734_v22 = vld [vmem:[%s14700_s0 + $0x41] sm:$0xff]  ;;  %v9735_v23 = vld [vmem:[%s14700_s0 + $0x49] sm:$0xff] }
 0xad7   :  { %10669 = vmatpush3.bf16.msra.mxu1 %v11333_v12  ;;  %10711 = vmatpush3.bf16.msra.mxu0 %v11334_v21  ;;  %v11380_v12 = vld [vmem:[%s14701_s1 + $0x64] ss:$8 sps:$4 sm:$0xff]   ;;  %v11378_v21 = vld [vmem:[%s14701_s1 + $0x60] ss:$8 sps:$4 sm:$0xff]  }
 0xad8   :  { %10670 = vmatprep.subr.bf16.mxu1 %v11829_v53  ;;  %10712 = vmatprep.subr.bf16.mxu0 %v11829_v53  ;;  %v11390_v35 = vld [vmem:[%s14701_s1 + $0x100] ss:$8 sps:$4 sm:$0xff]  }
 0xad9   :  { %10678 = vmatprep.mubr.msk.bf16.mxu1 %vm11830_vm11, %v11829_v53  ;;  %10720 = vmatprep.mubr.msk.bf16.mxu0 %vm11830_vm11, %v11829_v53 }
 0xadb   :  { %10671 = vmatpush3.bf16.msra.mxu1 %v11335_v24  ;;  %10713 = vmatpush3.bf16.msra.mxu0 %v11336_v25  ;;  %v11386_v24 = vld [vmem:[%s14701_s1 + $0x114] ss:$8 sps:$4 sm:$0xff]   ;;  %v11411_v25 = vld [vmem:[%s14701_s1 + $0x130] ss:$8 sps:$4 sm:$0xff]  }
 0xadc   :  { %10672 = vmatprep.subr.bf16.mxu1 %v11829_v53  ;;  %10714 = vmatprep.subr.bf16.mxu0 %v11829_v53 }
 0xadf   :  { %10673 = vmatpush3.bf16.msra.mxu1 %v11337_v26  ;;  %10715 = vmatpush3.bf16.msra.mxu0 %v11338_v27  ;;  %v11419_v26 = vld [vmem:[%s14701_s1 + $0x124] ss:$8 sps:$4 sm:$0xff]   ;;  %v4470_v27 = vpack.c.bf16 %v9735_v23, %v9734_v22  ;;  %v11440_v22 = vld [vmem:[%s14704_s4 + $0x30] sm:$0xff]  }
 0xae0   :  { %10674 = vmatprep.subr.bf16.mxu1 %v11829_v53  ;;  %10716 = vmatprep.subr.bf16.mxu0 %v11829_v53 }
 0xae3   :  { %10675 = vmatpush3.bf16.msra.mxu1 %v11339_v28  ;;  %10717 = vmatpush3.bf16.msra.mxu0 %v11340_v29  ;;  %v11384_v28 = vld [vmem:[%s14701_s1 + $0x110] ss:$8 sps:$4 sm:$0xff]   ;;  %v11392_v29 = vld [vmem:[%s14701_s1 + $0x104] ss:$8 sps:$4 sm:$0xff]  }
 0xae4   :  { %10676 = vmatprep.subr.bf16.mxu1 %v11829_v53  ;;  %10718 = vmatprep.subr.bf16.mxu0 %v11829_v53 }
 0xae7   :  { %10677 = vmatpush3.bf16.msra.mxu1 %v11341_v30  ;;  %10719 = vmatpush3.bf16.msra.mxu0 %v11342_v32  ;;  %v11417_v30 = vld [vmem:[%s14701_s1 + $0x120] ss:$8 sps:$4 sm:$0xff]  }
 0xae8   :  { %10696 = vmatprep.subr.bf16.mxu1 %v11829_v53  ;;  %4673 = vmatprep.subr.bf16.mxu0 %v11353_v33  ;;  %v9808_v32 = vld [vmem:[%s14700_s0 + $0x43] sm:$0xff]  ;;  %v9809_v33 = vld [vmem:[%s14700_s0 + $0x4b] sm:$0xff] }
 0xaea   :  { %10679 = vmatmul.mubr.msk.bf16.vlgmr.msra.gmra.mxu1 %vm1878_vm13, %v4016_v36  ;;  %10721 = vmatmul.mubr.msk.bf16.vlgmr.msra.gmra.mxu0 %vm1878_vm13, %v4358_v37  ;;  %v4871_v36 = vpack.c.bf16 %v9809_v33, %v9808_v32  ;;  %v11398_v37 = vld [vmem:[%s14701_s1 + $0xf4] ss:$8 sps:$4 sm:$0xff]  }
 0xaeb   :  { %10697 = vmatpush3.bf16.msra.mxu1 %v11343_v34  ;;  %10706 = vmatprep.mubr.msk.bf16.mxu1 %vm11830_vm11, %v11829_v53  ;;  %v9737_v34 = vld [vmem:[%s14700_s0 + $0x59] sm:$0xf] }
 0xaec   :  { %10698 = vmatprep.subr.bf16.mxu1 %v11829_v53  ;;  %4674 = vmatpush1.bf16.msra.mxu0 %v11351_v38  ;;  %v4471_v38 = vpack.c.bf16 %v9737_v34, %v9736_v31  ;;  %v11444_v31 = vld [vmem:[%s14704_s4 + $0x10] sm:$0xff]  }
 0xaed   :  { %4675 = vmatprep.subr.bf16.mxu0 %v11359_v39  ;;  %4701 = vmatprep.mubr.bf16.mxu0 %v11828_v2  ;;  %v11396_v39 = vld [vmem:[%s14701_s1 + $0xf0] ss:$8 sps:$4 sm:$0xff]  }
 0xaef   :  { %10699 = vmatpush3.bf16.msra.mxu1 %v11344_v40  ;;  %v11404_v40 = vld [vmem:[%s14701_s1 + $0xe4] ss:$8 sps:$4 sm:$0xff]  }
 0xaf0   :  { %10700 = vmatprep.subr.bf16.mxu1 %v11829_v53  ;;  %4676 = vmatpush1.bf16.msra.mxu0 %v11357_v42  ;;  %v9810_v42 = vld [vmem:[%s14700_s0 + $0x53] sm:$0xff] }
 0xaf1   :  { %4677 = vmatprep.subr.bf16.mxu0 %v11365_v41  ;;  %v9811_v41 = vld [vmem:[%s14700_s0 + $0x5b] sm:$0xf] }
 0xaf3   :  { %10701 = vmatpush3.bf16.msra.mxu1 %v11345_v45  ;;  %v11402_v45 = vld [vmem:[%s14701_s1 + $0xe0] ss:$8 sps:$4 sm:$0xff]  }
 0xaf4   :  { %10702 = vmatprep.subr.bf16.mxu1 %v11829_v53  ;;  %4678 = vmatpush1.bf16.msra.mxu0 %v11363_v46  ;;  %v4872_v46 = vpack.c.bf16 %v9811_v41, %v9810_v42  ;;  %v4443_v42 = vld [vmem:[%s14710_s10] sm:$0x1] }
 0xaf5   :  { %4679 = vmatprep.subr.bf16.mxu0 %v11371_v47  ;;  %v11410_v47 = vld [vmem:[%s14701_s1 + $0xd4] ss:$8 sps:$4 sm:$0xff]  }
 0xaf7   :  { %10703 = vmatpush3.bf16.msra.mxu1 %v11346_v48  ;;  %v11408_v48 = vld [vmem:[%s14701_s1 + $0xd0] ss:$8 sps:$4 sm:$0xff]  }
 0xaf8   :  { %10704 = vmatprep.subr.bf16.mxu1 %v11829_v53  ;;  %4680 = vmatpush1.bf16.msra.mxu0 %v11369_v49  ;;  %v11416_v49 = vld [vmem:[%s14701_s1 + $0xc4] ss:$8 sps:$4 sm:$0xff]  }
 0xaf9   :  { %4681 = vmatprep.subr.bf16.mxu0 %v11377_v50  ;;  %v11414_v50 = vld [vmem:[%s14701_s1 + $0xc0] ss:$8 sps:$4 sm:$0xff]  }
 0xafb   :  { %10705 = vmatpush3.bf16.msra.mxu1 %v11347_v52  ;;  %v9778_v52 = vld [vmem:[%s14700_s0 + $0x42] sm:$0xff] }
 0xafc   :  { %4554 = vmatprep.subr.bf16.mxu1 %v11350_v43  ;;  %4682 = vmatpush1.bf16.msra.mxu0 %v11375_v44  ;;  %v9779_v43 = vld [vmem:[%s14700_s0 + $0x4a] sm:$0xff]  ;;  %v11422_v44 = vld [vmem:[%s14701_s1 + $0x1d4] ss:$8 sps:$4 sm:$0xff]  }
 0xafd   :  { %4683 = vmatprep.subr.bf16.mxu0 %v11383_v55  ;;  %v4726_v54 = vpack.c.bf16 %v9779_v43, %v9778_v52  ;;  %v11420_v55 = vld [vmem:[%s14701_s1 + $0x1d0] ss:$8 sps:$4 sm:$0xff]  }
 0xafe   :  { %10707 = vmatmul.mubr.msk.bf16.vlgmr.msra.gmra.mxu1 %vm1878_vm13, %v4272_v57  ;;  %v9780_v57 = vld [vmem:[%s14700_s0 + $0x52] sm:$0xff] }
 0xaff   :  { %4555 = vmatpush1.bf16.msra.mxu1 %v11348_v51  ;;  %4582 = vmatprep.mubr.bf16.mxu1 %v11828_v2  ;;  %v11425_v51 = vld [vmem:[%s14701_s1 + $0x1c4] ss:$8 sps:$4 sm:$0xff]  }
 0xb00   :  { %4556 = vmatprep.subr.bf16.mxu1 %v11356_v56  ;;  %4684 = vmatpush1.bf16.msra.mxu0 %v11381_v58  ;;  %v11423_v56 = vld [vmem:[%s14701_s1 + $0x1c0] ss:$8 sps:$4 sm:$0xff]   ;;  %v9781_v58 = vld [vmem:[%s14700_s0 + $0x5a] sm:$0xf] }
 0xb01   :  { %4955 = vmatprep.subr.bf16.mxu0 %v11389_v61  ;;  %v4727_v60 = vpack.c.bf16 %v9781_v58, %v9780_v57  ;;  %v11426_v61 = vld [vmem:[%s14701_s1 + $0x1b0] ss:$8 sps:$4 sm:$0xff]  }
 0xb03   :  { %4557 = vmatpush1.bf16.msra.mxu1 %v11354_v62  ;;  %9776 = vmatmul.mubr.msk.bf16.vlgmr.msra.gmra.mxu0 %vm149_vm0, %v4452_v1  ;;  %v11431_v62 = vld [vmem:[%s14701_s1 + $0x1a4] ss:$8 sps:$4 sm:$0xff]   ;;  %v11429_v1 = vld [vmem:[%s14701_s1 + $0x1a0] ss:$8 sps:$4 sm:$0xff]  }
 0xb04   :  { %4558 = vmatprep.subr.bf16.mxu1 %v11362_v3  ;;  %4956 = vmatpush1.bf16.msra.mxu0 %v11387_v5  ;;  %v11434_v3 = vld [vmem:[%s14701_s1 + $0x194] ss:$8 sps:$4 sm:$0xff]   ;;  %v11432_v5 = vld [vmem:[%s14701_s1 + $0x190] ss:$8 sps:$4 sm:$0xff]  }
 0xb05   :  { %4957 = vmatprep.subr.bf16.mxu0 %v11395_v7  ;;  %4711 = vmatprep.mubr.bf16.mxu0 %v11828_v2  ;;  %v11437_v7 = vld [vmem:[%s14701_s1 + $0x184] ss:$8 sps:$4 sm:$0xff]  }
 0xb07   :  { %4559 = vmatpush1.bf16.msra.mxu1 %v11360_v6  ;;  %v11435_v6 = vld [vmem:[%s14701_s1 + $0x180] ss:$8 sps:$4 sm:$0xff]  }
 0xb08   :  { %4560 = vmatprep.subr.bf16.mxu1 %v11368_v8  ;;  %4958 = vmatpush1.bf16.msra.mxu0 %v11393_v9  ;;  %v9838_v8 = vld [vmem:[%s14700_s0 + $0x44] sm:$0xff]  ;;  %v9839_v9 = vld [vmem:[%s14700_s0 + $0x4c] sm:$0xff] }
 0xb09   :  { %4959 = vmatprep.subr.bf16.mxu0 %v11401_v13  ;;  %v5016_v10 = vpack.c.bf16 %v9839_v9, %v9838_v8  ;;  %v9841_v13 = vld [vmem:[%s14700_s0 + $0x5c] sm:$0xf] }
 0xb0b   :  { %4561 = vmatpush1.bf16.msra.mxu1 %v11366_v14  ;;  %9777 = vmatmul.mubr.msk.bf16.gmra.mxu0 %vm149_vm0, %v4453_v15  ;;  %v5017_v14 = vpack.c.bf16 %v9841_v13, %v9840_v11 }
 0xb0c   :  { %4562 = vmatprep.subr.bf16.mxu1 %v11374_v0  ;;  %4960 = vmatpush1.bf16.msra.mxu0 %v11399_v16 }
 0xb0d   :  { %4961 = vmatprep.subr.bf16.mxu0 %v11407_v17  ;;  %4983 = vmatprep.mubr.bf16.mxu0 %v11828_v2 }
 0xb0f   :  { %4563 = vmatpush1.bf16.msra.mxu1 %v11372_v18 }
 0xb10   :  { %4564 = vmatprep.subr.bf16.mxu1 %v11380_v12  ;;  %4962 = vmatpush1.bf16.msra.mxu0 %v11405_v19 }
 0xb11   :  { %4963 = vmatprep.subr.bf16.mxu0 %v11413_v20 }
 0xb13   :  { %4565 = vmatpush1.bf16.msra.mxu1 %v11378_v21  ;;  %v11439_v21 = vld [vmem:[%s14704_s4 + $0x38] sm:$0xff]  }
 0xb14   :  { %4810 = vmatprep.subr.bf16.mxu1 %v11386_v24  ;;  %4964 = vmatpush1.bf16.msra.mxu0 %v11411_v25  ;;  %v11441_v25 = vld [vmem:[%s14704_s4 + $0x28] sm:$0xff]  }
 0xb15   :  { %4965 = vmatprep.subr.bf16.mxu0 %v11419_v26 }
 0xb16   :  { %9762 = vmatmul.mubr.msk.bf16.vlgmr.msra.gmra.mxu1 %vm149_vm0, %v4470_v27 }
 0xb17   :  { %4811 = vmatpush1.bf16.msra.mxu1 %v11384_v28  ;;  %4592 = vmatprep.mubr.bf16.mxu1 %v11828_v2 }
 0xb18   :  { %4812 = vmatprep.subr.bf16.mxu1 %v11392_v29  ;;  %4966 = vmatpush1.bf16.msra.mxu0 %v11417_v30  ;;  %v11442_v30 = vld [vmem:[%s14704_s4 + $0x20] sm:$0xff]  }
 0xb1b   :  { %4813 = vmatpush1.bf16.msra.mxu1 %v11390_v35  ;;  %9836 = vmatmul.mubr.msk.bf16.vlgmr.msra.gmra.mxu0 %vm149_vm0, %v4871_v36  ;;  %v11443_v35 = vld [vmem:[%s14704_s4 + $0x18] sm:$0xff]   ;;  %v11445_v36 = vld [vmem:[%s14704_s4 + $0x8] sm:$0xff]  }
 0xb1c   :  { %4814 = vmatprep.subr.bf16.mxu1 %v11398_v37  ;;  %4993 = vmatprep.mubr.bf16.mxu0 %v11828_v2 }
 0xb1e   :  { %9763 = vmatmul.mubr.msk.bf16.gmra.mxu1 %vm149_vm0, %v4471_v38 }
 0xb1f   :  { %4815 = vmatpush1.bf16.msra.mxu1 %v11396_v39  ;;  %4838 = vmatprep.mubr.bf16.mxu1 %v11828_v2 }
 0xb20   :  { %4816 = vmatprep.subr.bf16.mxu1 %v11404_v40  ;;  %v11446_v40 = vld [vmem:[%s14704_s4] sm:$0xff]  }
 0xb23   :  { %4817 = vmatpush1.bf16.msra.mxu1 %v11402_v45  ;;  %9837 = vmatmul.mubr.msk.bf16.gmra.mxu0 %vm149_vm0, %v4872_v46  ;;  %v11447_v45 = vld [vmem:[%s14704_s4 + $0x50] ss:$0 sps:$4 sm:$0xff]  }
 0xb24   :  { %4818 = vmatprep.subr.bf16.mxu1 %v11410_v47  ;;  %5237 = vmatprep.mubr.bf16.mxu0 %v11828_v2 }
 0xb27   :  { %4819 = vmatpush1.bf16.msra.mxu1 %v11408_v48 }
 0xb28   :  { %4820 = vmatprep.subr.bf16.mxu1 %v11416_v49 }
 0xb2b   :  { %4821 = vmatpush1.bf16.msra.mxu1 %v11414_v50  ;;  %v5338_v50 = vsel %vm949_vm3, %v11447_v45, 0 }
 0xb2c   :  { %5100 = vmatprep.subr.bf16.mxu1 %v11422_v44 }
 0xb2e   :  { %9806 = vmatmul.mubr.msk.bf16.vlgmr.msra.gmra.mxu1 %vm149_vm0, %v4726_v54 }
 0xb2f   :  { %5101 = vmatpush1.bf16.msra.mxu1 %v11420_v55  ;;  %4848 = vmatprep.mubr.bf16.mxu1 %v11828_v2 }
 0xb30   :  { %5102 = vmatprep.subr.bf16.mxu1 %v11425_v51 }
 0xb33   :  { %5103 = vmatpush1.bf16.msra.mxu1 %v11423_v56 }
 0xb34   :  { %5104 = vmatprep.subr.bf16.mxu1 %v11428_v59 }
 0xb36   :  { %9807 = vmatmul.mubr.msk.bf16.gmra.mxu1 %vm149_vm0, %v4727_v60 }
 0xb37   :  { %5105 = vmatpush1.bf16.msra.mxu1 %v11426_v61  ;;  %5128 = vmatprep.mubr.bf16.mxu1 %v11828_v2 }
 0xb38   :  { %5106 = vmatprep.subr.bf16.mxu1 %v11431_v62 }
 0xb3b   :  { %5107 = vmatpush1.bf16.msra.mxu1 %v11429_v1 }
 0xb3c   :  { %5108 = vmatprep.subr.bf16.mxu1 %v11434_v3 }
 0xb3f   :  { %5109 = vmatpush1.bf16.msra.mxu1 %v11432_v5 }
 0xb40   :  { %5110 = vmatprep.subr.bf16.mxu1 %v11437_v7 }
 0xb43   :  { %5111 = vmatpush1.bf16.msra.mxu1 %v11435_v6 }
 0xb44   :  { %5340 = vmatprep.subr.bf16.mxu1 %v11828_v2 }
 0xb46   :  { %9866 = vmatmul.mubr.msk.bf16.vlgmr.msra.gmra.mxu1 %vm149_vm0, %v5016_v10 }
 0xb47   :  { %5138 = vmatprep.mubr.bf16.mxu1 %v11828_v2  ;;  %5341 = vmatpush1.bf16.msra.mxu1 %v11439_v21 }
 0xb48   :  { %5342 = vmatprep.subr.bf16.mxu1 %v11828_v2 }
 0xb4b   :  { %5343 = vmatpush1.bf16.msra.mxu1 %v11440_v22 }
 0xb4c   :  { %5344 = vmatprep.subr.bf16.mxu1 %v11828_v2 }
 0xb4e   :  { %9867 = vmatmul.mubr.msk.bf16.gmra.mxu1 %vm149_vm0, %v5017_v14 }
 0xb4f   :  { %5345 = vmatpush1.bf16.msra.mxu1 %v11441_v25 }
 0xb50   :  { %5346 = vmatprep.subr.bf16.mxu1 %v11828_v2 }
 0xb53   :  { %5347 = vmatpush1.bf16.msra.mxu1 %v11442_v30 }
 0xb54   :  { %5348 = vmatprep.subr.bf16.mxu1 %v11828_v2 }
 0xb57   :  { %5349 = vmatpush1.bf16.msra.mxu1 %v11443_v35 }
 0xb58   :  { %5350 = vmatprep.subr.bf16.mxu1 %v11828_v2 }
 0xb5b   :  { %5351 = vmatpush1.bf16.msra.mxu1 %v11444_v31 }
 0xb5c   :  { %5352 = vmatprep.subr.bf16.mxu1 %v11828_v2 }
 0xb5f   :  { %5353 = vmatpush1.bf16.msra.mxu1 %v11445_v36 }
 0xb60   :  { %5354 = vmatprep.subr.bf16.mxu1 %v11828_v2 }
 0xb63   :  { %5355 = vmatpush1.bf16.msra.mxu1 %v11446_v40 }
 0xb64   :  { %5366 = vmatprep.subr.bf16.mxu1 %v11828_v2 }
 0xb67   :  { %5367 = vmatpush2.bf16.msra.mxu1 %v5338_v50 }
 0xb68   :  { %5368 = vmatprep.subr.bf16.mxu1 %v11828_v2 }
 0xb96   :  { %v4106_v15 = vpop.f32.mrf.mxu1  ;;  %v4264_v0 = vpop.f32.mrf.mxu0 }
 0xb98   :  { %v10666_v16 = vpop.f32.mrf.mxu1  ;;  %v10694_v17 = vpop.f32.mrf.mxu0 }
 0xb9a   :  { %v4109_v18 = vpop.f32.mrf.mxu1  ;;  %v4267_v12 = vpop.f32.mrf.mxu0 }
 0xb9c   :  { %v10667_v19 = vpop.f32.mrf.mxu1  ;;  %v10695_v20 = vpop.f32.mrf.mxu0 }
 0xbaa   :  { %v4179_v23 = vpop.f32.mrf.mxu1  ;;  %v4436_v24 = vpop.f32.mrf.mxu0 }
 0xbab   :  { %v4180_v34 = vadd.f32 %v4179_v23, %v4106_v15 }
 0xbac   :  { %v10680_v26 = vpop.f32.mrf.mxu1  ;;  %v10722_v27 = vpop.f32.mrf.mxu0 }
 0xbad   :  { %v4270_v37 = vadd.f32 %v4264_v0, %v4180_v34 }
 0xbae   :  { %v4182_v28 = vpop.f32.mrf.mxu1  ;;  %v4439_v29 = vpop.f32.mrf.mxu0 }
 0xbb0   :  { %v10681_v32 = vpop.f32.mrf.mxu1  ;;  %v10723_v33 = vpop.f32.mrf.mxu0 }
 0xbbe   :  { %v4350_v38 = vpop.f32.mrf.mxu1 }
 0xbbf   :  { %v4356_v39 = vadd.f32 %v4350_v38, %v4270_v37  ;;  %v5157_v38 = vld [vmem:[%s14702_s2] sm:$0x3] }
 0xbc0   :  { %v10708_v41 = vpop.f32.mrf.mxu1  ;;  %v5162_v50 = vrot.slane %v5157_v38, %v12177_v63 }
 0xbc1   :  { %v4442_v46 = vadd.f32 %v4436_v24, %v4356_v39 }
 0xbc2   :  { %v4353_v47 = vpop.f32.mrf.mxu1 }
 0xbc3   :  { %v4444_v48 = vadd.f32 %v4443_v42, %v4442_v46  ;;  %v4703_v44 = vpop.f32.mrf.mxu0 }
 0xbc4   :  { %v10709_v49 = vpop.f32.mrf.mxu1 }
 0xbc5   :  { %v4445_v52 = vmax.f32 %v4444_v48, 0.0  ;;  %v4705_v51 = vpop.f32.mrf.mxu0 }
 0xbc7   :  { %4446 = vst.msk [vmem:[#allocation4 + $0x1] sm:$0x1] %vm2259_vm14, %v4445_v52  ;;  %v4707_v57 = vpop.f32.mrf.mxu0 }
 0xbc9   :  { %v4709_v59 = vpop.f32.mrf.mxu0 }
 0xbcb   :  { %v4713_v61 = vpop.f32.mrf.mxu0 }
 0xbcd   :  { %v4715_v1 = vpop.f32.mrf.mxu0 }
 0xbcf   :  { %v4717_v5 = vpop.f32.mrf.mxu0 }
 0xbd1   :  { %v4719_v8 = vpop.f32.mrf.mxu0 }
 0xbd6   :  { %v4584_v43 = vpop.f32.mrf.mxu1 }
 0xbd7   :  { %v4704_v39 = vadd.f32 %v4703_v44, %v4584_v43 }
 0xbd8   :  { %v4586_v54 = vpop.f32.mrf.mxu1 }
 0xbd9   :  { %v4706_v27 = vadd.f32 %v4705_v51, %v4586_v54 }
 0xbda   :  { %v4588_v55 = vpop.f32.mrf.mxu1 }
 0xbdb   :  { %v4985_v10 = vpop.f32.mrf.mxu0  ;;  %v4708_v32 = vadd.f32 %v4707_v57, %v4588_v55 }
 0xbdc   :  { %v4590_v56 = vpop.f32.mrf.mxu1 }
 0xbdd   :  { %v4987_v13 = vpop.f32.mrf.mxu0  ;;  %v4710_v23 = vadd.f32 %v4709_v59, %v4590_v56 }
 0xbde   :  { %v4594_v58 = vpop.f32.mrf.mxu1 }
 0xbdf   :  { %v4989_v15 = vpop.f32.mrf.mxu0  ;;  %v4714_v20 = vadd.f32 %v4713_v61, %v4594_v58  ;;  %v5166_v58 = vrot.slane %v5157_v38, %v12179_v4  ;;  %v11460_v38 = vld [vmem:[%s14705_s5 + $0x88] ss:$8 sps:$4 sm:$0xff]  }
 0xbe0   :  { %v4596_v60 = vpop.f32.mrf.mxu1 }
 0xbe1   :  { %v4991_v16 = vpop.f32.mrf.mxu0  ;;  %v4716_v24 = vadd.f32 %v4715_v1, %v4596_v60 }
 0xbe2   :  { %v4598_v62 = vpop.f32.mrf.mxu1 }
 0xbe3   :  { %v4995_v18 = vpop.f32.mrf.mxu0  ;;  %v4718_v28 = vadd.f32 %v4717_v5, %v4598_v62 }
 0xbe4   :  { %v4600_v3 = vpop.f32.mrf.mxu1 }
 0xbe5   :  { %v4997_v21 = vpop.f32.mrf.mxu0  ;;  %v4720_v31 = vadd.f32 %v4719_v8, %v4600_v3 }
 0xbe7   :  { %v4999_v33 = vpop.f32.mrf.mxu0 }
 0xbe9   :  { %v5001_v49 = vpop.f32.mrf.mxu0 }
 0xbee   :  { %v4840_v7 = vpop.f32.mrf.mxu1 }
 0xbef   :  { %v4859_v48 = vadd.f32 %v4840_v7, %v4704_v39 }
 0xbf0   :  { %v4842_v6 = vpop.f32.mrf.mxu1 }
 0xbf1   :  { %v4860_v34 = vadd.f32 %v4842_v6, %v4706_v27  ;;  %v5004_v62 = vadd.f32 %v4985_v10, %v4859_v48  ;;  %v11448_v27 = vld [vmem:[%s14704_s4 + $0x48] sm:$0xff]  }
 0xbf2   :  { %v4844_v9 = vpop.f32.mrf.mxu1  ;;  %5369 = vmatpush2.bf16.msra.mxu1 %v11448_v27  ;;  %v11494_v27 = vld [vmem:[%s14705_s5 + $0x30] ss:$8 sps:$4 sm:$0xff]  }
 0xbf3   :  { %v4861_v40 = vadd.f32 %v4844_v9, %v4708_v32  ;;  %v5005_v54 = vadd.f32 %v4987_v13, %v4860_v34  ;;  %5370 = vmatprep.subr.bf16.mxu1 %v11828_v2 }
 0xbf4   :  { %v4846_v11 = vpop.f32.mrf.mxu1 }
 0xbf5   :  { %v4862_v29 = vadd.f32 %v4846_v11, %v4710_v23  ;;  %v5006_v57 = vadd.f32 %v4989_v15, %v4861_v40 }
 0xbf6   :  { %v4850_v14 = vpop.f32.mrf.mxu1 }
 0xbf7   :  { %v4863_v25 = vadd.f32 %v4850_v14, %v4714_v20  ;;  %v5007_v41 = vadd.f32 %v4991_v16, %v4862_v29  ;;  %v9893_v29 = vld [vmem:[%s14705_s5 + $0xa8] sm:$0x33] }
 0xbf8   :  { %v4852_v0 = vpop.f32.mrf.mxu1  ;;  %v9905_v32 = vcombine.high %v9893_v29, %v9893_v29 }
 0xbf9   :  { %v4864_v30 = vadd.f32 %v4852_v0, %v4716_v24  ;;  %v5008_v36 = vadd.f32 %v4995_v18, %v4863_v25 }
 0xbfa   :  { %v4854_v17 = vpop.f32.mrf.mxu1 }
 0xbfb   :  { %v4865_v37 = vadd.f32 %v4854_v17, %v4718_v28  ;;  %v5009_v45 = vadd.f32 %v4997_v21, %v4864_v30  ;;  %v11449_v28 = vld [vmem:[%s14704_s4 + $0x40] sm:$0xff]  }
 0xbfc   :  { %v4856_v12 = vpop.f32.mrf.mxu1  ;;  %5371 = vmatpush2.bf16.msra.mxu1 %v11449_v28  ;;  %v9932_v30 = vld [vmem:[%s14705_s5 + $0x100] sm:$0x33]  ;;  %v11497_v28 = vld [vmem:[%s14705_s5 + $0x190] ss:$8 sps:$4 sm:$0xff]  }
 0xbfd   :  { %v4866_v46 = vadd.f32 %v4856_v12, %v4720_v31  ;;  %v5010_v55 = vadd.f32 %v4999_v33, %v4865_v37  ;;  %v9944_v33 = vcombine.high %v9932_v30, %v9932_v30  ;;  %v11456_v31 = vld [vmem:[%s14705_s5 + $0x9c] ss:$8 sps:$4 sm:$0xff]   ;;  %v11462_v37 = vld [vmem:[%s14705_s5 + $0x8c] ss:$8 sps:$4 sm:$0xff]  }
 0xbff   :  { %v5011_v43 = vadd.f32 %v5001_v49, %v4866_v46  ;;  %9945 = vmatprep.subr.msk.bf16.mxu1 %vm1085_vm4, %v9944_v33  ;;  %v11459_v49 = vld [vmem:[%s14705_s5 + $0xf4] ss:$8 sps:$4 sm:$0xff]   ;;  %v11503_v33 = vld [vmem:[%s14705_s5 + $0x180] ss:$8 sps:$4 sm:$0xff]  }
 0xc06   :  { %v5130_v19 = vpop.f32.mrf.mxu1 }
 0xc07   :  { %v5149_v9 = vadd.f32 %v5130_v19, %v5004_v62  ;;  %v11481_v62 = vld [vmem:[%s14705_s5 + $0xb0] ss:$8 sps:$4 sm:$0xff]  }
 0xc08   :  { %v5132_v22 = vpop.f32.mrf.mxu1 }
 0xc09   :  { %v5150_v44 = vadd.f32 %v5132_v22, %v5005_v54  ;;  %v5169_v20 = vadd.f32 %v5162_v50, %v5149_v9  ;;  %v11463_v54 = vld [vmem:[%s14705_s5 + $0xe0] ss:$8 sps:$4 sm:$0xff]  }
 0xc0a   :  { %v5134_v26 = vpop.f32.mrf.mxu1 }
 0xc0b   :  { %v5151_v1 = vadd.f32 %v5134_v26, %v5006_v57  ;;  %v5170_v11 = vadd.f32 %v5166_v58, %v5150_v44  ;;  %v5177_v25 = vmax.f32 %v5169_v20, 0.0  ;;  %v11438_v26 = vld [vmem:[%s14703_s3] sm:$0x7f]   ;;  %v11469_v57 = vld [vmem:[%s14705_s5 + $0xd0] ss:$8 sps:$4 sm:$0xff]  }
 0xc0c   :  { %v5136_v35 = vpop.f32.mrf.mxu1  ;;  %v11475_v44 = vld [vmem:[%s14705_s5 + $0xc0] ss:$8 sps:$4 sm:$0xff]  }
 0xc0d   :  { %v5152_v51 = vadd.f32 %v5136_v35, %v5007_v41  ;;  %v5171_v15 = vadd.f32 %v5162_v50, %v5151_v1  ;;  %v5178_v21 = vmax.f32 %v5170_v11, 0.0  ;;  %v9904_v35 = vcombine.low %v9893_v29, %v9893_v29  ;;  %v11483_v1 = vld [vmem:[%s14705_s5 + $0xb4] ss:$8 sps:$4 sm:$0xff]   ;;  %v11502_v29 = vld [vmem:[%s14705_s5 + $0x24] ss:$8 sps:$4 sm:$0xff]  }
 0xc0e   :  { %v5140_v42 = vpop.f32.mrf.mxu1  ;;  %v9943_v41 = vcombine.low %v9932_v30, %v9932_v30  ;;  %v11505_v30 = vld [vmem:[%s14705_s5 + $0x184] ss:$8 sps:$4 sm:$0xff]  }
 0xc0f   :  { %v5153_v47 = vadd.f32 %v5140_v42, %v5008_v36  ;;  %v5172_v5 = vadd.f32 %v5166_v58, %v5152_v51  ;;  %v5179_v10 = vmax.f32 %v5171_v15, 0.0  ;;  %v5471_v34 = vsel %vm1085_vm4, %v9904_v35, 0  ;;  %v11454_v36 = vld [vmem:[%s14705_s5 + $0x98] ss:$8 sps:$4 sm:$0xff]   ;;  %v11471_v51 = vld [vmem:[%s14705_s5 + $0xd4] ss:$8 sps:$4 sm:$0xff]  }
 0xc10   :  { %v5142_v52 = vpop.f32.mrf.mxu1  ;;  %v5699_v48 = vsel %vm1085_vm4, %v9943_v41, 0  ;;  %v11508_v35 = vld [vmem:[%s14705_s5 + $0x14] ss:$8 sps:$4 sm:$0xff]  }
 0xc11   :  { %v5154_v56 = vadd.f32 %v5142_v52, %v5009_v45  ;;  %v5173_v60 = vadd.f32 %v5162_v50, %v5153_v47  ;;  %v5180_v16 = vmax.f32 %v5172_v5, 0.0  ;;  %v5185_v19 = vpack.c.bf16 %v5179_v10, %v5177_v25  ;;  %v11465_v52 = vld [vmem:[%s14705_s5 + $0xe4] ss:$8 sps:$4 sm:$0xff]   ;;  %v9982_v5 = vld [vmem:[%s14705_s5 + $0x1b0] sm:$0x33] }
 0xc12   :  { %v5144_v59 = vpop.f32.mrf.mxu1  ;;  %v11491_v25 = vld [vmem:[%s14705_s5 + $0x1a0] ss:$8 sps:$4 sm:$0xff]  }
 0xc13   :  { %v5155_v61 = vadd.f32 %v5144_v59, %v5010_v55  ;;  %v5174_v7 = vadd.f32 %v5166_v58, %v5154_v56  ;;  %v5181_v13 = vmax.f32 %v5173_v60, 0.0  ;;  %v5186_v24 = vpack.c.bf16 %v5180_v16, %v5178_v21  ;;  %v11468_v55 = vld [vmem:[%s14705_s5 + $0x7c] ss:$8 sps:$4 sm:$0xff]   ;;  %v11466_v56 = vld [vmem:[%s14705_s5 + $0x78] ss:$8 sps:$4 sm:$0xff]  }
 0xc14   :  { %v5146_v3 = vpop.f32.mrf.mxu1  ;;  %v11477_v59 = vld [vmem:[%s14705_s5 + $0xc4] ss:$8 sps:$4 sm:$0xff]   ;;  %v11478_v60 = vld [vmem:[%s14705_s5 + $0x58] ss:$8 sps:$4 sm:$0xff]  }
 0xc15   :  { %v5175_v6 = vadd.f32 %v5162_v50, %v5155_v61  ;;  %v5156_v8 = vadd.f32 %v5146_v3, %v5011_v43  ;;  %v5182_v17 = vmax.f32 %v5174_v7, 0.0  ;;  %v11457_v50 = vld [vmem:[%s14705_s5 + $0xf0] ss:$8 sps:$4 sm:$0xff]   ;;  %v11480_v61 = vld [vmem:[%s14705_s5 + $0x5c] ss:$8 sps:$4 sm:$0xff]  }
 0xc16   :  { %v11472_v43 = vld [vmem:[%s14705_s5 + $0x68] ss:$8 sps:$4 sm:$0xff]   ;;  %v11490_v21 = vld [vmem:[%s14705_s5 + $0x44] ss:$8 sps:$4 sm:$0xff]  }
 0xc17   :  { %v5183_v14 = vmax.f32 %v5175_v6, 0.0  ;;  %v5176_v0 = vadd.f32 %v5166_v58, %v5156_v8  ;;  %v11474_v58 = vld [vmem:[%s14705_s5 + $0x6c] ss:$8 sps:$4 sm:$0xff]   ;;  %v9994_v6 = vcombine.high %v9982_v5, %v9982_v5 }
 0xc18   :  { %v5397_v3 = vld [vmem:[%s14705_s5 + $0x50] sm:$0x33] }
 0xc19   :  { %v5187_v18 = vpack.c.bf16 %v5183_v14, %v5181_v13  ;;  %v5184_v12 = vmax.f32 %v5176_v0, 0.0  ;;  %v9919_v7 = vcombine.high %v5397_v3, %v5397_v3  ;;  %v9918_v14 = vcombine.low %v5397_v3, %v5397_v3 }
 0xc1a   :  { %v9993_v0 = vcombine.low %v9982_v5, %v9982_v5 }
 0xc1b   :  { %v5188_v22 = vpack.c.bf16 %v5184_v12, %v5182_v17  ;;  %v5200_v23 = vsel %vm809_vm1, %v5187_v18, 0  ;;  %v5578_v12 = vsel %vm1085_vm4, %v9918_v14, 0 }
 0xc1c   :  { %v5949_v10 = vsel %vm1085_vm4, %v9993_v0, 0 }
 0xc1d   :  { %9869 = vmatprep.subr.msk.bf16.mxu0 %vm809_vm1, %v5188_v22 }
 0xc1e   :  { %5218 = vmatpush1.bf16.msra.mxu0 %v5200_v23  ;;  %v11493_v23 = vld [vmem:[%s14705_s5 + $0x1a4] ss:$8 sps:$4 sm:$0xff]  }
 0xc1f   :  { %5219 = vmatprep.subr.bf16.mxu0 %v5186_v24  ;;  %v11488_v24 = vld [vmem:[%s14705_s5 + $0x40] ss:$8 sps:$4 sm:$0xff]  }
 0xc22   :  { %5220 = vmatpush1.bf16.msra.mxu0 %v5185_v19  ;;  %v11496_v19 = vld [vmem:[%s14705_s5 + $0x34] ss:$8 sps:$4 sm:$0xff]  }
 0xc23   :  { %9906 = vmatprep.subr.msk.bf16.mxu0 %vm1085_vm4, %v9905_v32  ;;  %v11500_v32 = vld [vmem:[%s14705_s5 + $0x20] ss:$8 sps:$4 sm:$0xff]  }
 0xc25   :  { %9870 = vmatmul.mubr.msk.bf16.vlgmr.msra.gmra.mxu0 %vm805_vm2, %v11438_v26  ;;  %v11499_v26 = vld [vmem:[%s14705_s5 + $0x194] ss:$8 sps:$4 sm:$0xff]  }
 0xc26   :  { %5508 = vmatprep.mubr.bf16.mxu0 %v11828_v2  ;;  %5481 = vmatpush1.bf16.msra.mxu0 %v5471_v34  ;;  %v11506_v34 = vld [vmem:[%s14705_s5 + $0x10] ss:$8 sps:$4 sm:$0xff]  }
 0xc27   :  { %5482 = vmatprep.subr.bf16.mxu0 %v11456_v31  ;;  %v11511_v31 = vld [vmem:[%s14705_s5 + $0x174] ss:$8 sps:$4 sm:$0xff]  }
 0xc2a   :  { %5483 = vmatpush1.bf16.msra.mxu0 %v11454_v36  ;;  %v11509_v36 = vld [vmem:[%s14705_s5 + $0x170] ss:$8 sps:$4 sm:$0xff]  }
 0xc2b   :  { %5484 = vmatprep.subr.bf16.mxu0 %v11462_v37  ;;  %v11514_v37 = vld [vmem:[%s14705_s5 + $0x4] ss:$8 sps:$4 sm:$0xff]  }
 0xc2e   :  { %5485 = vmatpush1.bf16.msra.mxu0 %v11460_v38  ;;  %v11517_v38 = vld [vmem:[%s14705_s5 + $0x164] ss:$8 sps:$4 sm:$0xff]  }
 0xc2f   :  { %5486 = vmatprep.subr.bf16.mxu0 %v11468_v55 }
 0xc32   :  { %5487 = vmatpush1.bf16.msra.mxu0 %v11466_v56  ;;  %v11525_v56 = vld [vmem:[%s14705_s5 + $0x13c] ss:$8 sps:$4 sm:$0xff]  }
 0xc33   :  { %5488 = vmatprep.subr.bf16.mxu0 %v11474_v58  ;;  %v11528_v58 = vld [vmem:[%s14705_s5 + $0x12c] ss:$8 sps:$4 sm:$0xff]  }
 0xc36   :  { %5489 = vmatpush1.bf16.msra.mxu0 %v11472_v43  ;;  %v11531_v43 = vld [vmem:[%s14705_s5 + $0x11c] ss:$8 sps:$4 sm:$0xff]  }
 0xc37   :  { %5490 = vmatprep.subr.bf16.mxu0 %v11480_v61  ;;  %v11532_v61 = vld [vmem:[%s14705_s5 + $0x108] ss:$8 sps:$4 sm:$0xff]  }
 0xc3a   :  { %5491 = vmatpush1.bf16.msra.mxu0 %v11478_v60  ;;  %v11534_v60 = vld [vmem:[%s14705_s5 + $0x10c] ss:$8 sps:$4 sm:$0xff]  }
 0xc3b   :  { %9920 = vmatprep.subr.msk.bf16.mxu0 %vm1085_vm4, %v9919_v7 }
 0xce5   :  { %v5239_v39 = vpop.f32.mrf.mxu0 }
 0xce7   :  { %v5241_v40 = vpop.f32.mrf.mxu0 }
 0xce9   :  { %v5243_v42 = vpop.f32.mrf.mxu0 }
 0xcea   :  { %v5248_v47 = vpack.c.bf16 %v5243_v42, %v5239_v39  ;;  %v9957_v39 = vld [vmem:[%s14705_s5 + $0x158] sm:$0x33]  ;;  %v11515_v42 = vld [vmem:[%s14705_s5 + $0x160] ss:$8 sps:$4 sm:$0xff]  }
 0xceb   :  { %v5245_v45 = vpop.f32.mrf.mxu0  ;;  %v9969_v41 = vcombine.high %v9957_v39, %v9957_v39 }
 0xcec   :  { %v5249_v46 = vpack.c.bf16 %v5245_v45, %v5241_v40  ;;  %v11512_v40 = vld [vmem:[%s14705_s5] ss:$8 sps:$4 sm:$0xff]   ;;  %v9968_v45 = vcombine.low %v9957_v39, %v9957_v39 }
 0xcee   :  { %9882 = vmatprep.mubr.msk.bf16.mxu1 %vm945_vm5, %v5249_v46 }
 0xcef   :  { %5373 = vmatmul.mubr.bf16.vlgmr.msra.gmra.mxu1 %v5248_v47 }
 0xcf0   :  { %5709 = vmatpush1.bf16.msra.mxu1 %v5699_v48  ;;  %5736 = vmatprep.mubr.bf16.mxu1 %v11828_v2 }
 0xcf1   :  { %5710 = vmatprep.subr.bf16.mxu1 %v11459_v49 }
 0xcf4   :  { %5711 = vmatpush1.bf16.msra.mxu1 %v11457_v50 }
 0xcf5   :  { %5712 = vmatprep.subr.bf16.mxu1 %v11465_v52  ;;  %v5824_v52 = vsel %vm1085_vm4, %v9968_v45, 0 }
 0xcf8   :  { %5713 = vmatpush1.bf16.msra.mxu1 %v11463_v54  ;;  %v11522_v54 = vld [vmem:[%s14705_s5 + $0x14c] ss:$8 sps:$4 sm:$0xff]  }
 0xcf9   :  { %5714 = vmatprep.subr.bf16.mxu1 %v11471_v51  ;;  %v11520_v51 = vld [vmem:[%s14705_s5 + $0x148] ss:$8 sps:$4 sm:$0xff]  }
 0xcfc   :  { %5715 = vmatpush1.bf16.msra.mxu1 %v11469_v57  ;;  %v11523_v57 = vld [vmem:[%s14705_s5 + $0x138] ss:$8 sps:$4 sm:$0xff]  }
 0xcfd   :  { %5716 = vmatprep.subr.bf16.mxu1 %v11477_v59  ;;  %v11526_v59 = vld [vmem:[%s14705_s5 + $0x128] ss:$8 sps:$4 sm:$0xff]  }
 0xd00   :  { %5717 = vmatpush1.bf16.msra.mxu1 %v11475_v44  ;;  %v11529_v44 = vld [vmem:[%s14705_s5 + $0x118] ss:$8 sps:$4 sm:$0xff]  }
 0xd01   :  { %5718 = vmatprep.subr.bf16.mxu1 %v11483_v1 }
 0xd04   :  { %5719 = vmatpush1.bf16.msra.mxu1 %v11481_v62 }
 0xd05   :  { %9995 = vmatprep.subr.msk.bf16.mxu1 %vm1085_vm4, %v9994_v6 }
 0xdaf   :  { %v5374_v8 = vpop.f32.mrf.mxu1 }
 0xdb0   :  { %5382 = vst.msk [vmem:[#allocation2 + $0x20] sm:$0xff] %vm994_vm6, %v5374_v8 }
 0xdb1   :  { %v5376_v9 = vpop.f32.mrf.mxu1 }
 0xdb3   :  { %v5377_v11 = vpop.f32.mrf.mxu1 }
 0xdb4   :  { %5383 = vst.msk [vmem:[#allocation2 + $0x28] sm:$0x3f] %vm996_vm7, %v5377_v11 }
 0xdb5   :  { %v5379_v13 = vpop.f32.mrf.mxu1 }
 0xdb7   :  { %v5384_v49 = vld [vmem:[#allocation2 + $0x20] sm:$0xff] }
 0xdbb   :  { %v5398_v15 = vld [vmem:[#allocation2 + $0x21] sm:$0xff]  ;;  %v5399_v16 = vld [vmem:[#allocation2 + $0x29] sm:$0x3]  ;;  %v5877_v48 = vld [vmem:[#allocation2 + $0x2c] sm:$0x3] }
 0xdbc   :  { %v5626_v17 = vld [vmem:[#allocation2 + $0x22] sm:$0xff]  ;;  %v5400_v18 = vpack.c.bf16 %v5399_v16, %v5398_v15  ;;  %v5627_v20 = vld [vmem:[#allocation2 + $0x2a] sm:$0x3] }
 0xdbd   :  { %v5628_v22 = vpack.c.bf16 %v5627_v20, %v5626_v17  ;;  %v5385_v46 = vld [vmem:[#allocation2 + $0x28] sm:$0x3]  ;;  %v5752_v1 = vld [vmem:[#allocation2 + $0x2b] sm:$0x3] }
 0xdbe   :  { %9907 = vmatmul.mubr.msk.bf16.vlgmr.msra.gmra.mxu0 %vm994_vm6, %v5400_v18  ;;  %v5876_v47 = vld [vmem:[#allocation2 + $0x24] sm:$0xff]  ;;  %v5386_v50 = vpack.c.bf16 %v5385_v46, %v5384_v49 }
 0xdbf   :  { %5588 = vmatpush1.bf16.msra.mxu0 %v5578_v12  ;;  %9946 = vmatmul.mubr.msk.bf16.vlgmr.msra.gmra.mxu1 %vm994_vm6, %v5628_v22  ;;  %v5878_v55 = vpack.c.bf16 %v5877_v48, %v5876_v47  ;;  %v5751_v62 = vld [vmem:[#allocation2 + $0x23] sm:$0xff] }
 0xdc0   :  { %5959 = vmatpush1.bf16.msra.mxu1 %v5949_v10  ;;  %5589 = vmatprep.subr.bf16.mxu0 %v11490_v21  ;;  %v5753_v3 = vpack.c.bf16 %v5752_v1, %v5751_v62  ;;  %v11541_v62 = vld [vmem:[%s14708_s8 + $0x8] sm:$0xff]   ;;  %v11542_v1 = vld [vmem:[%s14708_s8] sm:$0xff]  }
 0xdc1   :  { %5960 = vmatprep.subr.bf16.mxu1 %v11493_v23  ;;  %5615 = vmatprep.mubr.bf16.mxu0 %v11828_v2 }
 0xdc2   :  { %5986 = vmatprep.mubr.bf16.mxu1 %v11828_v2 }
 0xdc3   :  { %5590 = vmatpush1.bf16.msra.mxu0 %v11488_v24  ;;  %v6001_v24 = vld [vmem:[%s14706_s6] sm:$0x3] }
 0xdc4   :  { %5961 = vmatpush1.bf16.msra.mxu1 %v11491_v25  ;;  %5591 = vmatprep.subr.bf16.mxu0 %v11496_v19 }
 0xdc5   :  { %5962 = vmatprep.subr.bf16.mxu1 %v11499_v26 }
 0xdc7   :  { %5592 = vmatpush1.bf16.msra.mxu0 %v11494_v27 }
 0xdc8   :  { %5963 = vmatpush1.bf16.msra.mxu1 %v11497_v28  ;;  %5593 = vmatprep.subr.bf16.mxu0 %v11502_v29  ;;  %v6006_v29 = vrot.slane %v6001_v24, %v12177_v63 }
 0xdc9   :  { %5964 = vmatprep.subr.bf16.mxu1 %v11505_v30 }
 0xdcb   :  { %5594 = vmatpush1.bf16.msra.mxu0 %v11500_v32 }
 0xdcc   :  { %5965 = vmatpush1.bf16.msra.mxu1 %v11503_v33  ;;  %5595 = vmatprep.subr.bf16.mxu0 %v11508_v35 }
 0xdcd   :  { %5966 = vmatprep.subr.bf16.mxu1 %v11511_v31 }
 0xdcf   :  { %5596 = vmatpush1.bf16.msra.mxu0 %v11506_v34  ;;  %v6010_v34 = vrot.slane %v6001_v24, %v12179_v4 }
 0xdd0   :  { %5967 = vmatpush1.bf16.msra.mxu1 %v11509_v36  ;;  %5597 = vmatprep.subr.bf16.mxu0 %v11514_v37 }
 0xdd1   :  { %5968 = vmatprep.subr.bf16.mxu1 %v11517_v38 }
 0xdd3   :  { %5598 = vmatpush1.bf16.msra.mxu0 %v11512_v40 }
 0xdd4   :  { %5969 = vmatpush1.bf16.msra.mxu1 %v11515_v42  ;;  %9970 = vmatprep.subr.msk.bf16.mxu0 %vm1085_vm4, %v9969_v41 }
 0xdd5   :  { %10724 = vmatprep.subr.bf16.mxu1 %v11829_v53 }
 0xdd6   :  { %9921 = vmatmul.mubr.msk.bf16.vlgmr.msra.gmra.mxu0 %vm994_vm6, %v5386_v50 }
 0xdd7   :  { %9996 = vmatmul.mubr.msk.bf16.vlgmr.msra.gmra.mxu1 %vm994_vm6, %v5878_v55  ;;  %5834 = vmatpush1.bf16.msra.mxu0 %v5824_v52 }
 0xdd8   :  { %5835 = vmatprep.subr.bf16.mxu0 %v11522_v54  ;;  %5861 = vmatprep.mubr.bf16.mxu0 %v11828_v2 }
 0xdd9   :  { %10734 = vmatprep.mubr.msk.bf16.mxu1 %vm11830_vm11, %v11829_v53 }
 0xddb   :  { %5836 = vmatpush1.bf16.msra.mxu0 %v11520_v51 }
 0xddc   :  { %5837 = vmatprep.subr.bf16.mxu0 %v11525_v56 }
 0xddf   :  { %5838 = vmatpush1.bf16.msra.mxu0 %v11523_v57  ;;  %v6023_v57 = vld [vmem:[%s14707_s7] sm:$0x7] }
 0xde0   :  { %5839 = vmatprep.subr.bf16.mxu0 %v11528_v58  ;;  %v11535_v58 = vld [vmem:[%s14708_s8 + $0x38] sm:$0xff]  }
 0xde3   :  { %5840 = vmatpush1.bf16.msra.mxu0 %v11526_v59  ;;  %v11536_v59 = vld [vmem:[%s14708_s8 + $0x30] sm:$0xff]  }
 0xde4   :  { %5841 = vmatprep.subr.bf16.mxu0 %v11531_v43  ;;  %v11537_v43 = vld [vmem:[%s14708_s8 + $0x28] sm:$0xff]  }
 0xde7   :  { %5842 = vmatpush1.bf16.msra.mxu0 %v11529_v44  ;;  %v11538_v44 = vld [vmem:[%s14708_s8 + $0x20] sm:$0xff]  }
 0xde8   :  { %5843 = vmatprep.subr.bf16.mxu0 %v11534_v60  ;;  %v11539_v60 = vld [vmem:[%s14708_s8 + $0x18] sm:$0xff]  }
 0xdeb   :  { %5844 = vmatpush1.bf16.msra.mxu0 %v11532_v61  ;;  %v11540_v61 = vld [vmem:[%s14708_s8 + $0x10] sm:$0xff]  }
 0xdee   :  { %9971 = vmatmul.mubr.msk.bf16.vlgmr.msra.gmra.mxu0 %vm994_vm6, %v5753_v3  ;;  %v11543_v3 = vld [vmem:[%s14708_s8 + $0x48] sm:$0xff]  }
 0xdef   :  { %6065 = vmatprep.mubr.bf16.mxu0 %v11828_v2 }
 0xe7e   :  { %v5510_v5 = vpop.f32.mrf.mxu0 }
 0xe7f   :  { %v5738_v8 = vpop.f32.mrf.mxu1 }
 0xe80   :  { %v5512_v7 = vpop.f32.mrf.mxu0 }
 0xe81   :  { %v5740_v11 = vpop.f32.mrf.mxu1 }
 0xe82   :  { %v5514_v6 = vpop.f32.mrf.mxu0 }
 0xe83   :  { %v5742_v14 = vpop.f32.mrf.mxu1 }
 0xe84   :  { %v5516_v9 = vpop.f32.mrf.mxu0 }
 0xe85   :  { %v5744_v15 = vpop.f32.mrf.mxu1 }
 0xe96   :  { %v5617_v13 = vpop.f32.mrf.mxu0 }
 0xe97   :  { %v5618_v17 = vadd.f32 %v5617_v13, %v5510_v5  ;;  %v5988_v18 = vpop.f32.mrf.mxu1  ;;  %v11544_v5 = vld [vmem:[%s14708_s8 + $0x40] sm:$0xff]  }
 0xe98   :  { %v5619_v0 = vpop.f32.mrf.mxu0 }
 0xe99   :  { %v5620_v12 = vadd.f32 %v5619_v0, %v5512_v7  ;;  %v5747_v22 = vadd.f32 %v5738_v8, %v5618_v17  ;;  %v5990_v10 = vpop.f32.mrf.mxu1  ;;  %v11545_v7 = vld [vmem:[%s14709_s9 + $0x48] sm:$0xff]   ;;  %v11549_v8 = vld [vmem:[%s14709_s9 + $0x38] sm:$0xff]  }
 0xe9a   :  { %v5621_v16 = vpop.f32.mrf.mxu0  ;;  %10725 = vmatpush3.bf16.msra.mxu1 %v11545_v7  ;;  %v11548_v17 = vld [vmem:[%s14709_s9 + $0x68] sm:$0xff]   ;;  %v10080_v7 = vld [vmem:[%s14700_s0 + $0x60] sm:$0xff] }
 0xe9b   :  { %v5622_v21 = vadd.f32 %v5621_v16, %v5514_v6  ;;  %v5748_v26 = vadd.f32 %v5740_v11, %v5620_v12  ;;  %v5992_v33 = vpop.f32.mrf.mxu1  ;;  %v11547_v6 = vld [vmem:[%s14709_s9 + $0x40] sm:$0xff]   ;;  %10726 = vmatprep.subr.bf16.mxu1 %v11829_v53  ;;  %v11551_v12 = vld [vmem:[%s14709_s9 + $0x30] sm:$0xff]  }
 0xe9c   :  { %v5623_v20 = vpop.f32.mrf.mxu0 }
 0xe9d   :  { %v5624_v25 = vadd.f32 %v5623_v20, %v5516_v9  ;;  %v5749_v32 = vadd.f32 %v5742_v14, %v5622_v21  ;;  %v5994_v41 = vpop.f32.mrf.mxu1  ;;  %v11546_v14 = vld [vmem:[%s14709_s9 + $0x70] sm:$0xff]   ;;  %v11552_v20 = vld [vmem:[%s14709_s9 + $0x58] sm:$0xff]   ;;  %v11553_v21 = vld [vmem:[%s14709_s9 + $0x28] sm:$0xff]  }
 0xe9e   :  { %10727 = vmatpush3.bf16.msra.mxu1 %v11547_v6  ;;  %v10081_v6 = vld [vmem:[%s14700_s0 + $0x68] sm:$0xff] }
 0xe9f   :  { %v5750_v37 = vadd.f32 %v5744_v15, %v5624_v25  ;;  %10728 = vmatprep.subr.bf16.mxu1 %v11829_v53 }
 0xea2   :  { %10729 = vmatpush3.bf16.msra.mxu1 %v11549_v8  ;;  %v11611_v8 = vld [vmem:[%s14701_s1 + $0x174] ss:$8 sps:$4 sm:$0xff]  }
 0xea3   :  { %10730 = vmatprep.subr.bf16.mxu1 %v11829_v53 }
 0xea6   :  { %10731 = vmatpush3.bf16.msra.mxu1 %v11551_v12  ;;  %v10083_v12 = vld [vmem:[%s14700_s0 + $0x78] sm:$0xf] }
 0xea7   :  { %10732 = vmatprep.subr.bf16.mxu1 %v11829_v53 }
 0xeaa   :  { %10733 = vmatpush3.bf16.msra.mxu1 %v11553_v21  ;;  %v11588_v21 = vld [vmem:[%s14701_s1 + $0x80] ss:$8 sps:$4 sm:$0xff]  }
 0xeab   :  { %10738 = vmatprep.subr.bf16.mxu1 %v11829_v53 }
 0xeae   :  { %v5863_v23 = vpop.f32.mrf.mxu0 }
 0xeaf   :  { %v5872_v19 = vadd.f32 %v5863_v23, %v5747_v22  ;;  %v11554_v22 = vld [vmem:[%s14709_s9 + $0x50] sm:$0xff]  }
 0xeb0   :  { %v5865_v27 = vpop.f32.mrf.mxu0 }
 0xeb1   :  { %v5997_v28 = vadd.f32 %v5988_v18, %v5872_v19  ;;  %v5873_v30 = vadd.f32 %v5865_v27, %v5748_v26  ;;  %v11550_v18 = vld [vmem:[%s14709_s9 + $0x60] sm:$0xff]  }
 0xeb2   :  { %v5867_v35 = vpop.f32.mrf.mxu0  ;;  %v11555_v19 = vld [vmem:[%s14709_s9 + $0x20] sm:$0xff]  }
 0xeb3   :  { %v5998_v31 = vadd.f32 %v5990_v10, %v5873_v30  ;;  %v5874_v36 = vadd.f32 %v5867_v35, %v5749_v32  ;;  %v6013_v39 = vadd.f32 %v6006_v29, %v5997_v28  ;;  %v11556_v28 = vld [vmem:[%s14709_s9 + $0xc0] sm:$0xff]   ;;  %v11557_v32 = vld [vmem:[%s14709_s9 + $0x18] sm:$0xff]   ;;  %v11559_v35 = vld [vmem:[%s14709_s9 + $0x10] sm:$0xff]  }
 0xeb4   :  { %v5869_v38 = vpop.f32.mrf.mxu0 }
 0xeb5   :  { %v5999_v40 = vadd.f32 %v5992_v33, %v5874_v36  ;;  %v5875_v42 = vadd.f32 %v5869_v38, %v5750_v37  ;;  %v6014_v45 = vadd.f32 %v6010_v34, %v5998_v31  ;;  %v6017_v48 = vmax.f32 %v6013_v39, 0.0  ;;  %v11558_v33 = vld [vmem:[%s14709_s9 + $0xb8] sm:$0xff]   ;;  %v11560_v31 = vld [vmem:[%s14709_s9 + $0xb0] sm:$0xff]   ;;  %v11562_v36 = vld [vmem:[%s14709_s9 + $0xa8] sm:$0xff]  }
 0xeb6   :  { %v11563_v37 = vld [vmem:[%s14709_s9] sm:$0xff]   ;;  %v11575_v39 = vld [vmem:[%s14701_s1 + $0x54] ss:$8 sps:$4 sm:$0xff]  }
 0xeb7   :  { %v6015_v46 = vadd.f32 %v6006_v29, %v5999_v40  ;;  %v6000_v47 = vadd.f32 %v5994_v41, %v5875_v42  ;;  %v6018_v52 = vmax.f32 %v6014_v45, 0.0  ;;  %v11564_v38 = vld [vmem:[%s14709_s9 + $0xa0] sm:$0xff]   ;;  %v11565_v41 = vld [vmem:[%s14709_s9 + $0x98] sm:$0xff]  }
 0xeb9   :  { %v6019_v49 = vmax.f32 %v6015_v46, 0.0  ;;  %v6016_v50 = vadd.f32 %v6010_v34, %v6000_v47  ;;  %v11561_v34 = vld [vmem:[%s14709_s9 + $0x8] sm:$0xff]   ;;  %v11573_v47 = vld [vmem:[%s14701_s1 + $0x50] ss:$8 sps:$4 sm:$0xff]  }
 0xebb   :  { %v6020_v54 = vmax.f32 %v6016_v50, 0.0  ;;  %v6021_v55 = vpack.c.bf16 %v6019_v49, %v6017_v48  ;;  %v11581_v48 = vld [vmem:[%s14701_s1 + $0x44] ss:$8 sps:$4 sm:$0xff]   ;;  %v11566_v49 = vld [vmem:[%s14709_s9 + $0x90] sm:$0xff]   ;;  %v11579_v50 = vld [vmem:[%s14701_s1 + $0x40] ss:$8 sps:$4 sm:$0xff]  }
 0xebd   :  { %v6022_v51 = vpack.c.bf16 %v6020_v54, %v6018_v52  ;;  %v6028_v56 = vsel %vm1647_vm8, %v6021_v55, 0  ;;  %v11587_v52 = vld [vmem:[%s14701_s1 + $0x34] ss:$8 sps:$4 sm:$0xff]   ;;  %v11567_v54 = vld [vmem:[%s14709_s9 + $0x88] sm:$0xff]   ;;  %v11585_v55 = vld [vmem:[%s14701_s1 + $0x30] ss:$8 sps:$4 sm:$0xff]  }
 0xebf   :  { %9997 = vmatprep.subr.msk.bf16.mxu0 %vm1647_vm8, %v6022_v51  ;;  %v11593_v51 = vld [vmem:[%s14701_s1 + $0x24] ss:$8 sps:$4 sm:$0xff]  }
 0xec0   :  { %6048 = vmatpush1.bf16.msra.mxu0 %v6028_v56  ;;  %v11568_v56 = vld [vmem:[%s14709_s9 + $0x80] sm:$0xff]  }
 0xec1   :  { %6159 = vmatprep.subr.bf16.mxu0 %v11828_v2 }
 0xec3   :  { %9998 = vmatmul.mubr.msk.bf16.vlgmr.msra.gmra.mxu0 %vm1643_vm9, %v6023_v57  ;;  %v11591_v57 = vld [vmem:[%s14701_s1 + $0x20] ss:$8 sps:$4 sm:$0xff]  }
 0xec4   :  { %6160 = vmatpush1.bf16.msra.mxu0 %v11535_v58  ;;  %v11599_v58 = vld [vmem:[%s14701_s1 + $0x14] ss:$8 sps:$4 sm:$0xff]  }
 0xec5   :  { %6161 = vmatprep.subr.bf16.mxu0 %v11828_v2 }
 0xec8   :  { %6162 = vmatpush1.bf16.msra.mxu0 %v11536_v59  ;;  %v11569_v59 = vld [vmem:[%s14709_s9 + $0x78] sm:$0xff]  }
 0xec9   :  { %6163 = vmatprep.subr.bf16.mxu0 %v11828_v2 }
 0xecc   :  { %6164 = vmatpush1.bf16.msra.mxu0 %v11537_v43  ;;  %v11572_v43 = vld [vmem:[%s14701_s1 + $0xb4] ss:$8 sps:$4 sm:$0xff]  }
 0xecd   :  { %6165 = vmatprep.subr.bf16.mxu0 %v11828_v2 }
 0xed0   :  { %6166 = vmatpush1.bf16.msra.mxu0 %v11538_v44  ;;  %v11597_v44 = vld [vmem:[%s14701_s1 + $0x10] ss:$8 sps:$4 sm:$0xff]  }
 0xed1   :  { %6167 = vmatprep.subr.bf16.mxu0 %v11828_v2 }
 0xed4   :  { %6168 = vmatpush1.bf16.msra.mxu0 %v11539_v60 }
 0xed5   :  { %6169 = vmatprep.subr.bf16.mxu0 %v11828_v2 }
 0xed8   :  { %6170 = vmatpush1.bf16.msra.mxu0 %v11540_v61  ;;  %v11605_v61 = vld [vmem:[%s14701_s1 + $0x4] ss:$8 sps:$4 sm:$0xff]  }
 0xed9   :  { %6171 = vmatprep.subr.bf16.mxu0 %v11828_v2 }
 0xedc   :  { %6172 = vmatpush1.bf16.msra.mxu0 %v11541_v62  ;;  %v11570_v62 = vld [vmem:[%s14701_s1 + $0xb0] ss:$8 sps:$4 sm:$0xff]  }
 0xedd   :  { %6173 = vmatprep.subr.bf16.mxu0 %v11828_v2 }
 0xee0   :  { %6174 = vmatpush1.bf16.msra.mxu0 %v11542_v1  ;;  %v11578_v1 = vld [vmem:[%s14701_s1 + $0xa4] ss:$8 sps:$4 sm:$0xff]  }
 0xee1   :  { %6187 = vmatprep.subr.bf16.mxu0 %v11828_v2 }
 0xee4   :  { %6188 = vmatpush2.bf16.msra.mxu0 %v11543_v3 }
 0xee5   :  { %6189 = vmatprep.subr.bf16.mxu0 %v11828_v2 }
 0xee8   :  { %6190 = vmatpush2.bf16.msra.mxu0 %v11544_v5  ;;  %v11603_v5 = vld [vmem:[%s14701_s1] ss:$8 sps:$4 sm:$0xff]  }
 0xee9   :  { %10752 = vmatprep.subr.bf16.mxu0 %v11829_v53 }
 0xf83   :  { %v6067_v9 = vpop.f32.mrf.mxu0 }
 0xf84   :  { %v6074_v0 = vpack.c.bf16 %v6067_v9, %v6067_v9  ;;  %v11576_v9 = vld [vmem:[%s14701_s1 + $0xa0] ss:$8 sps:$4 sm:$0xff]  }
 0xf85   :  { %v6069_v11 = vpop.f32.mrf.mxu0 }
 0xf86   :  { %v6075_v13 = vpack.c.bf16 %v6069_v11, %v6069_v11  ;;  %v6638_v11 = vpack.c.bf16 %v10081_v6, %v10080_v7  ;;  %v11650_v7 = vld [vmem:[%s14701_s1 + $0x1b4] ss:$8 sps:$4 sm:$0xff]  }
 0xf87   :  { %v6071_v15 = vpop.f32.mrf.mxu0 }
 0xf88   :  { %10009 = vmatprep.mubr.msk.bf16.mxu0 %vm1777_vm10, %v6075_v13  ;;  %v11584_v13 = vld [vmem:[%s14701_s1 + $0x94] ss:$8 sps:$4 sm:$0xff]   ;;  %v11582_v15 = vld [vmem:[%s14701_s1 + $0x90] ss:$8 sps:$4 sm:$0xff]  }
 0xf89   :  { %v6072_v16 = vpop.f32.mrf.mxu0  ;;  %6192 = vmatmul.mubr.bf16.vlgmr.msra.gmra.mxu0 %v6074_v0  ;;  %v11617_v0 = vld [vmem:[%s14701_s1 + $0x164] ss:$8 sps:$4 sm:$0xff]  }
 0xf8a   :  { %10753 = vmatpush3.bf16.msra.mxu0 %v11546_v14  ;;  %10762 = vmatprep.mubr.msk.bf16.mxu0 %vm11830_vm11, %v11829_v53  ;;  %v11609_v14 = vld [vmem:[%s14701_s1 + $0x170] ss:$8 sps:$4 sm:$0xff]   ;;  %v11590_v16 = vld [vmem:[%s14701_s1 + $0x84] ss:$8 sps:$4 sm:$0xff]  }
 0xf8b   :  { %10754 = vmatprep.subr.bf16.mxu0 %v11829_v53 }
 0xf8e   :  { %10755 = vmatpush3.bf16.msra.mxu0 %v11548_v17  ;;  %v11615_v17 = vld [vmem:[%s14701_s1 + $0x160] ss:$8 sps:$4 sm:$0xff]  }
 0xf8f   :  { %10756 = vmatprep.subr.bf16.mxu0 %v11829_v53 }
 0xf92   :  { %10757 = vmatpush3.bf16.msra.mxu0 %v11550_v18  ;;  %v10082_v18 = vld [vmem:[%s14700_s0 + $0x70] sm:$0xff] }
 0xf93   :  { %10758 = vmatprep.subr.bf16.mxu0 %v11829_v53 }
 0xf96   :  { %10759 = vmatpush3.bf16.msra.mxu0 %v11552_v20  ;;  %v11623_v20 = vld [vmem:[%s14701_s1 + $0x154] ss:$8 sps:$4 sm:$0xff]  }
 0xf97   :  { %10760 = vmatprep.subr.bf16.mxu0 %v11829_v53 }
 0xf9a   :  { %10761 = vmatpush3.bf16.msra.mxu0 %v11554_v22  ;;  %v6639_v22 = vpack.c.bf16 %v10083_v12, %v10082_v18  ;;  %v10190_v12 = vld [vmem:[%s14700_s0 + $0x74] sm:$0xff] }
 0xf9b   :  { %10780 = vmatprep.subr.bf16.mxu0 %v11829_v53 }
0x1049   :  { %v6193_v10 = vpop.f32.mrf.mxu0 }
0x104a   :  { %6200 = vst.msk [vmem:[#allocation3 + $0x10] sm:$0x1f] %vm1821_vm12, %v6193_v10  ;;  %v11596_v10 = vld [vmem:[%s14701_s1 + $0x74] ss:$8 sps:$4 sm:$0xff]  }
0x104b   :  { %v6195_v23 = vpop.f32.mrf.mxu0 }
0x104c   :  { %v11621_v23 = vld [vmem:[%s14701_s1 + $0x150] ss:$8 sps:$4 sm:$0xff]  }
0x104d   :  { %v6196_v24 = vpop.f32.mrf.mxu0 }
0x104e   :  { %v11629_v24 = vld [vmem:[%s14701_s1 + $0x144] ss:$8 sps:$4 sm:$0xff]  }
0x104f   :  { %v6197_v25 = vpop.f32.mrf.mxu0 }
0x1050   :  { %v11594_v25 = vld [vmem:[%s14701_s1 + $0x70] ss:$8 sps:$4 sm:$0xff]  }
0x1051   :  { %v6213_v26 = vld [vmem:[#allocation3 + $0x11] sm:$0x1]  ;;  %v6371_v27 = vld [vmem:[#allocation3 + $0x12] sm:$0x1]  ;;  %v6201_v40 = vld [vmem:[#allocation3 + $0x10] sm:$0x1] }
0x1052   :  { %v6214_v29 = vpack.c.bf16 %v6213_v26, %v6213_v26  ;;  %v6372_v30 = vpack.c.bf16 %v6371_v27, %v6371_v27  ;;  %v6543_v42 = vld [vmem:[#allocation3 + $0x14] sm:$0x1]  ;;  %v6202_v45 = vpack.c.bf16 %v6201_v40, %v6201_v40  ;;  %v6457_v60 = vld [vmem:[#allocation3 + $0x13] sm:$0x1]  ;;  %v11627_v26 = vld [vmem:[%s14701_s1 + $0x140] ss:$8 sps:$4 sm:$0xff]  }
0x1053   :  { %v6544_v46 = vpack.c.bf16 %v6543_v42, %v6543_v42  ;;  %v6458_v3 = vpack.c.bf16 %v6457_v60, %v6457_v60  ;;  %v11635_v27 = vld [vmem:[%s14701_s1 + $0x134] ss:$8 sps:$4 sm:$0xff]   ;;  %v11612_v40 = vld [vmem:[%s14701_s1 + $0x100] ss:$8 sps:$4 sm:$0xff]  }
0x1054   :  { %10735 = vmatmul.mubr.msk.bf16.vlgmr.msra.gmra.mxu1 %vm1878_vm13, %v6214_v29  ;;  %10763 = vmatmul.mubr.msk.bf16.vlgmr.msra.gmra.mxu0 %vm1878_vm13, %v6372_v30  ;;  %v10084_v29 = vld [vmem:[%s14700_s0 + $0x61] sm:$0xff]  ;;  %v10085_v30 = vld [vmem:[%s14700_s0 + $0x69] sm:$0xff]  ;;  %v10086_v42 = vld [vmem:[%s14700_s0 + $0x71] sm:$0xff] }
0x1055   :  { %10739 = vmatpush3.bf16.msra.mxu1 %v11555_v19  ;;  %10781 = vmatpush3.bf16.msra.mxu0 %v11556_v28  ;;  %v11602_v19 = vld [vmem:[%s14701_s1 + $0x64] ss:$8 sps:$4 sm:$0xff]   ;;  %v11600_v28 = vld [vmem:[%s14701_s1 + $0x60] ss:$8 sps:$4 sm:$0xff]  }
0x1056   :  { %10740 = vmatprep.subr.bf16.mxu1 %v11829_v53  ;;  %10782 = vmatprep.subr.bf16.mxu0 %v11829_v53 }
0x1057   :  { %10748 = vmatprep.mubr.msk.bf16.mxu1 %vm11830_vm11, %v11829_v53  ;;  %10790 = vmatprep.mubr.msk.bf16.mxu0 %vm11830_vm11, %v11829_v53 }
0x1059   :  { %10741 = vmatpush3.bf16.msra.mxu1 %v11557_v32  ;;  %10783 = vmatpush3.bf16.msra.mxu0 %v11558_v33  ;;  %v11608_v32 = vld [vmem:[%s14701_s1 + $0x114] ss:$8 sps:$4 sm:$0xff]   ;;  %v11633_v33 = vld [vmem:[%s14701_s1 + $0x130] ss:$8 sps:$4 sm:$0xff]  }
0x105a   :  { %10742 = vmatprep.subr.bf16.mxu1 %v11829_v53  ;;  %10784 = vmatprep.subr.bf16.mxu0 %v11829_v53 }
0x105d   :  { %10743 = vmatpush3.bf16.msra.mxu1 %v11559_v35  ;;  %10785 = vmatpush3.bf16.msra.mxu0 %v11560_v31  ;;  %v11641_v35 = vld [vmem:[%s14701_s1 + $0x124] ss:$8 sps:$4 sm:$0xff]   ;;  %v6656_v31 = vpack.c.bf16 %v10085_v30, %v10084_v29  ;;  %v11662_v29 = vld [vmem:[%s14704_s4 + $0x30] sm:$0xff]  }
0x105e   :  { %10744 = vmatprep.subr.bf16.mxu1 %v11829_v53  ;;  %10786 = vmatprep.subr.bf16.mxu0 %v11829_v53 }
0x1061   :  { %10745 = vmatpush3.bf16.msra.mxu1 %v11561_v34  ;;  %10787 = vmatpush3.bf16.msra.mxu0 %v11562_v36  ;;  %v11606_v34 = vld [vmem:[%s14701_s1 + $0x110] ss:$8 sps:$4 sm:$0xff]   ;;  %v11614_v36 = vld [vmem:[%s14701_s1 + $0x104] ss:$8 sps:$4 sm:$0xff]  }
0x1062   :  { %10746 = vmatprep.subr.bf16.mxu1 %v11829_v53  ;;  %10788 = vmatprep.subr.bf16.mxu0 %v11829_v53 }
0x1065   :  { %10747 = vmatpush3.bf16.msra.mxu1 %v11563_v37  ;;  %10789 = vmatpush3.bf16.msra.mxu0 %v11564_v38  ;;  %v11639_v37 = vld [vmem:[%s14701_s1 + $0x120] ss:$8 sps:$4 sm:$0xff]  }
0x1066   :  { %10766 = vmatprep.subr.bf16.mxu1 %v11829_v53  ;;  %6859 = vmatprep.subr.bf16.mxu0 %v11575_v39  ;;  %v10158_v38 = vld [vmem:[%s14700_s0 + $0x63] sm:$0xff]  ;;  %v10159_v39 = vld [vmem:[%s14700_s0 + $0x6b] sm:$0xff] }
0x1068   :  { %10749 = vmatmul.mubr.msk.bf16.vlgmr.msra.gmra.mxu1 %vm1878_vm13, %v6202_v45  ;;  %10791 = vmatmul.mubr.msk.bf16.vlgmr.msra.gmra.mxu0 %vm1878_vm13, %v6544_v46  ;;  %v7057_v45 = vpack.c.bf16 %v10159_v39, %v10158_v38  ;;  %v11620_v46 = vld [vmem:[%s14701_s1 + $0xf4] ss:$8 sps:$4 sm:$0xff]  }
0x1069   :  { %10767 = vmatpush3.bf16.msra.mxu1 %v11565_v41  ;;  %10776 = vmatprep.mubr.msk.bf16.mxu1 %vm11830_vm11, %v11829_v53  ;;  %v10087_v41 = vld [vmem:[%s14700_s0 + $0x79] sm:$0xf] }
0x106a   :  { %10768 = vmatprep.subr.bf16.mxu1 %v11829_v53  ;;  %6860 = vmatpush1.bf16.msra.mxu0 %v11573_v47  ;;  %v6657_v47 = vpack.c.bf16 %v10087_v41, %v10086_v42  ;;  %v11666_v42 = vld [vmem:[%s14704_s4 + $0x10] sm:$0xff]  }
0x106b   :  { %6861 = vmatprep.subr.bf16.mxu0 %v11581_v48  ;;  %6887 = vmatprep.mubr.bf16.mxu0 %v11828_v2  ;;  %v11618_v48 = vld [vmem:[%s14701_s1 + $0xf0] ss:$8 sps:$4 sm:$0xff]  }
0x106d   :  { %10769 = vmatpush3.bf16.msra.mxu1 %v11566_v49  ;;  %v11626_v49 = vld [vmem:[%s14701_s1 + $0xe4] ss:$8 sps:$4 sm:$0xff]  }
0x106e   :  { %10770 = vmatprep.subr.bf16.mxu1 %v11829_v53  ;;  %6862 = vmatpush1.bf16.msra.mxu0 %v11579_v50  ;;  %v10160_v50 = vld [vmem:[%s14700_s0 + $0x73] sm:$0xff] }
0x106f   :  { %6863 = vmatprep.subr.bf16.mxu0 %v11587_v52  ;;  %v10161_v52 = vld [vmem:[%s14700_s0 + $0x7b] sm:$0xf] }
0x1071   :  { %10771 = vmatpush3.bf16.msra.mxu1 %v11567_v54  ;;  %v11624_v54 = vld [vmem:[%s14701_s1 + $0xe0] ss:$8 sps:$4 sm:$0xff]  }
0x1072   :  { %10772 = vmatprep.subr.bf16.mxu1 %v11829_v53  ;;  %6864 = vmatpush1.bf16.msra.mxu0 %v11585_v55  ;;  %v7058_v55 = vpack.c.bf16 %v10161_v52, %v10160_v50  ;;  %v6629_v50 = vld [vmem:[%s14710_s10] sm:$0x1] }
0x1073   :  { %6865 = vmatprep.subr.bf16.mxu0 %v11593_v51  ;;  %v11632_v51 = vld [vmem:[%s14701_s1 + $0xd4] ss:$8 sps:$4 sm:$0xff]  }
0x1075   :  { %10773 = vmatpush3.bf16.msra.mxu1 %v11568_v56  ;;  %v11630_v56 = vld [vmem:[%s14701_s1 + $0xd0] ss:$8 sps:$4 sm:$0xff]  }
0x1076   :  { %10774 = vmatprep.subr.bf16.mxu1 %v11829_v53  ;;  %6866 = vmatpush1.bf16.msra.mxu0 %v11591_v57  ;;  %v11638_v57 = vld [vmem:[%s14701_s1 + $0xc4] ss:$8 sps:$4 sm:$0xff]  }
0x1077   :  { %6867 = vmatprep.subr.bf16.mxu0 %v11599_v58  ;;  %v11636_v58 = vld [vmem:[%s14701_s1 + $0xc0] ss:$8 sps:$4 sm:$0xff]  }
0x1079   :  { %10775 = vmatpush3.bf16.msra.mxu1 %v11569_v59  ;;  %v10128_v59 = vld [vmem:[%s14700_s0 + $0x62] sm:$0xff] }
0x107a   :  { %6740 = vmatprep.subr.bf16.mxu1 %v11572_v43  ;;  %6868 = vmatpush1.bf16.msra.mxu0 %v11597_v44  ;;  %v10129_v43 = vld [vmem:[%s14700_s0 + $0x6a] sm:$0xff]  ;;  %v11644_v44 = vld [vmem:[%s14701_s1 + $0x1d4] ss:$8 sps:$4 sm:$0xff]  }
0x107b   :  { %6869 = vmatprep.subr.bf16.mxu0 %v11605_v61  ;;  %v6912_v60 = vpack.c.bf16 %v10129_v43, %v10128_v59  ;;  %v11642_v61 = vld [vmem:[%s14701_s1 + $0x1d0] ss:$8 sps:$4 sm:$0xff]  }
0x107c   :  { %10777 = vmatmul.mubr.msk.bf16.vlgmr.msra.gmra.mxu1 %vm1878_vm13, %v6458_v3  ;;  %v10130_v3 = vld [vmem:[%s14700_s0 + $0x72] sm:$0xff] }
0x107d   :  { %6741 = vmatpush1.bf16.msra.mxu1 %v11570_v62  ;;  %6768 = vmatprep.mubr.bf16.mxu1 %v11828_v2  ;;  %v11647_v62 = vld [vmem:[%s14701_s1 + $0x1c4] ss:$8 sps:$4 sm:$0xff]  }
0x107e   :  { %6742 = vmatprep.subr.bf16.mxu1 %v11578_v1  ;;  %6870 = vmatpush1.bf16.msra.mxu0 %v11603_v5  ;;  %v11645_v1 = vld [vmem:[%s14701_s1 + $0x1c0] ss:$8 sps:$4 sm:$0xff]   ;;  %v10131_v5 = vld [vmem:[%s14700_s0 + $0x7a] sm:$0xf] }
0x107f   :  { %7141 = vmatprep.subr.bf16.mxu0 %v11611_v8  ;;  %v6913_v6 = vpack.c.bf16 %v10131_v5, %v10130_v3  ;;  %v11648_v8 = vld [vmem:[%s14701_s1 + $0x1b0] ss:$8 sps:$4 sm:$0xff]  }
0x1081   :  { %6743 = vmatpush1.bf16.msra.mxu1 %v11576_v9  ;;  %10126 = vmatmul.mubr.msk.bf16.vlgmr.msra.gmra.mxu0 %vm149_vm0, %v6638_v11  ;;  %v11653_v9 = vld [vmem:[%s14701_s1 + $0x1a4] ss:$8 sps:$4 sm:$0xff]   ;;  %v11651_v11 = vld [vmem:[%s14701_s1 + $0x1a0] ss:$8 sps:$4 sm:$0xff]  }
0x1082   :  { %6744 = vmatprep.subr.bf16.mxu1 %v11584_v13  ;;  %7142 = vmatpush1.bf16.msra.mxu0 %v11609_v14  ;;  %v11656_v13 = vld [vmem:[%s14701_s1 + $0x194] ss:$8 sps:$4 sm:$0xff]   ;;  %v11654_v14 = vld [vmem:[%s14701_s1 + $0x190] ss:$8 sps:$4 sm:$0xff]  }
0x1083   :  { %7143 = vmatprep.subr.bf16.mxu0 %v11617_v0  ;;  %6897 = vmatprep.mubr.bf16.mxu0 %v11828_v2  ;;  %v11659_v0 = vld [vmem:[%s14701_s1 + $0x184] ss:$8 sps:$4 sm:$0xff]  }
0x1085   :  { %6745 = vmatpush1.bf16.msra.mxu1 %v11582_v15  ;;  %v11657_v15 = vld [vmem:[%s14701_s1 + $0x180] ss:$8 sps:$4 sm:$0xff]  }
0x1086   :  { %6746 = vmatprep.subr.bf16.mxu1 %v11590_v16  ;;  %7144 = vmatpush1.bf16.msra.mxu0 %v11615_v17  ;;  %v10188_v16 = vld [vmem:[%s14700_s0 + $0x64] sm:$0xff]  ;;  %v10189_v17 = vld [vmem:[%s14700_s0 + $0x6c] sm:$0xff] }
0x1087   :  { %7145 = vmatprep.subr.bf16.mxu0 %v11623_v20  ;;  %v7202_v18 = vpack.c.bf16 %v10189_v17, %v10188_v16  ;;  %v10191_v20 = vld [vmem:[%s14700_s0 + $0x7c] sm:$0xf] }
0x1089   :  { %6747 = vmatpush1.bf16.msra.mxu1 %v11588_v21  ;;  %10127 = vmatmul.mubr.msk.bf16.gmra.mxu0 %vm149_vm0, %v6639_v22  ;;  %v7203_v21 = vpack.c.bf16 %v10191_v20, %v10190_v12 }
0x108a   :  { %6748 = vmatprep.subr.bf16.mxu1 %v11596_v10  ;;  %7146 = vmatpush1.bf16.msra.mxu0 %v11621_v23 }
0x108b   :  { %7147 = vmatprep.subr.bf16.mxu0 %v11629_v24  ;;  %7169 = vmatprep.mubr.bf16.mxu0 %v11828_v2 }
0x108d   :  { %6749 = vmatpush1.bf16.msra.mxu1 %v11594_v25 }
0x108e   :  { %6750 = vmatprep.subr.bf16.mxu1 %v11602_v19  ;;  %7148 = vmatpush1.bf16.msra.mxu0 %v11627_v26 }
0x108f   :  { %7149 = vmatprep.subr.bf16.mxu0 %v11635_v27 }
0x1091   :  { %6751 = vmatpush1.bf16.msra.mxu1 %v11600_v28  ;;  %v11661_v28 = vld [vmem:[%s14704_s4 + $0x38] sm:$0xff]  }
0x1092   :  { %6996 = vmatprep.subr.bf16.mxu1 %v11608_v32  ;;  %7150 = vmatpush1.bf16.msra.mxu0 %v11633_v33  ;;  %v11663_v33 = vld [vmem:[%s14704_s4 + $0x28] sm:$0xff]  }
0x1093   :  { %7151 = vmatprep.subr.bf16.mxu0 %v11641_v35 }
0x1094   :  { %10112 = vmatmul.mubr.msk.bf16.vlgmr.msra.gmra.mxu1 %vm149_vm0, %v6656_v31 }
0x1095   :  { %6997 = vmatpush1.bf16.msra.mxu1 %v11606_v34  ;;  %6778 = vmatprep.mubr.bf16.mxu1 %v11828_v2 }
0x1096   :  { %6998 = vmatprep.subr.bf16.mxu1 %v11614_v36  ;;  %7152 = vmatpush1.bf16.msra.mxu0 %v11639_v37  ;;  %v11664_v37 = vld [vmem:[%s14704_s4 + $0x20] sm:$0xff]  }
0x1099   :  { %6999 = vmatpush1.bf16.msra.mxu1 %v11612_v40  ;;  %10186 = vmatmul.mubr.msk.bf16.vlgmr.msra.gmra.mxu0 %vm149_vm0, %v7057_v45  ;;  %v11665_v40 = vld [vmem:[%s14704_s4 + $0x18] sm:$0xff]   ;;  %v11667_v45 = vld [vmem:[%s14704_s4 + $0x8] sm:$0xff]  }
0x109a   :  { %7000 = vmatprep.subr.bf16.mxu1 %v11620_v46  ;;  %7179 = vmatprep.mubr.bf16.mxu0 %v11828_v2 }
0x109c   :  { %10113 = vmatmul.mubr.msk.bf16.gmra.mxu1 %vm149_vm0, %v6657_v47 }
0x109d   :  { %7001 = vmatpush1.bf16.msra.mxu1 %v11618_v48  ;;  %7024 = vmatprep.mubr.bf16.mxu1 %v11828_v2 }
0x109e   :  { %7002 = vmatprep.subr.bf16.mxu1 %v11626_v49  ;;  %v11668_v49 = vld [vmem:[%s14704_s4] sm:$0xff]  }
0x10a1   :  { %7003 = vmatpush1.bf16.msra.mxu1 %v11624_v54  ;;  %10187 = vmatmul.mubr.msk.bf16.gmra.mxu0 %vm149_vm0, %v7058_v55  ;;  %v11669_v54 = vld [vmem:[%s14704_s4 + $0x50] ss:$0 sps:$4 sm:$0xff]  }
0x10a2   :  { %7004 = vmatprep.subr.bf16.mxu1 %v11632_v51  ;;  %7423 = vmatprep.mubr.bf16.mxu0 %v11828_v2 }
0x10a5   :  { %7005 = vmatpush1.bf16.msra.mxu1 %v11630_v56 }
0x10a6   :  { %7006 = vmatprep.subr.bf16.mxu1 %v11638_v57 }
0x10a9   :  { %7007 = vmatpush1.bf16.msra.mxu1 %v11636_v58  ;;  %v7524_v58 = vsel %vm949_vm3, %v11669_v54, 0 }
0x10aa   :  { %7286 = vmatprep.subr.bf16.mxu1 %v11644_v44 }
0x10ac   :  { %10156 = vmatmul.mubr.msk.bf16.vlgmr.msra.gmra.mxu1 %vm149_vm0, %v6912_v60 }
0x10ad   :  { %7287 = vmatpush1.bf16.msra.mxu1 %v11642_v61  ;;  %7034 = vmatprep.mubr.bf16.mxu1 %v11828_v2 }
0x10ae   :  { %7288 = vmatprep.subr.bf16.mxu1 %v11647_v62 }
0x10b1   :  { %7289 = vmatpush1.bf16.msra.mxu1 %v11645_v1 }
0x10b2   :  { %7290 = vmatprep.subr.bf16.mxu1 %v11650_v7 }
0x10b4   :  { %10157 = vmatmul.mubr.msk.bf16.gmra.mxu1 %vm149_vm0, %v6913_v6 }
0x10b5   :  { %7291 = vmatpush1.bf16.msra.mxu1 %v11648_v8  ;;  %7314 = vmatprep.mubr.bf16.mxu1 %v11828_v2 }
0x10b6   :  { %7292 = vmatprep.subr.bf16.mxu1 %v11653_v9 }
0x10b9   :  { %7293 = vmatpush1.bf16.msra.mxu1 %v11651_v11 }
0x10ba   :  { %7294 = vmatprep.subr.bf16.mxu1 %v11656_v13 }
0x10bd   :  { %7295 = vmatpush1.bf16.msra.mxu1 %v11654_v14 }
0x10be   :  { %7296 = vmatprep.subr.bf16.mxu1 %v11659_v0 }
0x10c1   :  { %7297 = vmatpush1.bf16.msra.mxu1 %v11657_v15 }
0x10c2   :  { %7526 = vmatprep.subr.bf16.mxu1 %v11828_v2 }
0x10c4   :  { %10216 = vmatmul.mubr.msk.bf16.vlgmr.msra.gmra.mxu1 %vm149_vm0, %v7202_v18 }
0x10c5   :  { %7324 = vmatprep.mubr.bf16.mxu1 %v11828_v2  ;;  %7527 = vmatpush1.bf16.msra.mxu1 %v11661_v28 }
0x10c6   :  { %7528 = vmatprep.subr.bf16.mxu1 %v11828_v2 }
0x10c9   :  { %7529 = vmatpush1.bf16.msra.mxu1 %v11662_v29 }
0x10ca   :  { %7530 = vmatprep.subr.bf16.mxu1 %v11828_v2 }
0x10cc   :  { %10217 = vmatmul.mubr.msk.bf16.gmra.mxu1 %vm149_vm0, %v7203_v21  ;;  %vm9034_vm0 = vcmask 76800  }
0x10cd   :  { %7531 = vmatpush1.bf16.msra.mxu1 %v11663_v33 }
0x10ce   :  { %7532 = vmatprep.subr.bf16.mxu1 %v11828_v2 }
0x10d1   :  { %7533 = vmatpush1.bf16.msra.mxu1 %v11664_v37 }
0x10d2   :  { %7534 = vmatprep.subr.bf16.mxu1 %v11828_v2 }
0x10d5   :  { %7535 = vmatpush1.bf16.msra.mxu1 %v11665_v40 }
0x10d6   :  { %7536 = vmatprep.subr.bf16.mxu1 %v11828_v2 }
0x10d9   :  { %7537 = vmatpush1.bf16.msra.mxu1 %v11666_v42 }
0x10da   :  { %7538 = vmatprep.subr.bf16.mxu1 %v11828_v2 }
0x10dd   :  { %7539 = vmatpush1.bf16.msra.mxu1 %v11667_v45 }
0x10de   :  { %7540 = vmatprep.subr.bf16.mxu1 %v11828_v2 }
0x10e1   :  { %7541 = vmatpush1.bf16.msra.mxu1 %v11668_v49 }
0x10e2   :  { %7552 = vmatprep.subr.bf16.mxu1 %v11828_v2 }
0x10e5   :  { %7553 = vmatpush2.bf16.msra.mxu1 %v7524_v58 }
0x10e6   :  { %7554 = vmatprep.subr.bf16.mxu1 %v11828_v2 }
0x1114   :  { %v6292_v22 = vpop.f32.mrf.mxu1  ;;  %v6450_v10 = vpop.f32.mrf.mxu0 }
0x1116   :  { %v10736_v23 = vpop.f32.mrf.mxu1  ;;  %v10764_v24 = vpop.f32.mrf.mxu0 }
0x1118   :  { %v6295_v25 = vpop.f32.mrf.mxu1  ;;  %v6453_v19 = vpop.f32.mrf.mxu0 }
0x111a   :  { %v10737_v26 = vpop.f32.mrf.mxu1  ;;  %v10765_v27 = vpop.f32.mrf.mxu0 }
0x1128   :  { %v6365_v30 = vpop.f32.mrf.mxu1  ;;  %v6622_v32 = vpop.f32.mrf.mxu0 }
0x1129   :  { %v6366_v41 = vadd.f32 %v6365_v30, %v6292_v22 }
0x112a   :  { %v10750_v35 = vpop.f32.mrf.mxu1  ;;  %v10792_v31 = vpop.f32.mrf.mxu0 }
0x112b   :  { %v6456_v46 = vadd.f32 %v6450_v10, %v6366_v41 }
0x112c   :  { %v6368_v34 = vpop.f32.mrf.mxu1  ;;  %v6625_v36 = vpop.f32.mrf.mxu0 }
0x112e   :  { %v10751_v38 = vpop.f32.mrf.mxu1  ;;  %v10793_v39 = vpop.f32.mrf.mxu0 }
0x113c   :  { %v6536_v47 = vpop.f32.mrf.mxu1 }
0x113d   :  { %v6542_v48 = vadd.f32 %v6536_v47, %v6456_v46  ;;  %v7343_v47 = vld [vmem:[%s14702_s2] sm:$0x3] }
0x113e   :  { %v10778_v52 = vpop.f32.mrf.mxu1  ;;  %v7348_v58 = vrot.slane %v7343_v47, %v12177_v63 }
0x113f   :  { %v6628_v55 = vadd.f32 %v6622_v32, %v6542_v48 }
0x1140   :  { %v6539_v51 = vpop.f32.mrf.mxu1 }
0x1141   :  { %v6630_v56 = vadd.f32 %v6629_v50, %v6628_v55  ;;  %v6889_v44 = vpop.f32.mrf.mxu0 }
0x1142   :  { %v10779_v57 = vpop.f32.mrf.mxu1 }
0x1143   :  { %v6631_v59 = vmax.f32 %v6630_v56, 0.0  ;;  %v6891_v62 = vpop.f32.mrf.mxu0 }
0x1145   :  { %6632 = vst.msk [vmem:[#allocation4 + $0x2] sm:$0x1] %vm2259_vm14, %v6631_v59  ;;  %v6893_v3 = vpop.f32.mrf.mxu0 }
0x1147   :  { %v6895_v7 = vpop.f32.mrf.mxu0 }
0x1149   :  { %v6899_v8 = vpop.f32.mrf.mxu0 }
0x114b   :  { %v6901_v11 = vpop.f32.mrf.mxu0 }
0x114d   :  { %v6903_v14 = vpop.f32.mrf.mxu0 }
0x114f   :  { %v6905_v16 = vpop.f32.mrf.mxu0 }
0x1154   :  { %v6770_v43 = vpop.f32.mrf.mxu1 }
0x1155   :  { %v6890_v48 = vadd.f32 %v6889_v44, %v6770_v43 }
0x1156   :  { %v6772_v60 = vpop.f32.mrf.mxu1 }
0x1157   :  { %v6892_v31 = vadd.f32 %v6891_v62, %v6772_v60 }
0x1158   :  { %v6774_v61 = vpop.f32.mrf.mxu1 }
0x1159   :  { %v7171_v18 = vpop.f32.mrf.mxu0  ;;  %v6894_v38 = vadd.f32 %v6893_v3, %v6774_v61 }
0x115a   :  { %v6776_v1 = vpop.f32.mrf.mxu1 }
0x115b   :  { %v7173_v20 = vpop.f32.mrf.mxu0  ;;  %v6896_v30 = vadd.f32 %v6895_v7, %v6776_v1 }
0x115c   :  { %v6780_v5 = vpop.f32.mrf.mxu1 }
0x115d   :  { %v7175_v22 = vpop.f32.mrf.mxu0  ;;  %v6900_v27 = vadd.f32 %v6899_v8, %v6780_v5  ;;  %v7352_v5 = vrot.slane %v7343_v47, %v12179_v4  ;;  %v11682_v47 = vld [vmem:[%s14705_s5 + $0x88] ss:$8 sps:$4 sm:$0xff]  }
0x115e   :  { %v6782_v6 = vpop.f32.mrf.mxu1 }
0x115f   :  { %v7177_v23 = vpop.f32.mrf.mxu0  ;;  %v6902_v32 = vadd.f32 %v6901_v11, %v6782_v6 }
0x1160   :  { %v6784_v9 = vpop.f32.mrf.mxu1 }
0x1161   :  { %v7181_v25 = vpop.f32.mrf.mxu0  ;;  %v6904_v34 = vadd.f32 %v6903_v14, %v6784_v9 }
0x1162   :  { %v6786_v13 = vpop.f32.mrf.mxu1 }
0x1163   :  { %v7183_v28 = vpop.f32.mrf.mxu0  ;;  %v6906_v42 = vadd.f32 %v6905_v16, %v6786_v13 }
0x1165   :  { %v7185_v39 = vpop.f32.mrf.mxu0 }
0x1167   :  { %v7187_v57 = vpop.f32.mrf.mxu0 }
0x116c   :  { %v7026_v0 = vpop.f32.mrf.mxu1 }
0x116d   :  { %v7045_v56 = vadd.f32 %v7026_v0, %v6890_v48 }
0x116e   :  { %v7028_v15 = vpop.f32.mrf.mxu1 }
0x116f   :  { %v7046_v41 = vadd.f32 %v7028_v15, %v6892_v31  ;;  %v7190_v9 = vadd.f32 %v7171_v18, %v7045_v56  ;;  %v11670_v31 = vld [vmem:[%s14704_s4 + $0x48] sm:$0xff]  }
0x1170   :  { %v7030_v17 = vpop.f32.mrf.mxu1  ;;  %7555 = vmatpush2.bf16.msra.mxu1 %v11670_v31  ;;  %v11716_v31 = vld [vmem:[%s14705_s5 + $0x30] ss:$8 sps:$4 sm:$0xff]  }
0x1171   :  { %v7047_v49 = vadd.f32 %v7030_v17, %v6894_v38  ;;  %v7191_v60 = vadd.f32 %v7173_v20, %v7046_v41  ;;  %7556 = vmatprep.subr.bf16.mxu1 %v11828_v2 }
0x1172   :  { %v7032_v12 = vpop.f32.mrf.mxu1 }
0x1173   :  { %v7048_v36 = vadd.f32 %v7032_v12, %v6896_v30  ;;  %v7192_v3 = vadd.f32 %v7175_v22, %v7047_v49 }
0x1174   :  { %v7036_v21 = vpop.f32.mrf.mxu1 }
0x1175   :  { %v7049_v33 = vadd.f32 %v7036_v21, %v6900_v27  ;;  %v7193_v52 = vadd.f32 %v7177_v23, %v7048_v36  ;;  %v10243_v36 = vld [vmem:[%s14705_s5 + $0xa8] sm:$0x33] }
0x1176   :  { %v7038_v10 = vpop.f32.mrf.mxu1  ;;  %v10255_v38 = vcombine.high %v10243_v36, %v10243_v36 }
0x1177   :  { %v7050_v37 = vadd.f32 %v7038_v10, %v6902_v32  ;;  %v7194_v45 = vadd.f32 %v7181_v25, %v7049_v33 }
0x1178   :  { %v7040_v24 = vpop.f32.mrf.mxu1 }
0x1179   :  { %v7051_v46 = vadd.f32 %v7040_v24, %v6904_v34  ;;  %v7195_v54 = vadd.f32 %v7183_v28, %v7050_v37  ;;  %v11671_v34 = vld [vmem:[%s14704_s4 + $0x40] sm:$0xff]  }
0x117a   :  { %v7042_v19 = vpop.f32.mrf.mxu1  ;;  %7557 = vmatpush2.bf16.msra.mxu1 %v11671_v34  ;;  %v10282_v37 = vld [vmem:[%s14705_s5 + $0x100] sm:$0x33]  ;;  %v11719_v34 = vld [vmem:[%s14705_s5 + $0x190] ss:$8 sps:$4 sm:$0xff]  }
0x117b   :  { %v7052_v55 = vadd.f32 %v7042_v19, %v6906_v42  ;;  %v7196_v61 = vadd.f32 %v7185_v39, %v7051_v46  ;;  %v10294_v39 = vcombine.high %v10282_v37, %v10282_v37  ;;  %v11678_v42 = vld [vmem:[%s14705_s5 + $0x9c] ss:$8 sps:$4 sm:$0xff]   ;;  %v11684_v46 = vld [vmem:[%s14705_s5 + $0x8c] ss:$8 sps:$4 sm:$0xff]  }
0x117d   :  { %v7197_v43 = vadd.f32 %v7187_v57, %v7052_v55  ;;  %10295 = vmatprep.subr.msk.bf16.mxu1 %vm1085_vm4, %v10294_v39  ;;  %v11681_v57 = vld [vmem:[%s14705_s5 + $0xf4] ss:$8 sps:$4 sm:$0xff]   ;;  %v11725_v39 = vld [vmem:[%s14705_s5 + $0x180] ss:$8 sps:$4 sm:$0xff]  }
0x1184   :  { %v7316_v26 = vpop.f32.mrf.mxu1 }
0x1185   :  { %v7335_v17 = vadd.f32 %v7316_v26, %v7190_v9  ;;  %v11703_v9 = vld [vmem:[%s14705_s5 + $0xb0] ss:$8 sps:$4 sm:$0xff]  }
0x1186   :  { %v7318_v29 = vpop.f32.mrf.mxu1 }
0x1187   :  { %v7336_v44 = vadd.f32 %v7318_v29, %v7191_v60  ;;  %v7355_v27 = vadd.f32 %v7348_v58, %v7335_v17  ;;  %v11685_v60 = vld [vmem:[%s14705_s5 + $0xe0] ss:$8 sps:$4 sm:$0xff]  }
0x1188   :  { %v7320_v35 = vpop.f32.mrf.mxu1 }
0x1189   :  { %v7337_v11 = vadd.f32 %v7320_v35, %v7192_v3  ;;  %v7356_v12 = vadd.f32 %v7352_v5, %v7336_v44  ;;  %v7363_v33 = vmax.f32 %v7355_v27, 0.0  ;;  %v11660_v35 = vld [vmem:[%s14703_s3] sm:$0x7f]   ;;  %v11691_v3 = vld [vmem:[%s14705_s5 + $0xd0] ss:$8 sps:$4 sm:$0xff]  }
0x118a   :  { %v7322_v40 = vpop.f32.mrf.mxu1  ;;  %v11697_v44 = vld [vmem:[%s14705_s5 + $0xc0] ss:$8 sps:$4 sm:$0xff]  }
0x118b   :  { %v7338_v62 = vadd.f32 %v7322_v40, %v7193_v52  ;;  %v7357_v22 = vadd.f32 %v7348_v58, %v7337_v11  ;;  %v7364_v28 = vmax.f32 %v7356_v12, 0.0  ;;  %v10254_v40 = vcombine.low %v10243_v36, %v10243_v36  ;;  %v11705_v11 = vld [vmem:[%s14705_s5 + $0xb4] ss:$8 sps:$4 sm:$0xff]   ;;  %v11724_v36 = vld [vmem:[%s14705_s5 + $0x24] ss:$8 sps:$4 sm:$0xff]  }
0x118c   :  { %v7326_v50 = vpop.f32.mrf.mxu1  ;;  %v10293_v52 = vcombine.low %v10282_v37, %v10282_v37  ;;  %v11727_v37 = vld [vmem:[%s14705_s5 + $0x184] ss:$8 sps:$4 sm:$0xff]  }
0x118d   :  { %v7339_v51 = vadd.f32 %v7326_v50, %v7194_v45  ;;  %v7358_v14 = vadd.f32 %v7352_v5, %v7338_v62  ;;  %v7365_v18 = vmax.f32 %v7357_v22, 0.0  ;;  %v7657_v41 = vsel %vm1085_vm4, %v10254_v40, 0  ;;  %v11676_v45 = vld [vmem:[%s14705_s5 + $0x98] ss:$8 sps:$4 sm:$0xff]   ;;  %v11693_v62 = vld [vmem:[%s14705_s5 + $0xd4] ss:$8 sps:$4 sm:$0xff]  }
0x118e   :  { %v7328_v59 = vpop.f32.mrf.mxu1  ;;  %v7885_v56 = vsel %vm1085_vm4, %v10293_v52, 0  ;;  %v11730_v40 = vld [vmem:[%s14705_s5 + $0x14] ss:$8 sps:$4 sm:$0xff]  }
0x118f   :  { %v7340_v1 = vadd.f32 %v7328_v59, %v7195_v54  ;;  %v7359_v6 = vadd.f32 %v7348_v58, %v7339_v51  ;;  %v7366_v23 = vmax.f32 %v7358_v14, 0.0  ;;  %v7371_v26 = vpack.c.bf16 %v7365_v18, %v7363_v33  ;;  %v11687_v59 = vld [vmem:[%s14705_s5 + $0xe4] ss:$8 sps:$4 sm:$0xff]   ;;  %v10332_v14 = vld [vmem:[%s14705_s5 + $0x1b0] sm:$0x33] }
0x1190   :  { %v7330_v7 = vpop.f32.mrf.mxu1  ;;  %v11713_v33 = vld [vmem:[%s14705_s5 + $0x1a0] ss:$8 sps:$4 sm:$0xff]  }
0x1191   :  { %v7341_v8 = vadd.f32 %v7330_v7, %v7196_v61  ;;  %v7360_v0 = vadd.f32 %v7352_v5, %v7340_v1  ;;  %v7367_v20 = vmax.f32 %v7359_v6, 0.0  ;;  %v7372_v32 = vpack.c.bf16 %v7366_v23, %v7364_v28  ;;  %v11690_v61 = vld [vmem:[%s14705_s5 + $0x7c] ss:$8 sps:$4 sm:$0xff]   ;;  %v11688_v1 = vld [vmem:[%s14705_s5 + $0x78] ss:$8 sps:$4 sm:$0xff]  }
0x1192   :  { %v7332_v13 = vpop.f32.mrf.mxu1  ;;  %v11699_v7 = vld [vmem:[%s14705_s5 + $0xc4] ss:$8 sps:$4 sm:$0xff]   ;;  %v11700_v6 = vld [vmem:[%s14705_s5 + $0x58] ss:$8 sps:$4 sm:$0xff]  }
0x1193   :  { %v7361_v15 = vadd.f32 %v7348_v58, %v7341_v8  ;;  %v7342_v16 = vadd.f32 %v7332_v13, %v7197_v43  ;;  %v7368_v24 = vmax.f32 %v7360_v0, 0.0  ;;  %v11679_v58 = vld [vmem:[%s14705_s5 + $0xf0] ss:$8 sps:$4 sm:$0xff]   ;;  %v11702_v8 = vld [vmem:[%s14705_s5 + $0x5c] ss:$8 sps:$4 sm:$0xff]  }
0x1194   :  { %v11694_v43 = vld [vmem:[%s14705_s5 + $0x68] ss:$8 sps:$4 sm:$0xff]   ;;  %v11712_v28 = vld [vmem:[%s14705_s5 + $0x44] ss:$8 sps:$4 sm:$0xff]  }
0x1195   :  { %v7369_v21 = vmax.f32 %v7361_v15, 0.0  ;;  %v7362_v10 = vadd.f32 %v7352_v5, %v7342_v16  ;;  %v11696_v5 = vld [vmem:[%s14705_s5 + $0x6c] ss:$8 sps:$4 sm:$0xff]   ;;  %v10344_v15 = vcombine.high %v10332_v14, %v10332_v14 }
0x1196   :  { %v7583_v13 = vld [vmem:[%s14705_s5 + $0x50] sm:$0x33] }
0x1197   :  { %v7373_v25 = vpack.c.bf16 %v7369_v21, %v7367_v20  ;;  %v7370_v19 = vmax.f32 %v7362_v10, 0.0  ;;  %v10269_v0 = vcombine.high %v7583_v13, %v7583_v13  ;;  %v10268_v21 = vcombine.low %v7583_v13, %v7583_v13 }
0x1198   :  { %v10343_v10 = vcombine.low %v10332_v14, %v10332_v14 }
0x1199   :  { %v7374_v29 = vpack.c.bf16 %v7370_v19, %v7368_v24  ;;  %v7386_v30 = vsel %vm809_vm1, %v7373_v25, 0  ;;  %v7764_v19 = vsel %vm1085_vm4, %v10268_v21, 0 }
0x119a   :  { %v8135_v18 = vsel %vm1085_vm4, %v10343_v10, 0 }
0x119b   :  { %10219 = vmatprep.subr.msk.bf16.mxu0 %vm809_vm1, %v7374_v29 }
0x119c   :  { %7404 = vmatpush1.bf16.msra.mxu0 %v7386_v30  ;;  %v11715_v30 = vld [vmem:[%s14705_s5 + $0x1a4] ss:$8 sps:$4 sm:$0xff]  }
0x119d   :  { %7405 = vmatprep.subr.bf16.mxu0 %v7372_v32  ;;  %v11710_v32 = vld [vmem:[%s14705_s5 + $0x40] ss:$8 sps:$4 sm:$0xff]  }
0x11a0   :  { %7406 = vmatpush1.bf16.msra.mxu0 %v7371_v26  ;;  %v11718_v26 = vld [vmem:[%s14705_s5 + $0x34] ss:$8 sps:$4 sm:$0xff]  }
0x11a1   :  { %10256 = vmatprep.subr.msk.bf16.mxu0 %vm1085_vm4, %v10255_v38  ;;  %v11722_v38 = vld [vmem:[%s14705_s5 + $0x20] ss:$8 sps:$4 sm:$0xff]  }
0x11a3   :  { %10220 = vmatmul.mubr.msk.bf16.vlgmr.msra.gmra.mxu0 %vm805_vm2, %v11660_v35  ;;  %v11721_v35 = vld [vmem:[%s14705_s5 + $0x194] ss:$8 sps:$4 sm:$0xff]  }
0x11a4   :  { %7694 = vmatprep.mubr.bf16.mxu0 %v11828_v2  ;;  %7667 = vmatpush1.bf16.msra.mxu0 %v7657_v41  ;;  %v11728_v41 = vld [vmem:[%s14705_s5 + $0x10] ss:$8 sps:$4 sm:$0xff]  }
0x11a5   :  { %7668 = vmatprep.subr.bf16.mxu0 %v11678_v42  ;;  %v11733_v42 = vld [vmem:[%s14705_s5 + $0x174] ss:$8 sps:$4 sm:$0xff]  }
0x11a8   :  { %7669 = vmatpush1.bf16.msra.mxu0 %v11676_v45  ;;  %v11731_v45 = vld [vmem:[%s14705_s5 + $0x170] ss:$8 sps:$4 sm:$0xff]  }
0x11a9   :  { %7670 = vmatprep.subr.bf16.mxu0 %v11684_v46  ;;  %v11736_v46 = vld [vmem:[%s14705_s5 + $0x4] ss:$8 sps:$4 sm:$0xff]  }
0x11ac   :  { %7671 = vmatpush1.bf16.msra.mxu0 %v11682_v47  ;;  %v11739_v47 = vld [vmem:[%s14705_s5 + $0x164] ss:$8 sps:$4 sm:$0xff]  }
0x11ad   :  { %7672 = vmatprep.subr.bf16.mxu0 %v11690_v61 }
0x11b0   :  { %7673 = vmatpush1.bf16.msra.mxu0 %v11688_v1  ;;  %v11747_v1 = vld [vmem:[%s14705_s5 + $0x13c] ss:$8 sps:$4 sm:$0xff]  }
0x11b1   :  { %7674 = vmatprep.subr.bf16.mxu0 %v11696_v5  ;;  %v11750_v5 = vld [vmem:[%s14705_s5 + $0x12c] ss:$8 sps:$4 sm:$0xff]  }
0x11b4   :  { %7675 = vmatpush1.bf16.msra.mxu0 %v11694_v43  ;;  %v11753_v43 = vld [vmem:[%s14705_s5 + $0x11c] ss:$8 sps:$4 sm:$0xff]  }
0x11b5   :  { %7676 = vmatprep.subr.bf16.mxu0 %v11702_v8  ;;  %v11754_v8 = vld [vmem:[%s14705_s5 + $0x108] ss:$8 sps:$4 sm:$0xff]  }
0x11b8   :  { %7677 = vmatpush1.bf16.msra.mxu0 %v11700_v6  ;;  %v11756_v6 = vld [vmem:[%s14705_s5 + $0x10c] ss:$8 sps:$4 sm:$0xff]  }
0x11b9   :  { %10270 = vmatprep.subr.msk.bf16.mxu0 %vm1085_vm4, %v10269_v0 }
0x1263   :  { %v7425_v48 = vpop.f32.mrf.mxu0 }
0x1265   :  { %v7427_v49 = vpop.f32.mrf.mxu0 }
0x1267   :  { %v7429_v50 = vpop.f32.mrf.mxu0 }
0x1268   :  { %v7434_v51 = vpack.c.bf16 %v7429_v50, %v7425_v48  ;;  %v10307_v48 = vld [vmem:[%s14705_s5 + $0x158] sm:$0x33]  ;;  %v11737_v50 = vld [vmem:[%s14705_s5 + $0x160] ss:$8 sps:$4 sm:$0xff]  }
0x1269   :  { %v7431_v54 = vpop.f32.mrf.mxu0  ;;  %v10319_v52 = vcombine.high %v10307_v48, %v10307_v48 }
0x126a   :  { %v7435_v55 = vpack.c.bf16 %v7431_v54, %v7427_v49  ;;  %v11734_v49 = vld [vmem:[%s14705_s5] ss:$8 sps:$4 sm:$0xff]   ;;  %v10318_v54 = vcombine.low %v10307_v48, %v10307_v48 }
0x126c   :  { %10232 = vmatprep.mubr.msk.bf16.mxu1 %vm945_vm5, %v7435_v55 }
0x126d   :  { %7559 = vmatmul.mubr.bf16.vlgmr.msra.gmra.mxu1 %v7434_v51 }
0x126e   :  { %7895 = vmatpush1.bf16.msra.mxu1 %v7885_v56  ;;  %7922 = vmatprep.mubr.bf16.mxu1 %v11828_v2 }
0x126f   :  { %7896 = vmatprep.subr.bf16.mxu1 %v11681_v57 }
0x1272   :  { %7897 = vmatpush1.bf16.msra.mxu1 %v11679_v58 }
0x1273   :  { %7898 = vmatprep.subr.bf16.mxu1 %v11687_v59  ;;  %v8010_v59 = vsel %vm1085_vm4, %v10318_v54, 0 }
0x1276   :  { %7899 = vmatpush1.bf16.msra.mxu1 %v11685_v60  ;;  %v11744_v60 = vld [vmem:[%s14705_s5 + $0x14c] ss:$8 sps:$4 sm:$0xff]  }
0x1277   :  { %7900 = vmatprep.subr.bf16.mxu1 %v11693_v62  ;;  %v11742_v62 = vld [vmem:[%s14705_s5 + $0x148] ss:$8 sps:$4 sm:$0xff]  }
0x127a   :  { %7901 = vmatpush1.bf16.msra.mxu1 %v11691_v3  ;;  %v11745_v3 = vld [vmem:[%s14705_s5 + $0x138] ss:$8 sps:$4 sm:$0xff]  }
0x127b   :  { %7902 = vmatprep.subr.bf16.mxu1 %v11699_v7  ;;  %v11748_v7 = vld [vmem:[%s14705_s5 + $0x128] ss:$8 sps:$4 sm:$0xff]  }
0x127e   :  { %7903 = vmatpush1.bf16.msra.mxu1 %v11697_v44  ;;  %v11751_v44 = vld [vmem:[%s14705_s5 + $0x118] ss:$8 sps:$4 sm:$0xff]  }
0x127f   :  { %7904 = vmatprep.subr.bf16.mxu1 %v11705_v11 }
0x1282   :  { %7905 = vmatpush1.bf16.msra.mxu1 %v11703_v9 }
0x1283   :  { %10345 = vmatprep.subr.msk.bf16.mxu1 %vm1085_vm4, %v10344_v15 }
0x132d   :  { %v7560_v16 = vpop.f32.mrf.mxu1 }
0x132e   :  { %7568 = vst.msk [vmem:[#allocation2 + $0x30] sm:$0xff] %vm994_vm6, %v7560_v16 }
0x132f   :  { %v7562_v17 = vpop.f32.mrf.mxu1 }
0x1331   :  { %v7563_v12 = vpop.f32.mrf.mxu1 }
0x1332   :  { %7569 = vst.msk [vmem:[#allocation2 + $0x38] sm:$0x3f] %vm996_vm7, %v7563_v12 }
0x1333   :  { %v7565_v20 = vpop.f32.mrf.mxu1 }
0x1335   :  { %v7570_v57 = vld [vmem:[#allocation2 + $0x30] sm:$0xff] }
0x1339   :  { %v7584_v22 = vld [vmem:[#allocation2 + $0x31] sm:$0xff]  ;;  %v7585_v23 = vld [vmem:[#allocation2 + $0x39] sm:$0x3]  ;;  %v8063_v56 = vld [vmem:[#allocation2 + $0x3c] sm:$0x3] }
0x133a   :  { %v7812_v24 = vld [vmem:[#allocation2 + $0x32] sm:$0xff]  ;;  %v7586_v25 = vpack.c.bf16 %v7585_v23, %v7584_v22  ;;  %v7813_v27 = vld [vmem:[#allocation2 + $0x3a] sm:$0x3] }
0x133b   :  { %v7814_v29 = vpack.c.bf16 %v7813_v27, %v7812_v24  ;;  %v7571_v55 = vld [vmem:[#allocation2 + $0x38] sm:$0x3]  ;;  %v7938_v11 = vld [vmem:[#allocation2 + $0x3b] sm:$0x3] }
0x133c   :  { %10257 = vmatmul.mubr.msk.bf16.vlgmr.msra.gmra.mxu0 %vm994_vm6, %v7586_v25  ;;  %v8062_v51 = vld [vmem:[#allocation2 + $0x34] sm:$0xff]  ;;  %v7572_v58 = vpack.c.bf16 %v7571_v55, %v7570_v57 }
0x133d   :  { %7774 = vmatpush1.bf16.msra.mxu0 %v7764_v19  ;;  %10296 = vmatmul.mubr.msk.bf16.vlgmr.msra.gmra.mxu1 %vm994_vm6, %v7814_v29  ;;  %v8064_v61 = vpack.c.bf16 %v8063_v56, %v8062_v51  ;;  %v7937_v9 = vld [vmem:[#allocation2 + $0x33] sm:$0xff] }
0x133e   :  { %8145 = vmatpush1.bf16.msra.mxu1 %v8135_v18  ;;  %7775 = vmatprep.subr.bf16.mxu0 %v11712_v28  ;;  %v7939_v13 = vpack.c.bf16 %v7938_v11, %v7937_v9  ;;  %v11765_v9 = vld [vmem:[%s14708_s8 + $0x48] sm:$0xff]   ;;  %v11766_v11 = vld [vmem:[%s14708_s8 + $0x40] sm:$0xff]  }
0x133f   :  { %8146 = vmatprep.subr.bf16.mxu1 %v11715_v30  ;;  %7801 = vmatprep.mubr.bf16.mxu0 %v11828_v2 }
0x1340   :  { %8172 = vmatprep.mubr.bf16.mxu1 %v11828_v2 }
0x1341   :  { %7776 = vmatpush1.bf16.msra.mxu0 %v11710_v32  ;;  %v8187_v32 = vld [vmem:[%s14706_s6] sm:$0x3] }
0x1342   :  { %8147 = vmatpush1.bf16.msra.mxu1 %v11713_v33  ;;  %7777 = vmatprep.subr.bf16.mxu0 %v11718_v26 }
0x1343   :  { %8148 = vmatprep.subr.bf16.mxu1 %v11721_v35 }
0x1345   :  { %7778 = vmatpush1.bf16.msra.mxu0 %v11716_v31 }
0x1346   :  { %8149 = vmatpush1.bf16.msra.mxu1 %v11719_v34  ;;  %7779 = vmatprep.subr.bf16.mxu0 %v11724_v36  ;;  %v8192_v36 = vrot.slane %v8187_v32, %v12177_v63 }
0x1347   :  { %8150 = vmatprep.subr.bf16.mxu1 %v11727_v37 }
0x1349   :  { %7780 = vmatpush1.bf16.msra.mxu0 %v11722_v38 }
0x134a   :  { %8151 = vmatpush1.bf16.msra.mxu1 %v11725_v39  ;;  %7781 = vmatprep.subr.bf16.mxu0 %v11730_v40 }
0x134b   :  { %8152 = vmatprep.subr.bf16.mxu1 %v11733_v42 }
0x134d   :  { %7782 = vmatpush1.bf16.msra.mxu0 %v11728_v41  ;;  %v8196_v41 = vrot.slane %v8187_v32, %v12179_v4 }
0x134e   :  { %8153 = vmatpush1.bf16.msra.mxu1 %v11731_v45  ;;  %7783 = vmatprep.subr.bf16.mxu0 %v11736_v46 }
0x134f   :  { %8154 = vmatprep.subr.bf16.mxu1 %v11739_v47 }
0x1351   :  { %7784 = vmatpush1.bf16.msra.mxu0 %v11734_v49 }
0x1352   :  { %8155 = vmatpush1.bf16.msra.mxu1 %v11737_v50  ;;  %10320 = vmatprep.subr.msk.bf16.mxu0 %vm1085_vm4, %v10319_v52 }
0x1353   :  { %10794 = vmatprep.subr.bf16.mxu1 %v11829_v53 }
0x1354   :  { %10271 = vmatmul.mubr.msk.bf16.vlgmr.msra.gmra.mxu0 %vm994_vm6, %v7572_v58 }
0x1355   :  { %10346 = vmatmul.mubr.msk.bf16.vlgmr.msra.gmra.mxu1 %vm994_vm6, %v8064_v61  ;;  %8020 = vmatpush1.bf16.msra.mxu0 %v8010_v59 }
0x1356   :  { %8021 = vmatprep.subr.bf16.mxu0 %v11744_v60  ;;  %8047 = vmatprep.mubr.bf16.mxu0 %v11828_v2 }
0x1357   :  { %10804 = vmatprep.mubr.msk.bf16.mxu1 %vm11830_vm11, %v11829_v53 }
0x1359   :  { %8022 = vmatpush1.bf16.msra.mxu0 %v11742_v62  ;;  %v8209_v62 = vld [vmem:[%s14707_s7] sm:$0x7] }
0x135a   :  { %8023 = vmatprep.subr.bf16.mxu0 %v11747_v1  ;;  %v11757_v1 = vld [vmem:[%s14708_s8 + $0x38] sm:$0xff]  }
0x135d   :  { %8024 = vmatpush1.bf16.msra.mxu0 %v11745_v3  ;;  %v11758_v3 = vld [vmem:[%s14708_s8 + $0x30] sm:$0xff]  }
0x135e   :  { %8025 = vmatprep.subr.bf16.mxu0 %v11750_v5  ;;  %v11759_v5 = vld [vmem:[%s14708_s8 + $0x28] sm:$0xff]  }
0x1361   :  { %8026 = vmatpush1.bf16.msra.mxu0 %v11748_v7  ;;  %v11760_v7 = vld [vmem:[%s14708_s8 + $0x20] sm:$0xff]  }
0x1362   :  { %8027 = vmatprep.subr.bf16.mxu0 %v11753_v43  ;;  %v11761_v43 = vld [vmem:[%s14708_s8 + $0x18] sm:$0xff]  }
0x1365   :  { %8028 = vmatpush1.bf16.msra.mxu0 %v11751_v44  ;;  %v11762_v44 = vld [vmem:[%s14708_s8 + $0x10] sm:$0xff]  }
0x1366   :  { %8029 = vmatprep.subr.bf16.mxu0 %v11756_v6  ;;  %v11763_v6 = vld [vmem:[%s14708_s8 + $0x8] sm:$0xff]  }
0x1369   :  { %8030 = vmatpush1.bf16.msra.mxu0 %v11754_v8  ;;  %v11764_v8 = vld [vmem:[%s14708_s8] sm:$0xff]  }
0x136c   :  { %10321 = vmatmul.mubr.msk.bf16.vlgmr.msra.gmra.mxu0 %vm994_vm6, %v7939_v13  ;;  %v11767_v13 = vld [vmem:[%s14709_s9 + $0x48] sm:$0xff]  }
0x136d   :  { %8251 = vmatprep.mubr.bf16.mxu0 %v11828_v2  ;;  %10795 = vmatpush3.bf16.msra.mxu1 %v11767_v13 }
0x136e   :  { %10796 = vmatprep.subr.bf16.mxu1 %v11829_v53 }
0x13fc   :  { %v7696_v14 = vpop.f32.mrf.mxu0 }
0x13fd   :  { %v7924_v16 = vpop.f32.mrf.mxu1 }
0x13fe   :  { %v7698_v0 = vpop.f32.mrf.mxu0 }
0x13ff   :  { %v7926_v12 = vpop.f32.mrf.mxu1 }
0x1400   :  { %v7700_v15 = vpop.f32.mrf.mxu0 }
0x1401   :  { %v7928_v21 = vpop.f32.mrf.mxu1 }
0x1402   :  { %v7702_v17 = vpop.f32.mrf.mxu0 }
0x1403   :  { %v7930_v22 = vpop.f32.mrf.mxu1 }
0x1414   :  { %v7803_v20 = vpop.f32.mrf.mxu0 }
0x1415   :  { %v7804_v24 = vadd.f32 %v7803_v20, %v7696_v14  ;;  %v8174_v25 = vpop.f32.mrf.mxu1  ;;  %v11769_v14 = vld [vmem:[%s14709_s9 + $0x40] sm:$0xff]  }
0x1416   :  { %v7805_v10 = vpop.f32.mrf.mxu0  ;;  %10797 = vmatpush3.bf16.msra.mxu1 %v11769_v14 }
0x1417   :  { %v7806_v19 = vadd.f32 %v7805_v10, %v7698_v0  ;;  %v7933_v29 = vadd.f32 %v7924_v16, %v7804_v24  ;;  %v8176_v18 = vpop.f32.mrf.mxu1  ;;  %10798 = vmatprep.subr.bf16.mxu1 %v11829_v53  ;;  %v11770_v10 = vld [vmem:[%s14709_s9 + $0x68] sm:$0xff]   ;;  %v11774_v24 = vld [vmem:[%s14709_s9 + $0x58] sm:$0xff]  }
0x1418   :  { %v7807_v23 = vpop.f32.mrf.mxu0 }
0x1419   :  { %v7808_v28 = vadd.f32 %v7807_v23, %v7700_v15  ;;  %v7934_v35 = vadd.f32 %v7926_v12, %v7806_v19  ;;  %v8178_v39 = vpop.f32.mrf.mxu1  ;;  %v11773_v23 = vld [vmem:[%s14709_s9 + $0x30] sm:$0xff]  }
0x141a   :  { %v7809_v27 = vpop.f32.mrf.mxu0  ;;  %v11776_v19 = vld [vmem:[%s14709_s9 + $0x50] sm:$0xff]  }
0x141b   :  { %v7810_v33 = vadd.f32 %v7809_v27, %v7702_v17  ;;  %v7935_v38 = vadd.f32 %v7928_v21, %v7808_v28  ;;  %v8180_v52 = vpop.f32.mrf.mxu1  ;;  %v11768_v17 = vld [vmem:[%s14709_s9 + $0x70] sm:$0xff]  }
0x141d   :  { %v7936_v46 = vadd.f32 %v7930_v22, %v7810_v33  ;;  %v11772_v22 = vld [vmem:[%s14709_s9 + $0x60] sm:$0xff]  }
0x142c   :  { %v8049_v30 = vpop.f32.mrf.mxu0 }
0x142d   :  { %v8058_v26 = vadd.f32 %v8049_v30, %v7933_v29  ;;  %v11777_v30 = vld [vmem:[%s14709_s9 + $0x20] sm:$0xff]  }
0x142e   :  { %v8051_v31 = vpop.f32.mrf.mxu0 }
0x142f   :  { %v8183_v34 = vadd.f32 %v8174_v25, %v8058_v26  ;;  %v8059_v37 = vadd.f32 %v8051_v31, %v7934_v35  ;;  %v11775_v25 = vld [vmem:[%s14709_s9 + $0x28] sm:$0xff]   ;;  %v11778_v26 = vld [vmem:[%s14709_s9 + $0xc0] sm:$0xff]  }
0x1430   :  { %v8053_v40 = vpop.f32.mrf.mxu0 }
0x1431   :  { %v8184_v42 = vadd.f32 %v8176_v18, %v8059_v37  ;;  %v8060_v45 = vadd.f32 %v8053_v40, %v7935_v38  ;;  %v8199_v48 = vadd.f32 %v8192_v36, %v8183_v34  ;;  %v11779_v34 = vld [vmem:[%s14709_s9 + $0x18] sm:$0xff]   ;;  %v11781_v37 = vld [vmem:[%s14709_s9 + $0x10] sm:$0xff]   ;;  %v11784_v40 = vld [vmem:[%s14709_s9 + $0xa8] sm:$0xff]  }
0x1432   :  { %v8055_v47 = vpop.f32.mrf.mxu0  ;;  %v11782_v38 = vld [vmem:[%s14709_s9 + $0xb0] sm:$0xff]  }
0x1433   :  { %v8185_v49 = vadd.f32 %v8178_v39, %v8060_v45  ;;  %v8061_v50 = vadd.f32 %v8055_v47, %v7936_v46  ;;  %v8200_v54 = vadd.f32 %v8196_v41, %v8184_v42  ;;  %v8203_v56 = vmax.f32 %v8199_v48, 0.0  ;;  %v11783_v39 = vld [vmem:[%s14709_s9 + $0x8] sm:$0xff]   ;;  %v11785_v42 = vld [vmem:[%s14709_s9] sm:$0xff]   ;;  %v11787_v47 = vld [vmem:[%s14709_s9 + $0x98] sm:$0xff]  }
0x1435   :  { %v8201_v55 = vadd.f32 %v8192_v36, %v8185_v49  ;;  %v8186_v51 = vadd.f32 %v8180_v52, %v8061_v50  ;;  %v8204_v58 = vmax.f32 %v8200_v54, 0.0  ;;  %v11780_v36 = vld [vmem:[%s14709_s9 + $0xb8] sm:$0xff]   ;;  %v11788_v50 = vld [vmem:[%s14709_s9 + $0x90] sm:$0xff]   ;;  %v11789_v52 = vld [vmem:[%s14709_s9 + $0x88] sm:$0xff]  }
0x1436   :  { %v11790_v54 = vld [vmem:[%s14709_s9 + $0x80] sm:$0xff]  }
0x1437   :  { %v8205_v57 = vmax.f32 %v8201_v55, 0.0  ;;  %v8202_v63 = vadd.f32 %v8196_v41, %v8186_v51  ;;  %v11786_v41 = vld [vmem:[%s14709_s9 + $0xa0] sm:$0xff]   ;;  %v11791_v55 = vld [vmem:[%s14709_s9 + $0x78] sm:$0xff]  }
0x1439   :  { %v8206_v59 = vmax.f32 %v8202_v63, 0.0  ;;  %v8207_v60 = vpack.c.bf16 %v8205_v57, %v8203_v56  ;;  %v11792_v57 = vld [vmem:[%s14711_s11 + $0x38] ss:$0 sps:$4 sm:$0xff]  }
0x143a   :  { %v8893_v63 = vsel %vm949_vm3, %v11792_v57, 0 }
0x143b   :  { %v8208_v61 = vpack.c.bf16 %v8206_v59, %v8204_v58  ;;  %v8214_v4 = vsel %vm1647_vm8, %v8207_v60, 0  ;;  %v11793_v58 = vld [vmem:[%s14711_s11 + $0x30] sm:$0xff]   ;;  %v11794_v59 = vld [vmem:[%s14711_s11 + $0x28] sm:$0xff]   ;;  %v11795_v60 = vld [vmem:[%s14711_s11 + $0x20] sm:$0xff]  }
0x143d   :  { %10347 = vmatprep.subr.msk.bf16.mxu0 %vm1647_vm8, %v8208_v61  ;;  %v11796_v61 = vld [vmem:[%s14711_s11 + $0x18] sm:$0xff]  }
0x143e   :  { %8234 = vmatpush1.bf16.msra.mxu0 %v8214_v4  ;;  %v11797_v4 = vld [vmem:[%s14711_s11 + $0x10] sm:$0xff]  }
0x143f   :  { %8345 = vmatprep.subr.bf16.mxu0 %v11828_v2 }
0x1441   :  { %10348 = vmatmul.mubr.msk.bf16.vlgmr.msra.gmra.mxu0 %vm1643_vm9, %v8209_v62  ;;  %v11798_v62 = vld [vmem:[%s14711_s11 + $0x8] sm:$0xff]  }
0x1442   :  { %8346 = vmatpush1.bf16.msra.mxu0 %v11757_v1  ;;  %v11799_v1 = vld [vmem:[%s14711_s11] sm:$0xff]  }
0x1443   :  { %8347 = vmatprep.subr.bf16.mxu0 %v11828_v2 }
0x1446   :  { %8348 = vmatpush1.bf16.msra.mxu0 %v11758_v3  ;;  %v11800_v3 = vld [vmem:[%s14713_s13 + $0x28] ss:$0 sps:$4 sm:$0x33]  }
0x1447   :  { %8349 = vmatprep.subr.bf16.mxu0 %v11828_v2 }
0x144a   :  { %8350 = vmatpush1.bf16.msra.mxu0 %v11759_v5  ;;  %v8992_v5 = vsel %vm1085_vm4, %v11800_v3, 0 }
0x144b   :  { %8351 = vmatprep.subr.bf16.mxu0 %v11828_v2 }
0x144e   :  { %8352 = vmatpush1.bf16.msra.mxu0 %v11760_v7  ;;  %v11801_v7 = vld [vmem:[%s14713_s13 + $0x20] sm:$0xff]  }
0x144f   :  { %8353 = vmatprep.subr.bf16.mxu0 %v11828_v2 }
0x1452   :  { %8354 = vmatpush1.bf16.msra.mxu0 %v11761_v43  ;;  %v11802_v43 = vld [vmem:[%s14713_s13 + $0x18] sm:$0xff]  }
0x1453   :  { %8355 = vmatprep.subr.bf16.mxu0 %v11828_v2 }
0x1456   :  { %8356 = vmatpush1.bf16.msra.mxu0 %v11762_v44  ;;  %v11803_v44 = vld [vmem:[%s14713_s13 + $0x10] sm:$0xff]  }
0x1457   :  { %8357 = vmatprep.subr.bf16.mxu0 %v11828_v2 }
0x145a   :  { %8358 = vmatpush1.bf16.msra.mxu0 %v11763_v6 }
0x145b   :  { %8359 = vmatprep.subr.bf16.mxu0 %v11828_v2 }
0x145e   :  { %8360 = vmatpush1.bf16.msra.mxu0 %v11764_v8 }
0x145f   :  { %8373 = vmatprep.subr.bf16.mxu0 %v11828_v2 }
0x1462   :  { %8374 = vmatpush2.bf16.msra.mxu0 %v11765_v9 }
0x1463   :  { %8375 = vmatprep.subr.bf16.mxu0 %v11828_v2  ;;  %v11771_v2 = vld [vmem:[%s14709_s9 + $0x38] sm:$0xff]  }
0x1464   :  { %10799 = vmatpush3.bf16.msra.mxu1 %v11771_v2 }
0x1465   :  { %10800 = vmatprep.subr.bf16.mxu1 %v11829_v53 }
0x1466   :  { %8376 = vmatpush2.bf16.msra.mxu0 %v11766_v11 }
0x1467   :  { %10822 = vmatprep.subr.bf16.mxu0 %v11829_v53 }
0x1468   :  { %10801 = vmatpush3.bf16.msra.mxu1 %v11773_v23 }
0x1469   :  { %10802 = vmatprep.subr.bf16.mxu1 %v11829_v53 }
0x146c   :  { %10803 = vmatpush3.bf16.msra.mxu1 %v11775_v25 }
0x146d   :  { %10808 = vmatprep.subr.bf16.mxu1 %v11829_v53 }
0x1501   :  { %v8253_v0 = vpop.f32.mrf.mxu0 }
0x1502   :  { %v8260_v12 = vpack.c.bf16 %v8253_v0, %v8253_v0 }
0x1503   :  { %v8255_v15 = vpop.f32.mrf.mxu0 }
0x1504   :  { %v8261_v16 = vpack.c.bf16 %v8255_v15, %v8255_v15 }
0x1505   :  { %v8257_v20 = vpop.f32.mrf.mxu0 }
0x1506   :  { %10359 = vmatprep.mubr.msk.bf16.mxu0 %vm1777_vm10, %v8261_v16 }
0x1507   :  { %8378 = vmatmul.mubr.bf16.vlgmr.msra.gmra.mxu0 %v8260_v12  ;;  %v8258_v21 = vpop.f32.mrf.mxu0 }
0x1508   :  { %10823 = vmatpush3.bf16.msra.mxu0 %v11768_v17  ;;  %10832 = vmatprep.mubr.msk.bf16.mxu0 %vm11830_vm11, %v11829_v53 }
0x1509   :  { %10824 = vmatprep.subr.bf16.mxu0 %v11829_v53 }
0x150c   :  { %10825 = vmatpush3.bf16.msra.mxu0 %v11770_v10 }
0x150d   :  { %10826 = vmatprep.subr.bf16.mxu0 %v11829_v53 }
0x1510   :  { %10827 = vmatpush3.bf16.msra.mxu0 %v11772_v22 }
0x1511   :  { %10828 = vmatprep.subr.bf16.mxu0 %v11829_v53 }
0x1514   :  { %10829 = vmatpush3.bf16.msra.mxu0 %v11774_v24 }
0x1515   :  { %10830 = vmatprep.subr.bf16.mxu0 %v11829_v53 }
0x1518   :  { %10831 = vmatpush3.bf16.msra.mxu0 %v11776_v19 }
0x1519   :  { %10850 = vmatprep.subr.bf16.mxu0 %v11829_v53 }
0x15c7   :  { %v8379_v27 = vpop.f32.mrf.mxu0 }
0x15c8   :  { %8386 = vst.msk [vmem:[#allocation3 + $0x18] sm:$0x1f] %vm1821_vm12, %v8379_v27  ;;  %v8815_v27 = vld [vmem:[%s14710_s10] sm:$0x1] }
0x15c9   :  { %v8381_v28 = vpop.f32.mrf.mxu0 }
0x15cb   :  { %v8382_v29 = vpop.f32.mrf.mxu0 }
0x15cd   :  { %v8383_v18 = vpop.f32.mrf.mxu0 }
0x15cf   :  { %v8399_v32 = vld [vmem:[#allocation3 + $0x19] sm:$0x1]  ;;  %v8557_v33 = vld [vmem:[#allocation3 + $0x1a] sm:$0x1]  ;;  %v8387_v45 = vld [vmem:[#allocation3 + $0x18] sm:$0x1] }
0x15d0   :  { %v8400_v35 = vpack.c.bf16 %v8399_v32, %v8399_v32  ;;  %v8558_v31 = vpack.c.bf16 %v8557_v33, %v8557_v33  ;;  %v8729_v46 = vld [vmem:[#allocation3 + $0x1c] sm:$0x1]  ;;  %v8388_v48 = vpack.c.bf16 %v8387_v45, %v8387_v45  ;;  %v8643_v51 = vld [vmem:[#allocation3 + $0x1b] sm:$0x1] }
0x15d1   :  { %v8730_v49 = vpack.c.bf16 %v8729_v46, %v8729_v46  ;;  %v8644_v56 = vpack.c.bf16 %v8643_v51, %v8643_v51 }
0x15d2   :  { %10805 = vmatmul.mubr.msk.bf16.vlgmr.msra.gmra.mxu1 %vm1878_vm13, %v8400_v35  ;;  %10833 = vmatmul.mubr.msk.bf16.vlgmr.msra.gmra.mxu0 %vm1878_vm13, %v8558_v31  ;;  %v11804_v31 = vld [vmem:[%s14713_s13 + $0x8] sm:$0xff]  }
0x15d3   :  { %10809 = vmatpush3.bf16.msra.mxu1 %v11777_v30  ;;  %10851 = vmatpush3.bf16.msra.mxu0 %v11778_v26 }
0x15d4   :  { %10810 = vmatprep.subr.bf16.mxu1 %v11829_v53  ;;  %10852 = vmatprep.subr.bf16.mxu0 %v11829_v53 }
0x15d5   :  { %10818 = vmatprep.mubr.msk.bf16.mxu1 %vm11830_vm11, %v11829_v53  ;;  %10860 = vmatprep.mubr.msk.bf16.mxu0 %vm11830_vm11, %v11829_v53 }
0x15d7   :  { %10811 = vmatpush3.bf16.msra.mxu1 %v11779_v34  ;;  %10853 = vmatpush3.bf16.msra.mxu0 %v11780_v36  ;;  %v11805_v34 = vld [vmem:[%s14713_s13] sm:$0xff]   ;;  %s9042_s13 = sshll.u32 %s11831_s21, 4  ;;  %s9043_s13 = int_to_ptr.vmem [resolvable:$true] %s9042_s13 }
0x15d8   :  { %10812 = vmatprep.subr.bf16.mxu1 %v11829_v53  ;;  %10854 = vmatprep.subr.bf16.mxu0 %v11829_v53  ;;  %v10430_v36 = vld [vmem:[%s14712_s12] ss:$0 sm:$0xff]  ;;  %s11806_s12 = scalar_lea.vmem %s9043_s13, 64  ;;  %p11811_p1 = scmp.lt.s32.totalorder %s9043_s13, %s9043_s13 }
0x15d9   :  { %p11807_p0 = scmp.ne.s32.totalorder %s9043_s13, %s11806_s12  ;;  %p11812_p2 = scmp.lt.s32.totalorder %s11806_s12, %s11806_s12 }
0x15db   :  { %10813 = vmatpush3.bf16.msra.mxu1 %v11781_v37  ;;  %10855 = vmatpush3.bf16.msra.mxu0 %v11782_v38  ;;  %p11813_p3 = por %p11812_p2, %p11811_p1 }
0x15dc   :  { %10814 = vmatprep.subr.bf16.mxu1 %v11829_v53  ;;  %10856 = vmatprep.subr.bf16.mxu0 %v11829_v53 }
0x15dd   :  { %p11814_p4 = pnand %p11813_p3, %p11807_p0 }
0x15df   :  { %10815 = vmatpush3.bf16.msra.mxu1 %v11783_v39  ;;  %10857 = vmatpush3.bf16.msra.mxu0 %v11784_v40 }
0x15e0   :  { %10816 = vmatprep.subr.bf16.mxu1 %v11829_v53  ;;  %10858 = vmatprep.subr.bf16.mxu0 %v11829_v53 }
0x15e3   :  { %10817 = vmatpush3.bf16.msra.mxu1 %v11785_v42  ;;  %10859 = vmatpush3.bf16.msra.mxu0 %v11786_v41 }
0x15e4   :  { %10836 = vmatprep.subr.bf16.mxu1 %v11829_v53  ;;  %10884 = vmatprep.subr.bf16.mxu0 %v11829_v53 }
0x15e6   :  { %10819 = vmatmul.mubr.msk.bf16.vlgmr.msra.gmra.mxu1 %vm1878_vm13, %v8388_v48  ;;  %10861 = vmatmul.mubr.msk.bf16.vlgmr.msra.gmra.mxu0 %vm1878_vm13, %v8730_v49 }
0x15e7   :  { %10837 = vmatpush3.bf16.msra.mxu1 %v11787_v47  ;;  %10846 = vmatprep.mubr.msk.bf16.mxu1 %vm11830_vm11, %v11829_v53 }
0x15e8   :  { %10838 = vmatprep.subr.bf16.mxu1 %v11829_v53  ;;  %10896 = vmatprep.mubr.msk.bf16.mxu0 %vm11830_vm11, %v11829_v53 }
0x15e9   :  { %10885 = vmatpush3.bf16.msra.mxu0 %v8992_v5 }
0x15ea   :  { %10886 = vmatprep.subr.bf16.mxu0 %v11829_v53 }
0x15eb   :  { %10839 = vmatpush3.bf16.msra.mxu1 %v11788_v50 }
0x15ec   :  { %10840 = vmatprep.subr.bf16.mxu1 %v11829_v53 }
0x15ed   :  { %10887 = vmatpush3.bf16.msra.mxu0 %v11801_v7 }
0x15ee   :  { %10888 = vmatprep.subr.bf16.mxu0 %v11829_v53 }
0x15ef   :  { %10841 = vmatpush3.bf16.msra.mxu1 %v11789_v52 }
0x15f0   :  { %10842 = vmatprep.subr.bf16.mxu1 %v11829_v53 }
0x15f1   :  { %10889 = vmatpush3.bf16.msra.mxu0 %v11802_v43 }
0x15f2   :  { %10890 = vmatprep.subr.bf16.mxu0 %v11829_v53 }
0x15f3   :  { %10843 = vmatpush3.bf16.msra.mxu1 %v11790_v54 }
0x15f4   :  { %10844 = vmatprep.subr.bf16.mxu1 %v11829_v53 }
0x15f5   :  { %10891 = vmatpush3.bf16.msra.mxu0 %v11803_v44 }
0x15f6   :  { %10892 = vmatprep.subr.bf16.mxu0 %v11829_v53 }
0x15f7   :  { %10845 = vmatpush3.bf16.msra.mxu1 %v11791_v55 }
0x15f8   :  { %10864 = vmatprep.subr.bf16.mxu1 %v11829_v53 }
0x15f9   :  { %10893 = vmatpush3.bf16.msra.mxu0 %v11804_v31 }
0x15fa   :  { %10847 = vmatmul.mubr.msk.bf16.vlgmr.msra.gmra.mxu1 %vm1878_vm13, %v8644_v56  ;;  %10894 = vmatprep.subr.bf16.mxu0 %v11829_v53 }
0x15fb   :  { %10880 = vmatprep.mubr.msk.bf16.mxu1 %vm11830_vm11, %v11829_v53  ;;  %10865 = vmatpush3.bf16.msra.mxu1 %v8893_v63 }
0x15fc   :  { %10866 = vmatprep.subr.bf16.mxu1 %v11829_v53 }
0x15fd   :  { %10895 = vmatpush3.bf16.msra.mxu0 %v11805_v34 }
0x15ff   :  { %10867 = vmatpush3.bf16.msra.mxu1 %v11793_v58 }
0x1600   :  { %10868 = vmatprep.subr.bf16.mxu1 %v11829_v53 }
0x1603   :  { %10869 = vmatpush3.bf16.msra.mxu1 %v11794_v59 }
0x1604   :  { %10870 = vmatprep.subr.bf16.mxu1 %v11829_v53 }
0x1607   :  { %10871 = vmatpush3.bf16.msra.mxu1 %v11795_v60 }
0x1608   :  { %10872 = vmatprep.subr.bf16.mxu1 %v11829_v53 }
0x160b   :  { %10873 = vmatpush3.bf16.msra.mxu1 %v11796_v61 }
0x160c   :  { %10874 = vmatprep.subr.bf16.mxu1 %v11829_v53 }
0x160f   :  { %10875 = vmatpush3.bf16.msra.mxu1 %v11797_v4 }
0x1610   :  { %10876 = vmatprep.subr.bf16.mxu1 %v11829_v53 }
0x1613   :  { %10877 = vmatpush3.bf16.msra.mxu1 %v11798_v62 }
0x1614   :  { %10878 = vmatprep.subr.bf16.mxu1 %v11829_v53  ;;  %v10440_v53 = vld [vmem:[%s14714_s14] ss:$0 sm:$0xff] }
0x1617   :  { %10879 = vmatpush3.bf16.msra.mxu1 %v11799_v1 }
0x1692   :  { %v8478_v6 = vpop.f32.mrf.mxu1  ;;  %v8636_v8 = vpop.f32.mrf.mxu0 }
0x1694   :  { %v10806_v9 = vpop.f32.mrf.mxu1  ;;  %v10834_v11 = vpop.f32.mrf.mxu0 }
0x1696   :  { %v8481_v13 = vpop.f32.mrf.mxu1  ;;  %v8639_v14 = vpop.f32.mrf.mxu0 }
0x1698   :  { %v10807_v2 = vpop.f32.mrf.mxu1  ;;  %v10835_v0 = vpop.f32.mrf.mxu0 }
0x16a6   :  { %v8551_v15 = vpop.f32.mrf.mxu1  ;;  %v8808_v16 = vpop.f32.mrf.mxu0 }
0x16a7   :  { %v8552_v23 = vadd.f32 %v8551_v15, %v8478_v6 }
0x16a8   :  { %v10820_v17 = vpop.f32.mrf.mxu1  ;;  %v10862_v12 = vpop.f32.mrf.mxu0 }
0x16a9   :  { %v8642_v24 = vadd.f32 %v8636_v8, %v8552_v23 }
0x16aa   :  { %v8554_v20 = vpop.f32.mrf.mxu1  ;;  %v8811_v21 = vpop.f32.mrf.mxu0 }
0x16ac   :  { %v10821_v10 = vpop.f32.mrf.mxu1  ;;  %v10863_v22 = vpop.f32.mrf.mxu0 }
0x16ba   :  { %v8722_v25 = vpop.f32.mrf.mxu1 }
0x16bb   :  { %v8728_v19 = vadd.f32 %v8722_v25, %v8642_v24 }
0x16bc   :  { %v10848_v28 = vpop.f32.mrf.mxu1 }
0x16bd   :  { %v8814_v29 = vadd.f32 %v8808_v16, %v8728_v19 }
0x16be   :  { %v8725_v18 = vpop.f32.mrf.mxu1 }
0x16bf   :  { %v8816_v30 = vadd.f32 %v8815_v27, %v8814_v29 }
0x16c0   :  { %v10849_v32 = vpop.f32.mrf.mxu1 }
0x16c1   :  { %v8817_v33 = vmax.f32 %v8816_v30, 0.0 }
0x16c3   :  { %8818 = vst.msk [vmem:[#allocation4 + $0x3] sm:$0x1] %vm2259_vm14, %v8817_v33 }
0x16ca   :  { %v8819_v26 = vld [vmem:[#allocation4] sm:$0xf] }
0x16cb   :  { %v8820_v35 = vpack.c.bf16 %v8819_v26, %v8819_v26 }
0x16cd   :  { %10881 = vmatmul.mubr.msk.bf16.vlgmr.msra.gmra.mxu1 %vm8888_vm15, %v8820_v35 }
0x178d   :  { %v8929_v37 = vpop.f32.mrf.mxu1 }
0x178e   :  { %v8930_v38 = vadd.f32 %v10430_v36, %v8929_v37 }
0x178f   :  { %v10882_v39 = vpop.f32.mrf.mxu1 }
0x1790   :  { %v8935_v40 = vmax.f32 %v8930_v38, 0.0 }
0x1791   :  { %v8932_v42 = vpop.f32.mrf.mxu1 }
0x1792   :  { %v8936_v41 = vpack.c.bf16 %v8935_v40, %v8935_v40 }
0x1793   :  { %v10883_v45 = vpop.f32.mrf.mxu1 }
0x1794   :  { %10897 = vmatmul.mubr.msk.bf16.vlgmr.msra.gmra.mxu0 %vm994_vm6, %v8936_v41 }
0x1854   :  { %v9028_v46 = vpop.f32.mrf.mxu0 }
0x1855   :  { %v9029_v47 = vadd.f32 %v10440_v53, %v9028_v46 }
0x1856   :  { %v10898_v48 = vpop.f32.mrf.mxu0 }
0x1857   :  { %9035 = vst.msk [vmem:[#allocation5] sm:$0xf] %vm9034_vm0, %v9029_v47 }
0x1858   :  { %v9031_v49 = vpop.f32.mrf.mxu0 }
0x1859   :  { %11817 = shalt.err (!%p11814_p4)
}
0x185a   :  { %9045 = dma.vmem_to_hbm [thread:$0]  %s9043_s13, 64, %s14715_s15, [#allocation6]   ;;  %v10899_v50 = vpop.f32.mrf.mxu0 }
0x185b   :  { %11826 = dma.done.wait [#allocation6], 64  }
0x185c   :  { %11827 = vsyncadd [#allocation6], 4294967232 }
0x185d   :  { %9049 = vsyncpa [#allocation6], 1 }

</bundles_post_ra>
